<compile_context>
chip_gen: v6e
topology: v6e:2x2x1
jax: 0.10.0
libtpu: 0.0.40
codegen_flags: <defaults>
</compile_context>

<pallas_src>
import jax
import jax.numpy as jnp
from jax.experimental import pallas as pl
from jax.experimental.pallas import tpu as pltpu


CP = 128  # padded (lane-dense) channel width for conv outputs / fc2 logits


# ----------------------------- Pallas kernels ------------------------------ #

def _conv2x2_relu_pool_kernel(x_ref, w_ref, b_ref, o_ref):
    """Fused Conv2d(k=2, pad=1) + bias + ReLU + MaxPool2d(2, 2) for one image.

    x_ref: (1, Hp, Wp//2, 2*Cin)  zero-padded NHWC input, columns paired into depth (bf16)
    w_ref: (2, 2, Cin, Cout)      conv weights laid out (kh, kw, cin, cout) (bf16)
    b_ref: (1, Cout)              bias (f32)
    o_ref: (1, Hq, Wq, Cout)      pooled activation (bf16)
    """
    _, hq, wq, cout = o_ref.shape
    cin = w_ref.shape[2]
    hh = 2 * hq  # conv rows feeding the pool (floor-mode pool drops the last conv row)

    # Two f32 accumulators: conv pre-activations at even / odd output columns,
    # rows ordered (h, j) with h in [0, 2*Hq), j in [0, Wq). All taps are plain
    # contiguous slices thanks to the column-pairing layout (no strided access).
    acc = []
    for q in range(2):
        a = jnp.zeros((hh * wq, cout), jnp.float32)
        for kh in range(2):
            for kw in range(2):
                s = q + kw
                woff = s // 2             # shift along the paired-column axis
                coff = (s % 2) * cin      # which half of the depth-2 channel block
                patch = x_ref[0, kh:kh + hh, woff:woff + wq, coff:coff + cin]
                a = a + jnp.dot(patch.reshape(hh * wq, cin), w_ref[kh, kw],
                                preferred_element_type=jnp.float32)
        acc.append(a)

    # Pool over column pairs, then bias + ReLU in f32 (bias is shared, ReLU monotone,
    # so epilogue-after-max == pool(relu(conv))).
    y = jnp.maximum(jnp.maximum(acc[0], acc[1]) + b_ref[...], 0.0)   # (2*Hq*Wq, C)
    # Pool over row pairs: rows are ordered (h, j), split h into (i, parity).
    y = y.reshape(hq, 2, wq, cout)
    y = jnp.maximum(y[:, 0], y[:, 1])                                # (Hq, Wq, C)
    o_ref[0] = y.astype(o_ref.dtype)


def _mlp_kernel(x_ref, w1_ref, b1_ref, w2_ref, b2_ref, o_ref, h_acc):
    """fc2(relu(fc1(x))) with fc1's K dimension tiled over the grid."""
    k = pl.program_id(0)

    @pl.when(k == 0)
    def _():
        h_acc[...] = jnp.zeros_like(h_acc)

    h_acc[...] += jnp.dot(x_ref[...], w1_ref[...],
                          preferred_element_type=jnp.float32)

    @pl.when(k == pl.num_programs(0) - 1)
    def _():
        h = jnp.maximum(h_acc[...] + b1_ref[...], 0.0).astype(jnp.bfloat16)
        y = jnp.dot(h, w2_ref[...], preferred_element_type=jnp.float32) + b2_ref[...]
        o_ref[...] = y.astype(o_ref.dtype)


# ----------------------------- wrappers ------------------------------------ #

def conv2x2_relu_pool(x, w, b):
    """x: (B, H, W, Cin) bf16 NHWC; w: (2, 2, Cin, Cout) bf16; b: (1, Cout) f32."""
    bsz, h, wsp, cin = x.shape
    assert h % 2 == 0 and wsp % 2 == 0
    cout = w.shape[3]
    hq, wq = (h + 1) // 2, (wsp + 1) // 2        # pool(conv output of size H+1)
    hp, wp = h + 2, wsp + 2
    xp = jnp.pad(x, ((0, 0), (1, 1), (1, 1), (0, 0)))
    # Pair adjacent columns into the channel dim — a pure (free) reshape, no transpose.
    xw = xp.reshape(bsz, hp, wp // 2, 2 * cin)
    return pl.pallas_call(
        _conv2x2_relu_pool_kernel,
        grid=(bsz,),
        out_shape=jax.ShapeDtypeStruct((bsz, hq, wq, cout), jnp.bfloat16),
        in_specs=[
            pl.BlockSpec((1, hp, wp // 2, 2 * cin), lambda i: (i, 0, 0, 0)),
            pl.BlockSpec((2, 2, cin, cout), lambda i: (0, 0, 0, 0)),
            pl.BlockSpec((1, cout), lambda i: (0, 0)),
        ],
        out_specs=pl.BlockSpec((1, hq, wq, cout), lambda i: (i, 0, 0, 0)),
        compiler_params=pltpu.CompilerParams(dimension_semantics=("parallel",)),
    )(xw, w, b)


def mlp_head(x, w1, b1, w2, b2, *, tk=512):
    """x: (B, K) bf16; w1: (K, 512) bf16; w2: (512, 128) bf16; biases f32."""
    m, k = x.shape
    n1 = w1.shape[1]
    n2 = w2.shape[1]
    assert k % tk == 0
    return pl.pallas_call(
        _mlp_kernel,
        grid=(k // tk,),
        out_shape=jax.ShapeDtypeStruct((m, n2), jnp.float32),
        in_specs=[
            pl.BlockSpec((m, tk), lambda kk: (0, kk)),
            pl.BlockSpec((tk, n1), lambda kk: (kk, 0)),
            pl.BlockSpec((1, n1), lambda kk: (0, 0)),
            pl.BlockSpec((n1, n2), lambda kk: (0, 0)),
            pl.BlockSpec((1, n2), lambda kk: (0, 0)),
        ],
        out_specs=pl.BlockSpec((m, n2), lambda kk: (0, 0)),
        scratch_shapes=[pltpu.VMEM((m, n1), jnp.float32)],
        compiler_params=pltpu.CompilerParams(dimension_semantics=("arbitrary",)),
    )(x, w1, b1, w2, b2)


def simple_nnn_forward(params, x_nchw):
    x = jnp.transpose(x_nchw, (0, 2, 3, 1)).astype(jnp.bfloat16)      # NCHW -> NHWC
    x = conv2x2_relu_pool(x, params["w_conv1"], params["b_conv1"])    # (B, 16, 16, 128)
    x = conv2x2_relu_pool(x, params["w_conv2"], params["b_conv2"])    # (B,  8,  8, 128)
    # Drop the zero padded channels and flatten in NHWC order; fc1's weight rows were
    # permuted at init so this matches torch's NCHW view(-1, 64*8*8) semantics.
    x = x[..., :64].reshape(x.shape[0], 8 * 8 * 64)
    logits = mlp_head(x, params["w_fc1"], params["b_fc1"],
                      params["w_fc2"], params["b_fc2"])
    return logits[:, :10]


# ----------------------------- parameters ---------------------------------- #

def init_params(key):
    """Synthetic torch-style U(-1/sqrt(fan_in), +) weights, pre-laid-out for the kernels:
    conv weights -> (kh, kw, cin, cout_pad) bf16 with Cout (and conv2 Cin) zero-padded
    to 128; fc1 rows permuted from torch's (c,h,w) order to NHWC (h,w,c) order; fc2
    output zero-padded 10 -> 128. Biases stay f32."""
    ks = jax.random.split(key, 8)

    def u(k, shape, fan_in):
        bound = 1.0 / float(fan_in) ** 0.5
        return jax.random.uniform(k, shape, jnp.float32, -bound, bound)

    c1, c2 = 32, 64

    # conv1: torch (Cout, Cin, kh, kw) -> (kh, kw, Cin, Cout_pad)
    w1 = jnp.transpose(u(ks[0], (c1, 3, 2, 2), 3 * 4), (2, 3, 1, 0))
    w1 = jnp.pad(w1, ((0, 0), (0, 0), (0, 0), (0, CP - c1))).astype(jnp.bfloat16)
    b1 = jnp.pad(u(ks[1], (c1,), 3 * 4), (0, CP - c1)).reshape(1, CP)

    # conv2: pad Cin 32->128 (conv1's padded channels are exactly zero) and Cout 64->128
    w2 = jnp.transpose(u(ks[2], (c2, c1, 2, 2), c1 * 4), (2, 3, 1, 0))
    w2 = jnp.pad(w2, ((0, 0), (0, 0), (0, CP - c1), (0, CP - c2))).astype(jnp.bfloat16)
    b2 = jnp.pad(u(ks[3], (c2,), c1 * 4), (0, CP - c2)).reshape(1, CP)

    # fc1: torch (512, 4096) consumes rows ordered (c, h, w); fold the NCHW-flatten
    # permutation into the weight so the kernel consumes the NHWC flatten directly.
    wf1 = u(ks[4], (512, c2 * 8 * 8), c2 * 8 * 8).T.reshape(c2, 8, 8, 512)
    wf1 = jnp.transpose(wf1, (1, 2, 0, 3)).reshape(8 * 8 * c2, 512).astype(jnp.bfloat16)
    bf1 = u(ks[5], (512,), c2 * 8 * 8).reshape(1, 512)

    # fc2: torch (10, 512) -> (512, 128) with the output dim zero-padded for lane-dense stores
    wf2 = jnp.pad(u(ks[6], (10, 512), 512).T, ((0, 0), (0, CP - 10))).astype(jnp.bfloat16)
    bf2 = jnp.pad(u(ks[7], (10,), 512), (0, CP - 10)).reshape(1, CP)

    return {
        "w_conv1": w1, "b_conv1": b1,
        "w_conv2": w2, "b_conv2": b2,
        "w_fc1": wf1, "b_fc1": bf1,
        "w_fc2": wf2, "b_fc2": bf2,
    }


if __name__ == "__main__":
    key = jax.random.PRNGKey(0)
    pkey, xkey = jax.random.split(key)
    params = init_params(pkey)
    # batch=2; spatial must be 32x32 (CIFAR-10) so the flatten matches fc1's 64*8*8 input.
    x = jax.random.normal(xkey, (2, 3, 32, 32), jnp.float32)
    out = jax.jit(simple_nnn_forward)(params, x)
    out = jax.block_until_ready(out)
    assert out.shape == (2, 10) and out.dtype == jnp.float32
    print("KERNEL_OK")
</pallas_src>

<mosaic_0001>
module attributes {stable_mosaic.version = 11 : i64} {
  func.func @_conv2x2_relu_pool_kernel(%arg0: i32, %arg1: memref<1x18x9x256xbf16, #tpu.memory_space<vmem>>, %arg2: memref<2x2x128x128xbf16, #tpu.memory_space<vmem>>, %arg3: memref<1x128xf32, #tpu.memory_space<vmem>>, %arg4: memref<1x8x8x128xbf16, #tpu.memory_space<vmem>>) attributes {dimension_semantics = [#tpu.dimension_semantics<parallel>], iteration_bounds = array<i64: 2>, scalar_prefetch = 0 : i64, scratch_operands = 0 : i64, tpu.core_type = #tpu.core_type<tc>, window_params = [{transform_indices = @transform_0, window_bounds = array<i64: 1, 18, 9, 256>}, {pipeline_mode = #tpu.pipeline_mode<synchronous>, transform_indices = @transform_1, window_bounds = array<i64: 2, 2, 128, 128>}, {pipeline_mode = #tpu.pipeline_mode<synchronous>, transform_indices = @transform_2, window_bounds = array<i64: 1, 128>}, {transform_indices = @transform_3, window_bounds = array<i64: 1, 8, 8, 128>}]} {
    %cst = arith.constant 0.000000e+00 : f32
    %0 = vector.broadcast %cst : f32 to vector<128x128xf32>
    %c0 = arith.constant 0 : index
    %c0_0 = arith.constant 0 : index
    %c0_1 = arith.constant 0 : index
    %c0_2 = arith.constant 0 : index
    %1 = vector.load %arg1[%c0, %c0_0, %c0_1, %c0_2] : memref<1x18x9x256xbf16, #tpu.memory_space<vmem>>, vector<1x16x8x128xbf16>
    %2 = vector.shape_cast %1 : vector<1x16x8x128xbf16> to vector<16x8x128xbf16>
    %3 = vector.shape_cast %2 : vector<16x8x128xbf16> to vector<128x128xbf16>
    %c0_3 = arith.constant 0 : index
    %c0_4 = arith.constant 0 : index
    %c0_5 = arith.constant 0 : index
    %c0_6 = arith.constant 0 : index
    %4 = vector.load %arg2[%c0_3, %c0_4, %c0_5, %c0_6] : memref<2x2x128x128xbf16, #tpu.memory_space<vmem>>, vector<1x1x128x128xbf16>
    %5 = vector.shape_cast %4 : vector<1x1x128x128xbf16> to vector<128x128xbf16>
    %cst_7 = arith.constant dense<0.000000e+00> : vector<128x128xf32>
    %6 = tpu.matmul %3, %5, %cst_7 {dimension_numbers = #tpu.dot_dimension_numbers<[1], [0], [0], [1], [0, 0, 1, 1], [], []>} : vector<128x128xbf16>, vector<128x128xbf16>, vector<128x128xf32> -> vector<128x128xf32>
    %7 = arith.addf %0, %6 : vector<128x128xf32>
    %c0_8 = arith.constant 0 : index
    %c0_9 = arith.constant 0 : index
    %c0_10 = arith.constant 0 : index
    %c128 = arith.constant 128 : index
    %8 = vector.load %arg1[%c0_8, %c0_9, %c0_10, %c128] : memref<1x18x9x256xbf16, #tpu.memory_space<vmem>>, vector<1x16x8x128xbf16>
    %9 = vector.shape_cast %8 : vector<1x16x8x128xbf16> to vector<16x8x128xbf16>
    %10 = vector.shape_cast %9 : vector<16x8x128xbf16> to vector<128x128xbf16>
    %c0_11 = arith.constant 0 : index
    %c1 = arith.constant 1 : index
    %c0_12 = arith.constant 0 : index
    %c0_13 = arith.constant 0 : index
    %11 = vector.load %arg2[%c0_11, %c1, %c0_12, %c0_13] : memref<2x2x128x128xbf16, #tpu.memory_space<vmem>>, vector<1x1x128x128xbf16>
    %12 = vector.shape_cast %11 : vector<1x1x128x128xbf16> to vector<128x128xbf16>
    %cst_14 = arith.constant dense<0.000000e+00> : vector<128x128xf32>
    %13 = tpu.matmul %10, %12, %cst_14 {dimension_numbers = #tpu.dot_dimension_numbers<[1], [0], [0], [1], [0, 0, 1, 1], [], []>} : vector<128x128xbf16>, vector<128x128xbf16>, vector<128x128xf32> -> vector<128x128xf32>
    %14 = arith.addf %7, %13 : vector<128x128xf32>
    %c0_15 = arith.constant 0 : index
    %c1_16 = arith.constant 1 : index
    %c0_17 = arith.constant 0 : index
    %c0_18 = arith.constant 0 : index
    %15 = vector.load %arg1[%c0_15, %c1_16, %c0_17, %c0_18] : memref<1x18x9x256xbf16, #tpu.memory_space<vmem>>, vector<1x16x8x128xbf16>
    %16 = vector.shape_cast %15 : vector<1x16x8x128xbf16> to vector<16x8x128xbf16>
    %17 = vector.shape_cast %16 : vector<16x8x128xbf16> to vector<128x128xbf16>
    %c1_19 = arith.constant 1 : index
    %c0_20 = arith.constant 0 : index
    %c0_21 = arith.constant 0 : index
    %c0_22 = arith.constant 0 : index
    %18 = vector.load %arg2[%c1_19, %c0_20, %c0_21, %c0_22] : memref<2x2x128x128xbf16, #tpu.memory_space<vmem>>, vector<1x1x128x128xbf16>
    %19 = vector.shape_cast %18 : vector<1x1x128x128xbf16> to vector<128x128xbf16>
    %cst_23 = arith.constant dense<0.000000e+00> : vector<128x128xf32>
    %20 = tpu.matmul %17, %19, %cst_23 {dimension_numbers = #tpu.dot_dimension_numbers<[1], [0], [0], [1], [0, 0, 1, 1], [], []>} : vector<128x128xbf16>, vector<128x128xbf16>, vector<128x128xf32> -> vector<128x128xf32>
    %21 = arith.addf %14, %20 : vector<128x128xf32>
    %c0_24 = arith.constant 0 : index
    %c1_25 = arith.constant 1 : index
    %c0_26 = arith.constant 0 : index
    %c128_27 = arith.constant 128 : index
    %22 = vector.load %arg1[%c0_24, %c1_25, %c0_26, %c128_27] : memref<1x18x9x256xbf16, #tpu.memory_space<vmem>>, vector<1x16x8x128xbf16>
    %23 = vector.shape_cast %22 : vector<1x16x8x128xbf16> to vector<16x8x128xbf16>
    %24 = vector.shape_cast %23 : vector<16x8x128xbf16> to vector<128x128xbf16>
    %c1_28 = arith.constant 1 : index
    %c1_29 = arith.constant 1 : index
    %c0_30 = arith.constant 0 : index
    %c0_31 = arith.constant 0 : index
    %25 = vector.load %arg2[%c1_28, %c1_29, %c0_30, %c0_31] : memref<2x2x128x128xbf16, #tpu.memory_space<vmem>>, vector<1x1x128x128xbf16>
    %26 = vector.shape_cast %25 : vector<1x1x128x128xbf16> to vector<128x128xbf16>
    %cst_32 = arith.constant dense<0.000000e+00> : vector<128x128xf32>
    %27 = tpu.matmul %24, %26, %cst_32 {dimension_numbers = #tpu.dot_dimension_numbers<[1], [0], [0], [1], [0, 0, 1, 1], [], []>} : vector<128x128xbf16>, vector<128x128xbf16>, vector<128x128xf32> -> vector<128x128xf32>
    %28 = arith.addf %21, %27 : vector<128x128xf32>
    %cst_33 = arith.constant 0.000000e+00 : f32
    %29 = vector.broadcast %cst_33 : f32 to vector<128x128xf32>
    %c0_34 = arith.constant 0 : index
    %c0_35 = arith.constant 0 : index
    %c0_36 = arith.constant 0 : index
    %c128_37 = arith.constant 128 : index
    %30 = vector.load %arg1[%c0_34, %c0_35, %c0_36, %c128_37] : memref<1x18x9x256xbf16, #tpu.memory_space<vmem>>, vector<1x16x8x128xbf16>
    %31 = vector.shape_cast %30 : vector<1x16x8x128xbf16> to vector<16x8x128xbf16>
    %32 = vector.shape_cast %31 : vector<16x8x128xbf16> to vector<128x128xbf16>
    %c0_38 = arith.constant 0 : index
    %c0_39 = arith.constant 0 : index
    %c0_40 = arith.constant 0 : index
    %c0_41 = arith.constant 0 : index
    %33 = vector.load %arg2[%c0_38, %c0_39, %c0_40, %c0_41] : memref<2x2x128x128xbf16, #tpu.memory_space<vmem>>, vector<1x1x128x128xbf16>
    %34 = vector.shape_cast %33 : vector<1x1x128x128xbf16> to vector<128x128xbf16>
    %cst_42 = arith.constant dense<0.000000e+00> : vector<128x128xf32>
    %35 = tpu.matmul %32, %34, %cst_42 {dimension_numbers = #tpu.dot_dimension_numbers<[1], [0], [0], [1], [0, 0, 1, 1], [], []>} : vector<128x128xbf16>, vector<128x128xbf16>, vector<128x128xf32> -> vector<128x128xf32>
    %36 = arith.addf %29, %35 : vector<128x128xf32>
    %c0_43 = arith.constant 0 : index
    %c0_44 = arith.constant 0 : index
    %c1_45 = arith.constant 1 : index
    %c0_46 = arith.constant 0 : index
    %37 = vector.load %arg1[%c0_43, %c0_44, %c1_45, %c0_46] : memref<1x18x9x256xbf16, #tpu.memory_space<vmem>>, vector<1x16x8x128xbf16>
    %38 = vector.shape_cast %37 : vector<1x16x8x128xbf16> to vector<16x8x128xbf16>
    %39 = vector.shape_cast %38 : vector<16x8x128xbf16> to vector<128x128xbf16>
    %c0_47 = arith.constant 0 : index
    %c1_48 = arith.constant 1 : index
    %c0_49 = arith.constant 0 : index
    %c0_50 = arith.constant 0 : index
    %40 = vector.load %arg2[%c0_47, %c1_48, %c0_49, %c0_50] : memref<2x2x128x128xbf16, #tpu.memory_space<vmem>>, vector<1x1x128x128xbf16>
    %41 = vector.shape_cast %40 : vector<1x1x128x128xbf16> to vector<128x128xbf16>
    %cst_51 = arith.constant dense<0.000000e+00> : vector<128x128xf32>
    %42 = tpu.matmul %39, %41, %cst_51 {dimension_numbers = #tpu.dot_dimension_numbers<[1], [0], [0], [1], [0, 0, 1, 1], [], []>} : vector<128x128xbf16>, vector<128x128xbf16>, vector<128x128xf32> -> vector<128x128xf32>
    %43 = arith.addf %36, %42 : vector<128x128xf32>
    %c0_52 = arith.constant 0 : index
    %c1_53 = arith.constant 1 : index
    %c0_54 = arith.constant 0 : index
    %c128_55 = arith.constant 128 : index
    %44 = vector.load %arg1[%c0_52, %c1_53, %c0_54, %c128_55] : memref<1x18x9x256xbf16, #tpu.memory_space<vmem>>, vector<1x16x8x128xbf16>
    %45 = vector.shape_cast %44 : vector<1x16x8x128xbf16> to vector<16x8x128xbf16>
    %46 = vector.shape_cast %45 : vector<16x8x128xbf16> to vector<128x128xbf16>
    %c1_56 = arith.constant 1 : index
    %c0_57 = arith.constant 0 : index
    %c0_58 = arith.constant 0 : index
    %c0_59 = arith.constant 0 : index
    %47 = vector.load %arg2[%c1_56, %c0_57, %c0_58, %c0_59] : memref<2x2x128x128xbf16, #tpu.memory_space<vmem>>, vector<1x1x128x128xbf16>
    %48 = vector.shape_cast %47 : vector<1x1x128x128xbf16> to vector<128x128xbf16>
    %cst_60 = arith.constant dense<0.000000e+00> : vector<128x128xf32>
    %49 = tpu.matmul %46, %48, %cst_60 {dimension_numbers = #tpu.dot_dimension_numbers<[1], [0], [0], [1], [0, 0, 1, 1], [], []>} : vector<128x128xbf16>, vector<128x128xbf16>, vector<128x128xf32> -> vector<128x128xf32>
    %50 = arith.addf %43, %49 : vector<128x128xf32>
    %c0_61 = arith.constant 0 : index
    %c1_62 = arith.constant 1 : index
    %c1_63 = arith.constant 1 : index
    %c0_64 = arith.constant 0 : index
    %51 = vector.load %arg1[%c0_61, %c1_62, %c1_63, %c0_64] : memref<1x18x9x256xbf16, #tpu.memory_space<vmem>>, vector<1x16x8x128xbf16>
    %52 = vector.shape_cast %51 : vector<1x16x8x128xbf16> to vector<16x8x128xbf16>
    %53 = vector.shape_cast %52 : vector<16x8x128xbf16> to vector<128x128xbf16>
    %c1_65 = arith.constant 1 : index
    %c1_66 = arith.constant 1 : index
    %c0_67 = arith.constant 0 : index
    %c0_68 = arith.constant 0 : index
    %54 = vector.load %arg2[%c1_65, %c1_66, %c0_67, %c0_68] : memref<2x2x128x128xbf16, #tpu.memory_space<vmem>>, vector<1x1x128x128xbf16>
    %55 = vector.shape_cast %54 : vector<1x1x128x128xbf16> to vector<128x128xbf16>
    %cst_69 = arith.constant dense<0.000000e+00> : vector<128x128xf32>
    %56 = tpu.matmul %53, %55, %cst_69 {dimension_numbers = #tpu.dot_dimension_numbers<[1], [0], [0], [1], [0, 0, 1, 1], [], []>} : vector<128x128xbf16>, vector<128x128xbf16>, vector<128x128xf32> -> vector<128x128xf32>
    %57 = arith.addf %50, %56 : vector<128x128xf32>
    %58 = arith.maximumf %28, %57 : vector<128x128xf32>
    %c0_70 = arith.constant 0 : index
    %c0_71 = arith.constant 0 : index
    %59 = vector.load %arg3[%c0_70, %c0_71] : memref<1x128xf32, #tpu.memory_space<vmem>>, vector<1x128xf32>
    %60 = vector.broadcast %59 : vector<1x128xf32> to vector<128x128xf32>
    %61 = arith.addf %58, %60 : vector<128x128xf32>
    %cst_72 = arith.constant 0.000000e+00 : f32
    %62 = vector.broadcast %cst_72 : f32 to vector<128x128xf32>
    %63 = arith.maximumf %61, %62 : vector<128x128xf32>
    %64 = vector.shape_cast %63 : vector<128x128xf32> to vector<8x2x8x128xf32>
    %65 = vector.extract_strided_slice %64 {offsets = [0, 0, 0, 0], sizes = [8, 1, 8, 128], strides = [1, 1, 1, 1]} : vector<8x2x8x128xf32> to vector<8x1x8x128xf32>
    %66 = vector.shape_cast %65 : vector<8x1x8x128xf32> to vector<8x8x128xf32>
    %67 = vector.extract_strided_slice %64 {offsets = [0, 1, 0, 0], sizes = [8, 1, 8, 128], strides = [1, 1, 1, 1]} : vector<8x2x8x128xf32> to vector<8x1x8x128xf32>
    %68 = vector.shape_cast %67 : vector<8x1x8x128xf32> to vector<8x8x128xf32>
    %69 = arith.maximumf %66, %68 : vector<8x8x128xf32>
    %70 = arith.truncf %69 : vector<8x8x128xf32> to vector<8x8x128xbf16>
    %c0_73 = arith.constant 0 : index
    %c0_74 = arith.constant 0 : index
    %c0_75 = arith.constant 0 : index
    %c0_76 = arith.constant 0 : index
    %71 = vector.load %arg4[%c0_73, %c0_74, %c0_75, %c0_76] : memref<1x8x8x128xbf16, #tpu.memory_space<vmem>>, vector<1x8x8x128xbf16>
    %72 = vector.shape_cast %71 : vector<1x8x8x128xbf16> to vector<8x8x128xbf16>
    %73 = vector.shape_cast %70 : vector<8x8x128xbf16> to vector<1x8x8x128xbf16>
    tpu.vector_store %arg4[%c0_73, %c0_74, %c0_75, %c0_76], %73 {strides = array<i32>} : memref<1x8x8x128xbf16, #tpu.memory_space<vmem>>, vector<1x8x8x128xbf16>,
    return
  }
  func.func @transform_0(%arg0: i32) -> (i32, i32, i32, i32) {
    %c0_i32 = arith.constant 0 : i32
    %c0_i32_0 = arith.constant 0 : i32
    %c0_i32_1 = arith.constant 0 : i32
    %c0_i32_2 = arith.constant 0 : i32
    return %arg0, %c0_i32, %c0_i32_0, %c0_i32_1 : i32, i32, i32, i32
  }
  func.func @transform_1(%arg0: i32) -> (i32, i32, i32, i32) {
    %c0_i32 = arith.constant 0 : i32
    %c0_i32_0 = arith.constant 0 : i32
    %c0_i32_1 = arith.constant 0 : i32
    %c0_i32_2 = arith.constant 0 : i32
    %c0_i32_3 = arith.constant 0 : i32
    return %c0_i32, %c0_i32_0, %c0_i32_1, %c0_i32_2 : i32, i32, i32, i32
  }
  func.func @transform_2(%arg0: i32) -> (i32, i32) {
    %c0_i32 = arith.constant 0 : i32
    %c0_i32_0 = arith.constant 0 : i32
    %c0_i32_1 = arith.constant 0 : i32
    return %c0_i32, %c0_i32_0 : i32, i32
  }
  func.func @transform_3(%arg0: i32) -> (i32, i32, i32, i32) {
    %c0_i32 = arith.constant 0 : i32
    %c0_i32_0 = arith.constant 0 : i32
    %c0_i32_1 = arith.constant 0 : i32
    %c0_i32_2 = arith.constant 0 : i32
    return %arg0, %c0_i32, %c0_i32_0, %c0_i32_1 : i32, i32, i32, i32
  }
}

module attributes {stable_mosaic.version = 11 : i64} {
  func.func @_conv2x2_relu_pool_kernel(%arg0: i32, %arg1: memref<1x34x17x6xbf16, #tpu.memory_space<vmem>>, %arg2: memref<2x2x3x128xbf16, #tpu.memory_space<vmem>>, %arg3: memref<1x128xf32, #tpu.memory_space<vmem>>, %arg4: memref<1x16x16x128xbf16, #tpu.memory_space<vmem>>) attributes {dimension_semantics = [#tpu.dimension_semantics<parallel>], iteration_bounds = array<i64: 2>, scalar_prefetch = 0 : i64, scratch_operands = 0 : i64, tpu.core_type = #tpu.core_type<tc>, window_params = [{transform_indices = @transform_0, window_bounds = array<i64: 1, 34, 17, 6>}, {pipeline_mode = #tpu.pipeline_mode<synchronous>, transform_indices = @transform_1, window_bounds = array<i64: 2, 2, 3, 128>}, {pipeline_mode = #tpu.pipeline_mode<synchronous>, transform_indices = @transform_2, window_bounds = array<i64: 1, 128>}, {transform_indices = @transform_3, window_bounds = array<i64: 1, 16, 16, 128>}]} {
    %cst = arith.constant 0.000000e+00 : f32
    %0 = vector.broadcast %cst : f32 to vector<512x128xf32>
    %c0 = arith.constant 0 : index
    %c0_0 = arith.constant 0 : index
    %c0_1 = arith.constant 0 : index
    %c0_2 = arith.constant 0 : index
    %1 = vector.load %arg1[%c0, %c0_0, %c0_1, %c0_2] : memref<1x34x17x6xbf16, #tpu.memory_space<vmem>>, vector<1x32x16x3xbf16>
    %2 = vector.shape_cast %1 : vector<1x32x16x3xbf16> to vector<32x16x3xbf16>
    %3 = vector.shape_cast %2 : vector<32x16x3xbf16> to vector<512x3xbf16>
    %c0_3 = arith.constant 0 : index
    %c0_4 = arith.constant 0 : index
    %c0_5 = arith.constant 0 : index
    %c0_6 = arith.constant 0 : index
    %4 = vector.load %arg2[%c0_3, %c0_4, %c0_5, %c0_6] : memref<2x2x3x128xbf16, #tpu.memory_space<vmem>>, vector<1x1x3x128xbf16>
    %5 = vector.shape_cast %4 : vector<1x1x3x128xbf16> to vector<3x128xbf16>
    %cst_7 = arith.constant dense<0.000000e+00> : vector<512x128xf32>
    %6 = tpu.matmul %3, %5, %cst_7 {dimension_numbers = #tpu.dot_dimension_numbers<[1], [0], [0], [1], [0, 0, 1, 1], [], []>} : vector<512x3xbf16>, vector<3x128xbf16>, vector<512x128xf32> -> vector<512x128xf32>
    %7 = arith.addf %0, %6 : vector<512x128xf32>
    %c0_8 = arith.constant 0 : index
    %c0_9 = arith.constant 0 : index
    %c0_10 = arith.constant 0 : index
    %c3 = arith.constant 3 : index
    %8 = vector.load %arg1[%c0_8, %c0_9, %c0_10, %c3] : memref<1x34x17x6xbf16, #tpu.memory_space<vmem>>, vector<1x32x16x3xbf16>
    %9 = vector.shape_cast %8 : vector<1x32x16x3xbf16> to vector<32x16x3xbf16>
    %10 = vector.shape_cast %9 : vector<32x16x3xbf16> to vector<512x3xbf16>
    %c0_11 = arith.constant 0 : index
    %c1 = arith.constant 1 : index
    %c0_12 = arith.constant 0 : index
    %c0_13 = arith.constant 0 : index
    %11 = vector.load %arg2[%c0_11, %c1, %c0_12, %c0_13] : memref<2x2x3x128xbf16, #tpu.memory_space<vmem>>, vector<1x1x3x128xbf16>
    %12 = vector.shape_cast %11 : vector<1x1x3x128xbf16> to vector<3x128xbf16>
    %cst_14 = arith.constant dense<0.000000e+00> : vector<512x128xf32>
    %13 = tpu.matmul %10, %12, %cst_14 {dimension_numbers = #tpu.dot_dimension_numbers<[1], [0], [0], [1], [0, 0, 1, 1], [], []>} : vector<512x3xbf16>, vector<3x128xbf16>, vector<512x128xf32> -> vector<512x128xf32>
    %14 = arith.addf %7, %13 : vector<512x128xf32>
    %c0_15 = arith.constant 0 : index
    %c1_16 = arith.constant 1 : index
    %c0_17 = arith.constant 0 : index
    %c0_18 = arith.constant 0 : index
    %15 = vector.load %arg1[%c0_15, %c1_16, %c0_17, %c0_18] : memref<1x34x17x6xbf16, #tpu.memory_space<vmem>>, vector<1x32x16x3xbf16>
    %16 = vector.shape_cast %15 : vector<1x32x16x3xbf16> to vector<32x16x3xbf16>
    %17 = vector.shape_cast %16 : vector<32x16x3xbf16> to vector<512x3xbf16>
    %c1_19 = arith.constant 1 : index
    %c0_20 = arith.constant 0 : index
    %c0_21 = arith.constant 0 : index
    %c0_22 = arith.constant 0 : index
    %18 = vector.load %arg2[%c1_19, %c0_20, %c0_21, %c0_22] : memref<2x2x3x128xbf16, #tpu.memory_space<vmem>>, vector<1x1x3x128xbf16>
    %19 = vector.shape_cast %18 : vector<1x1x3x128xbf16> to vector<3x128xbf16>
    %cst_23 = arith.constant dense<0.000000e+00> : vector<512x128xf32>
    %20 = tpu.matmul %17, %19, %cst_23 {dimension_numbers = #tpu.dot_dimension_numbers<[1], [0], [0], [1], [0, 0, 1, 1], [], []>} : vector<512x3xbf16>, vector<3x128xbf16>, vector<512x128xf32> -> vector<512x128xf32>
    %21 = arith.addf %14, %20 : vector<512x128xf32>
    %c0_24 = arith.constant 0 : index
    %c1_25 = arith.constant 1 : index
    %c0_26 = arith.constant 0 : index
    %c3_27 = arith.constant 3 : index
    %22 = vector.load %arg1[%c0_24, %c1_25, %c0_26, %c3_27] : memref<1x34x17x6xbf16, #tpu.memory_space<vmem>>, vector<1x32x16x3xbf16>
    %23 = vector.shape_cast %22 : vector<1x32x16x3xbf16> to vector<32x16x3xbf16>
    %24 = vector.shape_cast %23 : vector<32x16x3xbf16> to vector<512x3xbf16>
    %c1_28 = arith.constant 1 : index
    %c1_29 = arith.constant 1 : index
    %c0_30 = arith.constant 0 : index
    %c0_31 = arith.constant 0 : index
    %25 = vector.load %arg2[%c1_28, %c1_29, %c0_30, %c0_31] : memref<2x2x3x128xbf16, #tpu.memory_space<vmem>>, vector<1x1x3x128xbf16>
    %26 = vector.shape_cast %25 : vector<1x1x3x128xbf16> to vector<3x128xbf16>
    %cst_32 = arith.constant dense<0.000000e+00> : vector<512x128xf32>
    %27 = tpu.matmul %24, %26, %cst_32 {dimension_numbers = #tpu.dot_dimension_numbers<[1], [0], [0], [1], [0, 0, 1, 1], [], []>} : vector<512x3xbf16>, vector<3x128xbf16>, vector<512x128xf32> -> vector<512x128xf32>
    %28 = arith.addf %21, %27 : vector<512x128xf32>
    %cst_33 = arith.constant 0.000000e+00 : f32
    %29 = vector.broadcast %cst_33 : f32 to vector<512x128xf32>
    %c0_34 = arith.constant 0 : index
    %c0_35 = arith.constant 0 : index
    %c0_36 = arith.constant 0 : index
    %c3_37 = arith.constant 3 : index
    %30 = vector.load %arg1[%c0_34, %c0_35, %c0_36, %c3_37] : memref<1x34x17x6xbf16, #tpu.memory_space<vmem>>, vector<1x32x16x3xbf16>
    %31 = vector.shape_cast %30 : vector<1x32x16x3xbf16> to vector<32x16x3xbf16>
    %32 = vector.shape_cast %31 : vector<32x16x3xbf16> to vector<512x3xbf16>
    %c0_38 = arith.constant 0 : index
    %c0_39 = arith.constant 0 : index
    %c0_40 = arith.constant 0 : index
    %c0_41 = arith.constant 0 : index
    %33 = vector.load %arg2[%c0_38, %c0_39, %c0_40, %c0_41] : memref<2x2x3x128xbf16, #tpu.memory_space<vmem>>, vector<1x1x3x128xbf16>
    %34 = vector.shape_cast %33 : vector<1x1x3x128xbf16> to vector<3x128xbf16>
    %cst_42 = arith.constant dense<0.000000e+00> : vector<512x128xf32>
    %35 = tpu.matmul %32, %34, %cst_42 {dimension_numbers = #tpu.dot_dimension_numbers<[1], [0], [0], [1], [0, 0, 1, 1], [], []>} : vector<512x3xbf16>, vector<3x128xbf16>, vector<512x128xf32> -> vector<512x128xf32>
    %36 = arith.addf %29, %35 : vector<512x128xf32>
    %c0_43 = arith.constant 0 : index
    %c0_44 = arith.constant 0 : index
    %c1_45 = arith.constant 1 : index
    %c0_46 = arith.constant 0 : index
    %37 = vector.load %arg1[%c0_43, %c0_44, %c1_45, %c0_46] : memref<1x34x17x6xbf16, #tpu.memory_space<vmem>>, vector<1x32x16x3xbf16>
    %38 = vector.shape_cast %37 : vector<1x32x16x3xbf16> to vector<32x16x3xbf16>
    %39 = vector.shape_cast %38 : vector<32x16x3xbf16> to vector<512x3xbf16>
    %c0_47 = arith.constant 0 : index
    %c1_48 = arith.constant 1 : index
    %c0_49 = arith.constant 0 : index
    %c0_50 = arith.constant 0 : index
    %40 = vector.load %arg2[%c0_47, %c1_48, %c0_49, %c0_50] : memref<2x2x3x128xbf16, #tpu.memory_space<vmem>>, vector<1x1x3x128xbf16>
    %41 = vector.shape_cast %40 : vector<1x1x3x128xbf16> to vector<3x128xbf16>
    %cst_51 = arith.constant dense<0.000000e+00> : vector<512x128xf32>
    %42 = tpu.matmul %39, %41, %cst_51 {dimension_numbers = #tpu.dot_dimension_numbers<[1], [0], [0], [1], [0, 0, 1, 1], [], []>} : vector<512x3xbf16>, vector<3x128xbf16>, vector<512x128xf32> -> vector<512x128xf32>
    %43 = arith.addf %36, %42 : vector<512x128xf32>
    %c0_52 = arith.constant 0 : index
    %c1_53 = arith.constant 1 : index
    %c0_54 = arith.constant 0 : index
    %c3_55 = arith.constant 3 : index
    %44 = vector.load %arg1[%c0_52, %c1_53, %c0_54, %c3_55] : memref<1x34x17x6xbf16, #tpu.memory_space<vmem>>, vector<1x32x16x3xbf16>
    %45 = vector.shape_cast %44 : vector<1x32x16x3xbf16> to vector<32x16x3xbf16>
    %46 = vector.shape_cast %45 : vector<32x16x3xbf16> to vector<512x3xbf16>
    %c1_56 = arith.constant 1 : index
    %c0_57 = arith.constant 0 : index
    %c0_58 = arith.constant 0 : index
    %c0_59 = arith.constant 0 : index
    %47 = vector.load %arg2[%c1_56, %c0_57, %c0_58, %c0_59] : memref<2x2x3x128xbf16, #tpu.memory_space<vmem>>, vector<1x1x3x128xbf16>
    %48 = vector.shape_cast %47 : vector<1x1x3x128xbf16> to vector<3x128xbf16>
    %cst_60 = arith.constant dense<0.000000e+00> : vector<512x128xf32>
    %49 = tpu.matmul %46, %48, %cst_60 {dimension_numbers = #tpu.dot_dimension_numbers<[1], [0], [0], [1], [0, 0, 1, 1], [], []>} : vector<512x3xbf16>, vector<3x128xbf16>, vector<512x128xf32> -> vector<512x128xf32>
    %50 = arith.addf %43, %49 : vector<512x128xf32>
    %c0_61 = arith.constant 0 : index
    %c1_62 = arith.constant 1 : index
    %c1_63 = arith.constant 1 : index
    %c0_64 = arith.constant 0 : index
    %51 = vector.load %arg1[%c0_61, %c1_62, %c1_63, %c0_64] : memref<1x34x17x6xbf16, #tpu.memory_space<vmem>>, vector<1x32x16x3xbf16>
    %52 = vector.shape_cast %51 : vector<1x32x16x3xbf16> to vector<32x16x3xbf16>
    %53 = vector.shape_cast %52 : vector<32x16x3xbf16> to vector<512x3xbf16>
    %c1_65 = arith.constant 1 : index
    %c1_66 = arith.constant 1 : index
    %c0_67 = arith.constant 0 : index
    %c0_68 = arith.constant 0 : index
    %54 = vector.load %arg2[%c1_65, %c1_66, %c0_67, %c0_68] : memref<2x2x3x128xbf16, #tpu.memory_space<vmem>>, vector<1x1x3x128xbf16>
    %55 = vector.shape_cast %54 : vector<1x1x3x128xbf16> to vector<3x128xbf16>
    %cst_69 = arith.constant dense<0.000000e+00> : vector<512x128xf32>
    %56 = tpu.matmul %53, %55, %cst_69 {dimension_numbers = #tpu.dot_dimension_numbers<[1], [0], [0], [1], [0, 0, 1, 1], [], []>} : vector<512x3xbf16>, vector<3x128xbf16>, vector<512x128xf32> -> vector<512x128xf32>
    %57 = arith.addf %50, %56 : vector<512x128xf32>
    %58 = arith.maximumf %28, %57 : vector<512x128xf32>
    %c0_70 = arith.constant 0 : index
    %c0_71 = arith.constant 0 : index
    %59 = vector.load %arg3[%c0_70, %c0_71] : memref<1x128xf32, #tpu.memory_space<vmem>>, vector<1x128xf32>
    %60 = vector.broadcast %59 : vector<1x128xf32> to vector<512x128xf32>
    %61 = arith.addf %58, %60 : vector<512x128xf32>
    %cst_72 = arith.constant 0.000000e+00 : f32
    %62 = vector.broadcast %cst_72 : f32 to vector<512x128xf32>
    %63 = arith.maximumf %61, %62 : vector<512x128xf32>
    %64 = vector.shape_cast %63 : vector<512x128xf32> to vector<16x2x16x128xf32>
    %65 = vector.extract_strided_slice %64 {offsets = [0, 0, 0, 0], sizes = [16, 1, 16, 128], strides = [1, 1, 1, 1]} : vector<16x2x16x128xf32> to vector<16x1x16x128xf32>
    %66 = vector.shape_cast %65 : vector<16x1x16x128xf32> to vector<16x16x128xf32>
    %67 = vector.extract_strided_slice %64 {offsets = [0, 1, 0, 0], sizes = [16, 1, 16, 128], strides = [1, 1, 1, 1]} : vector<16x2x16x128xf32> to vector<16x1x16x128xf32>
    %68 = vector.shape_cast %67 : vector<16x1x16x128xf32> to vector<16x16x128xf32>
    %69 = arith.maximumf %66, %68 : vector<16x16x128xf32>
    %70 = arith.truncf %69 : vector<16x16x128xf32> to vector<16x16x128xbf16>
    %c0_73 = arith.constant 0 : index
    %c0_74 = arith.constant 0 : index
    %c0_75 = arith.constant 0 : index
    %c0_76 = arith.constant 0 : index
    %71 = vector.load %arg4[%c0_73, %c0_74, %c0_75, %c0_76] : memref<1x16x16x128xbf16, #tpu.memory_space<vmem>>, vector<1x16x16x128xbf16>
    %72 = vector.shape_cast %71 : vector<1x16x16x128xbf16> to vector<16x16x128xbf16>
    %73 = vector.shape_cast %70 : vector<16x16x128xbf16> to vector<1x16x16x128xbf16>
    tpu.vector_store %arg4[%c0_73, %c0_74, %c0_75, %c0_76], %73 {strides = array<i32>} : memref<1x16x16x128xbf16, #tpu.memory_space<vmem>>, vector<1x16x16x128xbf16>,
    return
  }
  func.func @transform_0(%arg0: i32) -> (i32, i32, i32, i32) {
    %c0_i32 = arith.constant 0 : i32
    %c0_i32_0 = arith.constant 0 : i32
    %c0_i32_1 = arith.constant 0 : i32
    %c0_i32_2 = arith.constant 0 : i32
    return %arg0, %c0_i32, %c0_i32_0, %c0_i32_1 : i32, i32, i32, i32
  }
  func.func @transform_1(%arg0: i32) -> (i32, i32, i32, i32) {
    %c0_i32 = arith.constant 0 : i32
    %c0_i32_0 = arith.constant 0 : i32
    %c0_i32_1 = arith.constant 0 : i32
    %c0_i32_2 = arith.constant 0 : i32
    %c0_i32_3 = arith.constant 0 : i32
    return %c0_i32, %c0_i32_0, %c0_i32_1, %c0_i32_2 : i32, i32, i32, i32
  }
  func.func @transform_2(%arg0: i32) -> (i32, i32) {
    %c0_i32 = arith.constant 0 : i32
    %c0_i32_0 = arith.constant 0 : i32
    %c0_i32_1 = arith.constant 0 : i32
    return %c0_i32, %c0_i32_0 : i32, i32
  }
  func.func @transform_3(%arg0: i32) -> (i32, i32, i32, i32) {
    %c0_i32 = arith.constant 0 : i32
    %c0_i32_0 = arith.constant 0 : i32
    %c0_i32_1 = arith.constant 0 : i32
    %c0_i32_2 = arith.constant 0 : i32
    return %arg0, %c0_i32, %c0_i32_0, %c0_i32_1 : i32, i32, i32, i32
  }
}

module attributes {stable_mosaic.version = 11 : i64} {
  func.func @_mlp_kernel(%arg0: i32, %arg1: memref<2x512xbf16, #tpu.memory_space<vmem>>, %arg2: memref<512x512xbf16, #tpu.memory_space<vmem>>, %arg3: memref<1x512xf32, #tpu.memory_space<vmem>>, %arg4: memref<512x128xbf16, #tpu.memory_space<vmem>>, %arg5: memref<1x128xf32, #tpu.memory_space<vmem>>, %arg6: memref<2x128xf32, #tpu.memory_space<vmem>>, %arg7: memref<2x512xf32, #tpu.memory_space<vmem>>) attributes {dimension_semantics = [#tpu.dimension_semantics<arbitrary>], iteration_bounds = array<i64: 8>, scalar_prefetch = 0 : i64, scratch_operands = 1 : i64, tpu.core_type = #tpu.core_type<tc>, window_params = [{transform_indices = @transform_0, window_bounds = array<i64: 2, 512>}, {transform_indices = @transform_1, window_bounds = array<i64: 512, 512>}, {pipeline_mode = #tpu.pipeline_mode<synchronous>, transform_indices = @transform_2, window_bounds = array<i64: 1, 512>}, {pipeline_mode = #tpu.pipeline_mode<synchronous>, transform_indices = @transform_3, window_bounds = array<i64: 512, 128>}, {pipeline_mode = #tpu.pipeline_mode<synchronous>, transform_indices = @transform_4, window_bounds = array<i64: 1, 128>}, {pipeline_mode = #tpu.pipeline_mode<synchronous>, transform_indices = @transform_5, window_bounds = array<i64: 2, 128>}]} {
    %c0_i32 = arith.constant 0 : i32
    %0 = arith.cmpi eq, %arg0, %c0_i32 : i32
    %1 = arith.extui %0 : i1 to i32
    %c0_i32_0 = arith.constant 0 : i32
    %2 = arith.cmpi ne, %1, %c0_i32_0 : i32
    scf.if %2 {
      %cst_9 = arith.constant 0.000000e+00 : f32
      %12 = vector.broadcast %cst_9 : f32 to vector<2x512xf32>
      %c0_10 = arith.constant 0 : index
      %c0_11 = arith.constant 0 : index
      %13 = vector.load %arg7[%c0_10, %c0_11] : memref<2x512xf32, #tpu.memory_space<vmem>>, vector<2x512xf32>
      tpu.vector_store %arg7[%c0_10, %c0_11], %12 {strides = array<i32>} : memref<2x512xf32, #tpu.memory_space<vmem>>, vector<2x512xf32>,
    } else {
    }
    %c0 = arith.constant 0 : index
    %c0_1 = arith.constant 0 : index
    %3 = vector.load %arg7[%c0, %c0_1] : memref<2x512xf32, #tpu.memory_space<vmem>>, vector<2x512xf32>
    %c0_2 = arith.constant 0 : index
    %c0_3 = arith.constant 0 : index
    %4 = vector.load %arg1[%c0_2, %c0_3] : memref<2x512xbf16, #tpu.memory_space<vmem>>, vector<2x512xbf16>
    %c0_4 = arith.constant 0 : index
    %c0_5 = arith.constant 0 : index
    %5 = vector.load %arg2[%c0_4, %c0_5] : memref<512x512xbf16, #tpu.memory_space<vmem>>, vector<512x512xbf16>
    %cst = arith.constant dense<0.000000e+00> : vector<2x512xf32>
    %6 = tpu.matmul %4, %5, %cst {dimension_numbers = #tpu.dot_dimension_numbers<[1], [0], [0], [1], [0, 0, 1, 1], [], []>} : vector<2x512xbf16>, vector<512x512xbf16>, vector<2x512xf32> -> vector<2x512xf32>
    %7 = arith.addf %3, %6 : vector<2x512xf32>
    %c0_6 = arith.constant 0 : index
    %c0_7 = arith.constant 0 : index
    %8 = vector.load %arg7[%c0_6, %c0_7] : memref<2x512xf32, #tpu.memory_space<vmem>>, vector<2x512xf32>
    tpu.vector_store %arg7[%c0_6, %c0_7], %7 {strides = array<i32>} : memref<2x512xf32, #tpu.memory_space<vmem>>, vector<2x512xf32>,
    %c7_i32 = arith.constant 7 : i32
    %9 = arith.cmpi eq, %arg0, %c7_i32 : i32
    %10 = arith.extui %9 : i1 to i32
    %c0_i32_8 = arith.constant 0 : i32
    %11 = arith.cmpi ne, %10, %c0_i32_8 : i32
    scf.if %11 {
      %c0_9 = arith.constant 0 : index
      %c0_10 = arith.constant 0 : index
      %12 = vector.load %arg7[%c0_9, %c0_10] : memref<2x512xf32, #tpu.memory_space<vmem>>, vector<2x512xf32>
      %c0_11 = arith.constant 0 : index
      %c0_12 = arith.constant 0 : index
      %13 = vector.load %arg3[%c0_11, %c0_12] : memref<1x512xf32, #tpu.memory_space<vmem>>, vector<1x512xf32>
      %14 = vector.broadcast %13 : vector<1x512xf32> to vector<2x512xf32>
      %15 = arith.addf %12, %14 : vector<2x512xf32>
      %cst_13 = arith.constant 0.000000e+00 : f32
      %16 = vector.broadcast %cst_13 : f32 to vector<2x512xf32>
      %17 = arith.maximumf %15, %16 : vector<2x512xf32>
      %18 = arith.truncf %17 : vector<2x512xf32> to vector<2x512xbf16>
      %c0_14 = arith.constant 0 : index
      %c0_15 = arith.constant 0 : index
      %19 = vector.load %arg4[%c0_14, %c0_15] : memref<512x128xbf16, #tpu.memory_space<vmem>>, vector<512x128xbf16>
      %cst_16 = arith.constant dense<0.000000e+00> : vector<2x128xf32>
      %20 = tpu.matmul %18, %19, %cst_16 {dimension_numbers = #tpu.dot_dimension_numbers<[1], [0], [0], [1], [0, 0, 1, 1], [], []>} : vector<2x512xbf16>, vector<512x128xbf16>, vector<2x128xf32> -> vector<2x128xf32>
      %c0_17 = arith.constant 0 : index
      %c0_18 = arith.constant 0 : index
      %21 = vector.load %arg5[%c0_17, %c0_18] : memref<1x128xf32, #tpu.memory_space<vmem>>, vector<1x128xf32>
      %22 = vector.broadcast %21 : vector<1x128xf32> to vector<2x128xf32>
      %23 = arith.addf %20, %22 : vector<2x128xf32>
      %c0_19 = arith.constant 0 : index
      %c0_20 = arith.constant 0 : index
      %24 = vector.load %arg6[%c0_19, %c0_20] : memref<2x128xf32, #tpu.memory_space<vmem>>, vector<2x128xf32>
      tpu.vector_store %arg6[%c0_19, %c0_20], %23 {strides = array<i32>} : memref<2x128xf32, #tpu.memory_space<vmem>>, vector<2x128xf32>,
    } else {
    }
    return
  }
  func.func @transform_0(%arg0: i32) -> (i32, i32) {
    %c0_i32 = arith.constant 0 : i32
    %c0_i32_0 = arith.constant 0 : i32
    return %c0_i32, %arg0 : i32, i32
  }
  func.func @transform_1(%arg0: i32) -> (i32, i32) {
    %c0_i32 = arith.constant 0 : i32
    %c0_i32_0 = arith.constant 0 : i32
    return %arg0, %c0_i32 : i32, i32
  }
  func.func @transform_2(%arg0: i32) -> (i32, i32) {
    %c0_i32 = arith.constant 0 : i32
    %c0_i32_0 = arith.constant 0 : i32
    %c0_i32_1 = arith.constant 0 : i32
    return %c0_i32, %c0_i32_0 : i32, i32
  }
  func.func @transform_3(%arg0: i32) -> (i32, i32) {
    %c0_i32 = arith.constant 0 : i32
    %c0_i32_0 = arith.constant 0 : i32
    %c0_i32_1 = arith.constant 0 : i32
    return %c0_i32, %c0_i32_0 : i32, i32
  }
  func.func @transform_4(%arg0: i32) -> (i32, i32) {
    %c0_i32 = arith.constant 0 : i32
    %c0_i32_0 = arith.constant 0 : i32
    %c0_i32_1 = arith.constant 0 : i32
    return %c0_i32, %c0_i32_0 : i32, i32
  }
  func.func @transform_5(%arg0: i32) -> (i32, i32) {
    %c0_i32 = arith.constant 0 : i32
    %c0_i32_0 = arith.constant 0 : i32
    %c0_i32_1 = arith.constant 0 : i32
    return %c0_i32, %c0_i32_0 : i32, i32
  }
}

</mosaic_0001>

<bundles_post_ra>
// kernel: simple_nnn_forward.5
= control target key start
LH: loop header
LB: loop body
LE: loop exit
PB: predicated region body
PF: predicated region fallthrough
CT: control target
= control target key end

     0   :  { %10 = vsyncpa [#allocation4], 0  ;;  %s2879_s0 = inlined_call_operand.vmem [shape: bf16[2,4096], index: 0, kind: input, shape index: {}]   ;;  %s2880_s1 = inlined_call_operand.hbm [shape: bf16[4096,512], index: 1, kind: input, shape index: {}]   ;;  %s2881_s2 = inlined_call_operand.hbm [shape: f32[1,512], index: 2, kind: input, shape index: {}]   ;;  %s2882_s3 = inlined_call_operand.hbm [shape: bf16[512,128], index: 3, kind: input, shape index: {}]   ;;  %s2883_s4 = inlined_call_operand.hbm [shape: f32[1,128], index: 4, kind: input, shape index: {}]   ;;  %s2884_s5 = inlined_call_operand.hbm [shape: f32[2,128], index: 5, kind: output, shape index: {}]  }
   0x1   :  { %12 = vsyncpa [#allocation4 + $0x1], 0 }
   0x2   :  { %13 = vsyncpa [#allocation7], 0 }
   0x3   :  { %14 = vsyncpa [#allocation10], 0 }
   0x4   :  { %15 = vsyncpa [#allocation5], 0  ;;  %s2551_s18 = smov 0   ;;  %s2553_s19 = smov 0  }
   0x5   :  { %s2555_s20 = smov 0   ;;  %s2557_s21 = smov 0  }
   0x6 LB: > { %s2570_s22 = sadd.s32 4294967295, %s2507_s21   ;;  %p67_p0 = scmp.ne.s32.totalorder %s2499_s19, %s2495_s18  ;;  %s2507_s21 = sphi %s2557_s21, %s2902_s21   ;;  %s2503_s20 = sphi %s2555_s20, %s2901_s20   ;;  %s2499_s19 = sphi %s2553_s19, %s2900_s19   ;;  %s2495_s18 = sphi %s2551_s18, %s2899_s18  }
   0x7   : > { %p2885_p1 = scmp.eq.s32.totalorder %s2570_s22, 0  ;;  %p1794_p2 = scmp.ge.s32.totalorder %s2507_s21, 1 }
   0x8   : > { %p162_p3 = scmp.lt.s32.totalorder %s2507_s21, 9  ;;  %s2509_s25 = smov [#allocation6]  }
   0x9   : > { %p2579_p5 = por %p2885_p1, %p67_p0  ;;  %s175_s26 = sshll.u32 %s2509_s25, 4  ;;  %s176_s26 = int_to_ptr.vmem [resolvable:$true] %s175_s26 }
   0xa   : > { %p2583_p6 = pnand %p1794_p2, %p162_p3  ;;  %s2510_s27 = smov [#allocation8]  }
   0xb   : > { %s2888_s23 = scalar_select %p2579_p5, 1, 0 }
   0xc   : > { %s2889_s24 = scalar_select %p2583_p6, 1, 0 }
   0xd   : > { %p2041_p7 = pneg %p2583_p6  ;;  %s185_s28 = sshll.u32 %s2510_s27, 4  ;;  %s186_s28 = int_to_ptr.vmem [resolvable:$true] %s185_s28 }
   0xe   : > { %s2511_s30 = smov [#allocation9]   ;;  %s2342_s7 = scalar_lea.vmem %s176_s26, 64 }
   0xf   : > { %p2591_p8 = pnand %p2041_p7, %p2885_p1  ;;  %s199_s6 = sshll.u32 %s2511_s30, 4  ;;  %s200_s6 = int_to_ptr.vmem [resolvable:$true] %s199_s6 }
  0x10   : > { %p2343_p10 = scmp.ne.s32.totalorder %s176_s26, %s2342_s7  ;;  %p2350_p13 = scmp.lt.s32.totalorder %s176_s26, %s176_s26 }
  0x11   : > { %p2333_p9 = pneg %p2591_p8  ;;  %p2351_p0 = scmp.lt.s32.totalorder %s2342_s7, %s2342_s7 }
  0x13   : > { %p2345_p11 = pnand %p2343_p10, %p2333_p9  ;;  %p2352_p2 = por %p2351_p0, %p2350_p13 }
  0x15   : > { %p2346_p12 = pneg %p2345_p11 }
  0x17   : > { %p2353_p3 = pnand %p2352_p2, %p2346_p12 }
  0x19   : > { %2356 = shalt.err (!%p2353_p3)
}
  0x1a   : > { %2044 = dma.hbm_to_vmem [thread:$0]  (!%p2591_p8), %s2881_s2, 64, %s176_s26, [#allocation7]  }
  0x1b   : > { %s2368_s10 = scalar_lea.vmem %s186_s28, 4096  ;;  %p2376_p10 = scmp.lt.s32.totalorder %s186_s28, %s186_s28 }
  0x1c   : > { %p2369_p7 = scmp.ne.s32.totalorder %s186_s28, %s2368_s10  ;;  %p2377_p11 = scmp.lt.s32.totalorder %s2368_s10, %s2368_s10 }
  0x1e   : > { %p2371_p4 = pnand %p2369_p7, %p2333_p9  ;;  %p2378_p5 = por %p2377_p11, %p2376_p10 }
  0x20   : > { %p2372_p1 = pneg %p2371_p4 }
  0x22   : > { %p2379_p6 = pnand %p2378_p5, %p2372_p1 }
  0x24   : > { %2382 = shalt.err (!%p2379_p6)
}
  0x25   : > { %s2512_s11 = smov 64   ;;  %s2513_s12 = smov 4  }
  0x26   : > { %2047 = dma.hbm_to_vmem [thread:$0]  (!%p2591_p8), %s2882_s3, 4096, %s186_s28, [#allocation7], %s2512_s11, %s2512_s11, %s2513_s12  }
  0x27   : > { %s2394_s15 = scalar_lea.vmem %s200_s6, 16  ;;  %s2401_s16 = scalar_lea.vmem %s200_s6, 32 }
  0x28   : > { %p2395_p12 = scmp.ne.s32.totalorder %s200_s6, %s2394_s15  ;;  %p2402_p0 = scmp.lt.s32.totalorder %s200_s6, %s200_s6 }
  0x29   : > { %p2403_p1 = scmp.lt.s32.totalorder %s2401_s16, %s2394_s15 }
  0x2a   : > { %p2397_p4 = pnand %p2395_p12, %p2333_p9 }
  0x2b   : > { %p2404_p5 = por %p2403_p1, %p2402_p0 }
  0x2c   : > { %p2398_p13 = pneg %p2397_p4 }
  0x2e   : > { %p2405_p6 = pnand %p2404_p5, %p2398_p13 }
  0x30   : > { %2408 = shalt.err (!%p2405_p6)
}
  0x31   : > { %2050 = dma.hbm_to_vmem [thread:$0]  (!%p2591_p8), %s2883_s4, 16, %s200_s6, [#allocation10]  }
  0x32   : > { %s2622_s25 = sadd.s32 1, %s2507_s21   ;;  %s54_s27 = sadd.s32 1, %s2503_s20 }
  0x33   : > { %s51_s26 = ssub.s32 %s2507_s21, %s2622_s25  ;;  %p61_p2 = scmp.ne.s32.totalorder %s2503_s20, %s2499_s19 }
  0x34   : > { %p52_p9 = scmp.eq.s32.totalorder %s51_s26, 0  ;;  %p62_p3 = scmp.eq.s32.totalorder %s2507_s21, 0 }
  0x35   : > { %p2058_p7 = scmp.lt.s32.totalorder %s2507_s21, 8  ;;  %s218_s29 = sand.u32 1, %s2503_s20  }
  0x36   : > { %s2632_s28 = scalar_select %p52_p9, %s2503_s20, %s54_s27  }
  0x37   : > { %p63_p10 = por %p62_p3, %p61_p2  ;;  %s1799_s30 = sshll.u32 %s218_s29, 10 }
  0x38   : > { %s1978_s7 = sshll.u32 %s2507_s21, 14  ;;  %s222_s6 = scalar_lea.vmem [#allocation3], %s1799_s30 }
  0x39   : > { %s2639_s10 = scalar_lea.hbm %s2880_s1, %s1978_s7  ;;  %s230_s11 = sshll.u32 %s222_s6, 4  ;;  %s2641_s11 = int_to_ptr.vmem [resolvable:$true] %s230_s11 }
  0x3a   : > { %p2643_p8 = pnand %p2058_p7, %p63_p10  ;;  %s2647_s13 = scalar_lea.sflag [#allocation4], %s218_s29 }
  0x3b   : > { %s2409_s21 = scalar_lea.hbm %s2639_s10, 16384  ;;  %s2414_s16 = scalar_lea.hbm %s2880_s1, 131072 }
  0x3c   : > { %p2410_p11 = scmp.ne.s32.totalorder %s2639_s10, %s2409_s21  ;;  %p2411_p12 = pneg %p2643_p8 }
  0x3d   : > { %p2415_p0 = scmp.lt.s32.totalorder %s2639_s10, %s2880_s1  ;;  %p2416_p1 = scmp.lt.s32.totalorder %s2414_s16, %s2409_s21 }
  0x3e   : > { %p2412_p4 = pnand %p2411_p12, %p2410_p11 }
  0x3f   : > { %p2417_p5 = por %p2416_p1, %p2415_p0 }
  0x40   : > { %p2413_p13 = pneg %p2412_p4 }
  0x42   : > { %p2418_p6 = pnand %p2417_p5, %p2413_p13 }
  0x44   : > { %2421 = shalt.err (!%p2418_p6)
}
  0x45   : > { %s2422_s26 = scalar_lea.vmem %s2641_s11, 16384  ;;  %s2514_s27 = smov [#allocation3]  }
  0x46   : > { %p2423_p9 = scmp.ne.s32.totalorder %s2641_s11, %s2422_s26  ;;  %s2427_s29 = sshll.u32 %s2514_s27, 4  ;;  %s2428_s29 = int_to_ptr.vmem [resolvable:$false] %s2427_s29 }
  0x47   : > { %s2429_s30 = scalar_lea.vmem %s2428_s29, 32768  ;;  %p2430_p7 = scmp.lt.s32.totalorder %s2641_s11, %s2428_s29 }
  0x48   : > { %p2425_p2 = pnand %p2423_p9, %p2411_p12  ;;  %p2431_p10 = scmp.lt.s32.totalorder %s2429_s30, %s2422_s26 }
  0x4a   : > { %p2426_p3 = pneg %p2425_p2  ;;  %p2432_p11 = por %p2431_p10, %p2430_p7 }
  0x4c   : > { %p2433_p4 = pnand %p2432_p11, %p2426_p3 }
  0x4e   : > { %2436 = shalt.err (!%p2433_p4)
}
  0x4f   : > { %s2515_s7 = smov 256   ;;  %s2516_s8 = smov 16  }
  0x50   : > { %2054 = dma.hbm_to_vmem [thread:$0]  (!%p2643_p8), %s2639_s10, 16384, %s2641_s11, %s2647_s13, %s2515_s7, %s2515_s7, %s2516_s8  }
  0x51   : > { %p2892_p12 = scmp.ne.s32.totalorder %s2889_s24, 0 }
  0x52   : > { %s244_s9 = sand.u32 (!%p2892_p12), 1, %s2499_s19   ;;  %p2893_p13 = scmp.ne.s32.totalorder (!%p2892_p12), %s2888_s23, 0 }
  0x53   : > { %242 = sbr.rel (%p2892_p12) target bundleno = 691 (0x2b3), region = 40  ;;  %s1804_s6 = sshll.u32 (!%p2892_p12), %s244_s9, 10 }
  0x54   : > { %s245_s21 = scalar_lea.sflag (!%p2892_p12), [#allocation4], %s244_s9  ;;  %s2671_s14 = scalar_lea.vmem (!%p2892_p12), [#allocation3], %s1804_s6 }
  0x58   : > { %2478 = dma.done.wait (%p2893_p13), %s245_s21, 16384  }
  0x59   : > { %2480 = vsyncadd (%p2893_p13), %s245_s21, 4294950912  ;;  %p2894_p0 = scmp.eq.s32.totalorder %s2570_s22, 0 }
  0x5b   : > { %2482 = dma.done.wait (%p2894_p0), [#allocation7], 4160   ;;  %p2895_p8 = pmov %p2894_p0 }
  0x5c   : > { %p2896_p1 = pmov %p2894_p0 }
  0x5d   : > { %2484 = vsyncadd (%p2895_p8), [#allocation7], 4294963136 }
  0x5e   : > { %2486 = dma.done.wait (%p2896_p1), [#allocation10], 16   ;;  %p2897_p5 = pmov %p2894_p0 }
  0x5f   : > { %s1808_s24 = sshll.u32 %s2570_s22, 2  ;;  %p2898_p9 = scmp.ne.s32.totalorder %s2570_s22, 0 }
  0x60   : > { %2488 = vsyncadd (%p2897_p5), [#allocation10], 4294967280  ;;  %p287_p6 = scmp.lt.s32.totalorder %s1808_s24, 31 }
  0x61   : > { %296 = sbr.rel (%p2898_p9) target bundleno = 104 (0x68), region = 60 }
  0x62   : > { %s2904_s24 = smov (!%p287_p6, %s1808_s24), 31 }
  0x63   : > { %s289_s11 = scalar_lea.vmem %s2879_s0, %s2904_s24 }
  0x66   : > { %v2517_v0 = vmov 0.0  }
  0x67   : > { %297 = vst [vmem:[#allocation2] sm:$0xff] %v2517_v0 }
  0x68 PF: > { %v2107_v1 = vld [vmem:[%s2671_s14 + $0xe4] ss:$16 sps:$4 sm:$0xff]   ;;  %v2111_v3 = vld [vmem:[%s2671_s14 + $0xe0] ss:$16 sps:$4 sm:$0xff]   ;;  %v2518_v39 = vmov 1966171168   ;;  %v440_v41 = vlaneseq }
  0x69   : > { %v2109_v2 = vld [vmem:[%s2671_s14 + $0x2e4] ss:$16 sps:$4 sm:$0xff]   ;;  %1097 = vmatprep.subr.bf16.mxu0 %v2107_v1  ;;  %v2112_v4 = vld [vmem:[%s2671_s14 + $0x2e0] ss:$16 sps:$4 sm:$0xff]   ;;  %v438_v40 = vunpack.c.l.s4 %v2518_v39  ;;  %v2239_v39 = vld [vmem:[%s2671_s14 + $0x28] ss:$16 sps:$4 sm:$0xff]  }
  0x6a   : > { %1138 = vmatprep.subr.bf16.mxu1 %v2109_v2  ;;  %v2113_v5 = vld [vmem:[%s2671_s14 + $0xc4] ss:$16 sps:$4 sm:$0xff]   ;;  %1098 = vmatpush1.bf16.msra.mxu0 %v2111_v3  ;;  %v2117_v7 = vld [vmem:[%s2671_s14 + $0xc0] ss:$16 sps:$4 sm:$0xff]   ;;  %v2736_v47 = vshrl.u32 %v440_v41, 7  ;;  %p1939_p2 = scmp.ne.s32.totalorder %s2570_s22, 7 }
  0x6b   : > { %1139 = vmatpush1.bf16.msra.mxu1 %v2112_v4  ;;  %v2115_v6 = vld [vmem:[%s2671_s14 + $0x2c4] ss:$16 sps:$4 sm:$0xff]   ;;  %1099 = vmatprep.subr.bf16.mxu0 %v2113_v5  ;;  %v2118_v8 = vld [vmem:[%s2671_s14 + $0x2c0] ss:$16 sps:$4 sm:$0xff]   ;;  %v439_v46 = vunpack.c.0.s8 %v438_v40  ;;  %v2242_v40 = vld [vmem:[%s2671_s14 + $0x228] ss:$16 sps:$4 sm:$0xff]  }
  0x6c   : > { %1140 = vmatprep.subr.bf16.mxu1 %v2115_v6  ;;  %v2119_v9 = vld [vmem:[%s2671_s14 + $0xa4] ss:$16 sps:$4 sm:$0xff]   ;;  %v2123_v11 = vld [vmem:[%s2671_s14 + $0xa0] ss:$16 sps:$4 sm:$0xff]   ;;  %v2247_v41 = vld [vmem:[%s2671_s14 + $0xc] ss:$16 sps:$4 sm:$0xff]  }
  0x6d   : > { %v2121_v10 = vld [vmem:[%s2671_s14 + $0x2a4] ss:$16 sps:$4 sm:$0xff]   ;;  %v2124_v12 = vld [vmem:[%s2671_s14 + $0x2a0] ss:$16 sps:$4 sm:$0xff]   ;;  %v442_v52 = vsub.s32 %v439_v46, %v2736_v47  ;;  %v2256_v46 = vld [vmem:[%s2671_s14 + $0x3ec] ss:$16 sps:$4 sm:$0xff]  }
  0x6e   : > { %1100 = vmatpush1.bf16.msra.mxu0 %v2117_v7  ;;  %v2125_v13 = vld [vmem:[%s2671_s14 + $0x84] ss:$16 sps:$4 sm:$0xff]   ;;  %v2129_v15 = vld [vmem:[%s2671_s14 + $0x80] ss:$16 sps:$4 sm:$0xff]  }
  0x6f   : > { %1141 = vmatpush1.bf16.msra.mxu1 %v2118_v8  ;;  %1101 = vmatprep.subr.bf16.mxu0 %v2119_v9  ;;  %v2127_v14 = vld [vmem:[%s2671_s14 + $0x284] ss:$16 sps:$4 sm:$0xff]   ;;  %v2130_v16 = vld [vmem:[%s2671_s14 + $0x280] ss:$16 sps:$4 sm:$0xff]  }
  0x70   : > { %1142 = vmatprep.subr.bf16.mxu1 %v2121_v10  ;;  %v2131_v17 = vld [vmem:[%s2671_s14 + $0x64] ss:$16 sps:$4 sm:$0xff]   ;;  %v2135_v19 = vld [vmem:[%s2671_s14 + $0x60] ss:$16 sps:$4 sm:$0xff]  }
  0x71   : > { %v2133_v18 = vld [vmem:[%s2671_s14 + $0x264] ss:$16 sps:$4 sm:$0xff]   ;;  %v2136_v20 = vld [vmem:[%s2671_s14 + $0x260] ss:$16 sps:$4 sm:$0xff]  }
  0x72   : > { %1102 = vmatpush1.bf16.msra.mxu0 %v2123_v11  ;;  %v2137_v21 = vld [vmem:[%s2671_s14 + $0x44] ss:$16 sps:$4 sm:$0xff]   ;;  %v2141_v23 = vld [vmem:[%s2671_s14 + $0x40] ss:$16 sps:$4 sm:$0xff]  }
  0x73   : > { %1143 = vmatpush1.bf16.msra.mxu1 %v2124_v12  ;;  %1103 = vmatprep.subr.bf16.mxu0 %v2125_v13  ;;  %v2139_v22 = vld [vmem:[%s2671_s14 + $0x244] ss:$16 sps:$4 sm:$0xff]   ;;  %v2142_v24 = vld [vmem:[%s2671_s14 + $0x240] ss:$16 sps:$4 sm:$0xff]   ;;  %v2205_v12 = vld [vmem:[%s2671_s14 + $0xec] ss:$16 sps:$4 sm:$0xff]  }
  0x74   : > { %1144 = vmatprep.subr.bf16.mxu1 %v2127_v14  ;;  %v2143_v25 = vld [vmem:[%s2671_s14 + $0x24] ss:$16 sps:$4 sm:$0xff]   ;;  %v2147_v27 = vld [vmem:[%s2671_s14 + $0x20] ss:$16 sps:$4 sm:$0xff]   ;;  %v2208_v13 = vld [vmem:[%s2671_s14 + $0x2ec] ss:$16 sps:$4 sm:$0xff]  }
  0x75   : > { %v2145_v26 = vld [vmem:[%s2671_s14 + $0x224] ss:$16 sps:$4 sm:$0xff]   ;;  %v2148_v28 = vld [vmem:[%s2671_s14 + $0x220] ss:$16 sps:$4 sm:$0xff]  }
  0x76   : > { %1104 = vmatpush1.bf16.msra.mxu0 %v2129_v15  ;;  %v2149_v29 = vld [vmem:[%s2671_s14 + $0x4] ss:$16 sps:$4 sm:$0xff]   ;;  %v2153_v31 = vld [vmem:[%s2671_s14] ss:$16 sps:$4 sm:$0xff]   ;;  %v2203_v15 = vld [vmem:[%s2671_s14 + $0xe8] ss:$16 sps:$4 sm:$0xff]  }
  0x77   : > { %1145 = vmatpush1.bf16.msra.mxu1 %v2130_v16  ;;  %1105 = vmatprep.subr.bf16.mxu0 %v2131_v17  ;;  %v2151_v30 = vld [vmem:[%s2671_s14 + $0x204] ss:$16 sps:$4 sm:$0xff]   ;;  %v2154_v32 = vld [vmem:[%s2671_s14 + $0x200] ss:$16 sps:$4 sm:$0xff]   ;;  %v2206_v16 = vld [vmem:[%s2671_s14 + $0x2e8] ss:$16 sps:$4 sm:$0xff]  }
  0x78   : > { %1146 = vmatprep.subr.bf16.mxu1 %v2133_v18  ;;  %v2155_v33 = vld [vmem:[%s2671_s14 + $0x1e4] ss:$16 sps:$4 sm:$0xff]   ;;  %v2159_v35 = vld [vmem:[%s2671_s14 + $0x1e0] ss:$16 sps:$4 sm:$0xff]   ;;  %v2211_v17 = vld [vmem:[%s2671_s14 + $0xcc] ss:$16 sps:$4 sm:$0xff]  }
  0x79   : > { %v2157_v34 = vld [vmem:[%s2671_s14 + $0x3e4] ss:$16 sps:$4 sm:$0xff]   ;;  %v2160_v36 = vld [vmem:[%s2671_s14 + $0x3e0] ss:$16 sps:$4 sm:$0xff]   ;;  %v2214_v18 = vld [vmem:[%s2671_s14 + $0x2cc] ss:$16 sps:$4 sm:$0xff]  }
  0x7a   : > { %1106 = vmatpush1.bf16.msra.mxu0 %v2135_v19  ;;  %v2161_v37 = vld [vmem:[%s2671_s14 + $0x1c4] ss:$16 sps:$4 sm:$0xff]   ;;  %v2165_v42 = vld [vmem:[%s2671_s14 + $0x1c0] ss:$16 sps:$4 sm:$0xff]   ;;  %v2209_v19 = vld [vmem:[%s2671_s14 + $0xc8] ss:$16 sps:$4 sm:$0xff]  }
  0x7b   : > { %1147 = vmatpush1.bf16.msra.mxu1 %v2136_v20  ;;  %1107 = vmatprep.subr.bf16.mxu0 %v2137_v21  ;;  %v2163_v38 = vld [vmem:[%s2671_s14 + $0x3c4] ss:$16 sps:$4 sm:$0xff]   ;;  %v2166_v43 = vld [vmem:[%s2671_s14 + $0x3c0] ss:$16 sps:$4 sm:$0xff]   ;;  %v2212_v20 = vld [vmem:[%s2671_s14 + $0x2c8] ss:$16 sps:$4 sm:$0xff]  }
  0x7c   : > { %1148 = vmatprep.subr.bf16.mxu1 %v2139_v22  ;;  %v2167_v44 = vld [vmem:[%s2671_s14 + $0x1a4] ss:$16 sps:$4 sm:$0xff]   ;;  %v2171_v48 = vld [vmem:[%s2671_s14 + $0x1a0] ss:$16 sps:$4 sm:$0xff]   ;;  %v2217_v21 = vld [vmem:[%s2671_s14 + $0xac] ss:$16 sps:$4 sm:$0xff]  }
  0x7d   : > { %v2169_v45 = vld [vmem:[%s2671_s14 + $0x3a4] ss:$16 sps:$4 sm:$0xff]   ;;  %v2172_v49 = vld [vmem:[%s2671_s14 + $0x3a0] ss:$16 sps:$4 sm:$0xff]   ;;  %v2220_v22 = vld [vmem:[%s2671_s14 + $0x2ac] ss:$16 sps:$4 sm:$0xff]  }
  0x7e   : > { %1108 = vmatpush1.bf16.msra.mxu0 %v2141_v23  ;;  %v2173_v50 = vld [vmem:[%s2671_s14 + $0x184] ss:$16 sps:$4 sm:$0xff]   ;;  %v1810_v53 = vld.sshfl [vmem:[%s289_s11] sm:$0x33 pattern:$0x75316420] }
  0x7f   : > { %1149 = vmatpush1.bf16.msra.mxu1 %v2142_v24  ;;  %1109 = vmatprep.subr.bf16.mxu0 %v2143_v25  ;;  %v2175_v51 = vld [vmem:[%s2671_s14 + $0x384] ss:$16 sps:$4 sm:$0xff]   ;;  %v2177_v54 = vld [vmem:[%s2671_s14 + $0x180] ss:$16 sps:$4 sm:$0xff]   ;;  %v436_v56 = vcombine.high %v1810_v53, %v1810_v53  ;;  %v2765_v10 = vrot.slane %v1810_v53, %v442_v52  ;;  %v2215_v23 = vld [vmem:[%s2671_s14 + $0xa8] ss:$16 sps:$4 sm:$0xff]  }
  0x80   : > { %1150 = vmatprep.subr.bf16.mxu1 %v2145_v26  ;;  %v2178_v55 = vld [vmem:[%s2671_s14 + $0x380] ss:$16 sps:$4 sm:$0xff]   ;;  %v2179_v57 = vld [vmem:[%s2671_s14 + $0x164] ss:$16 sps:$4 sm:$0xff]   ;;  %v2218_v24 = vld [vmem:[%s2671_s14 + $0x2a8] ss:$16 sps:$4 sm:$0xff]  }
  0x81   : > { %v2181_v58 = vld [vmem:[%s2671_s14 + $0x364] ss:$16 sps:$4 sm:$0xff]   ;;  %v450_v59 = vrot.slane %v436_v56, %v442_v52  ;;  %v2183_v60 = vld [vmem:[%s2671_s14 + $0x160] ss:$16 sps:$4 sm:$0xff]   ;;  %v2772_v14 = vcombine.high %v2765_v10, %v2765_v10  ;;  %v2223_v25 = vld [vmem:[%s2671_s14 + $0x8c] ss:$16 sps:$4 sm:$0xff]  }
  0x82   : > { %1110 = vmatpush1.bf16.msra.mxu0 %v2147_v27  ;;  %v2184_v61 = vld [vmem:[%s2671_s14 + $0x360] ss:$16 sps:$4 sm:$0xff]   ;;  %v2185_v63 = vld [vmem:[%s2671_s14 + $0x144] ss:$16 sps:$4 sm:$0xff]   ;;  %v2226_v26 = vld [vmem:[%s2671_s14 + $0x28c] ss:$16 sps:$4 sm:$0xff]  }
  0x83   : > { %1151 = vmatpush1.bf16.msra.mxu1 %v2148_v28  ;;  %1111 = vmatprep.subr.bf16.mxu0 %v2149_v29  ;;  %v452_v62 = vcombine.high %v450_v59, %v450_v59  ;;  %v2187_v0 = vld [vmem:[%s2671_s14 + $0x344] ss:$16 sps:$4 sm:$0xff]   ;;  %v2189_v1 = vld [vmem:[%s2671_s14 + $0x140] ss:$16 sps:$4 sm:$0xff]   ;;  %v2221_v27 = vld [vmem:[%s2671_s14 + $0x88] ss:$16 sps:$4 sm:$0xff]  }
  0x84   : > { %1152 = vmatprep.subr.bf16.mxu1 %v2151_v30  ;;  %1129 = vmatprep.mubr.bf16.mxu0 %v450_v59  ;;  %v2190_v2 = vld [vmem:[%s2671_s14 + $0x340] ss:$16 sps:$4 sm:$0xff]   ;;  %v2191_v3 = vld [vmem:[%s2671_s14 + $0x124] ss:$16 sps:$4 sm:$0xff]   ;;  %v2224_v28 = vld [vmem:[%s2671_s14 + $0x288] ss:$16 sps:$4 sm:$0xff]  }
  0x85   : > { %1170 = vmatprep.mubr.bf16.mxu1 %v452_v62  ;;  %v2193_v4 = vld [vmem:[%s2671_s14 + $0x324] ss:$16 sps:$4 sm:$0xff]   ;;  %v2195_v5 = vld [vmem:[%s2671_s14 + $0x120] ss:$16 sps:$4 sm:$0xff]   ;;  %v2229_v29 = vld [vmem:[%s2671_s14 + $0x6c] ss:$16 sps:$4 sm:$0xff]  }
  0x86   : > { %1112 = vmatpush1.bf16.msra.mxu0 %v2153_v31  ;;  %v2196_v6 = vld [vmem:[%s2671_s14 + $0x320] ss:$16 sps:$4 sm:$0xff]   ;;  %v2197_v7 = vld [vmem:[%s2671_s14 + $0x104] ss:$16 sps:$4 sm:$0xff]   ;;  %v2232_v30 = vld [vmem:[%s2671_s14 + $0x26c] ss:$16 sps:$4 sm:$0xff]  }
  0x87   : > { %1153 = vmatpush1.bf16.msra.mxu1 %v2154_v32  ;;  %1113 = vmatprep.subr.bf16.mxu0 %v2155_v33  ;;  %v2199_v8 = vld [vmem:[%s2671_s14 + $0x304] ss:$16 sps:$4 sm:$0xff]   ;;  %v2201_v9 = vld [vmem:[%s2671_s14 + $0x100] ss:$16 sps:$4 sm:$0xff]   ;;  %v2227_v31 = vld [vmem:[%s2671_s14 + $0x68] ss:$16 sps:$4 sm:$0xff]  }
  0x88   : > { %1154 = vmatprep.subr.bf16.mxu1 %v2157_v34  ;;  %v2202_v11 = vld [vmem:[%s2671_s14 + $0x300] ss:$16 sps:$4 sm:$0xff]   ;;  %v2230_v32 = vld [vmem:[%s2671_s14 + $0x268] ss:$16 sps:$4 sm:$0xff]   ;;  %v2235_v33 = vld [vmem:[%s2671_s14 + $0x4c] ss:$16 sps:$4 sm:$0xff]  }
  0x89   : > { %v2238_v34 = vld [vmem:[%s2671_s14 + $0x24c] ss:$16 sps:$4 sm:$0xff]   ;;  %v2257_v52 = vld [vmem:[%s2671_s14 + $0x1c8] ss:$16 sps:$4 sm:$0xff]  }
  0x8a   : > { %1114 = vmatpush2.bf16.msra.mxu0 %v2159_v35  ;;  %v2233_v35 = vld [vmem:[%s2671_s14 + $0x48] ss:$16 sps:$4 sm:$0xff]  }
  0x8b   : > { %1155 = vmatpush2.bf16.msra.mxu1 %v2160_v36  ;;  %1115 = vmatprep.subr.bf16.mxu0 %v2161_v37  ;;  %v2236_v36 = vld [vmem:[%s2671_s14 + $0x248] ss:$16 sps:$4 sm:$0xff]   ;;  %v2241_v37 = vld [vmem:[%s2671_s14 + $0x2c] ss:$16 sps:$4 sm:$0xff]  }
  0x8c   : > { %1156 = vmatprep.subr.bf16.mxu1 %v2163_v38  ;;  %v2244_v38 = vld [vmem:[%s2671_s14 + $0x22c] ss:$16 sps:$4 sm:$0xff]   ;;  %v2260_v53 = vld [vmem:[%s2671_s14 + $0x3c8] ss:$16 sps:$4 sm:$0xff]  }
  0x8d   : > { %v2263_v56 = vld [vmem:[%s2671_s14 + $0x1a8] ss:$16 sps:$4 sm:$0xff]  }
  0x8e   : > { %1116 = vmatpush2.bf16.msra.mxu0 %v2165_v42  ;;  %v2250_v42 = vld [vmem:[%s2671_s14 + $0x20c] ss:$16 sps:$4 sm:$0xff]  }
  0x8f   : > { %1157 = vmatpush2.bf16.msra.mxu1 %v2166_v43  ;;  %1117 = vmatprep.subr.bf16.mxu0 %v2167_v44  ;;  %v2245_v43 = vld [vmem:[%s2671_s14 + $0x8] ss:$16 sps:$4 sm:$0xff]  }
  0x90   : > { %1158 = vmatprep.subr.bf16.mxu1 %v2169_v45  ;;  %v2248_v44 = vld [vmem:[%s2671_s14 + $0x208] ss:$16 sps:$4 sm:$0xff]   ;;  %v2253_v45 = vld [vmem:[%s2671_s14 + $0x1ec] ss:$16 sps:$4 sm:$0xff]  }
  0x92   : > { %1118 = vmatpush2.bf16.msra.mxu0 %v2171_v48  ;;  %v2251_v48 = vld [vmem:[%s2671_s14 + $0x1e8] ss:$16 sps:$4 sm:$0xff]  }
  0x93   : > { %1159 = vmatpush2.bf16.msra.mxu1 %v2172_v49  ;;  %1119 = vmatprep.subr.bf16.mxu0 %v2173_v50  ;;  %v2254_v49 = vld [vmem:[%s2671_s14 + $0x3e8] ss:$16 sps:$4 sm:$0xff]   ;;  %v2259_v50 = vld [vmem:[%s2671_s14 + $0x1cc] ss:$16 sps:$4 sm:$0xff]  }
  0x94   : > { %1160 = vmatprep.subr.bf16.mxu1 %v2175_v51  ;;  %v2262_v51 = vld [vmem:[%s2671_s14 + $0x3cc] ss:$16 sps:$4 sm:$0xff]  }
  0x96   : > { %1120 = vmatpush2.bf16.msra.mxu0 %v2177_v54  ;;  %v2265_v54 = vld [vmem:[%s2671_s14 + $0x1ac] ss:$16 sps:$4 sm:$0xff]  }
  0x97   : > { %1161 = vmatpush2.bf16.msra.mxu1 %v2178_v55  ;;  %1121 = vmatprep.subr.bf16.mxu0 %v2179_v57  ;;  %v2268_v55 = vld [vmem:[%s2671_s14 + $0x3ac] ss:$16 sps:$4 sm:$0xff]   ;;  %v2266_v57 = vld [vmem:[%s2671_s14 + $0x3a8] ss:$16 sps:$4 sm:$0xff]  }
  0x98   : > { %1162 = vmatprep.subr.bf16.mxu1 %v2181_v58  ;;  %v2271_v58 = vld [vmem:[%s2671_s14 + $0x18c] ss:$16 sps:$4 sm:$0xff]  }
  0x9a   : > { %1122 = vmatpush2.bf16.msra.mxu0 %v2183_v60  ;;  %v2269_v60 = vld [vmem:[%s2671_s14 + $0x188] ss:$16 sps:$4 sm:$0xff]  }
  0x9b   : > { %1163 = vmatpush2.bf16.msra.mxu1 %v2184_v61  ;;  %1123 = vmatprep.subr.bf16.mxu0 %v2185_v63  ;;  %v2272_v61 = vld [vmem:[%s2671_s14 + $0x388] ss:$16 sps:$4 sm:$0xff]   ;;  %v2280_v63 = vld [vmem:[%s2671_s14 + $0x36c] ss:$16 sps:$4 sm:$0xff]  }
  0x9c   : > { %1164 = vmatprep.subr.bf16.mxu1 %v2187_v0  ;;  %v2275_v0 = vld [vmem:[%s2671_s14 + $0x168] ss:$16 sps:$4 sm:$0xff]  }
  0x9e   : > { %1124 = vmatpush2.bf16.msra.mxu0 %v2189_v1  ;;  %v2278_v1 = vld [vmem:[%s2671_s14 + $0x368] ss:$16 sps:$4 sm:$0xff]  }
  0x9f   : > { %1165 = vmatpush2.bf16.msra.mxu1 %v2190_v2  ;;  %1125 = vmatprep.subr.bf16.mxu0 %v2191_v3  ;;  %v2283_v2 = vld [vmem:[%s2671_s14 + $0x14c] ss:$16 sps:$4 sm:$0xff]  }
  0xa0   : > { %1166 = vmatprep.subr.bf16.mxu1 %v2193_v4  ;;  %v2286_v3 = vld [vmem:[%s2671_s14 + $0x34c] ss:$16 sps:$4 sm:$0xff]   ;;  %v2281_v4 = vld [vmem:[%s2671_s14 + $0x148] ss:$16 sps:$4 sm:$0xff]  }
  0xa2   : > { %1126 = vmatpush2.bf16.msra.mxu0 %v2195_v5  ;;  %v2284_v5 = vld [vmem:[%s2671_s14 + $0x348] ss:$16 sps:$4 sm:$0xff]  }
  0xa3   : > { %1167 = vmatpush2.bf16.msra.mxu1 %v2196_v6  ;;  %1127 = vmatprep.subr.bf16.mxu0 %v2197_v7  ;;  %v2289_v6 = vld [vmem:[%s2671_s14 + $0x12c] ss:$16 sps:$4 sm:$0xff]  }
  0xa4   : > { %1168 = vmatprep.subr.bf16.mxu1 %v2199_v8  ;;  %v2292_v7 = vld [vmem:[%s2671_s14 + $0x32c] ss:$16 sps:$4 sm:$0xff]   ;;  %v2287_v8 = vld [vmem:[%s2671_s14 + $0x128] ss:$16 sps:$4 sm:$0xff]  }
  0xa6   : > { %1128 = vmatpush2.bf16.msra.mxu0 %v2201_v9  ;;  %v2290_v9 = vld [vmem:[%s2671_s14 + $0x328] ss:$16 sps:$4 sm:$0xff]  }
  0xa7   : > { %1169 = vmatpush2.bf16.msra.mxu1 %v2202_v11  ;;  %1179 = vmatprep.subr.bf16.mxu0 %v2205_v12  ;;  %v2295_v11 = vld [vmem:[%s2671_s14 + $0x10c] ss:$16 sps:$4 sm:$0xff]  }
  0xa8   : > { %1220 = vmatprep.subr.bf16.mxu1 %v2208_v13  ;;  %v2298_v12 = vld [vmem:[%s2671_s14 + $0x30c] ss:$16 sps:$4 sm:$0xff]   ;;  %v2293_v13 = vld [vmem:[%s2671_s14 + $0x108] ss:$16 sps:$4 sm:$0xff]  }
  0xa9   : > { %1130 = vmatmul.mubr.bf16.vlgmr.msra.gmra.mxu0 %v2765_v10 }
  0xaa   : > { %1171 = vmatmul.mubr.bf16.vlgmr.msra.gmra.mxu1 %v2772_v14  ;;  %1180 = vmatpush1.bf16.msra.mxu0 %v2203_v15  ;;  %v2296_v15 = vld [vmem:[%s2671_s14 + $0x308] ss:$16 sps:$4 sm:$0xff]  }
  0xab   : > { %1221 = vmatpush1.bf16.msra.mxu1 %v2206_v16  ;;  %1181 = vmatprep.subr.bf16.mxu0 %v2211_v17 }
  0xac   : > { %1222 = vmatprep.subr.bf16.mxu1 %v2214_v18  ;;  %1211 = vmatprep.mubr.bf16.mxu0 %v450_v59  ;;  %v2274_v59 = vld [vmem:[%s2671_s14 + $0x38c] ss:$16 sps:$4 sm:$0xff]  }
  0xad   : > { %1252 = vmatprep.mubr.bf16.mxu1 %v452_v62  ;;  %v2277_v62 = vld [vmem:[%s2671_s14 + $0x16c] ss:$16 sps:$4 sm:$0xff]  }
  0xae   : > { %1182 = vmatpush1.bf16.msra.mxu0 %v2209_v19 }
  0xaf   : > { %1223 = vmatpush1.bf16.msra.mxu1 %v2212_v20  ;;  %1183 = vmatprep.subr.bf16.mxu0 %v2217_v21 }
  0xb0   : > { %1224 = vmatprep.subr.bf16.mxu1 %v2220_v22 }
  0xb2   : > { %1184 = vmatpush1.bf16.msra.mxu0 %v2215_v23 }
  0xb3   : > { %1225 = vmatpush1.bf16.msra.mxu1 %v2218_v24  ;;  %1185 = vmatprep.subr.bf16.mxu0 %v2223_v25 }
  0xb4   : > { %1226 = vmatprep.subr.bf16.mxu1 %v2226_v26 }
  0xb6   : > { %1186 = vmatpush1.bf16.msra.mxu0 %v2221_v27  ;;  %v2519_v27 = vmov 1983009808  }
  0xb7   : > { %1227 = vmatpush1.bf16.msra.mxu1 %v2224_v28  ;;  %1187 = vmatprep.subr.bf16.mxu0 %v2229_v29  ;;  %v1268_v28 = vunpack.c.l.s4 %v2519_v27 }
  0xb8   : > { %1228 = vmatprep.subr.bf16.mxu1 %v2232_v30 }
  0xb9   : > { %v1269_v29 = vunpack.c.0.s8 %v1268_v28 }
  0xba   : > { %1188 = vmatpush1.bf16.msra.mxu0 %v2227_v31 }
  0xbb   : > { %1229 = vmatpush1.bf16.msra.mxu1 %v2230_v32  ;;  %1189 = vmatprep.subr.bf16.mxu0 %v2235_v33 }
  0xbc   : > { %1230 = vmatprep.subr.bf16.mxu1 %v2238_v34 }
  0xbe   : > { %1190 = vmatpush1.bf16.msra.mxu0 %v2233_v35 }
  0xbf   : > { %1231 = vmatpush1.bf16.msra.mxu1 %v2236_v36  ;;  %1191 = vmatprep.subr.bf16.mxu0 %v2241_v37 }
  0xc0   : > { %1232 = vmatprep.subr.bf16.mxu1 %v2244_v38 }
  0xc2   : > { %1192 = vmatpush1.bf16.msra.mxu0 %v2239_v39 }
  0xc3   : > { %1233 = vmatpush1.bf16.msra.mxu1 %v2242_v40  ;;  %1193 = vmatprep.subr.bf16.mxu0 %v2247_v41 }
  0xc4   : > { %1234 = vmatprep.subr.bf16.mxu1 %v2250_v42  ;;  %v298_v42 = vld [vmem:[#allocation2] sm:$0xff] }
  0xc6   : > { %1194 = vmatpush1.bf16.msra.mxu0 %v2245_v43 }
  0xc7   : > { %1235 = vmatpush1.bf16.msra.mxu1 %v2248_v44  ;;  %1195 = vmatprep.subr.bf16.mxu0 %v2253_v45 }
  0xc8   : > { %1236 = vmatprep.subr.bf16.mxu1 %v2256_v46 }
  0xca   : > { %1196 = vmatpush2.bf16.msra.mxu0 %v2251_v48 }
  0xcb   : > { %1237 = vmatpush2.bf16.msra.mxu1 %v2254_v49  ;;  %1197 = vmatprep.subr.bf16.mxu0 %v2259_v50 }
  0xcc   : > { %1238 = vmatprep.subr.bf16.mxu1 %v2262_v51 }
  0xce   : > { %1198 = vmatpush2.bf16.msra.mxu0 %v2257_v52 }
  0xcf   : > { %1239 = vmatpush2.bf16.msra.mxu1 %v2260_v53  ;;  %1199 = vmatprep.subr.bf16.mxu0 %v2265_v54 }
  0xd0   : > { %1240 = vmatprep.subr.bf16.mxu1 %v2268_v55 }
  0xd2   : > { %1200 = vmatpush2.bf16.msra.mxu0 %v2263_v56 }
  0xd3   : > { %1241 = vmatpush2.bf16.msra.mxu1 %v2266_v57  ;;  %1201 = vmatprep.subr.bf16.mxu0 %v2271_v58 }
  0xd4   : > { %1242 = vmatprep.subr.bf16.mxu1 %v2274_v59 }
  0xd6   : > { %1202 = vmatpush2.bf16.msra.mxu0 %v2269_v60 }
  0xd7   : > { %1243 = vmatpush2.bf16.msra.mxu1 %v2272_v61  ;;  %1203 = vmatprep.subr.bf16.mxu0 %v2277_v62 }
  0xd8   : > { %1244 = vmatprep.subr.bf16.mxu1 %v2280_v63 }
  0xda   : > { %1204 = vmatpush2.bf16.msra.mxu0 %v2275_v0 }
  0xdb   : > { %1245 = vmatpush2.bf16.msra.mxu1 %v2278_v1  ;;  %1205 = vmatprep.subr.bf16.mxu0 %v2283_v2 }
  0xdc   : > { %1246 = vmatprep.subr.bf16.mxu1 %v2286_v3 }
  0xde   : > { %1206 = vmatpush2.bf16.msra.mxu0 %v2281_v4 }
  0xdf   : > { %1247 = vmatpush2.bf16.msra.mxu1 %v2284_v5  ;;  %1207 = vmatprep.subr.bf16.mxu0 %v2289_v6 }
  0xe0   : > { %1248 = vmatprep.subr.bf16.mxu1 %v2292_v7 }
  0xe2   : > { %1208 = vmatpush2.bf16.msra.mxu0 %v2287_v8 }
  0xe3   : > { %1249 = vmatpush2.bf16.msra.mxu1 %v2290_v9  ;;  %1209 = vmatprep.subr.bf16.mxu0 %v2295_v11 }
  0xe4   : > { %1250 = vmatprep.subr.bf16.mxu1 %v2298_v12 }
  0xe6   : > { %1210 = vmatpush2.bf16.msra.mxu0 %v2293_v13 }
  0xe7   : > { %1251 = vmatpush2.bf16.msra.mxu1 %v2296_v15 }
  0xe9   : > { %1212 = vmatmul.mubr.bf16.vlgmr.msra.gmra.mxu0 %v2765_v10 }
  0xea   : > { %1253 = vmatmul.mubr.bf16.vlgmr.msra.gmra.mxu1 %v2772_v14  ;;  %v2841_v14 = vsub.s32 %v1269_v29, %v2736_v47 }
 0x169   : > { %v1131_v16 = vpop.f32.mrf.mxu0 }
 0x16a   : > { %v1172_v17 = vpop.f32.mrf.mxu1 }
 0x16b   : > { %v1173_v18 = vadd.f32 %v1172_v17, %v1131_v16  ;;  %v1133_v19 = vpop.f32.mrf.mxu0 }
 0x16c   : > { %v1174_v20 = vpop.f32.mrf.mxu1 }
 0x16d   : > { %v1175_v21 = vadd.f32 %v1174_v20, %v1133_v19  ;;  %v1135_v22 = vpop.f32.mrf.mxu0 }
 0x16e   : > { %v1176_v23 = vpop.f32.mrf.mxu1 }
 0x16f   : > { %v1265_v24 = vcombine.low %v1173_v18, %v1175_v21  ;;  %v1136_v25 = vpop.f32.mrf.mxu0 }
 0x170   : > { %v1177_v26 = vpop.f32.mrf.mxu1 }
 0x171   : > { %v1273_v40 = vrot.slane %v1265_v24, %v2841_v14 }
 0x1a9   : > { %v1213_v30 = vpop.f32.mrf.mxu0 }
 0x1aa   : > { %v1254_v31 = vpop.f32.mrf.mxu1 }
 0x1ab   : > { %v1215_v32 = vpop.f32.mrf.mxu0  ;;  %v1255_v33 = vadd.f32 %v1254_v31, %v1213_v30 }
 0x1ac   : > { %v1256_v10 = vpop.f32.mrf.mxu1 }
 0x1ad   : > { %v1257_v34 = vadd.f32 %v1256_v10, %v1215_v32  ;;  %v1217_v35 = vpop.f32.mrf.mxu0 }
 0x1ae   : > { %v1258_v36 = vpop.f32.mrf.mxu1 }
 0x1af   : > { %v1266_v37 = vcombine.low %v1255_v33, %v1257_v34  ;;  %v1218_v38 = vpop.f32.mrf.mxu0 }
 0x1b0   : > { %v1259_v39 = vpop.f32.mrf.mxu1 }
 0x1b1   : > { %v1280_v41 = vrot.slane %v1266_v37, %v2841_v14 }
 0x1b3   : > { %v1281_v43 = vcombine.low %v1273_v40, %v1280_v41  ;;  %1288 = sbr.rel (%p1939_p2) target bundleno = 676 (0x2a4), region = 64 }
 0x1b5   : > { %v1283_v44 = vadd.f32 %v1281_v43, %v298_v42 }
 0x1b7   : > { %1284 = vst [vmem:[#allocation2] sm:$0xff] %v1283_v44 }
 0x1b8   : > { %v2299_v45 = vld [vmem:[#allocation8 + $0x78] sm:$0xff]   ;;  %v2303_v50 = vld [vmem:[#allocation8 + $0x70] sm:$0xff]   ;;  %v2307_v54 = vld [vmem:[#allocation8 + $0x68] sm:$0xff]   ;;  %v1294_v9 = vsub.s32 0, %v2736_v47  ;;  %v1298_v12 = vsub.s32 1, %v2736_v47  ;;  %v1302_v15 = vsub.s32 2, %v2736_v47 }
 0x1b9   : > { %v2300_v46 = vld [vmem:[#allocation8 + $0xf8] sm:$0xff]   ;;  %1979 = vmatprep.subr.bf16.mxu0 %v2299_v45  ;;  %v2304_v51 = vld [vmem:[#allocation8 + $0xf0] sm:$0xff]   ;;  %v2308_v55 = vld [vmem:[#allocation8 + $0xe8] sm:$0xff]   ;;  %v1306_v17 = vsub.s32 3, %v2736_v47 }
 0x1ba   : > { %v2301_v48 = vld [vmem:[#allocation8 + $0x38] sm:$0xff]   ;;  %2001 = vmatprep.subr.bf16.mxu1 %v2300_v46  ;;  %v2305_v52 = vld [vmem:[#allocation8 + $0x30] sm:$0xff]   ;;  %v2309_v56 = vld [vmem:[#allocation8 + $0x28] sm:$0xff]  }
 0x1bb   : > { %v2302_v49 = vld [vmem:[#allocation8 + $0xb8] sm:$0xff]   ;;  %1980 = vmatpush3.bf16.msra.mxu0 %v2301_v48  ;;  %v2306_v53 = vld [vmem:[#allocation8 + $0xb0] sm:$0xff]   ;;  %v2310_v57 = vld [vmem:[#allocation8 + $0xa8] sm:$0xff]  }
 0x1bc   : > { %2002 = vmatpush3.bf16.msra.mxu1 %v2302_v49  ;;  %1981 = vmatprep.subr.bf16.mxu0 %v2303_v50  ;;  %v2311_v58 = vld [vmem:[#allocation8 + $0x60] sm:$0xff]   ;;  %v2315_v62 = vld [vmem:[#allocation8 + $0x58] sm:$0xff]   ;;  %v2319_v2 = vld [vmem:[#allocation8 + $0x50] sm:$0xff]  }
 0x1bd   : > { %2003 = vmatprep.subr.bf16.mxu1 %v2304_v51  ;;  %v2312_v59 = vld [vmem:[#allocation8 + $0xe0] sm:$0xff]   ;;  %v2316_v63 = vld [vmem:[#allocation8 + $0xd8] sm:$0xff]   ;;  %v2320_v3 = vld [vmem:[#allocation8 + $0xd0] sm:$0xff]  }
 0x1be   : > { %v2313_v60 = vld [vmem:[#allocation8 + $0x20] sm:$0xff]   ;;  %v2317_v0 = vld [vmem:[#allocation8 + $0x18] sm:$0xff]   ;;  %v2321_v4 = vld [vmem:[#allocation8 + $0x10] sm:$0xff]  }
 0x1bf   : > { %1982 = vmatpush3.bf16.msra.mxu0 %v2305_v52  ;;  %v2314_v61 = vld [vmem:[#allocation8 + $0xa0] sm:$0xff]   ;;  %v2318_v1 = vld [vmem:[#allocation8 + $0x98] sm:$0xff]   ;;  %v2322_v5 = vld [vmem:[#allocation8 + $0x90] sm:$0xff]  }
 0x1c0   : > { %2004 = vmatpush3.bf16.msra.mxu1 %v2306_v53  ;;  %1983 = vmatprep.subr.bf16.mxu0 %v2307_v54  ;;  %v2323_v6 = vld [vmem:[#allocation8 + $0x48] sm:$0xff]   ;;  %v2327_v13 = vld [vmem:[#allocation8 + $0x40] sm:$0xff]   ;;  %v1290_v20 = vld [vmem:[#allocation6] sm:$0xf] }
 0x1c1   : > { %2005 = vmatprep.subr.bf16.mxu1 %v2308_v55  ;;  %v2324_v7 = vld [vmem:[#allocation8 + $0xc8] sm:$0xff]   ;;  %v2328_v16 = vld [vmem:[#allocation8 + $0xc0] sm:$0xff]   ;;  %v1295_v21 = vrot.slane %v1290_v20, %v1294_v9  ;;  %v1299_v22 = vrot.slane %v1290_v20, %v1298_v12  ;;  %v1303_v23 = vrot.slane %v1290_v20, %v1302_v15  ;;  %v1307_v24 = vrot.slane %v1290_v20, %v1306_v17  ;;  %v1289_v29 = vld [vmem:[#allocation2] sm:$0xff] }
 0x1c2   : > { %v2325_v8 = vld [vmem:[#allocation8 + $0x8] sm:$0xff]   ;;  %v2329_v18 = vld [vmem:[#allocation8] sm:$0xff]  }
 0x1c3   : > { %1984 = vmatpush3.bf16.msra.mxu0 %v2309_v56  ;;  %v2326_v11 = vld [vmem:[#allocation8 + $0x88] sm:$0xff]   ;;  %v2330_v19 = vld [vmem:[#allocation8 + $0x80] sm:$0xff]   ;;  %v1308_v25 = vcombine.low %v1295_v21, %v1299_v22  ;;  %v1309_v26 = vcombine.low %v1303_v23, %v1307_v24 }
 0x1c4   : > { %2006 = vmatpush3.bf16.msra.mxu1 %v2310_v57  ;;  %1985 = vmatprep.subr.bf16.mxu0 %v2311_v58  ;;  %v1940_v42 = vld [vmem:[#allocation9] ss:$0 sm:$0xff] }
 0x1c5   : > { %2007 = vmatprep.subr.bf16.mxu1 %v2312_v59  ;;  %v1316_v27 = vrot.slane %v1308_v25, %v2841_v14  ;;  %v1323_v28 = vrot.slane %v1309_v26, %v2841_v14 }
 0x1c7   : > { %1986 = vmatpush3.bf16.msra.mxu0 %v2313_v60  ;;  %v1324_v30 = vcombine.low %v1316_v27, %v1323_v28 }
 0x1c8   : > { %2008 = vmatpush3.bf16.msra.mxu1 %v2314_v61  ;;  %1987 = vmatprep.subr.bf16.mxu0 %v2315_v62 }
 0x1c9   : > { %2009 = vmatprep.subr.bf16.mxu1 %v2316_v63  ;;  %v1326_v47 = vadd.f32 %v1324_v30, %v1289_v29 }
 0x1cb   : > { %1988 = vmatpush3.bf16.msra.mxu0 %v2317_v0  ;;  %v1327_v31 = vmax.f32 %v1326_v47, 0.0 }
 0x1cc   : > { %2010 = vmatpush3.bf16.msra.mxu1 %v2318_v1  ;;  %1989 = vmatprep.subr.bf16.mxu0 %v2319_v2 }
 0x1cd   : > { %2011 = vmatprep.subr.bf16.mxu1 %v2320_v3  ;;  %v1336_v32 = vrot.slane %v1327_v31, %v2841_v14  ;;  %v1329_v10 = vcombine.high %v1327_v31, %v1327_v31 }
 0x1cf   : > { %1990 = vmatpush3.bf16.msra.mxu0 %v2321_v4  ;;  %v1344_v33 = vcombine.high %v1336_v32, %v1336_v32  ;;  %v1343_v34 = vrot.slane %v1329_v10, %v2841_v14  ;;  %v1350_v35 = vpack.c.bf16 %v1336_v32, %v1336_v32 }
 0x1d0   : > { %2012 = vmatpush3.bf16.msra.mxu1 %v2322_v5  ;;  %1991 = vmatprep.subr.bf16.mxu0 %v2323_v6 }
 0x1d1   : > { %2013 = vmatprep.subr.bf16.mxu1 %v2324_v7  ;;  %v1351_v36 = vpack.c.bf16 %v1344_v33, %v1344_v33  ;;  %v1345_v37 = vcombine.high %v1343_v34, %v1343_v34  ;;  %v1352_v38 = vpack.c.bf16 %v1343_v34, %v1343_v34 }
 0x1d3   : > { %1992 = vmatpush3.bf16.msra.mxu0 %v2325_v8  ;;  %1649 = vmatprep.mubr.bf16.mxu0 %v1351_v36  ;;  %v1353_v39 = vpack.c.bf16 %v1345_v37, %v1345_v37 }
 0x1d4   : > { %2014 = vmatpush3.bf16.msra.mxu1 %v2326_v11  ;;  %1993 = vmatprep.subr.bf16.mxu0 %v2327_v13 }
 0x1d5   : > { %2015 = vmatprep.subr.bf16.mxu1 %v2328_v16  ;;  %1689 = vmatprep.mubr.bf16.mxu1 %v1353_v39 }
 0x1d7   : > { %1994 = vmatpush3.bf16.msra.mxu0 %v2329_v18 }
 0x1d8   : > { %2016 = vmatpush3.bf16.msra.mxu1 %v2330_v19 }
 0x1da   : > { %1650 = vmatmul.mubr.bf16.vlgmr.msra.gmra.mxu0 %v1350_v35 }
 0x1db   : > { %1690 = vmatmul.mubr.bf16.vlgmr.msra.gmra.mxu1 %v1352_v38 }
 0x29a   : > { %v1995_v40 = vpop.f32.mrf.mxu0 }
 0x29b   : > { %v2017_v41 = vpop.f32.mrf.mxu1 }
 0x29c   : > { %v1996_v43 = vpop.f32.mrf.mxu0 }
 0x29d   : > { %v1997_v44 = vadd.f32 %v1996_v43, %v1995_v40  ;;  %v2018_v45 = vpop.f32.mrf.mxu1 }
 0x29e   : > { %v1998_v46 = vpop.f32.mrf.mxu0  ;;  %v2019_v49 = vadd.f32 %v2018_v45, %v2017_v41 }
 0x29f   : > { %v1652_v48 = vadd.f32 %v1997_v44, %v1940_v42  ;;  %v2020_v50 = vpop.f32.mrf.mxu1 }
 0x2a0   : > { %v1999_v14 = vpop.f32.mrf.mxu0 }
 0x2a1   : > { %v1692_v51 = vadd.f32 %v2019_v49, %v1652_v48  ;;  %v2021_v52 = vpop.f32.mrf.mxu1 }
 0x2a3   : > { %1697 = vst [vmem:[#allocation11] sm:$0x3] %v1692_v51 }
 0x2a4 PF: > { %p2062_p3 = scmp.eq.s32.totalorder %s2570_s22, 7  ;;  %s2520_s15 = smov [#allocation11]  }
 0x2a5   : > { %s1705_s16 = sshll.u32 %s2520_s15, 4  ;;  %s1706_s16 = int_to_ptr.vmem [resolvable:$true] %s1705_s16 }
 0x2a6   : > { %s2437_s17 = scalar_lea.vmem %s1706_s16, 32  ;;  %p2444_p4 = scmp.lt.s32.totalorder %s1706_s16, %s1706_s16 }
 0x2a7   : > { %p2438_p7 = scmp.ne.s32.totalorder %s1706_s16, %s2437_s17  ;;  %p2445_p12 = scmp.lt.s32.totalorder %s2437_s17, %s2437_s17 }
 0x2a9   : > { %p2439_p10 = pnand %p2438_p7, %p2062_p3  ;;  %p2446_p13 = por %p2445_p12, %p2444_p4 }
 0x2ab   : > { %p2440_p11 = pneg %p2439_p10 }
 0x2ad   : > { %p2447_p0 = pnand %p2446_p13, %p2440_p11 }
 0x2af   : > { %2450 = shalt.err (!%p2447_p0)
}
 0x2b0   : > { %2038 = dma.vmem_to_hbm [thread:$0]  (%p2062_p3), %s1706_s16, 32, %s2884_s5, [#allocation5]  }
 0x2b1   : > { %2490 = dma.done.wait (%p2062_p3), [#allocation5], 32  }
 0x2b2   : > { %2492 = vsyncadd (%p2062_p3), [#allocation5], 4294967264 }
 0x2b3 PF: > { %p18_p8 = scmp.ge.s32.totalorder %s2622_s25, 10   ;;  %s2899_s18 = smov %s2499_s19 }
 0x2b4   : > { %s2900_s19 = smov %s2503_s20  ;;  %s2901_s20 = smov %s2632_s28 }
 0x2b5   : > { %s2902_s21 = smov %s2622_s25  ;;  %20 = sbr.rel (!%p18_p8) target bundleno = 6 (0x6), region = 100 }
 0x2ba   :  { %1718 = vsyncpa [#allocation4], 1 }
 0x2bb   :  { %1720 = vsyncpa [#allocation4 + $0x1], 1 }
 0x2bc   :  { %1721 = vsyncpa [#allocation7], 1 }
 0x2bd   :  { %1722 = vsyncpa [#allocation10], 1 }
 0x2be   :  { %1723 = vsyncpa [#allocation5], 1 }
 0x2bf   :  { %1725 = vsyncpa [#allocation5 + $0x1], 1 }

// kernel: simple_nnn_forward.4
= control target key start
LH: loop header
LB: loop body
LE: loop exit
PB: predicated region body
PF: predicated region fallthrough
CT: control target
= control target key end

     0   :  { %8 = vsyncpa [#allocation3], 0  ;;  %s3715_s0 = inlined_call_operand.vmem [shape: bf16[2,18,9,256], index: 0, kind: input, shape index: {}]   ;;  %s3716_s1 = inlined_call_operand.hbm [shape: bf16[2,2,128,128], index: 1, kind: input, shape index: {}]   ;;  %s3717_s2 = inlined_call_operand.hbm [shape: f32[1,128], index: 2, kind: input, shape index: {}]   ;;  %s3718_s3 = inlined_call_operand.vmem [shape: bf16[2,8,8,128], index: 3, kind: output, shape index: {}]  }
   0x1   :  { %9 = vsyncpa [#allocation5], 0  ;;  %s3046_s12 = smov 0  }
   0x2 LB: > { %s3052_s13 = sadd.s32 4294967295, %s3020_s12   ;;  %p2293_p0 = scmp.ge.s32.totalorder %s3020_s12, 1  ;;  %s3020_s12 = sphi %s3046_s12, %s15_s12  }
   0x3   : > { %p114_p1 = scmp.lt.s32.totalorder %s3020_s12, 3  ;;  %s3022_s14 = smov [#allocation2]  }
   0x4   : > { %s126_s15 = sshll.u32 %s3022_s14, 4  ;;  %p2874_p3 = scmp.eq.s32.totalorder %s3052_s13, 0  ;;  %s127_s15 = int_to_ptr.vmem [resolvable:$true] %s126_s15 }
   0x5   : > { %p3056_p2 = pnand %p2293_p0, %p114_p1  ;;  %s3023_s17 = smov [#allocation4]  }
   0x6   : > { %s140_s18 = sshll.u32 %s3023_s17, 4  ;;  %s2965_s20 = scalar_lea.vmem %s127_s15, 4096  ;;  %s141_s18 = int_to_ptr.vmem [resolvable:$true] %s140_s18 }
   0x7   : > { %p2867_p4 = pneg %p3056_p2  ;;  %p2966_p7 = scmp.ne.s32.totalorder %s127_s15, %s2965_s20 }
   0x8   : > { %p2973_p10 = scmp.lt.s32.totalorder %s127_s15, %s127_s15  ;;  %p2974_p11 = scmp.lt.s32.totalorder %s2965_s20, %s2965_s20 }
   0x9   : > { %p3065_p5 = pnand %p2874_p3, %p2867_p4 }
   0xa   : > { %p2975_p12 = por %p2974_p11, %p2973_p10 }
   0xb   : > { %p2956_p6 = pneg %p3065_p5 }
   0xd   : > { %p2968_p8 = pnand %p2966_p7, %p2956_p6 }
   0xf   : > { %p2969_p9 = pneg %p2968_p8 }
  0x11   : > { %p2976_p13 = pnand %p2975_p12, %p2969_p9 }
  0x13   : > { %2979 = shalt.err (!%p2976_p13)
}
  0x14   : > { %s3024_s21 = smov 64   ;;  %s3025_s22 = smov 4  }
  0x15   : > { %2870 = dma.hbm_to_vmem [thread:$0]  (!%p3065_p5), %s3716_s1, 4096, %s127_s15, [#allocation3], %s3024_s21, %s3024_s21, %s3025_s22  }
  0x16   : > { %s2991_s25 = scalar_lea.vmem %s141_s18, 16  ;;  %s2998_s26 = scalar_lea.vmem %s141_s18, 32 }
  0x17   : > { %p2992_p0 = scmp.ne.s32.totalorder %s141_s18, %s2991_s25  ;;  %p2999_p7 = scmp.lt.s32.totalorder %s141_s18, %s141_s18 }
  0x18   : > { %p3000_p8 = scmp.lt.s32.totalorder %s2998_s26, %s2991_s25 }
  0x19   : > { %p2994_p1 = pnand %p2992_p0, %p2956_p6 }
  0x1a   : > { %p3001_p9 = por %p3000_p8, %p2999_p7 }
  0x1b   : > { %p2995_p4 = pneg %p2994_p1 }
  0x1d   : > { %p3002_p10 = pnand %p3001_p9, %p2995_p4 }
  0x1f   : > { %3005 = shalt.err (!%p3002_p10)
}
  0x20   : > { %2873 = dma.hbm_to_vmem [thread:$0]  (!%p3065_p5), %s3717_s2, 16, %s141_s18, [#allocation5]  }
  0x21   : > { %161 = sbr.rel (%p3056_p2) target bundleno = 408 (0x198), region = 32 }
  0x26   : > { %3011 = dma.done.wait (%p2874_p3), [#allocation3], 4096  }
  0x27   : > { %3013 = vsyncadd (%p2874_p3), [#allocation3], 4294963200 }
  0x28   : > { %3015 = dma.done.wait (%p2874_p3), [#allocation5], 16  }
  0x29   : > { %3017 = vsyncadd (%p2874_p3), [#allocation5], 4294967280  ;;  %v3097_v0 = vld [vmem:[#allocation2 + $0x78] sm:$0xff]   ;;  %p189_p5 = scmp.lt.s32.totalorder %s3052_s13, 1  ;;  %v3103_v2 = vld [vmem:[#allocation2 + $0x70] sm:$0xff]  }
  0x2a   : > { %v3099_v1 = vld [vmem:[#allocation2 + $0x38] sm:$0xff]   ;;  %2602 = vmatprep.subr.bf16.mxu0 %v3097_v0  ;;  %v3107_v3 = vld [vmem:[#allocation2 + $0x30] sm:$0xff]   ;;  %v3111_v4 = vld [vmem:[#allocation2 + $0x68] sm:$0xff]   ;;  %vm1168_vm0 = vsmask.f32 3328 }
  0x2b   : > { %2634 = vmatprep.subr.bf16.mxu1 %v3099_v1  ;;  %2603 = vmatpush3.bf16.msra.mxu0 %v3097_v0  ;;  %v3114_v5 = vld [vmem:[#allocation2 + $0x28] sm:$0xff]   ;;  %s3753_s13 = smov (!%p189_p5, %s3052_s13), 1  ;;  %v3122_v6 = vld [vmem:[#allocation2 + $0x60] sm:$0xff]   ;;  %v3131_v8 = vld [vmem:[#allocation2 + $0x58] sm:$0xff]   ;;  %vm1169_vm1 = vsmask.f32 7440 }
  0x2c   : > { %2635 = vmatpush3.bf16.msra.mxu1 %v3099_v1  ;;  %2604 = vmatprep.subr.bf16.mxu0 %v3103_v2  ;;  %v3125_v7 = vld [vmem:[#allocation2 + $0x20] sm:$0xff]   ;;  %s2858_s29 = smul.u32 288, %s3753_s13  ;;  %v3134_v9 = vld [vmem:[#allocation2 + $0x18] sm:$0xff]   ;;  %v3141_v10 = vld [vmem:[#allocation2 + $0x50] sm:$0xff]   ;;  %s2450_s6 = sshll.u32 %s3753_s13, 5 }
  0x2d   : > { %2636 = vmatprep.subr.bf16.mxu1 %v3107_v3  ;;  %v3144_v11 = vld [vmem:[#allocation2 + $0x10] sm:$0xff]   ;;  %v3157_v14 = vld [vmem:[#allocation2 + $0x48] sm:$0xff]   ;;  %v3165_v16 = vld [vmem:[#allocation2 + $0x40] sm:$0xff]   ;;  %s3674_s9 = scalar_lea.vmem %s3718_s3, %s2450_s6 }
  0x2e   : > { %s3139_s5 = scalar_lea.vmem %s3715_s0, %s2858_s29  ;;  %v3160_v15 = vld [vmem:[#allocation2 + $0x8] sm:$0xff]   ;;  %v3168_v17 = vld [vmem:[#allocation2] sm:$0xff]   ;;  %v3176_v19 = vld [vmem:[#allocation2 + $0xb8] sm:$0xff]  }
  0x2f   : > { %2605 = vmatpush3.bf16.msra.mxu0 %v3103_v2  ;;  %v3149_v12 = vld [vmem:[%s3139_s5 + $0x4] ss:$16 sps:$4 sm:$0xff]   ;;  %v2907_v13 = vld [vmem:[%s3139_s5] ss:$16 sps:$4 sm:$0xff]   ;;  %v3179_v20 = vld [vmem:[#allocation2 + $0xf8] sm:$0xff]  }
  0x30   : > { %2637 = vmatpush3.bf16.msra.mxu1 %v3107_v3  ;;  %2606 = vmatprep.subr.bf16.mxu0 %v3111_v4  ;;  %v3174_v18 = vld [vmem:[%s3139_s5 + $0x24] ss:$16 sps:$4 sm:$0xff]   ;;  %v2909_v21 = vld [vmem:[%s3139_s5 + $0x20] ss:$16 sps:$4 sm:$0xff]   ;;  %v3201_v27 = vld [vmem:[#allocation2 + $0xa8] sm:$0xff]  }
  0x31   : > { %2638 = vmatprep.subr.bf16.mxu1 %v3114_v5  ;;  %2618 = vmatprep.mubr.bf16.mxu0 %v3149_v12  ;;  %v3183_v22 = vld [vmem:[#allocation2 + $0xb0] sm:$0xff]   ;;  %v3205_v28 = vld [vmem:[#allocation2 + $0xe8] sm:$0xff]   ;;  %v3209_v30 = vld [vmem:[#allocation2 + $0xa0] sm:$0xff]  }
  0x32   : > { %2650 = vmatprep.mubr.bf16.mxu1 %v2907_v13  ;;  %v3187_v23 = vld [vmem:[#allocation2 + $0xf0] sm:$0xff]   ;;  %v3213_v31 = vld [vmem:[#allocation2 + $0xe0] sm:$0xff]   ;;  %v3227_v35 = vld [vmem:[#allocation2 + $0x98] sm:$0xff]  }
  0x33   : > { %2607 = vmatpush3.bf16.msra.mxu0 %v3111_v4  ;;  %v3191_v24 = vld [vmem:[%s3139_s5 + $0x44] ss:$16 sps:$4 sm:$0xff]   ;;  %v2915_v25 = vld [vmem:[%s3139_s5 + $0x40] ss:$16 sps:$4 sm:$0xff]   ;;  %v3231_v36 = vld [vmem:[#allocation2 + $0xd8] sm:$0xff]  }
  0x34   : > { %2639 = vmatpush3.bf16.msra.mxu1 %v3114_v5  ;;  %2608 = vmatprep.subr.bf16.mxu0 %v3122_v6  ;;  %v3199_v26 = vld [vmem:[%s3139_s5 + $0x64] ss:$16 sps:$4 sm:$0xff]   ;;  %v2917_v29 = vld [vmem:[%s3139_s5 + $0x60] ss:$16 sps:$4 sm:$0xff]   ;;  %v3253_v43 = vld [vmem:[#allocation2 + $0x88] sm:$0xff]  }
  0x35   : > { %2640 = vmatprep.subr.bf16.mxu1 %v3125_v7  ;;  %v3217_v32 = vld [vmem:[%s3139_s5 + $0x84] ss:$16 sps:$4 sm:$0xff]   ;;  %v2923_v33 = vld [vmem:[%s3139_s5 + $0x80] ss:$16 sps:$4 sm:$0xff]   ;;  %v3257_v44 = vld [vmem:[#allocation2 + $0xc8] sm:$0xff]  }
  0x36   : > { %v3225_v34 = vld [vmem:[%s3139_s5 + $0xa4] ss:$16 sps:$4 sm:$0xff]   ;;  %v2925_v37 = vld [vmem:[%s3139_s5 + $0xa0] ss:$16 sps:$4 sm:$0xff]   ;;  %v1137_v55 = vld [vmem:[%s3139_s5 + $0x8] sm:$0x1] }
  0x37   : > { %2609 = vmatpush3.bf16.msra.mxu0 %v3122_v6  ;;  %v3235_v38 = vld [vmem:[#allocation2 + $0x90] sm:$0xff]   ;;  %v3261_v46 = vld [vmem:[#allocation2 + $0x80] sm:$0xff]   ;;  %v1139_v57 = vld [vmem:[%s3139_s5 + $0x18] sm:$0x1]  ;;  %v1181_v60 = vshll.u32 %v1137_v55, 16 }
  0x38   : > { %2641 = vmatpush3.bf16.msra.mxu1 %v3125_v7  ;;  %2610 = vmatprep.subr.bf16.mxu0 %v3131_v8  ;;  %v3239_v39 = vld [vmem:[#allocation2 + $0xd0] sm:$0xff]   ;;  %3732 = vst [vmem:[#allocation9_spill] sm:$0xff] %v3261_v46  ;;  %v3265_v47 = vld [vmem:[#allocation2 + $0xc0] sm:$0xff]   ;;  %v1195_v63 = vshll.u32 %v1139_v57, 16  ;;  %vm3311_vm2 = vmor %vm1168_vm0, %vm1169_vm1 }
  0x39   : > { %2642 = vmatprep.subr.bf16.mxu1 %v3134_v9  ;;  %v3243_v40 = vld [vmem:[%s3139_s5 + $0xc4] ss:$16 sps:$4 sm:$0xff]   ;;  %v2931_v41 = vld [vmem:[%s3139_s5 + $0xc0] ss:$16 sps:$4 sm:$0xff]   ;;  %3733 = vst [vmem:[#allocation10_spill] sm:$0xff] %v3265_v47 }
  0x3a   : > { %v3251_v42 = vld [vmem:[%s3139_s5 + $0xe4] ss:$16 sps:$4 sm:$0xff]   ;;  %v2933_v45 = vld [vmem:[%s3139_s5 + $0xe0] ss:$16 sps:$4 sm:$0xff]  }
  0x3b   : > { %2611 = vmatpush3.bf16.msra.mxu0 %v3131_v8  ;;  %3731 = vst [vmem:[#allocation8_spill] sm:$0xff] %v3251_v42  ;;  %v2938_v48 = vld [vmem:[%s3139_s5 + $0x10] ss:$16 sps:$4 sm:$0xff]   ;;  %v3271_v49 = vld [vmem:[%s3139_s5 + $0x14] ss:$16 sps:$4 sm:$0xff]  }
  0x3c   : > { %2643 = vmatpush3.bf16.msra.mxu1 %v3134_v9  ;;  %2612 = vmatprep.subr.bf16.mxu0 %v3141_v10  ;;  %3734 = vst [vmem:[#allocation11_spill] sm:$0xff] %v3271_v49  ;;  %v2940_v50 = vld [vmem:[%s3139_s5 + $0x30] ss:$16 sps:$4 sm:$0xff]   ;;  %v3280_v51 = vld [vmem:[%s3139_s5 + $0x34] ss:$16 sps:$4 sm:$0xff]  }
  0x3d   : > { %2644 = vmatprep.subr.bf16.mxu1 %v3144_v11  ;;  %3735 = vst [vmem:[#allocation12_spill] sm:$0xff] %v3280_v51  ;;  %v2942_v52 = vld [vmem:[%s3139_s5 + $0x50] ss:$16 sps:$4 sm:$0xff]   ;;  %v3287_v53 = vld [vmem:[%s3139_s5 + $0x54] ss:$16 sps:$4 sm:$0xff]  }
  0x3e   : > { %3736 = vst [vmem:[#allocation13_spill] sm:$0xff] %v3287_v53  ;;  %v1136_v54 = vld [vmem:[%s3139_s5] sm:$0xf]  ;;  %v1138_v56 = vld [vmem:[%s3139_s5 + $0x10] sm:$0xf] }
  0x3f   : > { %2613 = vmatpush3.bf16.msra.mxu0 %v3141_v10  ;;  %v1172_v58 = vshrl.u32 %v1136_v54, 16  ;;  %v1175_v59 = vshll.u32 %v1136_v54, 16  ;;  %v1186_v61 = vshrl.u32 %v1138_v56, 16  ;;  %v1189_v62 = vshll.u32 %v1138_v56, 16  ;;  %v1140_v13 = vld [vmem:[%s3139_s5 + $0x20] sm:$0xf] }
  0x40   : > { %2645 = vmatpush3.bf16.msra.mxu1 %v3144_v11  ;;  %2614 = vmatprep.subr.bf16.mxu0 %v3157_v14  ;;  %v1200_v54 = vshrl.u32 %v1140_v13, 16  ;;  %v1203_v55 = vshll.u32 %v1140_v13, 16 }
  0x41   : > { %2646 = vmatprep.subr.bf16.mxu1 %v3160_v15 }
  0x42   : > { %v1205_v13 = vrot.slane %v1203_v55, 5 }
  0x43   : > { %2615 = vmatpush3.bf16.msra.mxu0 %v3157_v14 }
  0x44   : > { %2647 = vmatpush3.bf16.msra.mxu1 %v3160_v15  ;;  %2616 = vmatprep.subr.bf16.mxu0 %v3165_v16 }
  0x45   : > { %2648 = vmatprep.subr.bf16.mxu1 %v3168_v17 }
  0x47   : > { %2617 = vmatpush3.bf16.msra.mxu0 %v3165_v16 }
  0x48   : > { %2649 = vmatpush3.bf16.msra.mxu1 %v3168_v17  ;;  %2666 = vmatprep.subr.bf16.mxu0 %v3176_v19 }
  0x49   : > { %2698 = vmatprep.subr.bf16.mxu1 %v3179_v20 }
  0x4a   : > { %2619 = vmatmul.mubr.bf16.vlgmr.msra.gmra.mxu0 %v3174_v18 }
  0x4b   : > { %2651 = vmatmul.mubr.bf16.vlgmr.msra.gmra.mxu1 %v2909_v21  ;;  %2667 = vmatpush3.bf16.msra.mxu0 %v3176_v19  ;;  %v1141_v21 = vld [vmem:[%s3139_s5 + $0x28] sm:$0x1] }
  0x4c   : > { %2699 = vmatpush3.bf16.msra.mxu1 %v3179_v20  ;;  %2668 = vmatprep.subr.bf16.mxu0 %v3183_v22  ;;  %v1209_v56 = vshll.u32 %v1141_v21, 16 }
  0x4d   : > { %2700 = vmatprep.subr.bf16.mxu1 %v3187_v23  ;;  %2622 = vmatprep.mubr.bf16.mxu0 %v3191_v24 }
  0x4e   : > { %2654 = vmatprep.mubr.bf16.mxu1 %v2915_v25  ;;  %v1174_v25 = vrot.slane %v1172_v58, 4 }
  0x4f   : > { %2669 = vmatpush3.bf16.msra.mxu0 %v3183_v22 }
  0x50   : > { %2701 = vmatpush3.bf16.msra.mxu1 %v3187_v23  ;;  %2670 = vmatprep.subr.bf16.mxu0 %v3201_v27 }
  0x51   : > { %2702 = vmatprep.subr.bf16.mxu1 %v3205_v28 }
  0x52   : > { %2623 = vmatmul.mubr.bf16.gmra.mxu0 %v3199_v26 }
  0x53   : > { %2655 = vmatmul.mubr.bf16.gmra.mxu1 %v2917_v29  ;;  %2671 = vmatpush3.bf16.msra.mxu0 %v3201_v27  ;;  %v1177_v29 = vrot.slane %v1175_v59, 5  ;;  %v1144_v59 = vld [vmem:[%s3139_s5 + $0x40] sm:$0xf] }
  0x54   : > { %2703 = vmatpush3.bf16.msra.mxu1 %v3205_v28  ;;  %2672 = vmatprep.subr.bf16.mxu0 %v3209_v30  ;;  %v1231_v55 = vshll.u32 %v1144_v59, 16 }
  0x55   : > { %2704 = vmatprep.subr.bf16.mxu1 %v3213_v31  ;;  %2626 = vmatprep.mubr.bf16.mxu0 %v3217_v32 }
  0x56   : > { %2658 = vmatprep.mubr.bf16.mxu1 %v2923_v33  ;;  %v1188_v33 = vrot.slane %v1186_v61, 4 }
  0x57   : > { %2673 = vmatpush3.bf16.msra.mxu0 %v3209_v30 }
  0x58   : > { %2705 = vmatpush3.bf16.msra.mxu1 %v3213_v31  ;;  %2674 = vmatprep.subr.bf16.mxu0 %v3227_v35 }
  0x59   : > { %2706 = vmatprep.subr.bf16.mxu1 %v3231_v36 }
  0x5a   : > { %2627 = vmatmul.mubr.bf16.gmra.mxu0 %v3225_v34 }
  0x5b   : > { %2659 = vmatmul.mubr.bf16.gmra.mxu1 %v2925_v37  ;;  %2675 = vmatpush3.bf16.msra.mxu0 %v3227_v35  ;;  %v1142_v37 = vld [vmem:[%s3139_s5 + $0x30] sm:$0xf] }
  0x5c   : > { %2707 = vmatpush3.bf16.msra.mxu1 %v3231_v36  ;;  %2676 = vmatprep.subr.bf16.mxu0 %v3235_v38  ;;  %v1214_v57 = vshrl.u32 %v1142_v37, 16  ;;  %v1217_v58 = vshll.u32 %v1142_v37, 16  ;;  %v1146_v37 = vld [vmem:[%s3139_s5 + $0x50] sm:$0xf] }
  0x5d   : > { %2708 = vmatprep.subr.bf16.mxu1 %v3239_v39  ;;  %2630 = vmatprep.mubr.bf16.mxu0 %v3243_v40 }
  0x5e   : > { %2662 = vmatprep.mubr.bf16.mxu1 %v2931_v41  ;;  %v2944_v41 = vld [vmem:[%s3139_s5 + $0x70] ss:$16 sps:$4 sm:$0xff]  }
  0x5f   : > { %2677 = vmatpush3.bf16.msra.mxu0 %v3235_v38 }
  0x60   : > { %2709 = vmatpush3.bf16.msra.mxu1 %v3239_v39  ;;  %2678 = vmatprep.subr.bf16.mxu0 %v3253_v43 }
  0x61   : > { %2710 = vmatprep.subr.bf16.mxu1 %v3257_v44 }
  0x62   : > { %2631 = vmatmul.mubr.bf16.gmra.mxu0 %v3251_v42 }
  0x63   : > { %2663 = vmatmul.mubr.bf16.gmra.mxu1 %v2933_v45  ;;  %2679 = vmatpush3.bf16.msra.mxu0 %v3253_v43  ;;  %v1183_v45 = vrot.slane %v1181_v60, 5 }
  0x64   : > { %2711 = vmatpush3.bf16.msra.mxu1 %v3257_v44  ;;  %2680 = vmatprep.subr.bf16.mxu0 %v3261_v46 }
  0x65   : > { %2712 = vmatprep.subr.bf16.mxu1 %v3265_v47  ;;  %2682 = vmatprep.mubr.bf16.mxu0 %v2938_v48  ;;  %v1191_v48 = vrot.slane %v1189_v62, 5  ;;  %v1197_v62 = vrot.slane %v1195_v63, 5  ;;  %v1228_v63 = vshrl.u32 %v1144_v59, 16 }
  0x66   : > { %2714 = vmatprep.mubr.bf16.mxu1 %v3271_v49 }
  0x67   : > { %2681 = vmatpush3.bf16.msra.mxu0 %v3261_v46  ;;  %v1192_v61 = vor.u32 %v1191_v48, %v1188_v33  ;;  %v1145_v33 = vld [vmem:[%s3139_s5 + $0x48] sm:$0x1]  ;;  %v2946_v48 = vld [vmem:[%s3139_s5 + $0x90] ss:$16 sps:$4 sm:$0xff]  }
  0x68   : > { %2713 = vmatpush3.bf16.msra.mxu1 %v3265_v47  ;;  %2730 = vmatprep.subr.bf16.mxu0 %v3097_v0  ;;  %v1237_v59 = vshll.u32 %v1145_v33, 16  ;;  %v1151_v33 = vld [vmem:[%s3139_s5 + $0x78] sm:$0x1] }
  0x69   : > { %2762 = vmatprep.subr.bf16.mxu1 %v3099_v1 }
  0x6a   : > { %2683 = vmatmul.mubr.bf16.vlgmr.msra.gmra.mxu0 %v2940_v50  ;;  %v1143_v50 = vld [vmem:[%s3139_s5 + $0x38] sm:$0x1]  ;;  %v3357_v47 = vrot.slane %v1237_v59, 5  ;;  %v1154_v59 = vld [vmem:[%s3139_s5 + $0x90] sm:$0xf] }
  0x6b   : > { %2715 = vmatmul.mubr.bf16.vlgmr.msra.gmra.mxu1 %v3280_v51  ;;  %2731 = vmatpush3.bf16.msra.mxu0 %v3097_v0  ;;  %v1178_v0 = vor.u32 %v1177_v29, %v1174_v25  ;;  %v1216_v25 = vrot.slane %v1214_v57, 4  ;;  %v1219_v29 = vrot.slane %v1217_v58, 5  ;;  %v1223_v49 = vshll.u32 %v1143_v50, 16 }
  0x6c   : > { %2763 = vmatpush3.bf16.msra.mxu1 %v3099_v1  ;;  %2732 = vmatprep.subr.bf16.mxu0 %v3103_v2  ;;  %v3307_v1 = vld [vmem:[%s3139_s5 + $0x74] ss:$16 sps:$4 sm:$0xff]   ;;  %v1230_v57 = vrot.slane %v1228_v63, 4  ;;  %v1242_v58 = vshrl.u32 %v1146_v37, 16 }
  0x6d   : > { %2764 = vmatprep.subr.bf16.mxu1 %v3107_v3  ;;  %2686 = vmatprep.mubr.bf16.mxu0 %v2942_v52  ;;  %3737 = vst [vmem:[#allocation14_spill] sm:$0xff] %v3307_v1  ;;  %v1202_v52 = vrot.slane %v1200_v54, 4  ;;  %v1179_v21 = vrot.slane %v1178_v0, 4  ;;  %v3324_v54 = vrot.slane %v1209_v56, 5  ;;  %v1220_v0 = vor.u32 %v1219_v29, %v1216_v25  ;;  %v1150_v25 = vld [vmem:[%s3139_s5 + $0x70] sm:$0xf] }
  0x6e   : > { %2718 = vmatprep.mubr.bf16.mxu1 %v3287_v53  ;;  %v1193_v53 = vrot.slane %v1192_v61, 4  ;;  %v1148_v61 = vld [vmem:[%s3139_s5 + $0x60] sm:$0xf]  ;;  %v1233_v56 = vrot.slane %v1231_v55, 5 }
  0x6f   : > { %2733 = vmatpush3.bf16.msra.mxu0 %v3103_v2  ;;  %v1206_v51 = vor.u32 %v1205_v13, %v1202_v52  ;;  %v1184_v2 = vsel %vm3311_vm2, %v1179_v21, %v1183_v45  ;;  %v1147_v45 = vld [vmem:[%s3139_s5 + $0x58] sm:$0x1]  ;;  %v3341_v52 = vrot.slane %v1223_v49, 5  ;;  %v1244_v13 = vrot.slane %v1242_v58, 4 }
  0x70   : > { %2765 = vmatpush3.bf16.msra.mxu1 %v3107_v3  ;;  %2734 = vmatprep.subr.bf16.mxu0 %v3111_v4  ;;  %v3327_v3 = vld [vmem:[%s3139_s5 + $0x94] ss:$16 sps:$4 sm:$0xff]   ;;  %v1198_v50 = vsel %vm3311_vm2, %v1193_v53, %v1197_v62  ;;  %v2948_v53 = vld [vmem:[%s3139_s5 + $0xb0] ss:$16 sps:$4 sm:$0xff]   ;;  %v1245_v21 = vshll.u32 %v1146_v37, 16  ;;  %v1256_v63 = vshrl.u32 %v1148_v61, 16 }
  0x71   : > { %2766 = vmatprep.subr.bf16.mxu1 %v3114_v5  ;;  %3740 = vst [vmem:[#allocation15_spill] sm:$0xff] %v3327_v3  ;;  %v3339_v62 = vrot.slane %v1206_v51, 4  ;;  %v3348_v29 = vcombine.low %v1184_v2, %v1198_v50  ;;  %v1259_v51 = vshll.u32 %v1148_v61, 16  ;;  %v3352_v49 = vrot.slane %v1220_v0, 4  ;;  %v3362_v0 = vld [vmem:[%s3139_s5 + $0xd4] ss:$16 sps:$4 sm:$0xff]  }
  0x72   : > { %2687 = vmatmul.mubr.bf16.gmra.mxu0 %v2944_v41  ;;  %v1149_v41 = vld [vmem:[%s3139_s5 + $0x68] sm:$0x1]  ;;  %v1247_v55 = vrot.slane %v1245_v21, 5  ;;  %v1251_v37 = vshll.u32 %v1147_v45, 16  ;;  %v1258_v2 = vrot.slane %v1256_v63, 4 }
  0x73   : > { %2719 = vmatmul.mubr.bf16.gmra.mxu1 %v3307_v1  ;;  %2735 = vmatpush3.bf16.msra.mxu0 %v3111_v4  ;;  %v3346_v4 = vld [vmem:[%s3139_s5 + $0xb4] ss:$16 sps:$4 sm:$0xff]   ;;  %v1265_v58 = vshll.u32 %v1149_v41, 16  ;;  %v1152_v1 = vld [vmem:[%s3139_s5 + $0x80] sm:$0xf]  ;;  %v1261_v50 = vrot.slane %v1259_v51, 5 }
  0x74   : > { %2767 = vmatpush3.bf16.msra.mxu1 %v3114_v5  ;;  %2736 = vmatprep.subr.bf16.mxu0 %v3122_v6  ;;  %v1234_v5 = vor.u32 %v1233_v56, %v1230_v57  ;;  %v1270_v57 = vshrl.u32 %v1150_v25, 16  ;;  %v1248_v45 = vor.u32 %v1247_v55, %v1244_v13  ;;  %v1273_v56 = vshll.u32 %v1150_v25, 16  ;;  %v1153_v63 = vld [vmem:[%s3139_s5 + $0x88] sm:$0x1] }
  0x75   : > { %2768 = vmatprep.subr.bf16.mxu1 %v3125_v7  ;;  %2690 = vmatprep.mubr.bf16.mxu0 %v2946_v48  ;;  %v2950_v48 = vld [vmem:[%s3139_s5 + $0xd0] ss:$16 sps:$4 sm:$0xff]   ;;  %v1262_v41 = vor.u32 %v1261_v50, %v1258_v2  ;;  %v1284_v51 = vshrl.u32 %v1152_v1, 16  ;;  %v3375_v46 = vrot.slane %v1265_v58, 5  ;;  %v1287_v61 = vshll.u32 %v1152_v1, 16 }
  0x76   : > { %2722 = vmatprep.mubr.bf16.mxu1 %v3327_v3  ;;  %v1272_v21 = vrot.slane %v1270_v57, 4  ;;  %v3373_v3 = vrot.slane %v1251_v37, 5  ;;  %v1275_v42 = vrot.slane %v1273_v56, 5  ;;  %v1249_v13 = vrot.slane %v1248_v45, 4  ;;  %v1156_v2 = vld [vmem:[%s3139_s5 + $0xa0] sm:$0xf] }
  0x77   : > { %2737 = vmatpush3.bf16.msra.mxu0 %v3122_v6  ;;  %v3368_v6 = vrot.slane %v1234_v5, 4  ;;  %v1155_v5 = vld [vmem:[%s3139_s5 + $0x98] sm:$0x1]  ;;  %v3380_v25 = vrot.slane %v1262_v41, 4  ;;  %v1286_v55 = vrot.slane %v1284_v51, 4  ;;  %v1289_v37 = vrot.slane %v1287_v61, 5 }
  0x78   : > { %2769 = vmatpush3.bf16.msra.mxu1 %v3125_v7  ;;  %2738 = vmatprep.subr.bf16.mxu0 %v3131_v8  ;;  %v1279_v7 = vshll.u32 %v1151_v33, 16  ;;  %v1298_v33 = vshrl.u32 %v1154_v59, 16  ;;  %v1293_v58 = vshll.u32 %v1153_v63, 16  ;;  %v1301_v1 = vshll.u32 %v1154_v59, 16  ;;  %v1158_v50 = vld [vmem:[%s3139_s5 + $0xb0] sm:$0xf] }
  0x79   : > { %2770 = vmatprep.subr.bf16.mxu1 %v3134_v9  ;;  %v1157_v61 = vld [vmem:[%s3139_s5 + $0xa8] sm:$0x1]  ;;  %v2952_v45 = vld [vmem:[%s3139_s5 + $0xf0] ss:$16 sps:$4 sm:$0xff]   ;;  %v1290_v59 = vor.u32 %v1289_v37, %v1286_v55  ;;  %v1307_v41 = vshll.u32 %v1155_v5, 16 }
  0x7a   : > { %2691 = vmatmul.mubr.bf16.gmra.mxu0 %v2948_v53  ;;  %v1276_v53 = vor.u32 %v1275_v42, %v1272_v21  ;;  %v1281_v57 = vrot.slane %v1279_v7, 5  ;;  %v1300_v42 = vrot.slane %v1298_v33, 4  ;;  %v3400_v21 = vld [vmem:[%s3139_s5 + $0xf4] ss:$16 sps:$4 sm:$0xff]   ;;  %v1295_v7 = vrot.slane %v1293_v58, 5 }
  0x7b   : > { %2723 = vmatmul.mubr.bf16.gmra.mxu1 %v3346_v4  ;;  %2739 = vmatpush3.bf16.msra.mxu0 %v3131_v8  ;;  %v1226_v8 = vsel %vm3311_vm2, %v3352_v49, %v3341_v52  ;;  %v1254_v52 = vsel %vm3311_vm2, %v1249_v13, %v3373_v3  ;;  %v1315_v49 = vshll.u32 %v1156_v2, 16  ;;  %v1321_v51 = vshll.u32 %v1157_v61, 16  ;;  %v1160_v5 = vld [vmem:[%s3139_s5 + $0xc0] sm:$0xf]  ;;  %v1162_v33 = vld [vmem:[%s3139_s5 + $0xd0] sm:$0xf] }
  0x7c   : > { %2771 = vmatpush3.bf16.msra.mxu1 %v3134_v9  ;;  %2740 = vmatprep.subr.bf16.mxu0 %v3141_v10  ;;  %v1240_v9 = vsel %vm3311_vm2, %v3368_v6, %v3357_v47  ;;  %v1277_v56 = vrot.slane %v1276_v53, 4  ;;  %v1312_v47 = vshrl.u32 %v1156_v2, 16  ;;  %v1326_v6 = vshrl.u32 %v1158_v50, 16  ;;  %v1159_v37 = vld [vmem:[%s3139_s5 + $0xb8] sm:$0x1] }
  0x7d   : > { %2772 = vmatprep.subr.bf16.mxu1 %v3144_v11  ;;  %2694 = vmatprep.mubr.bf16.mxu0 %v2950_v48  ;;  %v1303_v48 = vrot.slane %v1301_v1, 5  ;;  %v1291_v13 = vrot.slane %v1290_v59, 4  ;;  %v1309_v53 = vrot.slane %v1307_v41, 5  ;;  %v3741_v58 = vsel %vm3311_vm2, %v3339_v62, %v3324_v54 }
  0x7e   : > { %2726 = vmatprep.mubr.bf16.mxu1 %v3362_v0  ;;  %v1282_v3 = vsel %vm3311_vm2, %v1277_v56, %v1281_v57  ;;  %v1314_v55 = vrot.slane %v1312_v47, 4  ;;  %v2400_v1 = vcombine.low %v3741_v58, %v1226_v8  ;;  %v1340_v57 = vshrl.u32 %v1160_v5, 16  ;;  %v1161_v56 = vld [vmem:[%s3139_s5 + $0xc8] sm:$0x1] }
  0x7f   : > { %2741 = vmatpush3.bf16.msra.mxu0 %v3141_v10  ;;  %v1268_v10 = vsel %vm3311_vm2, %v3380_v25, %v3375_v46  ;;  %v1304_v63 = vor.u32 %v1303_v48, %v1300_v42  ;;  %v1328_v46 = vrot.slane %v1326_v6, 4  ;;  %v1329_v25 = vshll.u32 %v1158_v50, 16 }
  0x80   : > { %2773 = vmatpush3.bf16.msra.mxu1 %v3144_v11  ;;  %2742 = vmatprep.subr.bf16.mxu0 %v3157_v14  ;;  %v1317_v11 = vrot.slane %v1315_v49, 5  ;;  %v1343_v42 = vshll.u32 %v1160_v5, 16  ;;  %v2401_v61 = vcombine.low %v1240_v9, %v1254_v52  ;;  %v1354_v59 = vshrl.u32 %v1162_v33, 16  ;;  %v1166_v49 = vld [vmem:[%s3139_s5 + $0xf0] sm:$0xf] }
  0x81   : > { %2774 = vmatprep.subr.bf16.mxu1 %v3160_v15  ;;  %v1305_v2 = vrot.slane %v1304_v63, 4  ;;  %v1331_v50 = vrot.slane %v1329_v25, 5  ;;  %v3430_v54 = vcombine.low %v1268_v10, %v1282_v3  ;;  %v3432_v62 = vrot.slane %v1321_v51, 5  ;;  %v1165_v63 = vld [vmem:[%s3139_s5 + $0xe8] sm:$0x1] }
  0x82   : > { %2695 = vmatmul.mubr.bf16.gmra.mxu0 %v2952_v45  ;;  %v1318_v45 = vor.u32 %v1317_v11, %v1314_v55  ;;  %v1335_v8 = vshll.u32 %v1159_v37, 16  ;;  %v1342_v48 = vrot.slane %v1340_v57, 4  ;;  %v1296_v9 = vsel %vm3311_vm2, %v1291_v13, %v1295_v7 }
  0x83   : > { %2727 = vmatmul.mubr.bf16.gmra.mxu1 %v3400_v21  ;;  %2743 = vmatpush3.bf16.msra.mxu0 %v3157_v14  ;;  %v1164_v14 = vld [vmem:[%s3139_s5 + $0xe0] sm:$0xf]  ;;  %v1310_v41 = vsel %vm3311_vm2, %v1305_v2, %v1309_v53  ;;  %v1332_v52 = vor.u32 %v1331_v50, %v1328_v46  ;;  %v1345_v47 = vrot.slane %v1343_v42, 5  ;;  %v1356_v6 = vrot.slane %v1354_v59, 4  ;;  %v2407_v2 = vld [vmem:[%s3139_s5 + $0x10] sm:$0xf] }
  0x84   : > { %2775 = vmatpush3.bf16.msra.mxu1 %v3160_v15  ;;  %2744 = vmatprep.subr.bf16.mxu0 %v3165_v16  ;;  %v1163_v15 = vld [vmem:[%s3139_s5 + $0xd8] sm:$0x1]  ;;  %v1357_v10 = vshll.u32 %v1162_v33, 16  ;;  %v1368_v51 = vshrl.u32 %v1164_v14, 16  ;;  %v1371_v3 = vshll.u32 %v1164_v14, 16  ;;  %v1337_v55 = vrot.slane %v1335_v8, 5 }
  0x85   : > { %2776 = vmatprep.subr.bf16.mxu1 %v3168_v17  ;;  %2746 = vmatprep.mubr.bf16.mxu0 %v3348_v29  ;;  %v1349_v29 = vshll.u32 %v1161_v56, 16  ;;  %v1346_v7 = vor.u32 %v1345_v47, %v1342_v48  ;;  %v1363_v5 = vshll.u32 %v1163_v15, 16  ;;  %v1333_v13 = vrot.slane %v1332_v52, 4  ;;  %v1167_v53 = vld [vmem:[%s3139_s5 + $0xf8] sm:$0x1] }
  0x86   : > { %2778 = vmatprep.mubr.bf16.mxu1 %v3149_v12  ;;  %v1319_v12 = vrot.slane %v1318_v45, 4  ;;  %v1382_v11 = vshrl.u32 %v1166_v49, 16  ;;  %v3447_v33 = vcombine.low %v1296_v9, %v1310_v41  ;;  %v1373_v37 = vrot.slane %v1371_v3, 5  ;;  %v2409_v45 = vld [vmem:[%s3139_s5 + $0x20] sm:$0xf] }
  0x87   : > { %2745 = vmatpush3.bf16.msra.mxu0 %v3165_v16  ;;  %v1359_v16 = vrot.slane %v1357_v10, 5  ;;  %v1377_v46 = vshll.u32 %v1165_v63, 16  ;;  %v1351_v25 = vrot.slane %v1349_v29, 5  ;;  %v1385_v42 = vshll.u32 %v1166_v49, 16  ;;  %v2410_v8 = vld [vmem:[%s3139_s5 + $0x28] sm:$0x1] }
  0x88   : > { %2777 = vmatpush3.bf16.msra.mxu1 %v3168_v17  ;;  %2794 = vmatprep.subr.bf16.mxu0 %v3176_v19  ;;  %v1370_v17 = vrot.slane %v1368_v51, 4  ;;  %v1384_v57 = vrot.slane %v1382_v11, 4  ;;  %v1347_v50 = vrot.slane %v1346_v7, 4  ;;  %v1365_v56 = vrot.slane %v1363_v5, 5  ;;  %v2411_v52 = vld [vmem:[%s3139_s5 + $0x30] sm:$0xf] }
  0x89   : > { %2826 = vmatprep.subr.bf16.mxu1 %v3179_v20  ;;  %v1360_v58 = vor.u32 %v1359_v16, %v1356_v6  ;;  %v1767_v59 = vshrl.u32 %v2407_v2, 16  ;;  %v1770_v15 = vshll.u32 %v2407_v2, 16  ;;  %v1781_v41 = vshrl.u32 %v2409_v45, 16  ;;  %v2413_v6 = vld [vmem:[%s3139_s5 + $0x40] sm:$0xf] }
  0x8a   : > { %2747 = vmatmul.mubr.bf16.vlgmr.msra.gmra.mxu0 %v2400_v1  ;;  %v1324_v1 = vsel %vm3311_vm2, %v1319_v12, %v3432_v62  ;;  %v1374_v48 = vor.u32 %v1373_v37, %v1370_v17  ;;  %v3464_v62 = vrot.slane %v1377_v46, 5  ;;  %v1391_v47 = vshll.u32 %v1167_v53, 16  ;;  %v2412_v5 = vld [vmem:[%s3139_s5 + $0x38] sm:$0x1]  ;;  %v2415_v37 = vld [vmem:[%s3139_s5 + $0x50] sm:$0xf] }
  0x8b   : > { %2779 = vmatmul.mubr.bf16.vlgmr.msra.gmra.mxu1 %v3174_v18  ;;  %2795 = vmatpush3.bf16.msra.mxu0 %v3176_v19  ;;  %v2408_v18 = vld [vmem:[%s3139_s5 + $0x18] sm:$0x1]  ;;  %v1338_v19 = vsel %vm3311_vm2, %v1333_v13, %v1337_v55  ;;  %v1361_v14 = vrot.slane %v1360_v58, 4  ;;  %v1769_v9 = vrot.slane %v1767_v59, 4  ;;  %v1772_v49 = vrot.slane %v1770_v15, 5 }
  0x8c   : > { %2827 = vmatpush3.bf16.msra.mxu1 %v3179_v20  ;;  %2796 = vmatprep.subr.bf16.mxu0 %v3183_v22  ;;  %v1387_v20 = vrot.slane %v1385_v42, 5  ;;  %v1776_v29 = vshll.u32 %v2408_v18, 16  ;;  %v2404_v10 = vcombine.low %v1324_v1, %v1338_v19  ;;  %v1783_v63 = vrot.slane %v1781_v41, 4  ;;  %v2414_v42 = vld [vmem:[%s3139_s5 + $0x48] sm:$0x1] }
  0x8d   : > { %2828 = vmatprep.subr.bf16.mxu1 %v3187_v23  ;;  %2750 = vmatprep.mubr.bf16.mxu0 %v2401_v61  ;;  %v1784_v51 = vshll.u32 %v2409_v45, 16  ;;  %v1773_v12 = vor.u32 %v1772_v49, %v1769_v9  ;;  %v1790_v7 = vshll.u32 %v2410_v8, 16  ;;  %v1795_v3 = vshrl.u32 %v2411_v52, 16  ;;  %v2419_v9 = vld [vmem:[%s3139_s5 + $0x70] sm:$0xf] }
  0x8e   : > { %2782 = vmatprep.mubr.bf16.mxu1 %v3191_v24  ;;  %v1388_v61 = vor.u32 %v1387_v20, %v1384_v57  ;;  %v1352_v24 = vsel %vm3311_vm2, %v1347_v50, %v1351_v25  ;;  %v1798_v55 = vshll.u32 %v2411_v52, 16  ;;  %v1809_v16 = vshrl.u32 %v2413_v6, 16  ;;  %v2417_v57 = vld [vmem:[%s3139_s5 + $0x60] sm:$0xf]  ;;  %v2418_v20 = vld [vmem:[%s3139_s5 + $0x68] sm:$0x1] }
  0x8f   : > { %2797 = vmatpush3.bf16.msra.mxu0 %v3183_v22  ;;  %v1366_v22 = vsel %vm3311_vm2, %v1361_v14, %v1365_v56  ;;  %v1786_v13 = vrot.slane %v1784_v51, 5  ;;  %v1393_v2 = vrot.slane %v1391_v47, 5  ;;  %v3482_v53 = vrot.slane %v1776_v29, 5  ;;  %v2416_v56 = vld [vmem:[%s3139_s5 + $0x58] sm:$0x1] }
  0x90   : > { %2829 = vmatpush3.bf16.msra.mxu1 %v3187_v23  ;;  %2798 = vmatprep.subr.bf16.mxu0 %v3201_v27  ;;  %v3478_v23 = vrot.slane %v1374_v48, 4  ;;  %v1389_v11 = vrot.slane %v1388_v61, 4  ;;  %v1797_v17 = vrot.slane %v1795_v3, 4  ;;  %v1800_v25 = vrot.slane %v1798_v55, 5  ;;  %v2421_v61 = vld [vmem:[%s3139_s5 + $0x80] sm:$0xf] }
  0x91   : > { %2830 = vmatprep.subr.bf16.mxu1 %v3205_v28  ;;  %v1787_v46 = vor.u32 %v1786_v13, %v1783_v63  ;;  %v1804_v58 = vshll.u32 %v2412_v5, 16  ;;  %v1811_v45 = vrot.slane %v1809_v16, 4  ;;  %v1812_v1 = vshll.u32 %v2413_v6, 16  ;;  %v3518_v63 = vld [vmem:[%s3139_s5 + $0x78] sm:$0x1] }
  0x92   : > { %2751 = vmatmul.mubr.bf16.gmra.mxu0 %v3430_v54  ;;  %v2405_v54 = vcombine.low %v1352_v24, %v1366_v22  ;;  %v1801_v50 = vor.u32 %v1800_v25, %v1797_v17  ;;  %v1823_v18 = vshrl.u32 %v2415_v37, 16  ;;  %v1826_v59 = vshll.u32 %v2415_v37, 16  ;;  %v2423_v3 = vld [vmem:[%s3139_s5 + $0x90] sm:$0xf]  ;;  %v2425_v55 = vld [vmem:[%s3139_s5 + $0xa0] sm:$0xf] }
  0x93   : > { %2783 = vmatmul.mubr.bf16.gmra.mxu1 %v3199_v26  ;;  %2799 = vmatpush3.bf16.msra.mxu0 %v3201_v27  ;;  %v1774_v26 = vrot.slane %v1773_v12, 4  ;;  %v1792_v27 = vrot.slane %v1790_v7, 5  ;;  %v1394_v19 = vsel %vm3311_vm2, %v1389_v11, %v1393_v2  ;;  %v1814_v14 = vrot.slane %v1812_v1, 5 }
  0x94   : > { %2831 = vmatpush3.bf16.msra.mxu1 %v3205_v28  ;;  %2800 = vmatprep.subr.bf16.mxu0 %v3209_v30  ;;  %v1788_v28 = vrot.slane %v1787_v46, 4  ;;  %v3503_v8 = vrot.slane %v1804_v58, 5  ;;  %v1818_v15 = vshll.u32 %v2414_v42, 16  ;;  %v1828_v48 = vrot.slane %v1826_v59, 5  ;;  %v2424_v46 = vld [vmem:[%s3139_s5 + $0x98] sm:$0x1] }
  0x95   : > { %2832 = vmatprep.subr.bf16.mxu1 %v3213_v31  ;;  %2754 = vmatprep.mubr.bf16.mxu0 %v3447_v33  ;;  %v1380_v33 = vsel %vm3311_vm2, %v3478_v23, %v3464_v62  ;;  %v1779_v62 = vsel %vm3311_vm2, %v1774_v26, %v3482_v53  ;;  %v1815_v52 = vor.u32 %v1814_v14, %v1811_v45  ;;  %v3513_v47 = vrot.slane %v1801_v50, 4  ;;  %v2422_v53 = vld [vmem:[%s3139_s5 + $0x88] sm:$0x1]  ;;  %v2429_v59 = vld [vmem:[%s3139_s5 + $0xc0] sm:$0xf] }
  0x96   : > { %2786 = vmatprep.mubr.bf16.mxu1 %v3217_v32  ;;  %v1837_v32 = vshrl.u32 %v2417_v57, 16  ;;  %v1793_v41 = vsel %vm3311_vm2, %v1788_v28, %v1792_v27  ;;  %v1840_v6 = vshll.u32 %v2417_v57, 16  ;;  %v1846_v24 = vshll.u32 %v2418_v20, 16  ;;  %v2426_v45 = vld [vmem:[%s3139_s5 + $0xa8] sm:$0x1] }
  0x97   : > { %2801 = vmatpush3.bf16.msra.mxu0 %v3209_v30  ;;  %v1825_v30 = vrot.slane %v1823_v18, 4  ;;  %v1851_v51 = vshrl.u32 %v2419_v9, 16  ;;  %v1854_v22 = vshll.u32 %v2419_v9, 16  ;;  %v1820_v12 = vrot.slane %v1818_v15, 5  ;;  %v2427_v28 = vld [vmem:[%s3139_s5 + $0xb0] sm:$0xf] }
  0x98   : > { %2833 = vmatpush3.bf16.msra.mxu1 %v3213_v31  ;;  %2802 = vmatprep.subr.bf16.mxu0 %v3227_v35  ;;  %v1832_v31 = vshll.u32 %v2416_v56, 16  ;;  %v1839_v29 = vrot.slane %v1837_v32, 4  ;;  %v1842_v7 = vrot.slane %v1840_v6, 5  ;;  %v1865_v5 = vshrl.u32 %v2421_v61, 16  ;;  %v2431_v6 = vld [vmem:[%s3139_s5 + $0xd0] sm:$0xf] }
  0x99   : > { %2834 = vmatprep.subr.bf16.mxu1 %v3231_v36  ;;  %v1829_v49 = vor.u32 %v1828_v48, %v1825_v30  ;;  %v1853_v23 = vrot.slane %v1851_v51, 4  ;;  %v1856_v13 = vrot.slane %v1854_v22, 5  ;;  %v1848_v17 = vrot.slane %v1846_v24, 5  ;;  %v2428_v51 = vld [vmem:[%s3139_s5 + $0xb8] sm:$0x1] }
  0x9a   : > { %2755 = vmatmul.mubr.bf16.gmra.mxu0 %v2404_v10  ;;  %v2406_v10 = vcombine.low %v1380_v33, %v1394_v19  ;;  %v1834_v11 = vrot.slane %v1832_v31, 5  ;;  %v1843_v2 = vor.u32 %v1842_v7, %v1839_v29  ;;  %v1867_v37 = vrot.slane %v1865_v5, 4  ;;  %v3742_v33 = vld [vmem:[#allocation8_spill] sm:$0xff] }
  0x9b   : > { %2787 = vmatmul.mubr.bf16.gmra.mxu1 %v3225_v34  ;;  %2803 = vmatpush3.bf16.msra.mxu0 %v3227_v35  ;;  %v2439_v34 = vcombine.low %v1779_v62, %v1793_v41  ;;  %v1816_v35 = vrot.slane %v1815_v52, 4  ;;  %v1830_v16 = vrot.slane %v1829_v49, 4  ;;  %v1879_v25 = vshrl.u32 %v2423_v3, 16  ;;  %v3744_v62 = vld [vmem:[#allocation10_spill] sm:$0xff]  ;;  %v3745_v41 = vld [vmem:[#allocation11_spill] sm:$0xff] }
  0x9c   : > { %2835 = vmatpush3.bf16.msra.mxu1 %v3231_v36  ;;  %2804 = vmatprep.subr.bf16.mxu0 %v3235_v38  ;;  %v1807_v36 = vsel %vm3311_vm2, %v3513_v47, %v3503_v8  ;;  %v1860_v58 = vshll.u32 %v3518_v63, 16  ;;  %v1882_v57 = vshll.u32 %v2423_v3, 16  ;;  %v1893_v26 = vshrl.u32 %v2425_v55, 16  ;;  %v3743_v8 = vld [vmem:[#allocation9_spill] sm:$0xff]  ;;  %v2430_v3 = vld [vmem:[%s3139_s5 + $0xc8] sm:$0x1] }
  0x9d   : > { %2836 = vmatprep.subr.bf16.mxu1 %v3239_v39  ;;  %2758 = vmatprep.mubr.bf16.mxu0 %v2405_v54  ;;  %v1868_v54 = vshll.u32 %v2421_v61, 16  ;;  %v1857_v27 = vor.u32 %v1856_v13, %v1853_v23  ;;  %v1881_v1 = vrot.slane %v1879_v25, 4  ;;  %v1874_v50 = vshll.u32 %v2422_v53, 16 }
  0x9e   : > { %2790 = vmatprep.mubr.bf16.mxu1 %v3243_v40  ;;  %v1844_v40 = vrot.slane %v1843_v2, 4  ;;  %v1884_v56 = vrot.slane %v1882_v57, 5  ;;  %v1888_v18 = vshll.u32 %v2424_v46, 16  ;;  %v1895_v20 = vrot.slane %v1893_v26, 4  ;;  %v3747_v46 = vld [vmem:[#allocation13_spill] sm:$0xff] }
  0x9f   : > { %2805 = vmatpush3.bf16.msra.mxu0 %v3235_v38  ;;  %v1821_v38 = vsel %vm3311_vm2, %v1816_v35, %v1820_v12  ;;  %v1870_v42 = vrot.slane %v1868_v54, 5  ;;  %v1896_v32 = vshll.u32 %v2425_v55, 16  ;;  %v1902_v30 = vshll.u32 %v2426_v45, 16  ;;  %v2433_v12 = vld [vmem:[%s3139_s5 + $0xe0] sm:$0xf] }
  0xa0   : > { %2837 = vmatpush3.bf16.msra.mxu1 %v3239_v39  ;;  %2806 = vmatprep.subr.bf16.mxu0 %v3253_v43  ;;  %v1835_v39 = vsel %vm3311_vm2, %v1830_v16, %v1834_v11  ;;  %v1849_v19 = vsel %vm3311_vm2, %v1844_v40, %v1848_v17  ;;  %v1885_v15 = vor.u32 %v1884_v56, %v1881_v1  ;;  %v1907_v48 = vshrl.u32 %v2427_v28, 16  ;;  %v2432_v55 = vld [vmem:[%s3139_s5 + $0xd8] sm:$0x1]  ;;  %v3746_v11 = vld [vmem:[#allocation12_spill] sm:$0xff]  ;;  %v2435_v26 = vld [vmem:[%s3139_s5 + $0xf0] sm:$0xf] }
  0xa1   : > { %2838 = vmatprep.subr.bf16.mxu1 %v3257_v44  ;;  %v1871_v14 = vor.u32 %v1870_v42, %v1867_v37  ;;  %v1910_v9 = vshll.u32 %v2427_v28, 16  ;;  %v1862_v52 = vrot.slane %v1860_v58, 5  ;;  %v1898_v31 = vrot.slane %v1896_v32, 5  ;;  %v2434_v37 = vld [vmem:[%s3139_s5 + $0xe8] sm:$0x1] }
  0xa2   : > { %2759 = vmatmul.mubr.bf16.gmra.mxu0 %v2406_v10  ;;  %v1921_v61 = vshrl.u32 %v2429_v59, 16  ;;  %v1876_v49 = vrot.slane %v1874_v50, 5  ;;  %v1890_v29 = vrot.slane %v1888_v18, 5  ;;  %v2441_v24 = vcombine.low %v1835_v39, %v1849_v19  ;;  %v2437_v1 = vld [vmem:[%s3139_s5 + $0x100] sm:$0xf] }
  0xa3   : > { %2791 = vmatmul.mubr.bf16.gmra.mxu1 %v3742_v33  ;;  %2807 = vmatpush3.bf16.msra.mxu0 %v3253_v43  ;;  %v1858_v43 = vrot.slane %v1857_v27, 4  ;;  %v1872_v47 = vrot.slane %v1871_v14, 4  ;;  %v1899_v63 = vor.u32 %v1898_v31, %v1895_v20  ;;  %v1909_v22 = vrot.slane %v1907_v48, 4  ;;  %v2436_v48 = vld [vmem:[%s3139_s5 + $0xf8] sm:$0x1] }
  0xa4   : > { %2839 = vmatpush3.bf16.msra.mxu1 %v3257_v44  ;;  %2808 = vmatprep.subr.bf16.mxu0 %v3743_v8  ;;  %v2440_v44 = vcombine.low %v1807_v36, %v1821_v38  ;;  %v1912_v10 = vrot.slane %v1910_v9, 5  ;;  %v1886_v7 = vrot.slane %v1885_v15, 4  ;;  %v1904_v5 = vrot.slane %v1902_v30, 5 }
  0xa5   : > { %2840 = vmatprep.subr.bf16.mxu1 %v3744_v62  ;;  %2810 = vmatprep.mubr.bf16.mxu0 %v3745_v41  ;;  %v1924_v35 = vshll.u32 %v2429_v59, 16  ;;  %v1863_v23 = vsel %vm3311_vm2, %v1858_v43, %v1862_v52  ;;  %v1900_v13 = vrot.slane %v1899_v63, 4  ;;  %v1935_v36 = vshrl.u32 %v2431_v6, 16 }
  0xa6   : > { %2842 = vmatprep.mubr.bf16.mxu1 %v2439_v34  ;;  %v1923_v34 = vrot.slane %v1921_v61, 4  ;;  %v1938_v16 = vshll.u32 %v2431_v6, 16  ;;  %v1877_v2 = vsel %vm3311_vm2, %v1872_v47, %v1876_v49  ;;  %v1916_v53 = vshll.u32 %v2428_v51, 16  ;;  %v2438_v61 = vld [vmem:[%s3139_s5 + $0x108] sm:$0x1] }
  0xa7   : > { %2809 = vmatpush3.bf16.msra.mxu0 %v3743_v8  ;;  %v1926_v17 = vrot.slane %v1924_v35, 5  ;;  %v1949_v54 = vshrl.u32 %v2433_v12, 16  ;;  %v1913_v25 = vor.u32 %v1912_v10, %v1909_v22  ;;  %v1930_v40 = vshll.u32 %v2430_v3, 16 }
  0xa8   : > { %2841 = vmatpush3.bf16.msra.mxu1 %v3744_v62  ;;  %v1937_v58 = vrot.slane %v1935_v36, 4  ;;  %v1940_v57 = vrot.slane %v1938_v16, 5  ;;  %v1891_v38 = vsel %vm3311_vm2, %v1886_v7, %v1890_v29  ;;  %v1905_v27 = vsel %vm3311_vm2, %v1900_v13, %v1904_v5  ;;  %v3749_v29 = vld [vmem:[#allocation15_spill] sm:$0xff] }
  0xa9   : > { %v1927_v42 = vor.u32 %v1926_v17, %v1923_v34  ;;  %v1944_v45 = vshll.u32 %v2432_v55, 16  ;;  %v1951_v39 = vrot.slane %v1949_v54, 4  ;;  %v1952_v50 = vshll.u32 %v2433_v12, 16 }
  0xaa   : > { %2811 = vmatmul.mubr.bf16.vlgmr.msra.gmra.mxu0 %v3746_v11  ;;  %v1941_v28 = vor.u32 %v1940_v57, %v1937_v58  ;;  %v1958_v56 = vshll.u32 %v2434_v37, 16  ;;  %v2442_v18 = vcombine.low %v1863_v23, %v1877_v2  ;;  %v1918_v59 = vrot.slane %v1916_v53, 5 }
  0xab   : > { %2843 = vmatmul.mubr.bf16.vlgmr.msra.gmra.mxu1 %v2440_v44  ;;  %2814 = vmatprep.mubr.bf16.mxu0 %v3747_v46  ;;  %v1963_v33 = vshrl.u32 %v2435_v26, 16  ;;  %v1966_v19 = vshll.u32 %v2435_v26, 16  ;;  %v1914_v14 = vrot.slane %v1913_v25, 4  ;;  %v1932_v20 = vrot.slane %v1930_v40, 5  ;;  %v3748_v44 = vld [vmem:[#allocation14_spill] sm:$0xff] }
  0xac   : > { %2846 = vmatprep.mubr.bf16.mxu1 %v2441_v24  ;;  %v1954_v32 = vrot.slane %v1952_v50, 5  ;;  %v1977_v8 = vshrl.u32 %v2437_v1, 16  ;;  %v2443_v15 = vcombine.low %v1891_v38, %v1905_v27  ;;  %v1928_v30 = vrot.slane %v1927_v42, 4 }
  0xad   : > { %v1965_v9 = vrot.slane %v1963_v33, 4  ;;  %v1968_v62 = vrot.slane %v1966_v19, 5  ;;  %v1942_v41 = vrot.slane %v1941_v28, 4  ;;  %v1946_v43 = vrot.slane %v1944_v45, 5 }
  0xae   : > { %v1955_v52 = vor.u32 %v1954_v32, %v1951_v39  ;;  %v1960_v31 = vrot.slane %v1958_v56, 5  ;;  %v1979_v47 = vrot.slane %v1977_v8, 4  ;;  %v1980_v49 = vshll.u32 %v2437_v1, 16 }
  0xaf   : > { %v1919_v6 = vsel %vm3311_vm2, %v1914_v14, %v1918_v59  ;;  %v1972_v63 = vshll.u32 %v2436_v48, 16  ;;  %v1933_v51 = vsel %vm3311_vm2, %v1928_v30, %v1932_v20  ;;  %v1969_v22 = vor.u32 %v1968_v62, %v1965_v9 }
  0xb0   : > { %v1956_v24 = vrot.slane %v1955_v52, 4  ;;  %v1982_v10 = vrot.slane %v1980_v49, 5  ;;  %v1986_v12 = vshll.u32 %v2438_v61, 16  ;;  %v1947_v7 = vsel %vm3311_vm2, %v1942_v41, %v1946_v43 }
  0xb1   : > { %v2444_v34 = vcombine.low %v1919_v6, %v1933_v51  ;;  %v1974_v35 = vrot.slane %v1972_v63, 5  ;;  %v1970_v13 = vrot.slane %v1969_v22, 4 }
  0xb2   : > { %2815 = vmatmul.mubr.bf16.gmra.mxu0 %v3748_v44  ;;  %v1961_v5 = vsel %vm3311_vm2, %v1956_v24, %v1960_v31  ;;  %v1983_v3 = vor.u32 %v1982_v10, %v1979_v47  ;;  %v1988_v36 = vrot.slane %v1986_v12, 5 }
  0xb3   : > { %2847 = vmatmul.mubr.bf16.gmra.mxu1 %v2442_v18  ;;  %2818 = vmatprep.mubr.bf16.mxu0 %v3749_v29  ;;  %v2445_v23 = vcombine.low %v1947_v7, %v1961_v5  ;;  %v1975_v16 = vsel %vm3311_vm2, %v1970_v13, %v1974_v35 }
  0xb4   : > { %2850 = vmatprep.mubr.bf16.mxu1 %v2443_v15  ;;  %v1984_v55 = vrot.slane %v1983_v3, 4 }
  0xb6   : > { %v1989_v11 = vsel %vm3311_vm2, %v1984_v55, %v1988_v36 }
  0xb7   : > { %v2446_v2 = vcombine.low %v1975_v16, %v1989_v11 }
  0xba   : > { %2819 = vmatmul.mubr.bf16.gmra.mxu0 %v3346_v4 }
  0xbb   : > { %2851 = vmatmul.mubr.bf16.gmra.mxu1 %v2444_v34  ;;  %2822 = vmatprep.mubr.bf16.mxu0 %v3362_v0 }
  0xbc   : > { %2854 = vmatprep.mubr.bf16.mxu1 %v2445_v23 }
  0xc2   : > { %2823 = vmatmul.mubr.bf16.gmra.mxu0 %v3400_v21 }
  0xc3   : > { %2855 = vmatmul.mubr.bf16.gmra.mxu1 %v2446_v2 }
 0x10a   : > { %v2620_v53 = vpop.f32.mrf.mxu0 }
 0x10b   : > { %v2652_v17 = vpop.f32.mrf.mxu1 }
 0x10c   : > { %v597_v37 = vadd.f32 %v2652_v17, %v2620_v53  ;;  %v395_v54 = vpop.f32.mrf.mxu0 }
 0x10d   : > { %v588_v46 = vpop.f32.mrf.mxu1 }
 0x10e   : > { %v589_v4 = vadd.f32 %v588_v46, %v395_v54  ;;  %v2621_v25 = vpop.f32.mrf.mxu0 }
 0x10f   : > { %v2653_v40 = vpop.f32.mrf.mxu1 }
 0x110   : > { %v600_v0 = vadd.f32 %v2653_v40, %v2621_v25  ;;  %v398_v58 = vpop.f32.mrf.mxu0 }
 0x111   : > { %v591_v57 = vpop.f32.mrf.mxu1 }
 0x112   : > { %v592_v26 = vadd.f32 %v591_v57, %v398_v58  ;;  %v2624_v38 = vpop.f32.mrf.mxu0 }
 0x113   : > { %v2656_v27 = vpop.f32.mrf.mxu1 }
 0x114   : > { %v613_v60 = vadd.f32 %v2656_v27, %v2624_v38  ;;  %v411_v42 = vpop.f32.mrf.mxu0 }
 0x115   : > { %v604_v45 = vpop.f32.mrf.mxu1 }
 0x116   : > { %v605_v1 = vadd.f32 %v604_v45, %v411_v42  ;;  %v2625_v21 = vpop.f32.mrf.mxu0 }
 0x117   : > { %v2657_v28 = vpop.f32.mrf.mxu1 }
 0x118   : > { %v616_v39 = vadd.f32 %v2657_v28, %v2625_v21  ;;  %v414_v50 = vpop.f32.mrf.mxu0 }
 0x119   : > { %v607_v56 = vpop.f32.mrf.mxu1 }
 0x11a   : > { %v608_v18 = vadd.f32 %v607_v56, %v414_v50  ;;  %v2628_v59 = vpop.f32.mrf.mxu0 }
 0x11b   : > { %v2660_v33 = vpop.f32.mrf.mxu1 }
 0x11c   : > { %v629_v19 = vadd.f32 %v2660_v33, %v2628_v59  ;;  %v427_v14 = vpop.f32.mrf.mxu0 }
 0x11d   : > { %v620_v20 = vpop.f32.mrf.mxu1 }
 0x11e   : > { %v621_v32 = vadd.f32 %v620_v20, %v427_v14  ;;  %v2629_v8 = vpop.f32.mrf.mxu0 }
 0x11f   : > { %v2661_v15 = vpop.f32.mrf.mxu1 }
 0x120   : > { %v632_v30 = vadd.f32 %v2661_v15, %v2629_v8  ;;  %v430_v48 = vpop.f32.mrf.mxu0 }
 0x121   : > { %v623_v9 = vpop.f32.mrf.mxu1 }
 0x122   : > { %v624_v62 = vadd.f32 %v623_v9, %v430_v48  ;;  %v2632_v41 = vpop.f32.mrf.mxu0 }
 0x123   : > { %v2664_v43 = vpop.f32.mrf.mxu1 }
 0x124   : > { %v645_v52 = vadd.f32 %v2664_v43, %v2632_v41  ;;  %v443_v31 = vpop.f32.mrf.mxu0 }
 0x125   : > { %v636_v61 = vpop.f32.mrf.mxu1 }
 0x126   : > { %v637_v44 = vadd.f32 %v636_v61, %v443_v31  ;;  %v2633_v47 = vpop.f32.mrf.mxu0 }
 0x127   : > { %v2665_v49 = vpop.f32.mrf.mxu1 }
 0x128   : > { %v648_v29 = vadd.f32 %v2665_v49, %v2633_v47  ;;  %v446_v6 = vpop.f32.mrf.mxu0 }
 0x129   : > { %v639_v24 = vpop.f32.mrf.mxu1 }
 0x12a   : > { %v640_v63 = vadd.f32 %v639_v24, %v446_v6  ;;  %v2684_v51 = vpop.f32.mrf.mxu0 }
 0x12b   : > { %v880_v22 = vadd.f32 %v2684_v51, %v597_v37  ;;  %v2716_v10 = vpop.f32.mrf.mxu1 }
 0x12c   : > { %v815_v12 = vpop.f32.mrf.mxu0 }
 0x12d   : > { %v3591_v7 = vadd.f32 %v2716_v10, %v880_v22  ;;  %v878_v5 = vadd.f32 %v815_v12, %v589_v4  ;;  %v1057_v3 = vpop.f32.mrf.mxu1 }
 0x12e   : > { %v2685_v34 = vpop.f32.mrf.mxu0 }
 0x12f   : > { %v3593_v35 = vadd.f32 %v1057_v3, %v878_v5  ;;  %v881_v23 = vadd.f32 %v2685_v34, %v600_v0  ;;  %v2717_v13 = vpop.f32.mrf.mxu1 }
 0x130   : > { %v818_v55 = vpop.f32.mrf.mxu0 }
 0x131   : > { %v3595_v36 = vadd.f32 %v2717_v13, %v881_v23  ;;  %v879_v16 = vadd.f32 %v818_v55, %v592_v26  ;;  %v1060_v11 = vpop.f32.mrf.mxu1 }
 0x132   : > { %v2688_v2 = vpop.f32.mrf.mxu0 }
 0x133   : > { %v3597_v53 = vadd.f32 %v1060_v11, %v879_v16  ;;  %v884_v17 = vadd.f32 %v2688_v2, %v613_v60  ;;  %v2720_v37 = vpop.f32.mrf.mxu1 }
 0x134   : > { %v831_v54 = vpop.f32.mrf.mxu0 }
 0x135   : > { %v3599_v46 = vadd.f32 %v2720_v37, %v884_v17  ;;  %v882_v4 = vadd.f32 %v831_v54, %v605_v1  ;;  %v1073_v25 = vpop.f32.mrf.mxu1 }
 0x136   : > { %v2689_v40 = vpop.f32.mrf.mxu0 }
 0x137   : > { %v3601_v58 = vadd.f32 %v1073_v25, %v882_v4  ;;  %v885_v0 = vadd.f32 %v2689_v40, %v616_v39  ;;  %v2721_v57 = vpop.f32.mrf.mxu1 }
 0x138   : > { %v834_v38 = vpop.f32.mrf.mxu0 }
 0x139   : > { %v3603_v27 = vadd.f32 %v2721_v57, %v885_v0  ;;  %v883_v26 = vadd.f32 %v834_v38, %v608_v18  ;;  %v1076_v42 = vpop.f32.mrf.mxu1 }
 0x13a   : > { %v2692_v45 = vpop.f32.mrf.mxu0 }
 0x13b   : > { %v3605_v21 = vadd.f32 %v1076_v42, %v883_v26  ;;  %v888_v60 = vadd.f32 %v2692_v45, %v629_v19  ;;  %v2724_v28 = vpop.f32.mrf.mxu1 }
 0x13c   : > { %v847_v50 = vpop.f32.mrf.mxu0 }
 0x13d   : > { %v3607_v56 = vadd.f32 %v2724_v28, %v888_v60  ;;  %v886_v1 = vadd.f32 %v847_v50, %v621_v32  ;;  %v1089_v59 = vpop.f32.mrf.mxu1 }
 0x13e   : > { %v2693_v33 = vpop.f32.mrf.mxu0 }
 0x13f   : > { %v3609_v14 = vadd.f32 %v1089_v59, %v886_v1  ;;  %v889_v39 = vadd.f32 %v2693_v33, %v632_v30  ;;  %v2725_v20 = vpop.f32.mrf.mxu1 }
 0x140   : > { %v850_v8 = vpop.f32.mrf.mxu0 }
 0x141   : > { %v3611_v15 = vadd.f32 %v2725_v20, %v889_v39  ;;  %v887_v18 = vadd.f32 %v850_v8, %v624_v62  ;;  %v1092_v48 = vpop.f32.mrf.mxu1 }
 0x142   : > { %v2696_v9 = vpop.f32.mrf.mxu0 }
 0x143   : > { %v3613_v41 = vadd.f32 %v1092_v48, %v887_v18  ;;  %v892_v19 = vadd.f32 %v2696_v9, %v645_v52  ;;  %v2728_v43 = vpop.f32.mrf.mxu1 }
 0x144   : > { %v863_v31 = vpop.f32.mrf.mxu0 }
 0x145   : > { %v3615_v61 = vadd.f32 %v2728_v43, %v892_v19  ;;  %v890_v32 = vadd.f32 %v863_v31, %v637_v44  ;;  %v1105_v47 = vpop.f32.mrf.mxu1 }
 0x146   : > { %v2697_v49 = vpop.f32.mrf.mxu0 }
 0x147   : > { %v3617_v6 = vadd.f32 %v1105_v47, %v890_v32  ;;  %v893_v30 = vadd.f32 %v2697_v49, %v648_v29  ;;  %v2729_v24 = vpop.f32.mrf.mxu1 }
 0x148   : > { %v866_v51 = vpop.f32.mrf.mxu0 }
 0x149   : > { %v3619_v22 = vadd.f32 %v2729_v24, %v893_v30  ;;  %v891_v62 = vadd.f32 %v866_v51, %v640_v63  ;;  %v1108_v10 = vpop.f32.mrf.mxu1  ;;  %v3654_v51 = vld [vmem:[#allocation4] ss:$0 sm:$0xff] }
 0x14a   : > { %v2748_v12 = vpop.f32.mrf.mxu0 }
 0x14b   : > { %v3621_v5 = vadd.f32 %v1108_v10, %v891_v62  ;;  %v2780_v52 = vpop.f32.mrf.mxu1 }
 0x14c   : > { %v1461_v3 = vpop.f32.mrf.mxu0  ;;  %v1567_v39 = vadd.f32 %v2780_v52, %v2748_v12 }
 0x14d   : > { %3750 = vst [vmem:[#allocation8_spill] sm:$0xff] %v3621_v5  ;;  %v1558_v34 = vpop.f32.mrf.mxu1 }
 0x14e   : > { %v2749_v23 = vpop.f32.mrf.mxu0  ;;  %v1559_v18 = vadd.f32 %v1558_v34, %v1461_v3 }
 0x14f   : > { %v2781_v13 = vpop.f32.mrf.mxu1 }
 0x150   : > { %v1464_v44 = vpop.f32.mrf.mxu0  ;;  %v1570_v43 = vadd.f32 %v2781_v13, %v2749_v23 }
 0x151   : > { %v1561_v55 = vpop.f32.mrf.mxu1 }
 0x152   : > { %v2752_v16 = vpop.f32.mrf.mxu0  ;;  %v1562_v30 = vadd.f32 %v1561_v55, %v1464_v44 }
 0x153   : > { %v2784_v11 = vpop.f32.mrf.mxu1 }
 0x154   : > { %v1477_v2 = vpop.f32.mrf.mxu0 }
 0x155   : > { %v1574_v29 = vpop.f32.mrf.mxu1 }
 0x156   : > { %v2753_v17 = vpop.f32.mrf.mxu0 }
 0x157   : > { %v2785_v37 = vpop.f32.mrf.mxu1 }
 0x158   : > { %v3623_v54 = vpop.f32.mrf.mxu0 }
 0x159   : > { %v1577_v63 = vpop.f32.mrf.mxu1 }
 0x15a   : > { %v2756_v4 = vpop.f32.mrf.mxu0 }
 0x15b   : > { %v2788_v25 = vpop.f32.mrf.mxu1 }
 0x15c   : > { %v3625_v40 = vpop.f32.mrf.mxu0 }
 0x15d   : > { %v3627_v0 = vpop.f32.mrf.mxu1 }
 0x15e   : > { %v3629_v57 = vpop.f32.mrf.mxu0 }
 0x15f   : > { %v3631_v38 = vpop.f32.mrf.mxu1 }
 0x160   : > { %v3633_v26 = vpop.f32.mrf.mxu0 }
 0x161   : > { %v3635_v42 = vpop.f32.mrf.mxu1 }
 0x162   : > { %v3637_v45 = vpop.f32.mrf.mxu0 }
 0x163   : > { %v3639_v60 = vpop.f32.mrf.mxu1 }
 0x164   : > { %v3641_v28 = vpop.f32.mrf.mxu0 }
 0x165   : > { %v3643_v50 = vpop.f32.mrf.mxu1 }
 0x166   : > { %v3645_v1 = vpop.f32.mrf.mxu0 }
 0x167   : > { %v3647_v59 = vpop.f32.mrf.mxu1 }
 0x168   : > { %v3649_v33 = vpop.f32.mrf.mxu0 }
 0x169   : > { %v3651_v20 = vpop.f32.mrf.mxu1 }
 0x16a   : > { %v2812_v8 = vpop.f32.mrf.mxu0 }
 0x16b   : > { %v1720_v48 = vadd.f32 %v2812_v8, %v1567_v39  ;;  %v2844_v9 = vpop.f32.mrf.mxu1  ;;  %v1583_v8 = vadd.f32 %v2784_v11, %v2752_v16 }
 0x16c   : > { %v1655_v19 = vpop.f32.mrf.mxu0 }
 0x16d   : > { %v2121_v31 = vadd.f32 %v2844_v9, %v1720_v48  ;;  %v1718_v32 = vadd.f32 %v1655_v19, %v1559_v18  ;;  %v2056_v47 = vpop.f32.mrf.mxu1  ;;  %v1575_v18 = vadd.f32 %v1574_v29, %v1477_v2  ;;  %v1586_v48 = vadd.f32 %v2785_v37, %v2753_v17 }
 0x16e   : > { %v2813_v49 = vpop.f32.mrf.mxu0  ;;  %v1578_v37 = vadd.f32 %v1577_v63, %v3623_v54 }
 0x16f   : > { %v2137_v24 = vmax.f32 %v3591_v7, %v2121_v31  ;;  %v2119_v62 = vadd.f32 %v2056_v47, %v1718_v32  ;;  %v1721_v10 = vadd.f32 %v2813_v49, %v1570_v43  ;;  %v2845_v12 = vpop.f32.mrf.mxu1 }
 0x170   : > { %v1658_v52 = vpop.f32.mrf.mxu0 }
 0x171   : > { %v2135_v5 = vmax.f32 %v3593_v35, %v2119_v62  ;;  %v2122_v3 = vadd.f32 %v2845_v12, %v1721_v10  ;;  %v1719_v34 = vadd.f32 %v1658_v52, %v1562_v30  ;;  %v2059_v39 = vpop.f32.mrf.mxu1  ;;  %v2160_v23 = vadd.f32 %v3654_v51, %v2137_v24 }
 0x172   : > { %v2816_v13 = vpop.f32.mrf.mxu0  ;;  %v1599_v24 = vadd.f32 %v2788_v25, %v2756_v4  ;;  %v1602_v25 = vadd.f32 %v3631_v38, %v3629_v57 }
 0x173   : > { %v2138_v44 = vmax.f32 %v3595_v36, %v2122_v3  ;;  %v2120_v55 = vadd.f32 %v2059_v39, %v1719_v34  ;;  %v2848_v7 = vpop.f32.mrf.mxu1  ;;  %v1724_v9 = vadd.f32 %v2816_v13, %v1583_v8  ;;  %v2158_v43 = vadd.f32 %v3654_v51, %v2135_v5 }
 0x174   : > { %v1671_v19 = vpop.f32.mrf.mxu0  ;;  %v2176_v11 = vmax.f32 %v2160_v23, 0.0 }
 0x175   : > { %v2161_v31 = vadd.f32 %v3654_v51, %v2138_v44  ;;  %v2136_v35 = vmax.f32 %v3597_v53, %v2120_v55  ;;  %v1722_v32 = vadd.f32 %v1671_v19, %v1575_v18  ;;  %v2072_v16 = vpop.f32.mrf.mxu1  ;;  %v2125_v47 = vadd.f32 %v2848_v7, %v1724_v9 }
 0x176   : > { %v2817_v49 = vpop.f32.mrf.mxu0  ;;  %v2174_v10 = vmax.f32 %v2158_v43, 0.0 }
 0x177   : > { %v2177_v2 = vmax.f32 %v2161_v31, 0.0  ;;  %v2159_v36 = vadd.f32 %v3654_v51, %v2136_v35  ;;  %v2123_v29 = vadd.f32 %v2072_v16, %v1722_v32  ;;  %v1725_v30 = vadd.f32 %v2817_v49, %v1586_v48  ;;  %v2849_v17 = vpop.f32.mrf.mxu1 }
 0x178   : > { %v2141_v5 = vmax.f32 %v3599_v46, %v2125_v47  ;;  %v1674_v62 = vpop.f32.mrf.mxu0  ;;  %v1591_v46 = vadd.f32 %v3627_v0, %v3625_v40  ;;  %v1594_v48 = vadd.f32 %v3635_v42, %v3633_v26  ;;  %v1615_v26 = vadd.f32 %v3639_v60, %v3637_v45 }
 0x179   : > { %v2191_v53 = vmax.f32 %v2176_v11, %v2177_v2  ;;  %v2175_v12 = vmax.f32 %v2159_v36, 0.0  ;;  %v2126_v52 = vadd.f32 %v2849_v17, %v1725_v30  ;;  %v2075_v3 = vpop.f32.mrf.mxu1  ;;  %v2139_v34 = vmax.f32 %v3601_v58, %v2123_v29 }
 0x17a   : > { %v1723_v39 = vadd.f32 %v1674_v62, %v1578_v37  ;;  %v2820_v8 = vpop.f32.mrf.mxu0  ;;  %v2164_v13 = vadd.f32 %v3654_v51, %v2141_v5  ;;  %v1607_v2 = vadd.f32 %v3643_v50, %v3641_v28 }
 0x17b   : > { %v2190_v23 = vmax.f32 %v2174_v10, %v2175_v12  ;;  %v2142_v18 = vmax.f32 %v3603_v27, %v2126_v52  ;;  %v1728_v54 = vadd.f32 %v2820_v8, %v1599_v24  ;;  %v2852_v63 = vpop.f32.mrf.mxu1  ;;  %v2162_v40 = vadd.f32 %v3654_v51, %v2139_v34 }
 0x17c   : > { %v2124_v4 = vadd.f32 %v2075_v3, %v1723_v39  ;;  %v1687_v58 = vpop.f32.mrf.mxu0  ;;  %v2180_v43 = vmax.f32 %v2164_v13, 0.0  ;;  %v1618_v52 = vadd.f32 %v3647_v59, %v3645_v1 }
 0x17d   : > { %v2454_v44 = vpack.c.bf16 %v2191_v53, %v2190_v23  ;;  %v2165_v55 = vadd.f32 %v3654_v51, %v2142_v18  ;;  %v2129_v27 = vadd.f32 %v2852_v63, %v1728_v54  ;;  %v2088_v7 = vpop.f32.mrf.mxu1  ;;  %v1726_v9 = vadd.f32 %v1687_v58, %v1591_v46 }
 0x17e   : > { %v2140_v0 = vmax.f32 %v3605_v21, %v2124_v4  ;;  %v2821_v19 = vpop.f32.mrf.mxu0  ;;  %v2178_v36 = vmax.f32 %v2162_v40, 0.0  ;;  %v1610_v18 = vadd.f32 %v3651_v20, %v3649_v33  ;;  %v3751_v40 = vld [vmem:[#allocation8_spill] sm:$0xff] }
 0x17f   : > { %2455 = vst [vmem:[%s3674_s9] sm:$0xff] %v2454_v44   ;;  %v2181_v31 = vmax.f32 %v2165_v55, 0.0  ;;  %v2145_v35 = vmax.f32 %v3607_v56, %v2129_v27  ;;  %v1729_v57 = vadd.f32 %v2821_v19, %v1602_v25  ;;  %v2853_v38 = vpop.f32.mrf.mxu1  ;;  %v2127_v16 = vadd.f32 %v2088_v7, %v1726_v9 }
 0x180   : > { %v2163_v32 = vadd.f32 %v3654_v51, %v2140_v0  ;;  %v1690_v11 = vpop.f32.mrf.mxu0 }
 0x181   : > { %v2193_v42 = vmax.f32 %v2180_v43, %v2181_v31  ;;  %v2130_v47 = vadd.f32 %v2853_v38, %v1729_v57  ;;  %v1727_v49 = vadd.f32 %v1690_v11, %v1594_v48  ;;  %v2091_v21 = vpop.f32.mrf.mxu1  ;;  %v2143_v56 = vmax.f32 %v3609_v14, %v2127_v16 }
 0x182   : > { %v2179_v29 = vmax.f32 %v2163_v32, 0.0  ;;  %v2824_v30 = vpop.f32.mrf.mxu0  ;;  %v2168_v17 = vadd.f32 %v3654_v51, %v2145_v35 }
 0x183   : > { %v2146_v37 = vmax.f32 %v3611_v15, %v2130_v47  ;;  %v2128_v24 = vadd.f32 %v2091_v21, %v1727_v49  ;;  %v1732_v5 = vadd.f32 %v2824_v30, %v1615_v26  ;;  %v2856_v62 = vpop.f32.mrf.mxu1  ;;  %v2166_v60 = vadd.f32 %v3654_v51, %v2143_v56 }
 0x184   : > { %v2192_v45 = vmax.f32 %v2178_v36, %v2179_v29  ;;  %v1703_v10 = vpop.f32.mrf.mxu0  ;;  %v2184_v34 = vmax.f32 %v2168_v17, 0.0 }
 0x185   : > { %v2169_v53 = vadd.f32 %v3654_v51, %v2146_v37  ;;  %v2144_v28 = vmax.f32 %v3613_v41, %v2128_v24  ;;  %v2133_v50 = vadd.f32 %v2856_v62, %v1732_v5  ;;  %v1730_v12 = vadd.f32 %v1703_v10, %v1607_v2  ;;  %v2104_v14 = vpop.f32.mrf.mxu1 }
 0x186   : > { %v2459_v3 = vpack.c.bf16 %v2193_v42, %v2192_v45  ;;  %v2825_v15 = vpop.f32.mrf.mxu0  ;;  %v2182_v46 = vmax.f32 %v2166_v60, 0.0 }
 0x187   : > { %v2185_v39 = vmax.f32 %v2169_v53, 0.0  ;;  %v2167_v8 = vadd.f32 %v3654_v51, %v2144_v28  ;;  %v2131_v23 = vadd.f32 %v2104_v14, %v1730_v12  ;;  %v2857_v13 = vpop.f32.mrf.mxu1  ;;  %v2149_v41 = vmax.f32 %v3615_v61, %v2133_v50 }
 0x188   : > { %2471 = vst [vmem:[%s3674_s9 + $0x8] sm:$0xff] %v2459_v3   ;;  %v1733_v54 = vadd.f32 %v2825_v15, %v1618_v52  ;;  %v1706_v63 = vpop.f32.mrf.mxu0 }
 0x189   : > { %v2195_v4 = vmax.f32 %v2184_v34, %v2185_v39  ;;  %v2183_v1 = vmax.f32 %v2167_v8, 0.0  ;;  %v2147_v59 = vmax.f32 %v3617_v6, %v2131_v23  ;;  %v1731_v25 = vadd.f32 %v1706_v63, %v1610_v18  ;;  %v2107_v55 = vpop.f32.mrf.mxu1 }
 0x18a   : > { %v2134_v58 = vadd.f32 %v2857_v13, %v1733_v54  ;;  %v2172_v27 = vadd.f32 %v3654_v51, %v2149_v41 }
 0x18b   : > { %v2194_v44 = vmax.f32 %v2182_v46, %v2183_v1  ;;  %v2132_v20 = vadd.f32 %v2107_v55, %v1731_v25  ;;  %v2170_v61 = vadd.f32 %v3654_v51, %v2147_v59 }
 0x18c   : > { %v2150_v33 = vmax.f32 %v3619_v22, %v2134_v58  ;;  %v2188_v9 = vmax.f32 %v2172_v27, 0.0 }
 0x18d   : > { %v2464_v7 = vpack.c.bf16 %v2195_v4, %v2194_v44  ;;  %v2148_v0 = vmax.f32 %v3751_v40, %v2132_v20  ;;  %v2186_v43 = vmax.f32 %v2170_v61, 0.0 }
 0x18e   : > { %v2173_v48 = vadd.f32 %v3654_v51, %v2150_v33 }
 0x18f   : > { %2472 = vst [vmem:[%s3674_s9 + $0x10] sm:$0xff] %v2464_v7   ;;  %v2171_v19 = vadd.f32 %v3654_v51, %v2148_v0 }
 0x190   : > { %v2189_v6 = vmax.f32 %v2173_v48, 0.0 }
 0x191   : > { %v2187_v35 = vmax.f32 %v2171_v19, 0.0 }
 0x192   : > { %v2197_v31 = vmax.f32 %v2188_v9, %v2189_v6 }
 0x193   : > { %v2196_v57 = vmax.f32 %v2186_v43, %v2187_v35 }
 0x195   : > { %v2469_v38 = vpack.c.bf16 %v2197_v31, %v2196_v57 }
 0x197   : > { %2473 = vst [vmem:[%s3674_s9 + $0x18] sm:$0xff] %v2469_v38  }
 0x198 PF: > { %s15_s12 = sadd.s32 1, %s3020_s12  }
 0x199   : > { %p12_p2 = scmp.ge.s32.totalorder %s15_s12, 4  }
 0x19b   :  { %14 = sbr.rel (!%p12_p2) target bundleno = 2 (0x2), region = 75 }
 0x1a0   :  { %2235 = vsyncpa [#allocation3], 1 }
 0x1a1   :  { %2237 = vsyncpa [#allocation3 + $0x1], 1 }
 0x1a2   :  { %2238 = vsyncpa [#allocation5], 1 }

// kernel: simple_nnn_forward.3
= control target key start
LH: loop header
LB: loop body
LE: loop exit
PB: predicated region body
PF: predicated region fallthrough
CT: control target
= control target key end

     0   :  { %8 = vsyncpa [#allocation3], 0  ;;  %s7986_s12 = smov 0   ;;  %s11470_s0 = inlined_call_operand.vmem [shape: bf16[2,34,17,6], index: 0, kind: input, shape index: {}]   ;;  %s11471_s1 = inlined_call_operand.vmem [shape: bf16[2,2,3,128], index: 1, kind: input, shape index: {}]   ;;  %s11472_s2 = inlined_call_operand.hbm [shape: f32[1,128], index: 2, kind: input, shape index: {}]   ;;  %s11473_s3 = inlined_call_operand.vmem [shape: bf16[2,16,16,128], index: 3, kind: output, shape index: {}]  }
   0x1 LB: > { %s6311_s13 = sadd.s32 4294967295, %s7961_s12   ;;  %p6313_p0 = scmp.ge.s32.totalorder %s7961_s12, 1  ;;  %s7961_s12 = sphi %s7986_s12, %s14_s12  }
   0x2   : > { %p113_p1 = scmp.lt.s32.totalorder %s7961_s12, 3  ;;  %p7832_p3 = scmp.eq.s32.totalorder %s6311_s13, 0 }
   0x3   : > { %s7963_s15 = smov [#allocation2]  }
   0x4   : > { %p7994_p2 = pnand %p6313_p0, %p113_p1  ;;  %s129_s16 = sshll.u32 %s7963_s15, 4  ;;  %s130_s16 = int_to_ptr.vmem [resolvable:$true] %s129_s16 }
   0x5   : > { %s7936_s17 = scalar_lea.vmem %s130_s16, 16  ;;  %s7943_s18 = scalar_lea.vmem %s130_s16, 32 }
   0x6   : > { %p7828_p4 = pneg %p7994_p2  ;;  %p7937_p7 = scmp.ne.s32.totalorder %s130_s16, %s7936_s17 }
   0x7   : > { %p7944_p10 = scmp.lt.s32.totalorder %s130_s16, %s130_s16  ;;  %p7945_p11 = scmp.lt.s32.totalorder %s7943_s18, %s7936_s17 }
   0x8   : > { %p7829_p5 = pnand %p7832_p3, %p7828_p4 }
   0x9   : > { %p7946_p12 = por %p7945_p11, %p7944_p10 }
   0xa   : > { %p7927_p6 = pneg %p7829_p5 }
   0xc   : > { %p7939_p8 = pnand %p7937_p7, %p7927_p6 }
   0xe   : > { %p7940_p9 = pneg %p7939_p8 }
  0x10   : > { %p7947_p13 = pnand %p7946_p12, %p7940_p9 }
  0x12   : > { %7950 = shalt.err (!%p7947_p13)
}
  0x13   : > { %7831 = dma.hbm_to_vmem [thread:$0]  (!%p7829_p5), %s11472_s2, 16, %s130_s16, [#allocation3]  }
  0x14   : > { %150 = sbr.rel (%p7994_p2) target bundleno = 870 (0x366), region = 32 }
  0x19   : > { %7956 = dma.done.wait (%p7832_p3), [#allocation3], 16  }
  0x1a   : > { %7958 = vsyncadd (%p7832_p3), [#allocation3], 4294967280  ;;  %p174_p0 = scmp.lt.s32.totalorder %s6311_s13, 1  ;;  %vm476_vm0 = vcmask 23552   ;;  %s7964_s25 = smov 125   ;;  %vm573_vm1 = vcmask 1040384  }
  0x1b   : > { %vm574_vm2 = vcmask 1041408   ;;  %v7965_v12 = vmov 65535   ;;  %v249_v17 = vld [vmem:[%s11471_s1] sm:$0x3]  ;;  %v6321_v31 = vld [vmem:[%s11471_s1 + $0x2] sm:$0x3] }
  0x1c   : > { %s12381_s13 = smov (!%p174_p0, %s6311_s13), 1  ;;  %v575_v13 = vsel %vm573_vm1, 4294967295, %v7965_v12  ;;  %v6482_v32 = vld [vmem:[%s11471_s1 + $0x4] sm:$0x3]  ;;  %v6547_v35 = vld [vmem:[%s11471_s1 + $0x6] sm:$0x3] }
  0x1d   : > { %s7823_s21 = smul.u32 408, %s12381_s13  ;;  %v576_v15 = vsel %vm574_vm2, %v575_v13, 0  ;;  %vm2550_vm3 = vsmask.f32 3328  ;;  %vm2551_vm4 = vsmask.f32 7440 }
  0x1e   : > { %v8065_v18 = vand.u32 %v576_v15, %v249_v17  ;;  %v8140_v33 = vand.u32 %v6321_v31, %v576_v15  ;;  %v8142_v34 = vand.u32 %v6482_v32, %v576_v15  ;;  %v8148_v36 = vand.u32 %v6547_v35, %v576_v15  ;;  %vm8656_vm5 = vmor %vm2550_vm3, %vm2551_vm4  ;;  %s6903_s7 = sshll.u32 %s12381_s13, 7 }
  0x1f   : > { %s8014_s24 = scalar_lea.vmem %s11470_s0, %s7823_s21  ;;  %s11079_s10 = scalar_lea.vmem %s11473_s3, %s6903_s7 }
  0x20   : > { %v7845_v0 = vld [vmem:[%s8014_s24] sm:$0xff]   ;;  %v7846_v1 = vld [vmem:[%s8014_s24 + $0x18] sm:$0xff]   ;;  %v7847_v2 = vld [vmem:[%s8014_s24 + $0xc] sm:$0xff]   ;;  %7361 = vmatprep.subr.bf16.mxu1 %v8065_v18  ;;  %11531 = vst [vmem:[#allocation5_spill] sm:$0xff] %v8142_v34  ;;  %7295 = vmatprep.subr.bf16.mxu0 %v8140_v33 }
  0x21   : > { %412 = vrot.lane.b32.xlu0 %v7845_v0, %s7964_s25  ;;  %7363 = vmatprep.mubr.msk.bf16.mxu1 %vm476_vm0, %v7845_v0  ;;  %v7848_v3 = vld [vmem:[%s8014_s24 + $0x24] sm:$0xff]   ;;  %v7849_v4 = vld [vmem:[%s8014_s24 + $0x30] sm:$0xff]   ;;  %v7850_v5 = vld [vmem:[%s8014_s24 + $0x3c] sm:$0xff]  }
  0x22   : > { %416 = vrot.lane.b32.xlu1 %v7846_v1, %s7964_s25  ;;  %v7851_v6 = vld [vmem:[%s8014_s24 + $0x48] sm:$0xff]   ;;  %v8031_v7 = vld [vmem:[%s8014_s24 + $0x54] sm:$0xff]   ;;  %v8035_v8 = vld [vmem:[%s8014_s24 + $0x60] sm:$0xff]   ;;  %7362 = vmatpush3.bf16.msra.mxu1 %v8065_v18 }
  0x23   : > { %v8040_v9 = vld [vmem:[%s8014_s24 + $0x6c] sm:$0xff]   ;;  %v8045_v10 = vld [vmem:[%s8014_s24 + $0x78] sm:$0xff]   ;;  %v8050_v11 = vld [vmem:[%s8014_s24 + $0x84] sm:$0xff]   ;;  %7296 = vmatpush3.bf16.msra.mxu0 %v8140_v33  ;;  %7493 = vmatprep.subr.bf16.mxu1 %v8148_v36 }
  0x24   : > { %v8055_v14 = vld [vmem:[%s8014_s24 + $0x90] sm:$0xff]   ;;  %v8060_v16 = vld [vmem:[%s8014_s24 + $0x9c] sm:$0xff]   ;;  %v8070_v19 = vld [vmem:[%s8014_s24 + $0xa8] sm:$0xff]   ;;  %7427 = vmatprep.subr.bf16.mxu0 %v8142_v34 }
  0x25   : > { %414 = vrot.lane.b32.xlu0 %v7847_v2, %s7964_s25  ;;  %v8075_v20 = vld [vmem:[%s8014_s24 + $0xb4] sm:$0xff]   ;;  %v8082_v21 = vld [vmem:[%s8014_s24 + $0xc0] sm:$0xff]   ;;  %v8087_v22 = vld [vmem:[%s8014_s24 + $0xcc] sm:$0xff]   ;;  %7364 = vmatmul.mubr.msk.bf16.vlgmr.msra.gmra.mxu1 %vm476_vm0, %v7847_v2 }
  0x26   : > { %418 = vrot.lane.b32.xlu1 %v7848_v3, %s7964_s25  ;;  %7367 = vmatprep.mubr.msk.bf16.mxu1 %vm476_vm0, %v7846_v1  ;;  %v8094_v23 = vld [vmem:[%s8014_s24 + $0xd8] sm:$0xff]   ;;  %v8099_v24 = vld [vmem:[%s8014_s24 + $0xe4] sm:$0xff]   ;;  %v8104_v25 = vld [vmem:[%s8014_s24 + $0xf0] sm:$0xff]  }
  0x27   : > { %v8109_v26 = vld [vmem:[%s8014_s24 + $0xfc] sm:$0xff]   ;;  %v8116_v27 = vld [vmem:[%s8014_s24 + $0x108] sm:$0xff]   ;;  %v8121_v28 = vld [vmem:[%s8014_s24 + $0x114] sm:$0xff]   ;;  %7494 = vmatpush3.bf16.msra.mxu1 %v8148_v36 }
  0x28   : > { %v8124_v29 = vld [vmem:[%s8014_s24 + $0x120] sm:$0xff]   ;;  %v8129_v30 = vld [vmem:[%s8014_s24 + $0x12c] sm:$0xff]   ;;  %v8154_v37 = vld [vmem:[%s8014_s24 + $0x138] sm:$0xff]   ;;  %7625 = vmatprep.subr.bf16.mxu1 %v8065_v18 }
  0x29   : > { %420 = vrot.lane.b32.xlu0 %v7849_v4, %s7964_s25  ;;  %v8160_v38 = vld [vmem:[%s8014_s24 + $0x144] sm:$0xff]   ;;  %v8168_v39 = vld [vmem:[%s8014_s24 + $0x150] sm:$0xff]   ;;  %v8174_v40 = vld [vmem:[%s8014_s24 + $0x15c] sm:$0xff]  }
  0x2a   : > { %422 = vrot.lane.b32.xlu1 %v7850_v5, %s7964_s25  ;;  %v8183_v41 = vld [vmem:[%s8014_s24 + $0x168] sm:$0xff]   ;;  %v8188_v42 = vld [vmem:[%s8014_s24 + $0x174] sm:$0xff]   ;;  %v8217_v47 = vld [vmem:[%s8014_s24 + $0x3c] sm:$0xff]  }
  0x2b   : > { %v8193_v43 = vld [vmem:[%s8014_s24 + $0xc] sm:$0xff]   ;;  %v8198_v44 = vld [vmem:[%s8014_s24 + $0x18] sm:$0xff]   ;;  %v8207_v45 = vld [vmem:[%s8014_s24 + $0x24] sm:$0xff]  }
  0x2c   : > { %v8212_v46 = vld [vmem:[%s8014_s24 + $0x30] sm:$0xff]   ;;  %v8222_v48 = vld [vmem:[%s8014_s24 + $0x48] sm:$0xff]   ;;  %v8236_v50 = vld [vmem:[%s8014_s24 + $0x60] sm:$0xff]  }
  0x2d   : > { %424 = vrot.lane.b32.xlu0 %v7851_v6, %s7964_s25  ;;  %7368 = vmatmul.mubr.msk.bf16.gmra.mxu1 %vm476_vm0, %v7848_v3  ;;  %v8231_v49 = vld [vmem:[%s8014_s24 + $0x54] sm:$0xff]   ;;  %v8241_v51 = vld [vmem:[%s8014_s24 + $0x6c] sm:$0xff]   ;;  %v8255_v53 = vld [vmem:[%s8014_s24 + $0x84] sm:$0xff]  }
  0x2e   : > { %426 = vrot.lane.b32.xlu1 %v8031_v7, %s7964_s25  ;;  %7371 = vmatprep.mubr.msk.bf16.mxu1 %vm476_vm0, %v7849_v4  ;;  %v8246_v52 = vld [vmem:[%s8014_s24 + $0x78] sm:$0xff]   ;;  %v8260_v54 = vld [vmem:[%s8014_s24 + $0x90] sm:$0xff]   ;;  %v8272_v56 = vld [vmem:[%s8014_s24 + $0xa8] sm:$0xff]  }
  0x2f   : > { %v8265_v55 = vld [vmem:[%s8014_s24 + $0x9c] sm:$0xff]   ;;  %v8279_v57 = vld [vmem:[%s8014_s24 + $0xb4] sm:$0xff]   ;;  %v8289_v59 = vld [vmem:[%s8014_s24 + $0xcc] sm:$0xff]  }
  0x30   : > { %v8284_v58 = vld [vmem:[%s8014_s24 + $0xc0] sm:$0xff]   ;;  %v7894_v60 = vld [vmem:[%s8014_s24 + $0xd8] sm:$0xff]   ;;  %v7896_v62 = vld [vmem:[%s8014_s24 + $0xf0] sm:$0xff]  }
  0x31   : > { %428 = vrot.lane.b32.xlu0 %v8035_v8, %s7964_s25  ;;  %v7895_v61 = vld [vmem:[%s8014_s24 + $0xe4] sm:$0xff]   ;;  %v7897_v63 = vld [vmem:[%s8014_s24 + $0xfc] sm:$0xff]   ;;  %v7899_v1 = vld [vmem:[%s8014_s24 + $0x114] sm:$0xff]  }
  0x32   : > { %430 = vrot.lane.b32.xlu1 %v8040_v9, %s7964_s25  ;;  %v7898_v0 = vld [vmem:[%s8014_s24 + $0x108] sm:$0xff]   ;;  %v7900_v2 = vld [vmem:[%s8014_s24 + $0x120] sm:$0xff]   ;;  %v7902_v4 = vld [vmem:[%s8014_s24 + $0x138] sm:$0xff]  }
  0x33   : > { %v7901_v3 = vld [vmem:[%s8014_s24 + $0x12c] sm:$0xff]   ;;  %v7907_v13 = vld [vmem:[%s8014_s24 + $0x174] sm:$0xff]   ;;  %v7908_v15 = vld [vmem:[%s8014_s24 + $0x180] sm:$0xff]  }
  0x35   : > { %432 = vrot.lane.b32.xlu0 %v8045_v10, %s7964_s25  ;;  %7372 = vmatmul.mubr.msk.bf16.gmra.mxu1 %vm476_vm0, %v7850_v5  ;;  %v7903_v5 = vld [vmem:[%s8014_s24 + $0x144] sm:$0xff]  }
  0x36   : > { %434 = vrot.lane.b32.xlu1 %v8050_v11, %s7964_s25  ;;  %7375 = vmatprep.mubr.msk.bf16.mxu1 %vm476_vm0, %v7851_v6  ;;  %v7904_v6 = vld [vmem:[%s8014_s24 + $0x150] sm:$0xff]  }
  0x39   : > { %436 = vrot.lane.b32.xlu0 %v8055_v14, %s7964_s25 }
  0x3a   : > { %438 = vrot.lane.b32.xlu1 %v8060_v16, %s7964_s25 }
  0x3d   : > { %440 = vrot.lane.b32.xlu0 %v8070_v19, %s7964_s25  ;;  %7376 = vmatmul.mubr.msk.bf16.gmra.mxu1 %vm476_vm0, %v8031_v7 }
  0x3e   : > { %442 = vrot.lane.b32.xlu1 %v8075_v20, %s7964_s25  ;;  %7379 = vmatprep.mubr.msk.bf16.mxu1 %vm476_vm0, %v8035_v8 }
  0x41   : > { %444 = vrot.lane.b32.xlu0 %v8082_v21, %s7964_s25 }
  0x42   : > { %446 = vrot.lane.b32.xlu1 %v8087_v22, %s7964_s25 }
  0x45   : > { %448 = vrot.lane.b32.xlu0 %v8094_v23, %s7964_s25  ;;  %7380 = vmatmul.mubr.msk.bf16.gmra.mxu1 %vm476_vm0, %v8040_v9  ;;  %v7905_v9 = vld [vmem:[%s8014_s24 + $0x15c] sm:$0xff]  }
  0x46   : > { %450 = vrot.lane.b32.xlu1 %v8099_v24, %s7964_s25  ;;  %7383 = vmatprep.mubr.msk.bf16.mxu1 %vm476_vm0, %v8045_v10  ;;  %v7906_v10 = vld [vmem:[%s8014_s24 + $0x168] sm:$0xff]  }
  0x49   : > { %452 = vrot.lane.b32.xlu0 %v8104_v25, %s7964_s25 }
  0x4a   : > { %454 = vrot.lane.b32.xlu1 %v8109_v26, %s7964_s25 }
  0x4d   : > { %456 = vrot.lane.b32.xlu0 %v8116_v27, %s7964_s25  ;;  %7384 = vmatmul.mubr.msk.bf16.gmra.mxu1 %vm476_vm0, %v8050_v11 }
  0x4e   : > { %458 = vrot.lane.b32.xlu1 %v8121_v28, %s7964_s25  ;;  %7387 = vmatprep.mubr.msk.bf16.mxu1 %vm476_vm0, %v8055_v14 }
  0x51   : > { %460 = vrot.lane.b32.xlu0 %v8124_v29, %s7964_s25 }
  0x52   : > { %462 = vrot.lane.b32.xlu1 %v8129_v30, %s7964_s25 }
  0x55   : > { %464 = vrot.lane.b32.xlu0 %v8154_v37, %s7964_s25  ;;  %7388 = vmatmul.mubr.msk.bf16.gmra.mxu1 %vm476_vm0, %v8060_v16 }
  0x56   : > { %466 = vrot.lane.b32.xlu1 %v8160_v38, %s7964_s25  ;;  %7391 = vmatprep.mubr.msk.bf16.mxu1 %vm476_vm0, %v8070_v19 }
  0x59   : > { %468 = vrot.lane.b32.xlu0 %v8168_v39, %s7964_s25 }
  0x5a   : > { %470 = vrot.lane.b32.xlu1 %v8174_v40, %s7964_s25 }
  0x5d   : > { %472 = vrot.lane.b32.xlu0 %v8183_v41, %s7964_s25  ;;  %7392 = vmatmul.mubr.msk.bf16.gmra.mxu1 %vm476_vm0, %v8075_v20 }
  0x5e   : > { %474 = vrot.lane.b32.xlu1 %v8188_v42, %s7964_s25  ;;  %7395 = vmatprep.mubr.msk.bf16.mxu1 %vm476_vm0, %v8082_v21 }
  0x61   : > { %1938 = vrot.lane.b32.xlu0 %v8193_v43, %s7964_s25 }
  0x62   : > { %1940 = vrot.lane.b32.xlu1 %v8198_v44, %s7964_s25 }
  0x65   : > { %1942 = vrot.lane.b32.xlu0 %v8207_v45, %s7964_s25  ;;  %7396 = vmatmul.mubr.msk.bf16.gmra.mxu1 %vm476_vm0, %v8087_v22 }
  0x66   : > { %1944 = vrot.lane.b32.xlu1 %v8212_v46, %s7964_s25  ;;  %7399 = vmatprep.mubr.msk.bf16.mxu1 %vm476_vm0, %v8094_v23 }
  0x69   : > { %1946 = vrot.lane.b32.xlu0 %v8217_v47, %s7964_s25 }
  0x6a   : > { %1948 = vrot.lane.b32.xlu1 %v8222_v48, %s7964_s25 }
  0x6d   : > { %1950 = vrot.lane.b32.xlu0 %v8231_v49, %s7964_s25  ;;  %7400 = vmatmul.mubr.msk.bf16.gmra.mxu1 %vm476_vm0, %v8099_v24 }
  0x6e   : > { %1952 = vrot.lane.b32.xlu1 %v8236_v50, %s7964_s25  ;;  %7403 = vmatprep.mubr.msk.bf16.mxu1 %vm476_vm0, %v8104_v25 }
  0x71   : > { %1954 = vrot.lane.b32.xlu0 %v8241_v51, %s7964_s25 }
  0x72   : > { %1956 = vrot.lane.b32.xlu1 %v8246_v52, %s7964_s25 }
  0x75   : > { %1958 = vrot.lane.b32.xlu0 %v8255_v53, %s7964_s25  ;;  %7404 = vmatmul.mubr.msk.bf16.gmra.mxu1 %vm476_vm0, %v8109_v26 }
  0x76   : > { %1960 = vrot.lane.b32.xlu1 %v8260_v54, %s7964_s25  ;;  %7407 = vmatprep.mubr.msk.bf16.mxu1 %vm476_vm0, %v8116_v27 }
  0x79   : > { %1962 = vrot.lane.b32.xlu0 %v8265_v55, %s7964_s25 }
  0x7a   : > { %1964 = vrot.lane.b32.xlu1 %v8272_v56, %s7964_s25 }
  0x7d   : > { %1966 = vrot.lane.b32.xlu0 %v8279_v57, %s7964_s25  ;;  %7408 = vmatmul.mubr.msk.bf16.gmra.mxu1 %vm476_vm0, %v8121_v28 }
  0x7e   : > { %1968 = vrot.lane.b32.xlu1 %v8284_v58, %s7964_s25  ;;  %7411 = vmatprep.mubr.msk.bf16.mxu1 %vm476_vm0, %v8124_v29 }
  0x81   : > { %1970 = vrot.lane.b32.xlu0 %v8289_v59, %s7964_s25 }
  0x82   : > { %1972 = vrot.lane.b32.xlu1 %v7894_v60, %s7964_s25 }
  0x85   : > { %1974 = vrot.lane.b32.xlu0 %v7895_v61, %s7964_s25  ;;  %7412 = vmatmul.mubr.msk.bf16.gmra.mxu1 %vm476_vm0, %v8129_v30 }
  0x86   : > { %1976 = vrot.lane.b32.xlu1 %v7896_v62, %s7964_s25  ;;  %7415 = vmatprep.mubr.msk.bf16.mxu1 %vm476_vm0, %v8154_v37 }
  0x89   : > { %1978 = vrot.lane.b32.xlu0 %v7897_v63, %s7964_s25 }
  0x8a   : > { %1980 = vrot.lane.b32.xlu1 %v7898_v0, %s7964_s25 }
  0x8d   : > { %1982 = vrot.lane.b32.xlu0 %v7899_v1, %s7964_s25  ;;  %7416 = vmatmul.mubr.msk.bf16.gmra.mxu1 %vm476_vm0, %v8160_v38 }
  0x8e   : > { %1984 = vrot.lane.b32.xlu1 %v7900_v2, %s7964_s25  ;;  %7419 = vmatprep.mubr.msk.bf16.mxu1 %vm476_vm0, %v8168_v39 }
  0x91   : > { %1986 = vrot.lane.b32.xlu0 %v7901_v3, %s7964_s25 }
  0x92   : > { %1988 = vrot.lane.b32.xlu1 %v7902_v4, %s7964_s25 }
  0x93   : > { %v8327_v7 = vpop.permute.xlu0 %412 }
  0x94   : > { %v8329_v8 = vpop.permute.xlu1 %416  ;;  %7297 = vmatprep.mubr.msk.bf16.mxu0 %vm476_vm0, %v8327_v7 }
  0x95   : > { %1990 = vrot.lane.b32.xlu0 %v7903_v5, %s7964_s25  ;;  %7420 = vmatmul.mubr.msk.bf16.gmra.mxu1 %vm476_vm0, %v8174_v40 }
  0x96   : > { %1992 = vrot.lane.b32.xlu1 %v7904_v6, %s7964_s25  ;;  %7423 = vmatprep.mubr.msk.bf16.mxu1 %vm476_vm0, %v8183_v41 }
  0x97   : > { %v8339_v11 = vpop.permute.xlu0 %414 }
  0x98   : > { %v8343_v12 = vpop.permute.xlu1 %418  ;;  %7298 = vmatmul.mubr.msk.bf16.vlgmr.msra.gmra.mxu0 %vm476_vm0, %v8339_v11 }
  0x99   : > { %7428 = vmatpush3.bf16.msra.mxu0 %v8142_v34  ;;  %7301 = vmatprep.mubr.msk.bf16.mxu0 %vm476_vm0, %v8329_v8 }
  0x9a   : > { %1994 = vrot.lane.b32.xlu0 %v7905_v9, %s7964_s25  ;;  %1996 = vrot.lane.b32.xlu1 %v7906_v10, %s7964_s25 }
  0x9b   : > { %v8353_v14 = vpop.permute.xlu0 %420  ;;  %7559 = vmatprep.subr.bf16.mxu0 %v8140_v33 }
  0x9c   : > { %v8357_v16 = vpop.permute.xlu1 %422 }
  0x9d   : > { %7424 = vmatmul.mubr.msk.bf16.gmra.mxu1 %vm476_vm0, %v8188_v42 }
  0x9e   : > { %1998 = vrot.lane.b32.xlu0 %v7907_v13, %s7964_s25  ;;  %2000 = vrot.lane.b32.xlu1 %v7908_v15, %s7964_s25 }
  0x9f   : > { %v8362_v17 = vpop.permute.xlu0 %424 }
  0xa0   : > { %v8367_v19 = vpop.permute.xlu1 %426  ;;  %7302 = vmatmul.mubr.msk.bf16.gmra.mxu0 %vm476_vm0, %v8343_v12 }
  0xa1   : > { %7305 = vmatprep.mubr.msk.bf16.mxu0 %vm476_vm0, %v8353_v14 }
  0xa3   : > { %v8373_v20 = vpop.permute.xlu0 %428 }
  0xa4   : > { %v8375_v21 = vpop.permute.xlu1 %430 }
  0xa5   : > { %11532 = vst [vmem:[#allocation6_spill] sm:$0xff] %v8375_v21 }
  0xa7   : > { %v8379_v22 = vpop.permute.xlu0 %432 }
  0xa8   : > { %11533 = vst [vmem:[#allocation7_spill] sm:$0xff] %v8379_v22  ;;  %v8383_v23 = vpop.permute.xlu1 %434  ;;  %7306 = vmatmul.mubr.msk.bf16.gmra.mxu0 %vm476_vm0, %v8357_v16 }
  0xa9   : > { %11534 = vst [vmem:[#allocation8_spill] sm:$0xff] %v8383_v23  ;;  %7309 = vmatprep.mubr.msk.bf16.mxu0 %vm476_vm0, %v8362_v17 }
  0xab   : > { %v8389_v24 = vpop.permute.xlu0 %436 }
  0xac   : > { %11535 = vst [vmem:[#allocation9_spill] sm:$0xff] %v8389_v24  ;;  %v8391_v25 = vpop.permute.xlu1 %438 }
  0xad   : > { %11536 = vst [vmem:[#allocation10_spill] sm:$0xff] %v8391_v25 }
  0xaf   : > { %v8395_v26 = vpop.permute.xlu0 %440 }
  0xb0   : > { %11537 = vst [vmem:[#allocation11_spill] sm:$0xff] %v8395_v26  ;;  %v8399_v27 = vpop.permute.xlu1 %442  ;;  %7310 = vmatmul.mubr.msk.bf16.gmra.mxu0 %vm476_vm0, %v8367_v19 }
  0xb1   : > { %11538 = vst [vmem:[#allocation12_spill] sm:$0xff] %v8399_v27  ;;  %7313 = vmatprep.mubr.msk.bf16.mxu0 %vm476_vm0, %v8373_v20 }
  0xb3   : > { %v8405_v28 = vpop.permute.xlu0 %444 }
  0xb4   : > { %11539 = vst [vmem:[#allocation13_spill] sm:$0xff] %v8405_v28  ;;  %v8407_v29 = vpop.permute.xlu1 %446 }
  0xb5   : > { %11540 = vst [vmem:[#allocation14_spill] sm:$0xff] %v8407_v29 }
  0xb7   : > { %v8411_v30 = vpop.permute.xlu0 %448 }
  0xb8   : > { %11541 = vst [vmem:[#allocation15_spill] sm:$0xff] %v8411_v30  ;;  %v8413_v31 = vpop.permute.xlu1 %450  ;;  %7314 = vmatmul.mubr.msk.bf16.gmra.mxu0 %vm476_vm0, %v8375_v21 }
  0xb9   : > { %11542 = vst [vmem:[#allocation16_spill] sm:$0xff] %v8413_v31  ;;  %7317 = vmatprep.mubr.msk.bf16.mxu0 %vm476_vm0, %v8379_v22 }
  0xbb   : > { %v8419_v32 = vpop.permute.xlu0 %452 }
  0xbc   : > { %11543 = vst [vmem:[#allocation17_spill] sm:$0xff] %v8419_v32  ;;  %v8421_v35 = vpop.permute.xlu1 %454 }
  0xbd   : > { %11544 = vst [vmem:[#allocation18_spill] sm:$0xff] %v8421_v35 }
  0xbf   : > { %v8423_v37 = vpop.permute.xlu0 %456 }
  0xc0   : > { %11545 = vst [vmem:[#allocation19_spill] sm:$0xff] %v8423_v37  ;;  %v8425_v38 = vpop.permute.xlu1 %458  ;;  %7318 = vmatmul.mubr.msk.bf16.gmra.mxu0 %vm476_vm0, %v8383_v23  ;;  %v2465_v23 = vld [vmem:[%s8014_s24 + $0x2c] sm:$0x1] }
  0xc1   : > { %11546 = vst [vmem:[#allocation20_spill] sm:$0xff] %v8425_v38  ;;  %7321 = vmatprep.mubr.msk.bf16.mxu0 %vm476_vm0, %v8389_v24 }
  0xc3   : > { %v8431_v39 = vpop.permute.xlu0 %460 }
  0xc4   : > { %11547 = vst [vmem:[#allocation21_spill] sm:$0xff] %v8431_v39  ;;  %v8433_v40 = vpop.permute.xlu1 %462 }
  0xc5   : > { %11548 = vst [vmem:[#allocation22_spill] sm:$0xff] %v8433_v40 }
  0xc7   : > { %v8435_v41 = vpop.permute.xlu0 %464 }
  0xc8   : > { %11549 = vst [vmem:[#allocation23_spill] sm:$0xff] %v8435_v41  ;;  %v8437_v42 = vpop.permute.xlu1 %466  ;;  %7322 = vmatmul.mubr.msk.bf16.gmra.mxu0 %vm476_vm0, %v8391_v25 }
  0xc9   : > { %11550 = vst [vmem:[#allocation24_spill] sm:$0xff] %v8437_v42  ;;  %7325 = vmatprep.mubr.msk.bf16.mxu0 %vm476_vm0, %v8395_v26 }
  0xcb   : > { %v8443_v60 = vpop.permute.xlu0 %468 }
  0xcc   : > { %11551 = vst [vmem:[#allocation25_spill] sm:$0xff] %v8443_v60  ;;  %v8445_v61 = vpop.permute.xlu1 %470 }
  0xcd   : > { %11552 = vst [vmem:[#allocation26_spill] sm:$0xff] %v8445_v61 }
  0xcf   : > { %v8447_v62 = vpop.permute.xlu0 %472 }
  0xd0   : > { %11553 = vst [vmem:[#allocation27_spill] sm:$0xff] %v8447_v62  ;;  %v8449_v63 = vpop.permute.xlu1 %474  ;;  %7326 = vmatmul.mubr.msk.bf16.gmra.mxu0 %vm476_vm0, %v8399_v27 }
  0xd1   : > { %11554 = vst [vmem:[#allocation28_spill] sm:$0xff] %v8449_v63  ;;  %7329 = vmatprep.mubr.msk.bf16.mxu0 %vm476_vm0, %v8405_v28  ;;  %v2460_v28 = vld [vmem:[%s8014_s24 + $0x18] sm:$0xf] }
  0xd3   : > { %v8455_v0 = vpop.permute.xlu0 %1938 }
  0xd4   : > { %11555 = vst [vmem:[#allocation29_spill] sm:$0xff] %v8455_v0  ;;  %v8457_v1 = vpop.permute.xlu1 %1940  ;;  %7495 = vmatprep.mubr.msk.bf16.mxu1 %vm476_vm0, %v8455_v0 }
  0xd5   : > { %11556 = vst [vmem:[#allocation30_spill] sm:$0xff] %v8457_v1  ;;  %7496 = vmatmul.mubr.msk.bf16.vlgmr.msra.gmra.mxu1 %vm476_vm0, %v8457_v1 }
  0xd6   : > { %7626 = vmatpush3.bf16.msra.mxu1 %v8065_v18 }
  0xd7   : > { %v8464_v2 = vpop.permute.xlu0 %1942  ;;  %7757 = vmatprep.subr.bf16.mxu1 %v8148_v36 }
  0xd8   : > { %11557 = vst [vmem:[#allocation31_spill] sm:$0xff] %v8464_v2  ;;  %7330 = vmatmul.mubr.msk.bf16.gmra.mxu0 %vm476_vm0, %v8407_v29  ;;  %7499 = vmatprep.mubr.msk.bf16.mxu1 %vm476_vm0, %v8464_v2  ;;  %v8473_v3 = vpop.permute.xlu1 %1944 }
  0xd9   : > { %7333 = vmatprep.mubr.msk.bf16.mxu0 %vm476_vm0, %v8411_v30  ;;  %11558 = vst [vmem:[#allocation32_spill] sm:$0xff] %v8473_v3 }
  0xdb   : > { %v8475_v4 = vpop.permute.xlu0 %1946 }
  0xdc   : > { %11559 = vst [vmem:[#allocation33_spill] sm:$0xff] %v8475_v4  ;;  %v8485_v18 = vpop.permute.xlu1 %1948 }
  0xdd   : > { %7500 = vmatmul.mubr.msk.bf16.gmra.mxu1 %vm476_vm0, %v8473_v3  ;;  %11560 = vst [vmem:[#allocation34_spill] sm:$0xff] %v8485_v18 }
  0xde   : > { %7503 = vmatprep.mubr.msk.bf16.mxu1 %vm476_vm0, %v8475_v4 }
  0xdf   : > { %v8487_v5 = vpop.permute.xlu0 %1950 }
  0xe0   : > { %7334 = vmatmul.mubr.msk.bf16.gmra.mxu0 %vm476_vm0, %v8413_v31  ;;  %11561 = vst [vmem:[#allocation35_spill] sm:$0xff] %v8487_v5  ;;  %v8497_v6 = vpop.permute.xlu1 %1952 }
  0xe1   : > { %7337 = vmatprep.mubr.msk.bf16.mxu0 %vm476_vm0, %v8419_v32  ;;  %11562 = vst [vmem:[#allocation36_spill] sm:$0xff] %v8497_v6 }
  0xe3   : > { %v8499_v9 = vpop.permute.xlu0 %1954 }
  0xe4   : > { %11563 = vst [vmem:[#allocation37_spill] sm:$0xff] %v8499_v9  ;;  %v8509_v10 = vpop.permute.xlu1 %1956 }
  0xe5   : > { %7504 = vmatmul.mubr.msk.bf16.gmra.mxu1 %vm476_vm0, %v8485_v18  ;;  %11564 = vst [vmem:[#allocation38_spill] sm:$0xff] %v8509_v10 }
  0xe6   : > { %7507 = vmatprep.mubr.msk.bf16.mxu1 %vm476_vm0, %v8487_v5 }
  0xe7   : > { %v8511_v13 = vpop.permute.xlu0 %1958 }
  0xe8   : > { %7338 = vmatmul.mubr.msk.bf16.gmra.mxu0 %vm476_vm0, %v8421_v35  ;;  %11565 = vst [vmem:[#allocation39_spill] sm:$0xff] %v8511_v13  ;;  %v8521_v15 = vpop.permute.xlu1 %1960 }
  0xe9   : > { %7341 = vmatprep.mubr.msk.bf16.mxu0 %vm476_vm0, %v8423_v37  ;;  %11566 = vst [vmem:[#allocation40_spill] sm:$0xff] %v8521_v15 }
  0xed   : > { %7508 = vmatmul.mubr.msk.bf16.gmra.mxu1 %vm476_vm0, %v8497_v6  ;;  %v8537_v6 = vpop.permute.xlu1 %1964 }
  0xee   : > { %7511 = vmatprep.mubr.msk.bf16.mxu1 %vm476_vm0, %v8499_v9  ;;  %v8523_v9 = vpop.permute.xlu0 %1962  ;;  %11569 = vst [vmem:[#allocation43_spill] sm:$0xff] %v8537_v6 }
  0xef   : > { %11567 = vst [vmem:[#allocation41_spill] sm:$0xff] %v8523_v9 }
  0xf0   : > { %7342 = vmatmul.mubr.msk.bf16.gmra.mxu0 %vm476_vm0, %v8425_v38 }
  0xf1   : > { %7345 = vmatprep.mubr.msk.bf16.mxu0 %vm476_vm0, %v8431_v39  ;;  %v8557_v3 = vpop.permute.xlu1 %1968 }
  0xf2   : > { %v8541_v18 = vpop.permute.xlu0 %1966  ;;  %11575 = vst [vmem:[#allocation49_spill] sm:$0xff] %v8557_v3 }
  0xf3   : > { %11571 = vst [vmem:[#allocation45_spill] sm:$0xff] %v8541_v18 }
  0xf5   : > { %7512 = vmatmul.mubr.msk.bf16.gmra.mxu1 %vm476_vm0, %v8509_v10  ;;  %v8529_v10 = vpop.f32.mrf.mxu1 }
  0xf6   : > { %7515 = vmatprep.mubr.msk.bf16.mxu1 %vm476_vm0, %v8511_v13 }
  0xf7   : > { %v8533_v13 = vpop.f32.mrf.mxu1 }
  0xf8   : > { %7346 = vmatmul.mubr.msk.bf16.gmra.mxu0 %vm476_vm0, %v8433_v40  ;;  %11568 = vst [vmem:[#allocation42_spill] sm:$0xff] %v8533_v13 }
  0xf9   : > { %7349 = vmatprep.mubr.msk.bf16.mxu0 %vm476_vm0, %v8435_v41  ;;  %v8539_v5 = vpop.f32.mrf.mxu1  ;;  %v2457_v41 = vld [vmem:[%s8014_s24 + $0xc] sm:$0xf] }
  0xfa   : > { %11570 = vst [vmem:[#allocation44_spill] sm:$0xff] %v8539_v5  ;;  %v2578_v32 = vshrl.u32 %v2457_v41, 16  ;;  %v2581_v31 = vshll.u32 %v2457_v41, 16 }
  0xfc   : > { %v2583_v27 = vrot.slane %v2581_v31, 5  ;;  %v2464_v31 = vld [vmem:[%s8014_s24 + $0x28] sm:$0xf] }
  0xfd   : > { %7516 = vmatmul.mubr.msk.bf16.gmra.mxu1 %vm476_vm0, %v8521_v15  ;;  %v8543_v15 = vpop.f32.mrf.mxu1 }
  0xfe   : > { %7519 = vmatprep.mubr.msk.bf16.mxu1 %vm476_vm0, %v8523_v9  ;;  %11572 = vst [vmem:[#allocation46_spill] sm:$0xff] %v8543_v15 }
  0xff   : > { %v8549_v9 = vpop.f32.mrf.mxu1 }
 0x100   : > { %7350 = vmatmul.mubr.msk.bf16.gmra.mxu0 %vm476_vm0, %v8437_v42  ;;  %11573 = vst [vmem:[#allocation47_spill] sm:$0xff] %v8549_v9  ;;  %v2454_v42 = vld [vmem:[%s8014_s24] sm:$0xf] }
 0x101   : > { %7353 = vmatprep.mubr.msk.bf16.mxu0 %vm476_vm0, %v8443_v60  ;;  %v8553_v4 = vpop.f32.mrf.mxu1  ;;  %v2554_v40 = vshrl.u32 %v2454_v42, 16  ;;  %v2557_v39 = vshll.u32 %v2454_v42, 16 }
 0x102   : > { %11574 = vst [vmem:[#allocation48_spill] sm:$0xff] %v8553_v4  ;;  %v2479_v4 = vld [vmem:[%s8014_s24 + $0x64] sm:$0xf] }
 0x103   : > { %v8559_v2 = vpop.f32.mrf.mxu1  ;;  %v2556_v30 = vrot.slane %v2554_v40, 4  ;;  %v2559_v41 = vrot.slane %v2557_v39, 5  ;;  %v2602_v39 = vshrl.u32 %v2460_v28, 16  ;;  %v2755_v15 = vshll.u32 %v2479_v4, 16 }
 0x104   : > { %11576 = vst [vmem:[#allocation50_spill] sm:$0xff] %v8559_v2  ;;  %v2471_v2 = vld [vmem:[%s8014_s24 + $0x44] sm:$0x1] }
 0x105   : > { %7520 = vmatmul.mubr.msk.bf16.gmra.mxu1 %vm476_vm0, %v8537_v6  ;;  %v8561_v6 = vpop.permute.xlu0 %1970  ;;  %v2693_v21 = vshll.u32 %v2471_v2, 16  ;;  %v8793_v13 = vrot.slane %v2755_v15, 5 }
 0x106   : > { %7523 = vmatprep.mubr.msk.bf16.mxu1 %vm476_vm0, %v8541_v18  ;;  %11577 = vst [vmem:[#allocation51_spill] sm:$0xff] %v8561_v6  ;;  %v8563_v18 = vpop.f32.mrf.mxu1 }
 0x107   : > { %11578 = vst [vmem:[#allocation52_spill] sm:$0xff] %v8563_v18 }
 0x108   : > { %7354 = vmatmul.mubr.msk.bf16.gmra.mxu0 %vm476_vm0, %v8445_v61  ;;  %v8569_v1 = vpop.f32.mrf.mxu1 }
 0x109   : > { %7357 = vmatprep.mubr.msk.bf16.mxu0 %vm476_vm0, %v8447_v62  ;;  %11579 = vst [vmem:[#allocation53_spill] sm:$0xff] %v8569_v1  ;;  %v8577_v62 = vpop.permute.xlu1 %1972  ;;  %v8581_v60 = vpop.permute.xlu0 %1974  ;;  %v2466_v1 = vld [vmem:[%s8014_s24 + $0x30] sm:$0xf] }
 0x10a   : > { %v8573_v0 = vpop.f32.mrf.mxu1  ;;  %11581 = vst [vmem:[#allocation55_spill] sm:$0xff] %v8577_v62  ;;  %11583 = vst [vmem:[#allocation57_spill] sm:$0xff] %v8581_v60 }
 0x10b   : > { %11580 = vst [vmem:[#allocation54_spill] sm:$0xff] %v8573_v0 }
 0x10c   : > { %v8579_v61 = vpop.f32.mrf.mxu1 }
 0x10d   : > { %7524 = vmatmul.mubr.msk.bf16.gmra.mxu1 %vm476_vm0, %v8557_v3  ;;  %11582 = vst [vmem:[#allocation56_spill] sm:$0xff] %v8579_v61  ;;  %v8602_v42 = vpop.permute.xlu1 %1976 }
 0x10e   : > { %7527 = vmatprep.mubr.msk.bf16.mxu1 %vm476_vm0, %v8561_v6  ;;  %v8583_v3 = vpop.f32.mrf.mxu1  ;;  %v2455_v6 = vld [vmem:[%s8014_s24 + $0x4] sm:$0xf]  ;;  %11587 = vst [vmem:[#allocation61_spill] sm:$0xff] %v8602_v42 }
 0x10f   : > { %11584 = vst [vmem:[#allocation58_spill] sm:$0xff] %v8583_v3  ;;  %v2563_v38 = vshll.u32 %v2455_v6, 16  ;;  %v2567_v37 = vshrl.u32 %v2455_v6, 16 }
 0x110   : > { %7358 = vmatmul.mubr.msk.bf16.gmra.mxu0 %vm476_vm0, %v8449_v63  ;;  %v8592_v63 = vpop.f32.mrf.mxu1 }
 0x111   : > { %7429 = vmatprep.mubr.msk.bf16.mxu0 %vm476_vm0, %v8193_v43  ;;  %11585 = vst [vmem:[#allocation59_spill] sm:$0xff] %v8592_v63  ;;  %v2458_v43 = vld [vmem:[%s8014_s24 + $0x10] sm:$0xf]  ;;  %v2569_v29 = vrot.slane %v2567_v37, 4  ;;  %v2463_v63 = vld [vmem:[%s8014_s24 + $0x24] sm:$0xf] }
 0x112   : > { %v8597_v35 = vpop.f32.mrf.mxu1  ;;  %v2459_v37 = vld [vmem:[%s8014_s24 + $0x14] sm:$0x1]  ;;  %v2626_v25 = vshrl.u32 %v2463_v63, 16  ;;  %v2629_v3 = vshll.u32 %v2463_v63, 16  ;;  %v8635_v63 = vpop.permute.xlu1 %1980 }
 0x113   : > { %11586 = vst [vmem:[#allocation60_spill] sm:$0xff] %v8597_v35  ;;  %v2461_v35 = vld [vmem:[%s8014_s24 + $0x1c] sm:$0xf]  ;;  %11593 = vst [vmem:[#allocation67_spill] sm:$0xff] %v8635_v63 }
 0x114   : > { %v8604_v6 = vpop.f32.mrf.mxu1  ;;  %v2611_v26 = vshll.u32 %v2461_v35, 16  ;;  %v2631_v0 = vrot.slane %v2629_v3, 5 }
 0x115   : > { %7528 = vmatmul.mubr.msk.bf16.gmra.mxu1 %vm476_vm0, %v8577_v62  ;;  %v2591_v62 = vshrl.u32 %v2458_v43, 16  ;;  %11588 = vst [vmem:[#allocation62_spill] sm:$0xff] %v8604_v6 }
 0x116   : > { %7531 = vmatprep.mubr.msk.bf16.mxu1 %vm476_vm0, %v8581_v60  ;;  %v2587_v60 = vshll.u32 %v2458_v43, 16  ;;  %v2580_v43 = vrot.slane %v2578_v32, 4  ;;  %v2615_v32 = vshrl.u32 %v2461_v35, 16  ;;  %v2597_v35 = vshll.u32 %v2459_v37, 16 }
 0x117   : > { %v2593_v40 = vrot.slane %v2591_v62, 4 }
 0x118   : > { %7430 = vmatmul.mubr.msk.bf16.vlgmr.msra.gmra.mxu0 %vm476_vm0, %v8198_v44  ;;  %v8607_v44 = vpop.permute.xlu0 %1978  ;;  %v8619_v6 = vrot.slane %v2587_v60, 5  ;;  %v2560_v60 = vor.u32 %v2559_v41, %v2556_v30  ;;  %v2584_v61 = vor.u32 %v2583_v27, %v2580_v43  ;;  %v2635_v41 = vshll.u32 %v2464_v31, 16  ;;  %v2462_v27 = vld [vmem:[%s8014_s24 + $0x20] sm:$0x1] }
 0x119   : > { %7560 = vmatpush3.bf16.msra.mxu0 %v8140_v33  ;;  %7433 = vmatprep.mubr.msk.bf16.mxu0 %vm476_vm0, %v8207_v45  ;;  %11589 = vst [vmem:[#allocation63_spill] sm:$0xff] %v8607_v44  ;;  %v8609_v33 = vrot.slane %v2563_v38, 5  ;;  %v8612_v45 = vpop.f32.mrf.mxu1  ;;  %v2628_v43 = vrot.slane %v2626_v25, 4 }
 0x11a   : > { %7691 = vmatprep.subr.bf16.mxu0 %v8142_v34  ;;  %11590 = vst [vmem:[#allocation64_spill] sm:$0xff] %v8612_v45  ;;  %v2456_v34 = vld [vmem:[%s8014_s24 + $0x8] sm:$0x1]  ;;  %v2605_v45 = vshll.u32 %v2460_v28, 16  ;;  %v2594_v28 = vor.u32 %v2593_v40, %v8619_v6  ;;  %v2561_v37 = vrot.slane %v2560_v60, 4  ;;  %v8660_v60 = vrot.slane %v2635_v41, 5 }
 0x11b   : > { %v8623_v38 = vpop.f32.mrf.mxu1  ;;  %v2570_v62 = vor.u32 %v2569_v29, %v8609_v33  ;;  %v8642_v29 = vrot.slane %v2611_v26, 5 }
 0x11c   : > { %11591 = vst [vmem:[#allocation65_spill] sm:$0xff] %v8623_v38  ;;  %v2607_v30 = vrot.slane %v2605_v45, 5  ;;  %v2639_v38 = vshrl.u32 %v2464_v31, 16  ;;  %v2595_v31 = vrot.slane %v2594_v28, 4  ;;  %v2645_v28 = vshll.u32 %v2465_v23, 16 }
 0x11d   : > { %7532 = vmatmul.mubr.msk.bf16.gmra.mxu1 %vm476_vm0, %v8602_v42  ;;  %v8629_v42 = vpop.f32.mrf.mxu1  ;;  %v2571_v24 = vrot.slane %v2570_v62, 4  ;;  %v2632_v62 = vor.u32 %v2631_v0, %v2628_v43  ;;  %v2467_v0 = vld [vmem:[%s8014_s24 + $0x34] sm:$0xf] }
 0x11e   : > { %7535 = vmatprep.mubr.msk.bf16.mxu1 %vm476_vm0, %v8607_v44  ;;  %11592 = vst [vmem:[#allocation66_spill] sm:$0xff] %v8629_v42  ;;  %v2573_v44 = vshll.u32 %v2456_v34, 16  ;;  %v2604_v42 = vrot.slane %v2602_v39, 4  ;;  %v8639_v34 = vpop.permute.xlu0 %1982  ;;  %v2585_v39 = vrot.slane %v2584_v61, 4  ;;  %v2641_v61 = vrot.slane %v2639_v38, 4 }
 0x11f   : > { %11595 = vst [vmem:[#allocation69_spill] sm:$0xff] %v8639_v34  ;;  %v8694_v43 = vrot.slane %v2632_v62, 4  ;;  %v8712_v62 = vld [vmem:[%s8014_s24 + $0x38] sm:$0x1] }
 0x120   : > { %7434 = vmatmul.mubr.msk.bf16.gmra.mxu0 %vm476_vm0, %v8212_v46  ;;  %v8637_v46 = vpop.f32.mrf.mxu1  ;;  %v2575_v45 = vrot.slane %v2573_v44, 5  ;;  %v2608_v3 = vor.u32 %v2607_v30, %v2604_v42  ;;  %v2566_v42 = vsel %vm8656_vm5, %v2561_v37, %v8609_v33  ;;  %v2590_v23 = vsel %vm8656_vm5, %v2585_v39, %v8619_v6  ;;  %v2470_v39 = vld [vmem:[%s8014_s24 + $0x40] sm:$0xf] }
 0x121   : > { %7437 = vmatprep.mubr.msk.bf16.mxu0 %vm476_vm0, %v8217_v47  ;;  %11594 = vst [vmem:[#allocation68_spill] sm:$0xff] %v8637_v46  ;;  %v2617_v47 = vrot.slane %v2615_v32, 4  ;;  %v2599_v46 = vrot.slane %v2597_v35, 5  ;;  %v2621_v32 = vshll.u32 %v2462_v27, 16  ;;  %v2469_v27 = vld [vmem:[%s8014_s24 + $0x3c] sm:$0xf] }
 0x122   : > { %v8644_v40 = vpop.f32.mrf.mxu1  ;;  %v2576_v38 = vsel %vm8656_vm5, %v2571_v24, %v2575_v45  ;;  %v8684_v41 = vrot.slane %v2608_v3, 4  ;;  %v2642_v24 = vor.u32 %v2641_v61, %v8660_v60  ;;  %v8696_v37 = vrot.slane %v2645_v28, 5  ;;  %v2473_v61 = vld [vmem:[%s8014_s24 + $0x4c] sm:$0xf] }
 0x123   : > { %11596 = vst [vmem:[#allocation70_spill] sm:$0xff] %v8644_v40  ;;  %v2618_v44 = vor.u32 %v2617_v47, %v8642_v29  ;;  %v8686_v33 = vrot.slane %v2621_v32, 5  ;;  %v8690_v47 = vpop.permute.xlu0 %1986  ;;  %v2653_v45 = vshll.u32 %v2466_v1, 16  ;;  %v2659_v3 = vshll.u32 %v2467_v0, 16  ;;  %v2472_v32 = vld [vmem:[%s8014_s24 + $0x48] sm:$0xf] }
 0x124   : > { %v8652_v26 = vpop.f32.mrf.mxu1  ;;  %11603 = vst [vmem:[#allocation75_spill] sm:$0xff] %v8690_v47  ;;  %v2663_v28 = vshrl.u32 %v2467_v0, 16  ;;  %v2687_v40 = vshrl.u32 %v2470_v39, 16 }
 0x125   : > { %7536 = vmatmul.mubr.msk.bf16.gmra.mxu1 %vm476_vm0, %v8635_v63  ;;  %11597 = vst [vmem:[#allocation71_spill] sm:$0xff] %v8652_v26  ;;  %v8692_v6 = vrot.slane %v2618_v44, 4  ;;  %v8707_v44 = vcombine.low %v2566_v42, %v2576_v38  ;;  %v2683_v26 = vshll.u32 %v2470_v39, 16  ;;  %v2698_v42 = vshrl.u32 %v2472_v32, 16 }
 0x126   : > { %7539 = vmatprep.mubr.msk.bf16.mxu1 %vm476_vm0, %v8639_v34  ;;  %v8665_v35 = vpop.f32.mrf.mxu1  ;;  %v2650_v34 = vshrl.u32 %v2466_v1, 16  ;;  %v2674_v1 = vshrl.u32 %v2469_v27, 16  ;;  %v2701_v38 = vshll.u32 %v2472_v32, 16  ;;  %v2669_v39 = vshll.u32 %v8712_v62, 16 }
 0x127   : > { %11600 = vst [vmem:[#allocation72_spill] sm:$0xff] %v8665_v35  ;;  %11605 = vst [vmem:[#allocation77_spill] sm:$0xff] %v8707_v44  ;;  %v2677_v35 = vshll.u32 %v2469_v27, 16  ;;  %v2665_v27 = vrot.slane %v2663_v28, 4  ;;  %v2689_v18 = vrot.slane %v2687_v40, 4 }
 0x128   : > { %7438 = vmatmul.mubr.msk.bf16.gmra.mxu0 %vm476_vm0, %v8222_v48  ;;  %v8678_v48 = vpop.permute.xlu1 %1984  ;;  %v8680_v30 = vpop.f32.mrf.mxu1  ;;  %v2703_v28 = vrot.slane %v2701_v38, 5  ;;  %v8780_v2 = vrot.slane %v2669_v39, 5 }
 0x129   : > { %7441 = vmatprep.mubr.msk.bf16.mxu0 %vm476_vm0, %v8231_v49  ;;  %11601 = vst [vmem:[#allocation73_spill] sm:$0xff] %v8678_v48  ;;  %11602 = vst [vmem:[#allocation74_spill] sm:$0xff] %v8680_v30  ;;  %v2600_v49 = vsel %vm8656_vm5, %v2595_v31, %v2599_v46  ;;  %v8701_v31 = vrot.slane %v2650_v34, 4  ;;  %v2475_v30 = vld [vmem:[%s8014_s24 + $0x54] sm:$0xf] }
 0x12a   : > { %v8699_v46 = vpop.f32.mrf.mxu1  ;;  %v8709_v63 = vcombine.low %v2590_v23, %v2600_v49  ;;  %v2707_v23 = vshll.u32 %v2473_v61, 16  ;;  %v2711_v49 = vshrl.u32 %v2473_v61, 16 }
 0x12b   : > { %11604 = vst [vmem:[#allocation76_spill] sm:$0xff] %v8699_v46  ;;  %v8719_v46 = vrot.slane %v2642_v24, 4  ;;  %v2725_v24 = vshll.u32 %v2475_v30, 16 }
 0x12c   : > { %11606 = vst [vmem:[#allocation78_spill] sm:$0xff] %v8709_v63  ;;  %v8717_v34 = vpop.f32.mrf.mxu1  ;;  %v2655_v63 = vrot.slane %v2653_v45, 5  ;;  %v8731_v61 = vpop.permute.xlu1 %1988  ;;  %v2676_v45 = vrot.slane %v2674_v1, 4  ;;  %v8740_v62 = vrot.slane %v2707_v23, 5  ;;  %v2477_v1 = vld [vmem:[%s8014_s24 + $0x5c] sm:$0x1] }
 0x12d   : > { %7540 = vmatmul.mubr.msk.bf16.gmra.mxu1 %vm476_vm0, %v8678_v48  ;;  %11607 = vst [vmem:[#allocation79_spill] sm:$0xff] %v8717_v34  ;;  %v2476_v48 = vld [vmem:[%s8014_s24 + $0x58] sm:$0xf]  ;;  %v2722_v34 = vshrl.u32 %v2475_v30, 16  ;;  %11609 = vst [vmem:[#allocation81_spill] sm:$0xff] %v8731_v61  ;;  %v8737_v30 = vpop.permute.xlu0 %1990  ;;  %v2727_v38 = vrot.slane %v2725_v24, 5  ;;  %v2648_v15 = vsel %vm8656_vm5, %v8719_v46, %v8696_v37 }
 0x12e   : > { %7543 = vmatprep.mubr.msk.bf16.mxu1 %vm476_vm0, %v8690_v47  ;;  %v8724_v0 = vpop.f32.mrf.mxu1  ;;  %v8726_v47 = vrot.slane %v2659_v3, 5  ;;  %v2731_v32 = vshll.u32 %v2476_v48, 16  ;;  %v2735_v44 = vshrl.u32 %v2476_v48, 16  ;;  %v8735_v3 = vrot.slane %v2683_v26, 5  ;;  %11611 = vst [vmem:[#allocation83_spill] sm:$0xff] %v8737_v30 }
 0x12f   : > { %11608 = vst [vmem:[#allocation80_spill] sm:$0xff] %v8724_v0  ;;  %v2679_v0 = vrot.slane %v2677_v35, 5  ;;  %v2713_v48 = vrot.slane %v2711_v49, 4  ;;  %v2474_v26 = vld [vmem:[%s8014_s24 + $0x50] sm:$0x1]  ;;  %v2656_v49 = vor.u32 %v2655_v63, %v8701_v31  ;;  %v2741_v31 = vshll.u32 %v2477_v1, 16 }
 0x130   : > { %7442 = vmatmul.mubr.msk.bf16.gmra.mxu0 %vm476_vm0, %v8236_v50  ;;  %v8733_v50 = vpop.f32.mrf.mxu1  ;;  %v8761_v35 = vrot.slane %v2731_v32, 5  ;;  %v2666_v24 = vor.u32 %v2665_v27, %v8726_v47  ;;  %v2717_v63 = vshll.u32 %v2474_v26, 16  ;;  %v2759_v27 = vshrl.u32 %v2479_v4, 16  ;;  %v2481_v26 = vld [vmem:[%s8014_s24 + $0x6c] sm:$0xf] }
 0x131   : > { %7445 = vmatprep.mubr.msk.bf16.mxu0 %vm476_vm0, %v8241_v51  ;;  %11610 = vst [vmem:[#allocation82_spill] sm:$0xff] %v8733_v50  ;;  %v2700_v51 = vrot.slane %v2698_v42, 4  ;;  %v2724_v42 = vrot.slane %v2722_v34, 4  ;;  %v2478_v50 = vld [vmem:[%s8014_s24 + $0x60] sm:$0xf]  ;;  %v2680_v40 = vor.u32 %v2679_v0, %v2676_v45  ;;  %v2714_v23 = vor.u32 %v2713_v48, %v8740_v62  ;;  %v8783_v45 = vpop.permute.xlu1 %1992  ;;  %v8788_v1 = vpop.permute.xlu0 %1994 }
 0x132   : > { %v8742_v22 = vpop.f32.mrf.mxu1  ;;  %11615 = vst [vmem:[#allocation87_spill] sm:$0xff] %v8783_v45  ;;  %11616 = vst [vmem:[#allocation88_spill] sm:$0xff] %v8788_v1  ;;  %v2743_v39 = vrot.slane %v2741_v31, 5  ;;  %v2484_v46 = vld [vmem:[%s8014_s24 + $0x78] sm:$0xf] }
 0x133   : > { %11612 = vst [vmem:[#allocation84_spill] sm:$0xff] %v8742_v22  ;;  %v2737_v22 = vrot.slane %v2735_v44, 4  ;;  %v2704_v9 = vor.u32 %v2703_v28, %v2700_v51  ;;  %v2728_v32 = vor.u32 %v2727_v38, %v2724_v42  ;;  %v2667_v51 = vrot.slane %v2666_v24, 4 }
 0x134   : > { %v8767_v34 = vpop.f32.mrf.mxu1  ;;  %v2681_v28 = vrot.slane %v2680_v40, 4  ;;  %v2715_v42 = vrot.slane %v2714_v23, 4  ;;  %v2719_v38 = vrot.slane %v2717_v63, 5  ;;  %v2761_v40 = vrot.slane %v2759_v27, 4 }
 0x135   : > { %7544 = vmatmul.mubr.msk.bf16.gmra.mxu1 %vm476_vm0, %v8731_v61  ;;  %11613 = vst [vmem:[#allocation85_spill] sm:$0xff] %v8767_v34  ;;  %v2690_v61 = vor.u32 %v2689_v18, %v8735_v3  ;;  %v2749_v34 = vshll.u32 %v2478_v50, 16  ;;  %v8778_v18 = vrot.slane %v2656_v49, 4  ;;  %v2738_v0 = vor.u32 %v2737_v22, %v8761_v35  ;;  %v2482_v49 = vld [vmem:[%s8014_s24 + $0x70] sm:$0xf] }
 0x136   : > { %7547 = vmatprep.mubr.msk.bf16.mxu1 %vm476_vm0, %v8737_v30  ;;  %v8774_v44 = vpop.f32.mrf.mxu1  ;;  %v2746_v30 = vshrl.u32 %v2478_v50, 16  ;;  %v2695_v50 = vrot.slane %v2693_v21, 5  ;;  %v2729_v22 = vrot.slane %v2728_v32, 4  ;;  %v2770_v24 = vshrl.u32 %v2481_v26, 16 }
 0x137   : > { %11614 = vst [vmem:[#allocation86_spill] sm:$0xff] %v8774_v44  ;;  %v2691_v48 = vrot.slane %v2690_v61, 4  ;;  %v2751_v5 = vrot.slane %v2749_v34, 5  ;;  %v2739_v21 = vrot.slane %v2738_v0, 4  ;;  %v2480_v61 = vld [vmem:[%s8014_s24 + $0x68] sm:$0x1]  ;;  %v2672_v31 = vsel %vm8656_vm5, %v2667_v51, %v8780_v2 }
 0x138   : > { %7446 = vmatmul.mubr.msk.bf16.gmra.mxu0 %vm476_vm0, %v8246_v52  ;;  %v8785_v52 = vpop.f32.mrf.mxu1  ;;  %v2748_v4 = vrot.slane %v2746_v30, 4  ;;  %v2662_v30 = vsel %vm8656_vm5, %v8778_v18, %v8726_v47  ;;  %v2779_v34 = vshll.u32 %v2482_v49, 16  ;;  %v2783_v63 = vshrl.u32 %v2482_v49, 16  ;;  %v2485_v51 = vld [vmem:[%s8014_s24 + $0x7c] sm:$0xf]  ;;  %v8844_v49 = vpop.permute.xlu0 %1998 }
 0x139   : > { %7449 = vmatprep.mubr.msk.bf16.mxu0 %vm476_vm0, %v8255_v53  ;;  %v2705_v53 = vrot.slane %v2704_v9, 4  ;;  %v2773_v9 = vshll.u32 %v2481_v26, 16  ;;  %v2686_v32 = vsel %vm8656_vm5, %v2681_v28, %v8735_v3  ;;  %v2696_v0 = vsel %vm8656_vm5, %v2691_v48, %v2695_v50  ;;  %v8837_v50 = vpop.permute.xlu1 %1996  ;;  %11620 = vst [vmem:[#allocation92_spill] sm:$0xff] %v8844_v49 }
 0x13a   : > { %v8791_v44 = vpop.f32.mrf.mxu1  ;;  %v2720_v18 = vsel %vm8656_vm5, %v2715_v42, %v2719_v38  ;;  %v2734_v3 = vsel %vm8656_vm5, %v2729_v22, %v8761_v35  ;;  %v2752_v2 = vor.u32 %v2751_v5, %v2748_v4  ;;  %v2765_v27 = vshll.u32 %v2480_v61, 16  ;;  %11618 = vst [vmem:[#allocation90_spill] sm:$0xff] %v8837_v50 }
 0x13b   : > { %v2710_v37 = vsel %vm8656_vm5, %v2705_v53, %v8740_v62  ;;  %v2744_v62 = vsel %vm8656_vm5, %v2739_v21, %v2743_v39  ;;  %v2772_v28 = vrot.slane %v2770_v24, 4  ;;  %v2775_v48 = vrot.slane %v2773_v9, 5  ;;  %v2483_v53 = vld [vmem:[%s8014_s24 + $0x74] sm:$0x1]  ;;  %v2487_v9 = vld [vmem:[%s8014_s24 + $0x84] sm:$0xf] }
 0x13c   : > { %v8800_v23 = vpop.f32.mrf.mxu1  ;;  %v8842_v35 = vrot.slane %v2779_v34, 5  ;;  %v2785_v5 = vrot.slane %v2783_v63, 4  ;;  %v2794_v42 = vshrl.u32 %v2484_v46, 16  ;;  %v2797_v38 = vshll.u32 %v2484_v46, 16  ;;  %v2488_v63 = vld [vmem:[%s8014_s24 + $0x88] sm:$0xf] }
 0x13d   : > { %7548 = vmatmul.mubr.msk.bf16.gmra.mxu1 %vm476_vm0, %v8783_v45  ;;  %v11622_v39 = vsel %vm8656_vm5, %v8684_v41, %v8642_v29  ;;  %v11623_v4 = vsel %vm8656_vm5, %v8694_v43, %v8660_v60  ;;  %v2803_v61 = vshll.u32 %v2485_v51, 16  ;;  %v2753_v29 = vrot.slane %v2752_v2, 4  ;;  %v2490_v46 = vld [vmem:[%s8014_s24 + $0x90] sm:$0xf] }
 0x13e   : > { %7551 = vmatprep.mubr.msk.bf16.mxu1 %vm476_vm0, %v8788_v1  ;;  %v8824_v47 = vpop.f32.mrf.mxu1  ;;  %v8863_v21 = vcombine.low %v11623_v4, %v2648_v15  ;;  %v2767_v41 = vrot.slane %v2765_v27, 5  ;;  %v8874_v60 = vcombine.low %v2710_v37, %v2720_v18  ;;  %v8876_v43 = vcombine.low %v2734_v3, %v2744_v62  ;;  %v2491_v27 = vld [vmem:[%s8014_s24 + $0x94] sm:$0xf] }
 0x13f   : > { %11617 = vst [vmem:[#allocation89_spill] sm:$0xff] %v8824_v47  ;;  %v2789_v34 = vshll.u32 %v2483_v53, 16  ;;  %v2799_v2 = vrot.slane %v2797_v38, 5  ;;  %v8887_v37 = vrot.slane %v2803_v61, 5  ;;  %v2818_v3 = vshrl.u32 %v2487_v9, 16 }
 0x140   : > { %7450 = vmatmul.mubr.msk.bf16.gmra.mxu0 %vm476_vm0, %v8260_v54  ;;  %v2762_v54 = vor.u32 %v2761_v40, %v8793_v13  ;;  %v8839_v26 = vpop.f32.mrf.mxu1  ;;  %v2807_v40 = vshrl.u32 %v2485_v51, 16  ;;  %11625 = vst [vmem:[#allocation94_spill] sm:$0xff] %v8874_v60  ;;  %11626 = vst [vmem:[#allocation95_spill] sm:$0xff] %v8876_v43  ;;  %v2486_v51 = vld [vmem:[%s8014_s24 + $0x80] sm:$0x1]  ;;  %v2821_v62 = vshll.u32 %v2487_v9, 16 }
 0x141   : > { %7453 = vmatprep.mubr.msk.bf16.mxu0 %vm476_vm0, %v8265_v55  ;;  %11619 = vst [vmem:[#allocation91_spill] sm:$0xff] %v8839_v26  ;;  %v11621_v55 = vsel %vm8656_vm5, %v8692_v6, %v8686_v33  ;;  %v8867_v33 = vcombine.low %v2662_v30, %v2672_v31  ;;  %v8869_v6 = vcombine.low %v2686_v32, %v2696_v0  ;;  %v2796_v0 = vrot.slane %v2794_v42, 4 }
 0x142   : > { %v8856_v22 = vcombine.low %v11622_v39, %v11621_v55  ;;  %v8865_v24 = vpop.f32.mrf.mxu1  ;;  %v2763_v15 = vrot.slane %v2762_v54, 4  ;;  %v2776_v31 = vor.u32 %v2775_v48, %v2772_v28  ;;  %v2786_v32 = vor.u32 %v2785_v5, %v8842_v35  ;;  %v8900_v39 = vpop.permute.xlu1 %2000 }
 0x143   : > { %11624 = vst [vmem:[#allocation93_spill] sm:$0xff] %v8865_v24  ;;  %v2809_v18 = vrot.slane %v2807_v40, 4  ;;  %v2827_v53 = vshll.u32 %v2488_v63, 16  ;;  %v2831_v55 = vshrl.u32 %v2488_v63, 16  ;;  %v2842_v28 = vshrl.u32 %v2490_v46, 16  ;;  %11629 = vst [vmem:[#allocation98_spill] sm:$0xff] %v8900_v39 }
 0x144   : > { %v8882_v30 = vpop.f32.mrf.mxu1  ;;  %v2845_v48 = vshll.u32 %v2490_v46, 16  ;;  %v2758_v5 = vsel %vm8656_vm5, %v2753_v29, %v8793_v13  ;;  %v2768_v42 = vsel %vm8656_vm5, %v2763_v15, %v2767_v41  ;;  %v2851_v38 = vshll.u32 %v2491_v27, 16  ;;  %v2493_v63 = vld [vmem:[%s8014_s24 + $0x9c] sm:$0xf]  ;;  %v2489_v29 = vld [vmem:[%s8014_s24 + $0x8c] sm:$0x1] }
 0x145   : > { %7552 = vmatmul.mubr.msk.bf16.gmra.mxu1 %vm476_vm0, %v8837_v50  ;;  %11627 = vst [vmem:[#allocation96_spill] sm:$0xff] %v8882_v30  ;;  %v8904_v61 = vrot.slane %v2776_v31, 4  ;;  %v8906_v40 = vrot.slane %v2789_v34, 5  ;;  %v2813_v9 = vshll.u32 %v2486_v51, 16  ;;  %v8909_v46 = vrot.slane %v2786_v32, 4 }
 0x146   : > { %7555 = vmatprep.mubr.msk.bf16.mxu1 %vm476_vm0, %v8844_v49  ;;  %v8891_v54 = vpop.f32.mrf.mxu1  ;;  %v2810_v13 = vor.u32 %v2809_v18, %v8887_v37  ;;  %v2820_v41 = vrot.slane %v2818_v3, 4  ;;  %v2823_v15 = vrot.slane %v2821_v62, 5  ;;  %v8915_v49 = vrot.slane %v2827_v53, 5  ;;  %v2494_v34 = vld [vmem:[%s8014_s24 + $0xa0] sm:$0xf] }
 0x147   : > { %11628 = vst [vmem:[#allocation97_spill] sm:$0xff] %v8891_v54  ;;  %v2833_v50 = vrot.slane %v2831_v55, 4  ;;  %v2844_v31 = vrot.slane %v2842_v28, 4  ;;  %v2847_v1 = vrot.slane %v2845_v48, 5  ;;  %v8921_v32 = vrot.slane %v2851_v38, 5 }
 0x148   : > { %7454 = vmatmul.mubr.msk.bf16.gmra.mxu0 %vm476_vm0, %v8272_v56  ;;  %v2855_v56 = vshrl.u32 %v2491_v27, 16  ;;  %v8902_v4 = vpop.f32.mrf.mxu1  ;;  %v2866_v51 = vshrl.u32 %v2493_v63, 16  ;;  %v2869_v18 = vshll.u32 %v2493_v63, 16  ;;  %v8927_v62 = vcombine.low %v2758_v5, %v2768_v42  ;;  %v2496_v63 = vld [vmem:[%s8014_s24 + $0xa8] sm:$0xf] }
 0x149   : > { %7457 = vmatprep.mubr.msk.bf16.mxu0 %vm476_vm0, %v8279_v57  ;;  %11630 = vst [vmem:[#allocation99_spill] sm:$0xff] %v8902_v4  ;;  %v2800_v57 = vor.u32 %v2799_v2, %v2796_v0  ;;  %v2492_v0 = vld [vmem:[%s8014_s24 + $0x98] sm:$0x1]  ;;  %v2782_v53 = vsel %vm8656_vm5, %v8904_v61, %v8842_v35  ;;  %v2837_v28 = vshll.u32 %v2489_v29, 16  ;;  %v2792_v48 = vsel %vm8656_vm5, %v8909_v46, %v8906_v40  ;;  %v2497_v29 = vld [vmem:[%s8014_s24 + $0xac] sm:$0xf] }
 0x14a   : > { %v8913_v27 = vpop.f32.mrf.mxu1  ;;  %v2857_v2 = vrot.slane %v2855_v56, 4  ;;  %11633 = vst [vmem:[#allocation102_spill] sm:$0xff] %v8927_v62  ;;  %v2811_v38 = vrot.slane %v2810_v13, 4  ;;  %v2815_v56 = vrot.slane %v2813_v9, 5  ;;  %v2834_v42 = vor.u32 %v2833_v50, %v8915_v49  ;;  %v2495_v50 = vld [vmem:[%s8014_s24 + $0xa4] sm:$0x1] }
 0x14b   : > { %11631 = vst [vmem:[#allocation100_spill] sm:$0xff] %v8913_v27  ;;  %v2801_v55 = vrot.slane %v2800_v57, 4  ;;  %v2848_v35 = vor.u32 %v2847_v1, %v2844_v31  ;;  %v2861_v61 = vshll.u32 %v2492_v0, 16  ;;  %v2875_v57 = vshll.u32 %v2494_v34, 16  ;;  %v2501_v4 = vld [vmem:[%s8014_s24 + $0xbc] sm:$0x1] }
 0x14c   : > { %v8925_v3 = vpop.f32.mrf.mxu1  ;;  %v2858_v40 = vor.u32 %v2857_v2, %v8921_v32  ;;  %v2868_v9 = vrot.slane %v2866_v51, 4  ;;  %v2871_v46 = vrot.slane %v2869_v18, 5  ;;  %v2879_v13 = vshrl.u32 %v2494_v34, 16  ;;  %v2499_v34 = vld [vmem:[%s8014_s24 + $0xb4] sm:$0xf] }
 0x14d   : > { %7556 = vmatmul.mubr.msk.bf16.gmra.mxu1 %vm476_vm0, %v8900_v39  ;;  %11632 = vst [vmem:[#allocation101_spill] sm:$0xff] %v8925_v3  ;;  %v8952_v1 = vrot.slane %v2837_v28, 5  ;;  %v2893_v31 = vshll.u32 %v2496_v63, 16  ;;  %v2899_v2 = vshll.u32 %v2497_v29, 16  ;;  %v2903_v51 = vshrl.u32 %v2497_v29, 16 }
 0x14e   : > { %7627 = vmatprep.mubr.msk.bf16.mxu1 %vm476_vm0, %v8327_v7  ;;  %v2824_v7 = vor.u32 %v2823_v15, %v2820_v41  ;;  %v8940_v5 = vpop.f32.mrf.mxu1  ;;  %v2890_v15 = vshrl.u32 %v2496_v63, 16  ;;  %v8962_v39 = vrot.slane %v2834_v42, 4  ;;  %v8964_v45 = vrot.slane %v2848_v35, 4  ;;  %v2500_v28 = vld [vmem:[%s8014_s24 + $0xb8] sm:$0xf] }
 0x14f   : > { %11634 = vst [vmem:[#allocation103_spill] sm:$0xff] %v8940_v5  ;;  %v2885_v63 = vshll.u32 %v2495_v50, 16  ;;  %v2498_v35 = vld [vmem:[%s8014_s24 + $0xb0] sm:$0x1]  ;;  %v2914_v29 = vshrl.u32 %v2499_v34, 16 }
 0x150   : > { %7458 = vmatmul.mubr.msk.bf16.gmra.mxu0 %vm476_vm0, %v8284_v58  ;;  %v8947_v41 = vpop.f32.mrf.mxu1  ;;  %v2806_v58 = vsel %vm8656_vm5, %v2801_v55, %v8887_v37  ;;  %v8957_v0 = vrot.slane %v2824_v7, 4  ;;  %v8966_v37 = vrot.slane %v2861_v61, 5  ;;  %v8968_v55 = vrot.slane %v2875_v57, 5 }
 0x151   : > { %7461 = vmatprep.mubr.msk.bf16.mxu0 %vm476_vm0, %v8289_v59  ;;  %11635 = vst [vmem:[#allocation104_spill] sm:$0xff] %v8947_v41  ;;  %v2816_v59 = vsel %vm8656_vm5, %v2811_v38, %v2815_v56  ;;  %v8973_v38 = vrot.slane %v2858_v40, 4  ;;  %v2872_v56 = vor.u32 %v2871_v46, %v2868_v9  ;;  %v2881_v7 = vrot.slane %v2879_v13, 4  ;;  %v2506_v41 = vld [vmem:[%s8014_s24 + $0xd0] sm:$0xf] }
 0x152   : > { %v8960_v18 = vpop.f32.mrf.mxu1  ;;  %v2892_v61 = vrot.slane %v2890_v15, 4  ;;  %v2895_v57 = vrot.slane %v2893_v31, 5  ;;  %v2905_v40 = vrot.slane %v2903_v51, 4  ;;  %v2923_v9 = vshll.u32 %v2500_v28, 16  ;;  %v7910_v51 = vld [vmem:[%s8014_s24 + $0xe4] sm:$0xff]  }
 0x153   : > { %11636 = vst [vmem:[#allocation105_spill] sm:$0xff] %v8960_v18  ;;  %v2917_v18 = vshll.u32 %v2499_v34, 16  ;;  %v2927_v46 = vshrl.u32 %v2500_v28, 16  ;;  %v8991_v15 = vcombine.low %v2806_v58, %v2816_v59  ;;  %v9011_v58 = vrot.slane %v2885_v63, 5  ;;  %v2502_v34 = vld [vmem:[%s8014_s24 + $0xc0] sm:$0xf] }
 0x154   : > { %v8977_v42 = vpop.f32.mrf.mxu1  ;;  %v2909_v59 = vshll.u32 %v2498_v35, 16  ;;  %v2503_v28 = vld [vmem:[%s8014_s24 + $0xc4] sm:$0xf]  ;;  %v9022_v5 = vrot.slane %v2872_v56, 4  ;;  %v2941_v54 = vshll.u32 %v2502_v34, 16 }
 0x155   : > { %7628 = vmatmul.mubr.msk.bf16.vlgmr.msra.gmra.mxu1 %vm476_vm0, %v8339_v11  ;;  %11637 = vst [vmem:[#allocation106_spill] sm:$0xff] %v8977_v42  ;;  %v8981_v11 = vrot.slane %v2899_v2, 5  ;;  %11640 = vst [vmem:[#allocation109_spill] sm:$0xff] %v8991_v15  ;;  %v2896_v2 = vor.u32 %v2895_v57, %v2892_v61  ;;  %v2505_v42 = vld [vmem:[%s8014_s24 + $0xcc] sm:$0xf]  ;;  %v2929_v35 = vrot.slane %v2927_v46, 4 }
 0x156   : > { %7631 = vmatprep.mubr.msk.bf16.mxu1 %vm476_vm0, %v8329_v8  ;;  %7758 = vmatpush3.bf16.msra.mxu1 %v8148_v36  ;;  %v7909_v8 = vld [vmem:[%s8014_s24 + $0xd8] sm:$0xff]   ;;  %v8987_v50 = vpop.f32.mrf.mxu1  ;;  %v8989_v36 = vcombine.low %v2782_v53, %v2792_v48  ;;  %v2919_v53 = vrot.slane %v2917_v18, 5  ;;  %v9025_v48 = vrot.slane %v2923_v9, 5  ;;  %v2951_v61 = vshrl.u32 %v2503_v28, 16 }
 0x157   : > { %11638 = vst [vmem:[#allocation107_spill] sm:$0xff] %v8987_v50  ;;  %v2916_v50 = vrot.slane %v2914_v29, 4  ;;  %v2906_v63 = vor.u32 %v2905_v40, %v8981_v11  ;;  %v2962_v18 = vshrl.u32 %v2505_v42, 16  ;;  %v2965_v56 = vshll.u32 %v2505_v42, 16  ;;  %v7912_v15 = vld [vmem:[%s8014_s24 + $0xfc] sm:$0xff]  }
 0x158   : > { %v8983_v13 = vpop.f32.mrf.mxu0  ;;  %7462 = vmatmul.mubr.msk.bf16.gmra.mxu0 %vm476_vm0, %v7909_v8  ;;  %11639 = vst [vmem:[#allocation108_spill] sm:$0xff] %v8989_v36  ;;  %v9017_v31 = vpop.f32.mrf.mxu1  ;;  %v2971_v57 = vshll.u32 %v2506_v41, 16  ;;  %v2975_v29 = vshrl.u32 %v2506_v41, 16  ;;  %v2953_v41 = vrot.slane %v2951_v61, 4 }
 0x159   : > { %7465 = vmatprep.mubr.msk.bf16.mxu0 %vm476_vm0, %v7910_v51  ;;  %11641 = vst [vmem:[#allocation110_spill] sm:$0xff] %v9017_v31  ;;  %v2882_v51 = vor.u32 %v2881_v7, %v8968_v55  ;;  %v2938_v31 = vshrl.u32 %v2502_v34, 16  ;;  %v2947_v7 = vshll.u32 %v2503_v28, 16  ;;  %v9042_v34 = vrot.slane %v2896_v2, 4  ;;  %v7911_v2 = vld [vmem:[%s8014_s24 + $0xf0] sm:$0xff]  }
 0x15a   : > { %v9015_v8 = vpop.f32.mrf.mxu0  ;;  %v9029_v27 = vpop.f32.mrf.mxu1  ;;  %v9044_v28 = vrot.slane %v2909_v59, 5  ;;  %v9050_v42 = vrot.slane %v2906_v63, 4  ;;  %v2509_v63 = vld [vmem:[%s8014_s24 + $0xdc] sm:$0xf]  ;;  %v9066_v36 = vrot.slane %v2971_v57, 5  ;;  %v2977_v62 = vrot.slane %v2975_v29, 4 }
 0x15b   : > { %11642 = vst [vmem:[#allocation111_spill] sm:$0xff] %v9029_v27  ;;  %v9040_v46 = vrot.slane %v2882_v51, 4  ;;  %v2933_v27 = vshll.u32 %v2501_v4, 16  ;;  %v2508_v51 = vld [vmem:[%s8014_s24 + $0xd8] sm:$0xf]  ;;  %v9061_v24 = vrot.slane %v2947_v7, 5  ;;  %v2902_v61 = vsel %vm8656_vm5, %v9042_v34, %v8981_v11 }
 0x15c   : > { %v9027_v3 = vpop.f32.mrf.mxu0  ;;  %v9038_v9 = vpop.f32.mrf.mxu1  ;;  %v2964_v4 = vrot.slane %v2962_v18, 4  ;;  %v2986_v7 = vshrl.u32 %v2508_v51, 16  ;;  %v2989_v43 = vshll.u32 %v2508_v51, 16  ;;  %v2995_v18 = vshll.u32 %v2509_v63, 16 }
 0x15d   : > { %7632 = vmatmul.mubr.msk.bf16.gmra.mxu1 %vm476_vm0, %v8343_v12  ;;  %11643 = vst [vmem:[#allocation112_spill] sm:$0xff] %v9038_v9  ;;  %v2920_v12 = vor.u32 %v2919_v53, %v2916_v50  ;;  %v2504_v9 = vld [vmem:[%s8014_s24 + $0xc8] sm:$0x1]  ;;  %v2940_v50 = vrot.slane %v2938_v31, 4  ;;  %v2943_v53 = vrot.slane %v2941_v54, 5  ;;  %v2935_v51 = vrot.slane %v2933_v27, 5 }
 0x15e   : > { %v9034_v40 = vpop.f32.mrf.mxu0  ;;  %7635 = vmatprep.mubr.msk.bf16.mxu1 %vm476_vm0, %v8353_v14  ;;  %v2930_v14 = vor.u32 %v2929_v35, %v9025_v48  ;;  %v9059_v59 = vpop.f32.mrf.mxu1  ;;  %v2967_v35 = vrot.slane %v2965_v56, 5  ;;  %v2957_v31 = vshll.u32 %v2504_v9, 16  ;;  %v2507_v54 = vld [vmem:[%s8014_s24 + $0xd4] sm:$0x1]  ;;  %v2999_v56 = vshrl.u32 %v2509_v63, 16 }
 0x15f   : > { %11644 = vst [vmem:[#allocation113_spill] sm:$0xff] %v9059_v59  ;;  %v2921_v59 = vrot.slane %v2920_v12, 4  ;;  %v2912_v9 = vsel %vm8656_vm5, %v9050_v42, %v9044_v28  ;;  %v2954_v11 = vor.u32 %v2953_v41, %v9061_v24  ;;  %v2978_v63 = vor.u32 %v2977_v62, %v9066_v36 }
 0x160   : > { %v9055_v30 = vpop.f32.mrf.mxu0  ;;  %7466 = vmatmul.mubr.msk.bf16.gmra.mxu0 %vm476_vm0, %v7911_v2  ;;  %v9070_v2 = vpop.f32.mrf.mxu1  ;;  %v2931_v12 = vrot.slane %v2930_v14, 4  ;;  %v2968_v34 = vor.u32 %v2967_v35, %v2964_v4  ;;  %v2988_v41 = vrot.slane %v2986_v7, 4  ;;  %v2991_v42 = vrot.slane %v2989_v43, 5  ;;  %v2510_v14 = vld [vmem:[%s8014_s24 + $0xe0] sm:$0x1] }
 0x161   : > { %7469 = vmatprep.mubr.msk.bf16.mxu0 %vm476_vm0, %v7912_v15  ;;  %11645 = vst [vmem:[#allocation114_spill] sm:$0xff] %v9070_v2  ;;  %v2888_v15 = vsel %vm8656_vm5, %v9040_v46, %v9011_v58  ;;  %v2944_v58 = vor.u32 %v2943_v53, %v2940_v50  ;;  %v2511_v46 = vld [vmem:[%s8014_s24 + $0xe4] sm:$0xf]  ;;  %v2512_v2 = vld [vmem:[%s8014_s24 + $0xe8] sm:$0xf]  ;;  %v2926_v28 = vsel %vm8656_vm5, %v2921_v59, %v9025_v48  ;;  %v9105_v62 = vrot.slane %v2995_v18, 5 }
 0x162   : > { %v9068_v26 = vpop.f32.mrf.mxu0  ;;  %v9083_v29 = vpop.f32.mrf.mxu1  ;;  %v3001_v50 = vrot.slane %v2999_v56, 4  ;;  %v3010_v53 = vshrl.u32 %v2511_v46, 16  ;;  %v3013_v4 = vshll.u32 %v2511_v46, 16  ;;  %v3019_v48 = vshll.u32 %v2512_v2, 16 }
 0x163   : > { %11646 = vst [vmem:[#allocation115_spill] sm:$0xff] %v9083_v29  ;;  %v2981_v29 = vshll.u32 %v2507_v54, 16  ;;  %v7913_v54 = vld [vmem:[%s8014_s24 + $0x108] sm:$0xff]   ;;  %v3023_v59 = vshrl.u32 %v2512_v2, 16  ;;  %v2955_v7 = vrot.slane %v2954_v11, 4  ;;  %v2969_v18 = vrot.slane %v2968_v34, 4 }
 0x164   : > { %v9081_v57 = vpop.f32.mrf.mxu0  ;;  %v9099_v27 = vpop.f32.mrf.mxu1  ;;  %v2979_v56 = vrot.slane %v2978_v63, 4  ;;  %v11650_v2 = vsel %vm8656_vm5, %v8957_v0, %v8915_v49  ;;  %v11653_v49 = vsel %vm8656_vm5, %v9022_v5, %v8968_v55  ;;  %v3002_v34 = vor.u32 %v3001_v50, %v9105_v62 }
 0x165   : > { %7636 = vmatmul.mubr.msk.bf16.gmra.mxu1 %vm476_vm0, %v8357_v16  ;;  %11647 = vst [vmem:[#allocation116_spill] sm:$0xff] %v9099_v27  ;;  %v2959_v16 = vrot.slane %v2957_v31, 5  ;;  %v2945_v27 = vrot.slane %v2944_v58, 4  ;;  %v7914_v31 = vld [vmem:[%s8014_s24 + $0x114] sm:$0xff]   ;;  %v2983_v46 = vrot.slane %v2981_v29, 5  ;;  %v11651_v29 = vsel %vm8656_vm5, %v8973_v38, %v8966_v37 }
 0x166   : > { %v9095_v47 = vpop.f32.mrf.mxu0  ;;  %7639 = vmatprep.mubr.msk.bf16.mxu1 %vm476_vm0, %v8362_v17  ;;  %v2936_v17 = vsel %vm8656_vm5, %v2931_v12, %v2935_v51  ;;  %v9115_v43 = vpop.f32.mrf.mxu1  ;;  %v11649_v12 = vsel %vm8656_vm5, %v8962_v39, %v8952_v1  ;;  %v11652_v58 = vsel %vm8656_vm5, %v8964_v45, %v8921_v32  ;;  %v2992_v39 = vor.u32 %v2991_v42, %v2988_v41  ;;  %v2514_v38 = vld [vmem:[%s8014_s24 + $0xf0] sm:$0xf]  ;;  %v2513_v32 = vld [vmem:[%s8014_s24 + $0xec] sm:$0x1] }
 0x167   : > { %11648 = vst [vmem:[#allocation117_spill] sm:$0xff] %v9115_v43  ;;  %v9129_v51 = vcombine.low %v11650_v2, %v11649_v12  ;;  %v9141_v11 = vcombine.low %v11652_v58, %v11651_v29  ;;  %v3005_v1 = vshll.u32 %v2510_v14, 16  ;;  %v9148_v0 = vcombine.low %v11653_v49, %v2888_v15  ;;  %v2515_v14 = vld [vmem:[%s8014_s24 + $0xf4] sm:$0xf]  ;;  %v11658_v12 = vld [vmem:[#allocation44_spill] sm:$0xff]  ;;  %v7916_v29 = vld [vmem:[%s8014_s24 + $0x12c] sm:$0xff]  }
 0x168   : > { %v9107_v35 = vpop.f32.mrf.mxu0  ;;  %7470 = vmatmul.mubr.msk.bf16.gmra.mxu0 %vm476_vm0, %v7913_v54  ;;  %v3012_v63 = vrot.slane %v3010_v53, 4  ;;  %v3015_v37 = vrot.slane %v3013_v4, 5  ;;  %v9156_v45 = vcombine.low %v2926_v28, %v2936_v17  ;;  %v9159_v41 = vrot.slane %v3019_v48, 5  ;;  %v9164_v5 = vpop.f32.mrf.mxu1 }
 0x169   : > { %7473 = vmatprep.mubr.msk.bf16.mxu0 %vm476_vm0, %v7914_v31  ;;  %v9154_v31 = vcombine.low %v2902_v61, %v2912_v9  ;;  %v3025_v42 = vrot.slane %v3023_v59, 4  ;;  %11654 = vst [vmem:[#allocation118_spill] sm:$0xff] %v9164_v5  ;;  %v2950_v55 = vsel %vm8656_vm5, %v2945_v27, %v9061_v24  ;;  %v2960_v15 = vsel %vm8656_vm5, %v2955_v7, %v2959_v16  ;;  %v7915_v59 = vld [vmem:[%s8014_s24 + $0x120] sm:$0xff]  }
 0x16a   : > { %v9117_v60 = vpop.f32.mrf.mxu0  ;;  %v2974_v61 = vsel %vm8656_vm5, %v2969_v18, %v9066_v36  ;;  %v2984_v9 = vsel %vm8656_vm5, %v2979_v56, %v2983_v46  ;;  %v3007_v50 = vrot.slane %v3005_v1, 5  ;;  %v3034_v53 = vshrl.u32 %v2514_v38, 16  ;;  %v11656_v56 = vld [vmem:[#allocation42_spill] sm:$0xff]  ;;  %v9205_v58 = vpop.f32.mrf.mxu1  ;;  %v2517_v1 = vld [vmem:[%s8014_s24 + $0xfc] sm:$0xf] }
 0x16b   : > { %v3037_v24 = vshll.u32 %v2514_v38, 16  ;;  %v3003_v27 = vrot.slane %v3002_v34, 4  ;;  %v3016_v4 = vor.u32 %v3015_v37, %v3012_v63  ;;  %v3029_v16 = vshll.u32 %v2513_v32, 16  ;;  %11662 = vst [vmem:[#allocation120_spill] sm:$0xff] %v9205_v58  ;;  %v2518_v37 = vld [vmem:[%s8014_s24 + $0x100] sm:$0xf] }
 0x16c   : > { %v9152_v54 = vpop.f32.mrf.mxu0  ;;  %v3043_v17 = vshll.u32 %v2515_v14, 16  ;;  %v9182_v36 = vadd.f32 %v8529_v10, %v8983_v13  ;;  %v3026_v7 = vor.u32 %v3025_v42, %v9159_v41  ;;  %v3047_v18 = vshrl.u32 %v2515_v14, 16  ;;  %v11660_v13 = vld [vmem:[#allocation46_spill] sm:$0xff]  ;;  %v2527_v5 = vld [vmem:[%s8014_s24 + $0x124] sm:$0xf] }
 0x16d   : > { %7640 = vmatmul.mubr.msk.bf16.gmra.mxu1 %vm476_vm0, %v8367_v19  ;;  %v2993_v19 = vrot.slane %v2992_v39, 4  ;;  %v9193_v46 = vadd.f32 %v11656_v56, %v9015_v8  ;;  %v9197_v10 = vadd.f32 %v11658_v12, %v9027_v3  ;;  %v9201_v2 = vadd.f32 %v11660_v13, %v9034_v40  ;;  %v11663_v8 = vld [vmem:[#allocation47_spill] sm:$0xff]  ;;  %v2520_v38 = vld [vmem:[%s8014_s24 + $0x108] sm:$0xf]  ;;  %v2521_v12 = vld [vmem:[%s8014_s24 + $0x10c] sm:$0xf] }
 0x16e   : > { %v9176_v28 = vpop.f32.mrf.mxu0  ;;  %7643 = vmatprep.mubr.msk.bf16.mxu1 %vm476_vm0, %v8373_v20  ;;  %11655 = vst [vmem:[#allocation119_spill] sm:$0xff] %v9182_v36  ;;  %v9188_v20 = vcombine.low %v2950_v55, %v2960_v15  ;;  %v9207_v39 = vcombine.low %v2974_v61, %v2984_v9  ;;  %v9212_v49 = vadd.f32 %v11663_v8, %v9055_v30  ;;  %v3036_v40 = vrot.slane %v3034_v53, 4  ;;  %v2516_v55 = vld [vmem:[%s8014_s24 + $0xf8] sm:$0x1] }
 0x16f   : > { %11657 = vst [vmem:[#allocation42_spill] sm:$0xff] %v9193_v46  ;;  %11659 = vst [vmem:[#allocation44_spill] sm:$0xff] %v9197_v10  ;;  %v2998_v3 = vsel %vm8656_vm5, %v2993_v19, %v9105_v62  ;;  %v3039_v63 = vrot.slane %v3037_v24, 5  ;;  %v3008_v32 = vsel %vm8656_vm5, %v3003_v27, %v3007_v50  ;;  %v3017_v42 = vrot.slane %v3016_v4, 4  ;;  %v11665_v62 = vld [vmem:[#allocation6_spill] sm:$0xff]  ;;  %v9231_v19 = vpop.f32.mrf.mxu1  ;;  %v11667_v4 = vld [vmem:[#allocation48_spill] sm:$0xff] }
 0x170   : > { %v9184_v48 = vpop.f32.mrf.mxu0  ;;  %7474 = vmatmul.mubr.msk.bf16.gmra.mxu0 %vm476_vm0, %v7915_v59  ;;  %11661 = vst [vmem:[#allocation46_spill] sm:$0xff] %v9201_v2  ;;  %11664 = vst [vmem:[#allocation47_spill] sm:$0xff] %v9212_v49  ;;  %v3031_v14 = vrot.slane %v3029_v16, 5  ;;  %v9224_v15 = vrot.slane %v3043_v17, 5  ;;  %v3027_v61 = vrot.slane %v3026_v7, 4  ;;  %v3049_v9 = vrot.slane %v3047_v18, 4 }
 0x171   : > { %7477 = vmatprep.mubr.msk.bf16.mxu0 %vm476_vm0, %v7916_v29  ;;  %v3058_v59 = vshrl.u32 %v2517_v1, 16  ;;  %v3061_v56 = vshll.u32 %v2517_v1, 16  ;;  %11666 = vst [vmem:[#allocation6_spill] sm:$0xff] %v9231_v19  ;;  %v3067_v53 = vshll.u32 %v2518_v37, 16  ;;  %v3071_v50 = vshrl.u32 %v2518_v37, 16  ;;  %v11669_v7 = vld [vmem:[#allocation7_spill] sm:$0xff] }
 0x172   : > { %v9214_v34 = vpop.f32.mrf.mxu0  ;;  %v3082_v24 = vshrl.u32 %v2520_v38, 16  ;;  %v3085_v27 = vshll.u32 %v2520_v38, 16  ;;  %v9235_v16 = vadd.f32 %v11667_v4, %v9068_v26  ;;  %v9241_v18 = vcombine.low %v2998_v3, %v3008_v32  ;;  %v11671_v1 = vld [vmem:[#allocation50_spill] sm:$0xff]  ;;  %v7917_v4 = vld [vmem:[%s8014_s24 + $0x138] sm:$0xff]   ;;  %v2523_v32 = vld [vmem:[%s8014_s24 + $0x114] sm:$0xf] }
 0x173   : > { %v3040_v13 = vor.u32 %v3039_v63, %v3036_v40  ;;  %v3053_v29 = vshll.u32 %v2516_v55, 16  ;;  %v9245_v8 = vadd.f32 %v11671_v1, %v9081_v57  ;;  %v3022_v26 = vsel %vm8656_vm5, %v3017_v42, %v9159_v41  ;;  %v7918_v55 = vld [vmem:[%s8014_s24 + $0x144] sm:$0xff]   ;;  %v9260_v41 = vpop.f32.mrf.mxu1 }
 0x174   : > { %v9226_v30 = vpop.f32.mrf.mxu0  ;;  %11668 = vst [vmem:[#allocation48_spill] sm:$0xff] %v9235_v16  ;;  %11670 = vst [vmem:[#allocation7_spill] sm:$0xff] %v9241_v18  ;;  %v3091_v37 = vshll.u32 %v2521_v12, 16  ;;  %v3095_v38 = vshrl.u32 %v2521_v12, 16  ;;  %v3032_v3 = vsel %vm8656_vm5, %v3027_v61, %v3031_v14  ;;  %v3050_v40 = vor.u32 %v3049_v9, %v9224_v15  ;;  %v11674_v14 = vld [vmem:[#allocation52_spill] sm:$0xff]  ;;  %v11676_v9 = vld [vmem:[#allocation53_spill] sm:$0xff] }
 0x175   : > { %7644 = vmatmul.mubr.msk.bf16.gmra.mxu1 %vm476_vm0, %v11665_v62  ;;  %11672 = vst [vmem:[#allocation50_spill] sm:$0xff] %v9245_v8  ;;  %v3060_v63 = vrot.slane %v3058_v59, 4  ;;  %v3063_v57 = vrot.slane %v3061_v56, 5  ;;  %11673 = vst [vmem:[#allocation121_spill] sm:$0xff] %v9260_v41  ;;  %v9262_v42 = vrot.slane %v3067_v53, 5  ;;  %v3073_v12 = vrot.slane %v3071_v50, 4 }
 0x176   : > { %v9237_v17 = vpop.f32.mrf.mxu0  ;;  %7647 = vmatprep.mubr.msk.bf16.mxu1 %vm476_vm0, %v11669_v7  ;;  %v3084_v7 = vrot.slane %v3082_v24, 4  ;;  %v3087_v1 = vrot.slane %v3085_v27, 5  ;;  %v9267_v61 = vadd.f32 %v11674_v14, %v9095_v47  ;;  %v9271_v59 = vadd.f32 %v11676_v9, %v9107_v35  ;;  %v2519_v41 = vld [vmem:[%s8014_s24 + $0x104] sm:$0x1]  ;;  %v2526_v50 = vld [vmem:[%s8014_s24 + $0x120] sm:$0xf] }
 0x177   : > { %v9277_v53 = vrot.slane %v3053_v29, 5  ;;  %v9281_v24 = vrot.slane %v3091_v37, 5  ;;  %v3097_v27 = vrot.slane %v3095_v38, 4  ;;  %v3106_v19 = vshrl.u32 %v2523_v32, 16  ;;  %v2522_v9 = vld [vmem:[%s8014_s24 + $0x110] sm:$0x1]  ;;  %v9291_v29 = vpop.f32.mrf.mxu1 }
 0x178   : > { %v9250_v62 = vpop.f32.mrf.mxu0  ;;  %7478 = vmatmul.mubr.msk.bf16.gmra.mxu0 %vm476_vm0, %v7917_v4  ;;  %v2524_v4 = vld [vmem:[%s8014_s24 + $0x118] sm:$0xf]  ;;  %11675 = vst [vmem:[#allocation52_spill] sm:$0xff] %v9267_v61  ;;  %11677 = vst [vmem:[#allocation53_spill] sm:$0xff] %v9271_v59  ;;  %v3109_v58 = vshll.u32 %v2523_v32, 16  ;;  %v9286_v14 = vcombine.low %v3022_v26, %v3032_v3  ;;  %v3051_v35 = vrot.slane %v3050_v40, 4  ;;  %v3064_v61 = vor.u32 %v3063_v57, %v3060_v63 }
 0x179   : > { %7481 = vmatprep.mubr.msk.bf16.mxu0 %vm476_vm0, %v7918_v55  ;;  %v9275_v55 = vrot.slane %v3040_v13, 4  ;;  %v3115_v43 = vshll.u32 %v2524_v4, 16  ;;  %v3119_v59 = vshrl.u32 %v2524_v4, 16  ;;  %v11679_v13 = vld [vmem:[#allocation8_spill] sm:$0xff]  ;;  %v3074_v37 = vor.u32 %v3073_v12, %v9262_v42  ;;  %v11681_v26 = vld [vmem:[#allocation9_spill] sm:$0xff]  ;;  %v11682_v12 = vld [vmem:[#allocation54_spill] sm:$0xff] }
 0x17a   : > { %v9273_v56 = vpop.f32.mrf.mxu0  ;;  %11678 = vst [vmem:[#allocation122_spill] sm:$0xff] %v9286_v14  ;;  %11680 = vst [vmem:[#allocation8_spill] sm:$0xff] %v9291_v29  ;;  %v3077_v38 = vshll.u32 %v2519_v41, 16  ;;  %v3088_v32 = vor.u32 %v3087_v1, %v3084_v7  ;;  %v3130_v3 = vshrl.u32 %v2526_v50, 16  ;;  %v3133_v40 = vshll.u32 %v2526_v50, 16  ;;  %v7919_v1 = vld [vmem:[%s8014_s24 + $0x150] sm:$0xff]  }
 0x17b   : > { %v3139_v4 = vshll.u32 %v2527_v5, 16  ;;  %v3143_v16 = vshrl.u32 %v2527_v5, 16  ;;  %v3101_v29 = vshll.u32 %v2522_v9, 16  ;;  %v3108_v63 = vrot.slane %v3106_v19, 4  ;;  %v2525_v50 = vld [vmem:[%s8014_s24 + $0x11c] sm:$0x1] }
 0x17c   : > { %v9284_v47 = vpop.f32.mrf.mxu0  ;;  %v3111_v57 = vrot.slane %v3109_v58, 5  ;;  %v9301_v41 = vadd.f32 %v11682_v12, %v9117_v60  ;;  %v3046_v5 = vsel %vm8656_vm5, %v9275_v55, %v9224_v15  ;;  %v3121_v19 = vrot.slane %v3119_v59, 4  ;;  %v7920_v58 = vld [vmem:[%s8014_s24 + $0x15c] sm:$0xff]   ;;  %v9316_v60 = vpop.f32.mrf.mxu1 }
 0x17d   : > { %7648 = vmatmul.mubr.msk.bf16.gmra.mxu1 %vm476_vm0, %v11679_v13  ;;  %v3098_v13 = vor.u32 %v3097_v27, %v9281_v24  ;;  %v9312_v27 = vrot.slane %v3115_v43, 5  ;;  %11684 = vst [vmem:[#allocation54_spill] sm:$0xff] %v9316_v60  ;;  %v3056_v9 = vsel %vm8656_vm5, %v3051_v35, %v9277_v53  ;;  %v3075_v12 = vrot.slane %v3074_v37, 4  ;;  %v2528_v60 = vld [vmem:[%s8014_s24 + $0x128] sm:$0x1] }
 0x17e   : > { %v9294_v8 = vpop.f32.mrf.mxu0  ;;  %7651 = vmatprep.mubr.msk.bf16.mxu1 %vm476_vm0, %v11681_v26  ;;  %11683 = vst [vmem:[#allocation9_spill] sm:$0xff] %v9301_v41  ;;  %v3065_v26 = vrot.slane %v3064_v61, 4  ;;  %v2529_v41 = vld [vmem:[%s8014_s24 + $0x12c] sm:$0xf]  ;;  %v3132_v15 = vrot.slane %v3130_v3, 4  ;;  %v3135_v43 = vrot.slane %v3133_v40, 5  ;;  %v3112_v10 = vor.u32 %v3111_v57, %v3108_v63 }
 0x17f   : > { %v9324_v55 = vrot.slane %v3139_v4, 5  ;;  %v3145_v59 = vrot.slane %v3143_v16, 4  ;;  %v3089_v14 = vrot.slane %v3088_v32, 4  ;;  %v3103_v2 = vrot.slane %v3101_v29, 5  ;;  %v11687_v40 = vld [vmem:[#allocation58_spill] sm:$0xff]  ;;  %v9340_v29 = vpop.f32.mrf.mxu1 }
 0x180   : > { %v9303_v7 = vpop.f32.mrf.mxu0  ;;  %7482 = vmatmul.mubr.msk.bf16.gmra.mxu0 %vm476_vm0, %v7919_v1  ;;  %v3079_v1 = vrot.slane %v3077_v38, 5  ;;  %v3122_v53 = vor.u32 %v3121_v19, %v9312_v27  ;;  %v3125_v61 = vshll.u32 %v2525_v50, 16  ;;  %v3154_v35 = vshrl.u32 %v2529_v41, 16  ;;  %v11685_v38 = vld [vmem:[#allocation56_spill] sm:$0xff]  ;;  %v11689_v32 = vld [vmem:[#allocation10_spill] sm:$0xff]  ;;  %v11693_v19 = vld [vmem:[#allocation59_spill] sm:$0xff] }
 0x181   : > { %7485 = vmatprep.mubr.msk.bf16.mxu0 %vm476_vm0, %v7920_v58  ;;  %v3099_v58 = vrot.slane %v3098_v13, 4  ;;  %v3157_v37 = vshll.u32 %v2529_v41, 16  ;;  %v9332_v3 = vadd.f32 %v11685_v38, %v9152_v54  ;;  %v9336_v16 = vadd.f32 %v11687_v40, %v9176_v28  ;;  %11690 = vst [vmem:[#allocation10_spill] sm:$0xff] %v9340_v29  ;;  %v11692_v54 = vld [vmem:[#allocation11_spill] sm:$0xff]  ;;  %v11695_v40 = vld [vmem:[#allocation60_spill] sm:$0xff] }
 0x182   : > { %v9322_v49 = vpop.f32.mrf.mxu0  ;;  %v9342_v4 = vcombine.low %v3046_v5, %v3056_v9  ;;  %v3070_v13 = vsel %vm8656_vm5, %v3065_v26, %v9262_v42  ;;  %v3080_v28 = vsel %vm8656_vm5, %v3075_v12, %v3079_v1  ;;  %v3136_v57 = vor.u32 %v3135_v43, %v3132_v15  ;;  %v2530_v5 = vld [vmem:[%s8014_s24 + $0x130] sm:$0xf]  ;;  %v7921_v1 = vld [vmem:[%s8014_s24 + $0x168] sm:$0xff]   ;;  %v2531_v43 = vld [vmem:[%s8014_s24 + $0x134] sm:$0x1] }
 0x183   : > { %11686 = vst [vmem:[#allocation56_spill] sm:$0xff] %v9332_v3  ;;  %11688 = vst [vmem:[#allocation58_spill] sm:$0xff] %v9336_v16  ;;  %v3146_v41 = vor.u32 %v3145_v59, %v9324_v55  ;;  %v3149_v50 = vshll.u32 %v2528_v60, 16  ;;  %v9357_v9 = vadd.f32 %v11693_v19, %v9184_v48  ;;  %v3094_v42 = vsel %vm8656_vm5, %v3089_v14, %v9281_v24  ;;  %v9373_v24 = vpop.f32.mrf.mxu1 }
 0x184   : > { %v9327_v46 = vpop.f32.mrf.mxu0  ;;  %11691 = vst [vmem:[#allocation123_spill] sm:$0xff] %v9342_v4  ;;  %v3104_v26 = vsel %vm8656_vm5, %v3099_v58, %v3103_v2  ;;  %v3113_v38 = vrot.slane %v3112_v10, 4  ;;  %v3123_v60 = vrot.slane %v3122_v53, 4  ;;  %v3127_v15 = vrot.slane %v3125_v61, 5  ;;  %11697 = vst [vmem:[#allocation60_spill] sm:$0xff] %v9373_v24  ;;  %v7922_v2 = vld [vmem:[%s8014_s24 + $0x174] sm:$0xff]  }
 0x185   : > { %7652 = vmatmul.mubr.msk.bf16.gmra.mxu1 %vm476_vm0, %v11689_v32  ;;  %11694 = vst [vmem:[#allocation11_spill] sm:$0xff] %v9357_v9  ;;  %v3156_v48 = vrot.slane %v3154_v35, 4  ;;  %v3159_v59 = vrot.slane %v3157_v37, 5  ;;  %v9371_v32 = vadd.f32 %v11695_v40, %v9214_v34  ;;  %v9377_v10 = vcombine.low %v3070_v13, %v3080_v28  ;;  %v11699_v53 = vld [vmem:[#allocation62_spill] sm:$0xff]  ;;  %v11701_v40 = vld [vmem:[#allocation64_spill] sm:$0xff]  ;;  %v11723_v9 = vld [vmem:[#allocation15_spill] sm:$0xff] }
 0x186   : > { %v9347_v63 = vpop.f32.mrf.mxu0  ;;  %7655 = vmatprep.mubr.msk.bf16.mxu1 %vm476_vm0, %v11692_v54  ;;  %v3163_v14 = vshll.u32 %v2530_v5, 16  ;;  %v3167_v58 = vshrl.u32 %v2530_v5, 16  ;;  %v2532_v54 = vld [vmem:[%s8014_s24 + $0x138] sm:$0xf]  ;;  %v9382_v61 = vadd.f32 %v11699_v53, %v9226_v30  ;;  %v3137_v37 = vrot.slane %v3136_v57, 4  ;;  %v11704_v53 = vld [vmem:[#allocation65_spill] sm:$0xff] }
 0x187   : > { %11696 = vst [vmem:[#allocation59_spill] sm:$0xff] %v9371_v32  ;;  %11698 = vst [vmem:[#allocation124_spill] sm:$0xff] %v9377_v10  ;;  %v3147_v19 = vrot.slane %v3146_v41, 4  ;;  %v3151_v34 = vrot.slane %v3149_v50, 5  ;;  %v9389_v24 = vadd.f32 %v11701_v40, %v9237_v17  ;;  %v3118_v13 = vsel %vm8656_vm5, %v3113_v38, %v9312_v27  ;;  %v11711_v40 = vld [vmem:[#allocation68_spill] sm:$0xff]  ;;  %v11726_v10 = vld [vmem:[#allocation5_spill] sm:$0xff] }
 0x188   : > { %v9364_v12 = vpop.f32.mrf.mxu0  ;;  %7486 = vmatmul.mubr.msk.bf16.gmra.mxu0 %vm476_vm0, %v7921_v1  ;;  %11700 = vst [vmem:[#allocation62_spill] sm:$0xff] %v9382_v61  ;;  %v2533_v1 = vld [vmem:[%s8014_s24 + $0x13c] sm:$0xf]  ;;  %v3173_v28 = vshll.u32 %v2531_v43, 16  ;;  %v3128_v30 = vsel %vm8656_vm5, %v3123_v60, %v3127_v15  ;;  %v3160_v57 = vor.u32 %v3159_v59, %v3156_v48  ;;  %v3178_v41 = vshrl.u32 %v2532_v54, 16  ;;  %v11708_v15 = vld [vmem:[#allocation66_spill] sm:$0xff] }
 0x189   : > { %7489 = vmatprep.mubr.msk.bf16.mxu0 %vm476_vm0, %v7922_v2  ;;  %11702 = vst [vmem:[#allocation64_spill] sm:$0xff] %v9389_v24  ;;  %v9391_v2 = vcombine.low %v3094_v42, %v3104_v26  ;;  %v3181_v50 = vshll.u32 %v2532_v54, 16  ;;  %v9402_v17 = vadd.f32 %v11704_v53, %v9250_v62  ;;  %v11706_v42 = vld [vmem:[#allocation12_spill] sm:$0xff]  ;;  %v9406_v26 = vpop.f32.mrf.mxu1  ;;  %v9408_v27 = vrot.slane %v3163_v14, 5  ;;  %v11710_v62 = vld [vmem:[#allocation13_spill] sm:$0xff] }
 0x18a   : > { %v9384_v35 = vpop.f32.mrf.mxu0  ;;  %11707 = vst [vmem:[#allocation12_spill] sm:$0xff] %v9406_v26  ;;  %v9410_v38 = vrot.slane %v3167_v58, 4  ;;  %v3187_v60 = vshll.u32 %v2533_v1, 16  ;;  %v9414_v43 = vadd.f32 %v11708_v15, %v9273_v56  ;;  %v3142_v59 = vsel %vm8656_vm5, %v3137_v37, %v9324_v55  ;;  %v2535_v54 = vld [vmem:[%s8014_s24 + $0x144] sm:$0xf]  ;;  %v11713_v56 = vld [vmem:[#allocation70_spill] sm:$0xff] }
 0x18b   : > { %11703 = vst [vmem:[#allocation125_spill] sm:$0xff] %v9391_v2  ;;  %11705 = vst [vmem:[#allocation65_spill] sm:$0xff] %v9402_v17  ;;  %v3152_v14 = vsel %vm8656_vm5, %v3147_v19, %v3151_v34  ;;  %v3191_v58 = vshrl.u32 %v2533_v1, 16  ;;  %v9428_v53 = vadd.f32 %v11711_v40, %v9284_v47  ;;  %v9434_v15 = vcombine.low %v3118_v13, %v3128_v30  ;;  %v2536_v55 = vld [vmem:[%s8014_s24 + $0x148] sm:$0xf]  ;;  %v11716_v19 = vld [vmem:[#allocation71_spill] sm:$0xff] }
 0x18c   : > { %v9396_v5 = vpop.f32.mrf.mxu0  ;;  %11709 = vst [vmem:[#allocation66_spill] sm:$0xff] %v9414_v43  ;;  %v2538_v37 = vld [vmem:[%s8014_s24 + $0x150] sm:$0xf]  ;;  %v9442_v34 = vadd.f32 %v11716_v19, %v9303_v7  ;;  %v7923_v47 = vld [vmem:[%s8014_s24 + $0x180] sm:$0xff]   ;;  %v9448_v40 = vrot.slane %v3160_v57, 4  ;;  %v3183_v13 = vrot.slane %v3181_v50, 5  ;;  %v9455_v26 = vcombine.low %v3142_v59, %v3152_v14 }
 0x18d   : > { %7656 = vmatmul.mubr.msk.bf16.gmra.mxu1 %vm476_vm0, %v11706_v42  ;;  %11712 = vst [vmem:[#allocation13_spill] sm:$0xff] %v9428_v53  ;;  %v9432_v42 = vadd.f32 %v11713_v56, %v9294_v8  ;;  %11715 = vst [vmem:[#allocation70_spill] sm:$0xff] %v9434_v15  ;;  %v3180_v8 = vrot.slane %v3178_v41, 4  ;;  %v2539_v30 = vld [vmem:[%s8014_s24 + $0x154] sm:$0xf]  ;;  %v11719_v56 = vld [vmem:[#allocation77_spill] sm:$0xff]  ;;  %v3170_v7 = vor.u32 %v9410_v38, %v9408_v27 }
 0x18e   : > { %v9416_v48 = vpop.f32.mrf.mxu0  ;;  %7659 = vmatprep.mubr.msk.bf16.mxu1 %vm476_vm0, %v11710_v62  ;;  %v9436_v62 = vrot.slane %v3173_v28, 5  ;;  %11717 = vst [vmem:[#allocation71_spill] sm:$0xff] %v9442_v34  ;;  %v9451_v28 = vpop.f32.mrf.mxu1  ;;  %11720 = vst [vmem:[#allocation77_spill] sm:$0xff] %v9455_v26  ;;  %v2534_v19 = vld [vmem:[%s8014_s24 + $0x140] sm:$0x1]  ;;  %v9460_v29 = vrot.slane %v3187_v60, 5 }
 0x18f   : > { %11714 = vst [vmem:[#allocation68_spill] sm:$0xff] %v9432_v42  ;;  %11718 = vst [vmem:[#allocation126_spill] sm:$0xff] %v9451_v28  ;;  %v2541_v57 = vld [vmem:[%s8014_s24 + $0x15c] sm:$0xf]  ;;  %v3193_v41 = vrot.slane %v3191_v58, 4  ;;  %v3205_v50 = vshll.u32 %v2535_v54, 16  ;;  %v3184_v60 = vor.u32 %v3183_v13, %v3180_v8 }
 0x190   : > { %v9444_v1 = vpop.f32.mrf.mxu0  ;;  %7490 = vmatmul.mubr.msk.bf16.gmra.mxu0 %vm476_vm0, %v7923_v47  ;;  %v3202_v47 = vshrl.u32 %v2535_v54, 16  ;;  %v3211_v42 = vshll.u32 %v2536_v55, 16  ;;  %v3215_v53 = vshrl.u32 %v2536_v55, 16  ;;  %v2542_v28 = vld [vmem:[%s8014_s24 + $0x160] sm:$0xf]  ;;  %v3226_v43 = vshrl.u32 %v2538_v37, 16 }
 0x191   : > { %7561 = vmatprep.mubr.msk.bf16.mxu0 %vm476_vm0, %v11719_v56  ;;  %v3229_v17 = vshll.u32 %v2538_v37, 16  ;;  %v3235_v56 = vshll.u32 %v2539_v30, 16  ;;  %v3239_v59 = vshrl.u32 %v2539_v30, 16  ;;  %v3250_v24 = vshrl.u32 %v2541_v57, 16  ;;  %v11722_v55 = vld [vmem:[#allocation14_spill] sm:$0xff] }
 0x192   : > { %v9463_v34 = vpop.f32.mrf.mxu0  ;;  %v3253_v58 = vshll.u32 %v2541_v57, 16  ;;  %v3197_v37 = vshll.u32 %v2534_v19, 16  ;;  %v3204_v61 = vrot.slane %v3202_v47, 4  ;;  %v3259_v30 = vshll.u32 %v2542_v28, 16  ;;  %v11725_v2 = vld [vmem:[#allocation78_spill] sm:$0xff] }
 0x193   : > { %v3263_v32 = vshrl.u32 %v2542_v28, 16  ;;  %v3194_v8 = vor.u32 %v3193_v41, %v9460_v29  ;;  %v3207_v13 = vrot.slane %v3205_v50, 5  ;;  %v9481_v38 = vrot.slane %v3211_v42, 5  ;;  %v2540_v42 = vld [vmem:[%s8014_s24 + $0x158] sm:$0x1] }
 0x194   : > { %v9466_v14 = vpop.f32.mrf.mxu0  ;;  %v3217_v57 = vrot.slane %v3215_v53, 4  ;;  %v3228_v19 = vrot.slane %v3226_v43, 4  ;;  %v3231_v47 = vrot.slane %v3229_v17, 5  ;;  %v9487_v16 = vrot.slane %v3235_v56, 5 }
 0x195   : > { %v9472_v54 = vpop.f32.mrf.mxu1  ;;  %7660 = vmatmul.mubr.msk.bf16.gmra.mxu1 %vm476_vm0, %v11722_v55  ;;  %v2537_v55 = vld [vmem:[%s8014_s24 + $0x14c] sm:$0x1]  ;;  %v3241_v28 = vrot.slane %v3239_v59, 4  ;;  %v9493_v41 = vrot.slane %v3184_v60, 4  ;;  %v3252_v53 = vrot.slane %v3250_v24, 4  ;;  %v3255_v50 = vrot.slane %v3253_v58, 5 }
 0x196   : > { %11721 = vst [vmem:[#allocation127_spill] sm:$0xff] %v9472_v54  ;;  %v9476_v26 = vpop.f32.mrf.mxu0  ;;  %7663 = vmatprep.mubr.msk.bf16.mxu1 %vm476_vm0, %v11723_v9  ;;  %v2544_v54 = vld [vmem:[%s8014_s24 + $0x168] sm:$0xf]  ;;  %v3171_v9 = vrot.slane %v3170_v7, 4  ;;  %v9501_v17 = vrot.slane %v3259_v30, 5  ;;  %v3265_v43 = vrot.slane %v3263_v32, 4  ;;  %v3208_v4 = vor.u32 %v3207_v13, %v3204_v61 }
 0x197   : > { %v9484_v15 = vpop.f32.mrf.mxu1  ;;  %v3274_v56 = vshrl.u32 %v2544_v54, 16  ;;  %v3277_v59 = vshll.u32 %v2544_v54, 16  ;;  %v3195_v7 = vrot.slane %v3194_v8, 4  ;;  %v3199_v60 = vrot.slane %v3197_v37, 5  ;;  %v2543_v24 = vld [vmem:[%s8014_s24 + $0x164] sm:$0x1] }
 0x198   : > { %11724 = vst [vmem:[#allocation14_spill] sm:$0xff] %v9484_v15  ;;  %v9489_v3 = vpop.f32.mrf.mxu0  ;;  %7562 = vmatmul.mubr.msk.bf16.vlgmr.msra.gmra.mxu0 %vm476_vm0, %v11725_v2  ;;  %v3221_v18 = vshll.u32 %v2537_v55, 16  ;;  %v3245_v30 = vshll.u32 %v2540_v42, 16  ;;  %v11729_v32 = vld [vmem:[#allocation72_spill] sm:$0xff]  ;;  %v11730_v54 = vld [vmem:[#allocation74_spill] sm:$0xff]  ;;  %v3176_v37 = vsel %vm8656_vm5, %v3171_v9, %v9436_v62  ;;  %v3256_v13 = vor.u32 %v3255_v50, %v3252_v53 }
 0x199   : > { %7692 = vmatpush3.bf16.msra.mxu0 %v11726_v10  ;;  %v9497_v15 = vpop.f32.mrf.mxu1  ;;  %7565 = vmatprep.mubr.msk.bf16.mxu0 %vm476_vm0, %v8856_v22  ;;  %v3218_v10 = vor.u32 %v3217_v57, %v9481_v38  ;;  %v3242_v22 = vor.u32 %v3241_v28, %v9487_v16  ;;  %v9512_v36 = vadd.f32 %v11729_v32, %v9322_v49  ;;  %v11732_v55 = vld [vmem:[#allocation16_spill] sm:$0xff]  ;;  %v3269_v49 = vshll.u32 %v2543_v24, 16  ;;  %v11733_v32 = vld [vmem:[#allocation17_spill] sm:$0xff] }
 0x19a   : > { %11727 = vst [vmem:[#allocation15_spill] sm:$0xff] %v9497_v15  ;;  %v9503_v2 = vpop.f32.mrf.mxu0  ;;  %v3232_v15 = vor.u32 %v3231_v47, %v3228_v19  ;;  %v9516_v8 = vadd.f32 %v11730_v54, %v9327_v46  ;;  %v3266_v19 = vor.u32 %v3265_v43, %v9501_v17  ;;  %v2545_v47 = vld [vmem:[%s8014_s24 + $0x16c] sm:$0xf]  ;;  %v3276_v28 = vrot.slane %v3274_v56, 4 }
 0x19b   : > { %v9506_v58 = vpop.f32.mrf.mxu1  ;;  %v3279_v42 = vrot.slane %v3277_v59, 5  ;;  %v3190_v62 = vsel %vm8656_vm5, %v9493_v41, %v9460_v29  ;;  %v3200_v9 = vsel %vm8656_vm5, %v3195_v7, %v3199_v60  ;;  %v3209_v53 = vrot.slane %v3208_v4, 4  ;;  %v2547_v41 = vld [vmem:[%s8014_s24 + $0x174] sm:$0xf] }
 0x19c   : > { %11728 = vst [vmem:[#allocation78_spill] sm:$0xff] %v9506_v58  ;;  %v9518_v61 = vpop.f32.mrf.mxu0  ;;  %v3223_v50 = vrot.slane %v3221_v18, 5  ;;  %v3219_v56 = vrot.slane %v3218_v10, 4  ;;  %v3233_v59 = vrot.slane %v3232_v15, 4  ;;  %v3243_v24 = vrot.slane %v3242_v22, 4 }
 0x19d   : > { %v9523_v57 = vpop.f32.mrf.mxu1  ;;  %7664 = vmatmul.mubr.msk.bf16.gmra.mxu1 %vm476_vm0, %v11732_v55  ;;  %v3247_v54 = vrot.slane %v3245_v30, 5  ;;  %v11735_v55 = vld [vmem:[#allocation76_spill] sm:$0xff]  ;;  %v11736_v18 = vsel %vm8656_vm5, %v9448_v40, %v9408_v27  ;;  %v3257_v4 = vrot.slane %v3256_v13, 4  ;;  %v3283_v15 = vshll.u32 %v2545_v47, 16  ;;  %v2546_v10 = vld [vmem:[%s8014_s24 + $0x170] sm:$0x1] }
 0x19e   : > { %11731 = vst [vmem:[#allocation5_spill] sm:$0xff] %v9523_v57  ;;  %v9529_v46 = vpop.f32.mrf.mxu0  ;;  %7667 = vmatprep.mubr.msk.bf16.mxu1 %vm476_vm0, %v11733_v32  ;;  %v9543_v32 = vadd.f32 %v11735_v55, %v9347_v63  ;;  %v9554_v29 = vcombine.low %v11736_v18, %v3176_v37  ;;  %v3267_v63 = vrot.slane %v3266_v19, 4  ;;  %v3271_v60 = vrot.slane %v3269_v49, 5  ;;  %v11738_v30 = vld [vmem:[#allocation79_spill] sm:$0xff]  ;;  %v11739_v27 = vld [vmem:[#allocation80_spill] sm:$0xff]  ;;  %v11740_v19 = vld [vmem:[#allocation82_spill] sm:$0xff] }
 0x19f   : > { %v9539_v43 = vpop.f32.mrf.mxu1  ;;  %v3287_v22 = vshrl.u32 %v2545_v47, 16  ;;  %v9564_v55 = vadd.f32 %v11738_v30, %v9364_v12  ;;  %v9568_v40 = vadd.f32 %v11739_v27, %v9384_v35  ;;  %v9572_v13 = vcombine.low %v3190_v62, %v3200_v9  ;;  %v11748_v30 = vld [vmem:[#allocation19_spill] sm:$0xff] }
 0x1a0   : > { %11734 = vst [vmem:[#allocation72_spill] sm:$0xff] %v9539_v43  ;;  %v9545_v57 = vpop.f32.mrf.mxu0  ;;  %7566 = vmatmul.mubr.msk.bf16.gmra.mxu0 %vm476_vm0, %v8863_v21  ;;  %v3280_v21 = vor.u32 %v3279_v42, %v3276_v28  ;;  %v9579_v49 = vadd.f32 %v11740_v19, %v9396_v5  ;;  %v3224_v12 = vsel %vm8656_vm5, %v3219_v56, %v3223_v50  ;;  %v2548_v42 = vld [vmem:[%s8014_s24 + $0x178] sm:$0xf]  ;;  %v3293_v9 = vshll.u32 %v2546_v10, 16  ;;  %v11744_v50 = vld [vmem:[#allocation18_spill] sm:$0xff] }
 0x1a1   : > { %v9557_v7 = vpop.f32.mrf.mxu1  ;;  %7569 = vmatprep.mubr.msk.bf16.mxu0 %vm476_vm0, %v8867_v33  ;;  %v3214_v33 = vsel %vm8656_vm5, %v3209_v53, %v9481_v38  ;;  %v3238_v35 = vsel %vm8656_vm5, %v3233_v59, %v9487_v16  ;;  %v3248_v28 = vsel %vm8656_vm5, %v3243_v24, %v3247_v54  ;;  %v3262_v5 = vsel %vm8656_vm5, %v3257_v4, %v9501_v17  ;;  %v11745_v17 = vld [vmem:[#allocation84_spill] sm:$0xff]  ;;  %v11746_v4 = vld [vmem:[#allocation85_spill] sm:$0xff]  ;;  %v6708_v19 = vld [vmem:[%s8014_s24 + $0xc] sm:$0xf] }
 0x1a2   : > { %11737 = vst [vmem:[#allocation74_spill] sm:$0xff] %v9557_v7  ;;  %v9570_v37 = vpop.f32.mrf.mxu0  ;;  %v9596_v38 = vrot.slane %v3283_v15, 5  ;;  %v3298_v53 = vshrl.u32 %v2547_v41, 16  ;;  %v3272_v16 = vsel %vm8656_vm5, %v3267_v63, %v3271_v60  ;;  %v9604_v56 = vrot.slane %v3280_v21, 4 }
 0x1a3   : > { %v9581_v47 = vpop.f32.mrf.mxu1  ;;  %v3289_v59 = vrot.slane %v3287_v22, 4  ;;  %v3301_v24 = vshll.u32 %v2547_v41, 16  ;;  %v9608_v54 = vadd.f32 %v11745_v17, %v9416_v48  ;;  %v9612_v15 = vadd.f32 %v11746_v4, %v9444_v1  ;;  %v11749_v41 = vld [vmem:[#allocation86_spill] sm:$0xff] }
 0x1a4   : > { %11741 = vst [vmem:[#allocation16_spill] sm:$0xff] %v9581_v47  ;;  %v9591_v62 = vpop.f32.mrf.mxu0  ;;  %v9618_v63 = vcombine.low %v3214_v33, %v3224_v12  ;;  %v3307_v60 = vshll.u32 %v2548_v42, 16  ;;  %v9622_v21 = vadd.f32 %v11749_v41, %v9463_v34  ;;  %v9626_v48 = vadd.f32 %v8785_v52, %v9466_v14  ;;  %v2549_v33 = vld [vmem:[%s8014_s24 + $0x17c] sm:$0x1]  ;;  %v6709_v14 = vld [vmem:[%s8014_s24 + $0x10] sm:$0xf] }
 0x1a5   : > { %11742 = vst [vmem:[#allocation17_spill] sm:$0xff] %v9591_v62  ;;  %v9598_v18 = vpop.f32.mrf.mxu1  ;;  %7668 = vmatmul.mubr.msk.bf16.gmra.mxu1 %vm476_vm0, %v11744_v50  ;;  %v9630_v1 = vadd.f32 %v8791_v44, %v9476_v26  ;;  %v9634_v27 = vcombine.low %v3238_v35, %v3248_v28  ;;  %v9640_v34 = vadd.f32 %v8800_v23, %v9489_v3  ;;  %v9648_v44 = vrot.slane %v3293_v9, 5  ;;  %v6711_v35 = vld [vmem:[%s8014_s24 + $0x18] sm:$0xf]  ;;  %v11756_v50 = vld [vmem:[#allocation94_spill] sm:$0xff] }
 0x1a6   : > { %11743 = vst [vmem:[#allocation76_spill] sm:$0xff] %v9598_v18  ;;  %v9614_v10 = vpop.f32.mrf.mxu0  ;;  %7671 = vmatprep.mubr.msk.bf16.mxu1 %vm476_vm0, %v11748_v30  ;;  %11750 = vst [vmem:[#allocation80_spill] sm:$0xff] %v9626_v48  ;;  %v9646_v52 = vcombine.low %v3262_v5, %v3272_v16  ;;  %v3300_v26 = vrot.slane %v3298_v53, 4  ;;  %v3303_v3 = vrot.slane %v3301_v24, 5  ;;  %v3311_v5 = vshrl.u32 %v2548_v42, 16  ;;  %v11785_v48 = vld [vmem:[#allocation109_spill] sm:$0xff] }
 0x1a7   : > { %11747 = vst [vmem:[#allocation79_spill] sm:$0xff] %v9614_v10  ;;  %11751 = vst [vmem:[#allocation82_spill] sm:$0xff] %v9630_v1  ;;  %v9632_v22 = vpop.f32.mrf.mxu1  ;;  %v6712_v9 = vld [vmem:[%s8014_s24 + $0x1c] sm:$0xf]  ;;  %v6714_v16 = vld [vmem:[%s8014_s24 + $0x24] sm:$0xf] }
 0x1a8   : > { %11752 = vst [vmem:[#allocation18_spill] sm:$0xff] %v9632_v22  ;;  %11753 = vst [vmem:[#allocation84_spill] sm:$0xff] %v9640_v34  ;;  %v9642_v12 = vpop.f32.mrf.mxu0  ;;  %7570 = vmatmul.mubr.msk.bf16.gmra.mxu0 %vm476_vm0, %v8869_v6  ;;  %v3290_v6 = vor.u32 %v3289_v59, %v9596_v38  ;;  %v9665_v17 = vrot.slane %v3307_v60, 5  ;;  %v3317_v4 = vshll.u32 %v2549_v33, 16  ;;  %v4541_v30 = vshrl.u32 %v6708_v19, 16  ;;  %v11760_v60 = vld [vmem:[#allocation89_spill] sm:$0xff] }
 0x1a9   : > { %11754 = vst [vmem:[#allocation85_spill] sm:$0xff] %v9642_v12  ;;  %v9652_v28 = vpop.f32.mrf.mxu1  ;;  %7573 = vmatprep.mubr.msk.bf16.mxu0 %vm476_vm0, %v11756_v50  ;;  %v4544_v41 = vshll.u32 %v6708_v19, 16  ;;  %v4554_v22 = vshrl.u32 %v6709_v14, 16  ;;  %v4565_v18 = vshrl.u32 %v6711_v35, 16  ;;  %v4568_v23 = vshll.u32 %v6711_v35, 16  ;;  %v11763_v19 = vld [vmem:[#allocation20_spill] sm:$0xff] }
 0x1aa   : > { %11755 = vst [vmem:[#allocation19_spill] sm:$0xff] %v9652_v28  ;;  %v9663_v53 = vpop.f32.mrf.mxu0  ;;  %v4550_v28 = vshll.u32 %v6709_v14, 16  ;;  %v6715_v47 = vld [vmem:[%s8014_s24 + $0x28] sm:$0xf]  ;;  %v4574_v59 = vshll.u32 %v6712_v9, 16  ;;  %v4578_v42 = vshrl.u32 %v6712_v9, 16  ;;  %v9674_v58 = vadd.f32 %v11760_v60, %v9503_v2 }
 0x1ab   : > { %11757 = vst [vmem:[#allocation86_spill] sm:$0xff] %v9663_v53  ;;  %v9667_v50 = vpop.f32.mrf.mxu1  ;;  %v4589_v24 = vshrl.u32 %v6714_v16, 16  ;;  %v4592_v43 = vshll.u32 %v6714_v16, 16  ;;  %v3291_v14 = vrot.slane %v3290_v6, 4  ;;  %v3313_v35 = vrot.slane %v3311_v5, 4  ;;  %v11768_v5 = vld [vmem:[#allocation95_spill] sm:$0xff] }
 0x1ac   : > { %11758 = vst [vmem:[#allocation94_spill] sm:$0xff] %v9667_v50  ;;  %v9670_v7 = vpop.f32.mrf.mxu0  ;;  %11761 = vst [vmem:[#allocation89_spill] sm:$0xff] %v9674_v58  ;;  %v3304_v50 = vor.u32 %v3303_v3, %v3300_v26  ;;  %v4543_v9 = vrot.slane %v4541_v30, 4  ;;  %v4546_v16 = vrot.slane %v4544_v41, 5  ;;  %v4598_v12 = vshll.u32 %v6715_v47, 16 }
 0x1ad   : > { %11759 = vst [vmem:[#allocation128_spill] sm:$0xff] %v9670_v7  ;;  %v9676_v33 = vpop.f32.mrf.mxu1  ;;  %7672 = vmatmul.mubr.msk.bf16.gmra.mxu1 %vm476_vm0, %v11763_v19  ;;  %v11765_v7 = vld [vmem:[#allocation21_spill] sm:$0xff]  ;;  %v4602_v34 = vshrl.u32 %v6715_v47, 16  ;;  %v6717_v2 = vld [vmem:[%s8014_s24 + $0x30] sm:$0xf]  ;;  %v4556_v19 = vrot.slane %v4554_v22, 4 }
 0x1ae   : > { %11762 = vst [vmem:[#allocation129_spill] sm:$0xff] %v9676_v33  ;;  %v9680_v53 = vpop.f32.mrf.mxu0  ;;  %7675 = vmatprep.mubr.msk.bf16.mxu1 %vm476_vm0, %v11765_v7  ;;  %v9687_v33 = vrot.slane %v4550_v28, 5  ;;  %v4567_v6 = vrot.slane %v4565_v18, 4  ;;  %v4570_v26 = vrot.slane %v4568_v23, 5  ;;  %v9694_v7 = vrot.slane %v4574_v59, 5  ;;  %v11772_v18 = vld [vmem:[#allocation102_spill] sm:$0xff] }
 0x1af   : > { %11764 = vst [vmem:[#allocation20_spill] sm:$0xff] %v9680_v53  ;;  %v9685_v60 = vpop.f32.mrf.mxu1  ;;  %v6710_v53 = vld [vmem:[%s8014_s24 + $0x14] sm:$0x1]  ;;  %v4580_v30 = vrot.slane %v4578_v42, 4  ;;  %v4591_v47 = vrot.slane %v4589_v24, 4  ;;  %v4594_v41 = vrot.slane %v4592_v43, 5  ;;  %v3296_v43 = vsel %vm8656_vm5, %v3291_v14, %v9648_v44 }
 0x1b0   : > { %11766 = vst [vmem:[#allocation21_spill] sm:$0xff] %v9685_v60  ;;  %v9689_v3 = vpop.f32.mrf.mxu0  ;;  %7574 = vmatmul.mubr.msk.bf16.gmra.mxu0 %vm476_vm0, %v11768_v5  ;;  %v11769_v60 = vld [vmem:[#allocation91_spill] sm:$0xff]  ;;  %v9704_v22 = vrot.slane %v3317_v4, 5  ;;  %v6713_v23 = vld [vmem:[%s8014_s24 + $0x20] sm:$0x1]  ;;  %v4613_v59 = vshrl.u32 %v6717_v2, 16  ;;  %v3314_v4 = vor.u32 %v3313_v35, %v9665_v17  ;;  %v4571_v1 = vor.u32 %v4570_v26, %v4567_v6 }
 0x1b1   : > { %11767 = vst [vmem:[#allocation130_spill] sm:$0xff] %v9689_v3  ;;  %v9698_v58 = vadd.f32 %v11769_v60, %v9518_v61  ;;  %v9700_v28 = vpop.f32.mrf.mxu1  ;;  %7577 = vmatprep.mubr.msk.bf16.mxu0 %vm476_vm0, %v11772_v18  ;;  %v4616_v5 = vshll.u32 %v6717_v2, 16  ;;  %v9712_v61 = vrot.slane %v3304_v50, 4  ;;  %v9714_v42 = vrot.slane %v4598_v12, 5  ;;  %v6718_v60 = vld [vmem:[%s8014_s24 + $0x34] sm:$0xf] }
 0x1b2   : > { %11771 = vst [vmem:[#allocation91_spill] sm:$0xff] %v9700_v28  ;;  %v9707_v3 = vpop.f32.mrf.mxu0  ;;  %v4604_v24 = vrot.slane %v4602_v34, 4  ;;  %v4547_v28 = vor.u32 %v4546_v16, %v4543_v9  ;;  %v4560_v2 = vshll.u32 %v6710_v53, 16  ;;  %v6716_v10 = vld [vmem:[%s8014_s24 + $0x2c] sm:$0x1]  ;;  %v4581_v44 = vor.u32 %v4580_v30, %v9694_v7  ;;  %v11779_v53 = vld [vmem:[#allocation23_spill] sm:$0xff] }
 0x1b3   : > { %11770 = vst [vmem:[#allocation95_spill] sm:$0xff] %v9698_v58  ;;  %11773 = vst [vmem:[#allocation102_spill] sm:$0xff] %v9707_v3  ;;  %v9717_v18 = vpop.f32.mrf.mxu1  ;;  %v4557_v58 = vor.u32 %v4556_v19, %v9687_v33  ;;  %v6720_v3 = vld [vmem:[%s8014_s24 + $0x3c] sm:$0xf]  ;;  %v4584_v50 = vshll.u32 %v6713_v23, 16  ;;  %v4595_v12 = vor.u32 %v4594_v41, %v4591_v47  ;;  %v11777_v34 = vld [vmem:[#allocation22_spill] sm:$0xff]  ;;  %v11781_v23 = vsel %vm8656_vm5, %v9604_v56, %v9596_v38 }
 0x1b4   : > { %11774 = vst [vmem:[#allocation131_spill] sm:$0xff] %v9717_v18  ;;  %v9723_v62 = vpop.f32.mrf.mxu0  ;;  %v4615_v18 = vrot.slane %v4613_v59, 4  ;;  %v4618_v35 = vrot.slane %v4616_v5, 5  ;;  %v4622_v9 = vshll.u32 %v6718_v60, 16  ;;  %v4626_v16 = vshrl.u32 %v6718_v60, 16 }
 0x1b5   : > { %11775 = vst [vmem:[#allocation132_spill] sm:$0xff] %v9723_v62  ;;  %v9726_v14 = vpop.f32.mrf.mxu1  ;;  %7676 = vmatmul.mubr.msk.bf16.gmra.mxu1 %vm476_vm0, %v11777_v34  ;;  %v4605_v6 = vor.u32 %v4604_v24, %v9714_v42  ;;  %v4608_v26 = vshll.u32 %v6716_v10, 16  ;;  %v4637_v30 = vshrl.u32 %v6720_v3, 16  ;;  %v4640_v47 = vshll.u32 %v6720_v3, 16 }
 0x1b6   : > { %11776 = vst [vmem:[#allocation133_spill] sm:$0xff] %v9726_v14  ;;  %v9730_v19 = vpop.f32.mrf.mxu0  ;;  %7679 = vmatprep.mubr.msk.bf16.mxu1 %vm476_vm0, %v11779_v53  ;;  %v9742_v59 = vcombine.low %v11781_v23, %v3296_v43  ;;  %v3315_v5 = vrot.slane %v3314_v4, 4  ;;  %v4548_v60 = vrot.slane %v4547_v28, 4  ;;  %v4562_v34 = vrot.slane %v4560_v2, 5  ;;  %v11783_v14 = vld [vmem:[#allocation108_spill] sm:$0xff] }
 0x1b7   : > { %11778 = vst [vmem:[#allocation22_spill] sm:$0xff] %v9730_v19  ;;  %v9735_v41 = vpop.f32.mrf.mxu1  ;;  %v4558_v10 = vrot.slane %v4557_v58, 4  ;;  %v4572_v3 = vrot.slane %v4571_v1, 4  ;;  %v4582_v24 = vrot.slane %v4581_v44, 4  ;;  %v6719_v19 = vld [vmem:[%s8014_s24 + $0x38] sm:$0x1]  ;;  %v4619_v56 = vor.u32 %v4618_v35, %v4615_v18 }
 0x1b8   : > { %11780 = vst [vmem:[#allocation23_spill] sm:$0xff] %v9735_v41  ;;  %v9744_v53 = vpop.f32.mrf.mxu0  ;;  %7578 = vmatmul.mubr.msk.bf16.gmra.mxu0 %vm476_vm0, %v11783_v14  ;;  %v4586_v41 = vrot.slane %v4584_v50, 5  ;;  %v4596_v38 = vrot.slane %v4595_v12, 4  ;;  %v9753_v28 = vrot.slane %v4622_v9, 5  ;;  %v4628_v43 = vrot.slane %v4626_v16, 4  ;;  %v11787_v14 = vld [vmem:[#allocation93_spill] sm:$0xff] }
 0x1b9   : > { %11782 = vst [vmem:[#allocation134_spill] sm:$0xff] %v9744_v53  ;;  %v9749_v62 = vpop.f32.mrf.mxu1  ;;  %7581 = vmatprep.mubr.msk.bf16.mxu0 %vm476_vm0, %v11785_v48  ;;  %v6721_v4 = vld [vmem:[%s8014_s24 + $0x40] sm:$0xf]  ;;  %v4606_v58 = vrot.slane %v4605_v6, 4  ;;  %v4610_v1 = vrot.slane %v4608_v26, 5  ;;  %v4639_v44 = vrot.slane %v4637_v30, 4  ;;  %v9760_v23 = vadd.f32 %v11787_v14, %v9529_v46 }
 0x1ba   : > { %11784 = vst [vmem:[#allocation108_spill] sm:$0xff] %v9749_v62  ;;  %v9756_v2 = vpop.f32.mrf.mxu0  ;;  %v4642_v50 = vrot.slane %v4640_v47, 5  ;;  %v3310_v48 = vsel %vm8656_vm5, %v9712_v61, %v9665_v17  ;;  %v3320_v18 = vsel %vm8656_vm5, %v3315_v5, %v9704_v22  ;;  %v4553_v12 = vsel %vm8656_vm5, %v4548_v60, %v9687_v33  ;;  %v6722_v35 = vld [vmem:[%s8014_s24 + $0x44] sm:$0x1]  ;;  %v6723_v61 = vld [vmem:[%s8014_s24 + $0x48] sm:$0xf] }
 0x1bb   : > { %11786 = vst [vmem:[#allocation109_spill] sm:$0xff] %v9756_v2  ;;  %v9762_v62 = vpop.f32.mrf.mxu1  ;;  %v4563_v46 = vsel %vm8656_vm5, %v4558_v10, %v4562_v34  ;;  %v4577_v16 = vsel %vm8656_vm5, %v4572_v3, %v9694_v7  ;;  %v4632_v6 = vshll.u32 %v6719_v19, 16  ;;  %v4646_v17 = vshll.u32 %v6721_v4, 16  ;;  %v11791_v22 = vld [vmem:[#allocation24_spill] sm:$0xff]  ;;  %v11793_v7 = vld [vmem:[#allocation25_spill] sm:$0xff] }
 0x1bc   : > { %11788 = vst [vmem:[#allocation93_spill] sm:$0xff] %v9762_v62  ;;  %v9775_v9 = vpop.f32.mrf.mxu0  ;;  %v4587_v33 = vsel %vm8656_vm5, %v4582_v24, %v4586_v41  ;;  %v9789_v30 = vrot.slane %v4619_v56, 4  ;;  %v4629_v47 = vor.u32 %v4628_v43, %v9753_v28  ;;  %v4650_v5 = vshrl.u32 %v6721_v4, 16  ;;  %v11794_v3 = vld [vmem:[#allocation96_spill] sm:$0xff]  ;;  %v11795_v56 = vld [vmem:[#allocation97_spill] sm:$0xff] }
 0x1bd   : > { %11789 = vst [vmem:[#allocation135_spill] sm:$0xff] %v9775_v9  ;;  %v9783_v26 = vpop.f32.mrf.mxu1  ;;  %7680 = vmatmul.mubr.msk.bf16.gmra.mxu1 %vm476_vm0, %v11791_v22  ;;  %v4601_v19 = vsel %vm8656_vm5, %v4596_v38, %v9714_v42  ;;  %v4611_v34 = vsel %vm8656_vm5, %v4606_v58, %v4610_v1  ;;  %v4643_v41 = vor.u32 %v4642_v50, %v4639_v44  ;;  %v4656_v10 = vshll.u32 %v6722_v35, 16  ;;  %v6724_v42 = vld [vmem:[%s8014_s24 + $0x4c] sm:$0xf]  ;;  %v6726_v50 = vld [vmem:[%s8014_s24 + $0x54] sm:$0xf] }
 0x1be   : > { %11790 = vst [vmem:[#allocation136_spill] sm:$0xff] %v9783_v26  ;;  %v9792_v60 = vpop.f32.mrf.mxu0  ;;  %7683 = vmatprep.mubr.msk.bf16.mxu1 %vm476_vm0, %v11793_v7  ;;  %v9803_v24 = vadd.f32 %v11794_v3, %v9545_v57  ;;  %v9807_v43 = vadd.f32 %v11795_v56, %v9570_v37  ;;  %v9811_v14 = vcombine.low %v3310_v48, %v3320_v18  ;;  %v4661_v38 = vshrl.u32 %v6723_v61, 16  ;;  %v6727_v48 = vld [vmem:[%s8014_s24 + $0x58] sm:$0xf] }
 0x1bf   : > { %11792 = vst [vmem:[#allocation24_spill] sm:$0xff] %v9792_v60  ;;  %v9809_v4 = vpop.f32.mrf.mxu1  ;;  %v9818_v1 = vcombine.low %v4553_v12, %v4563_v46  ;;  %v9820_v57 = vcombine.low %v4577_v16, %v4587_v33  ;;  %v9822_v44 = vrot.slane %v4632_v6, 5  ;;  %v9824_v37 = vrot.slane %v4646_v17, 5  ;;  %v6729_v16 = vld [vmem:[%s8014_s24 + $0x60] sm:$0xf] }
 0x1c0   : > { %11796 = vst [vmem:[#allocation25_spill] sm:$0xff] %v9807_v43  ;;  %11797 = vst [vmem:[#allocation96_spill] sm:$0xff] %v9809_v4  ;;  %v9814_v58 = vpop.f32.mrf.mxu0  ;;  %7582 = vmatmul.mubr.msk.bf16.gmra.mxu0 %vm476_vm0, %v9129_v51  ;;  %v9832_v35 = vcombine.low %v4601_v19, %v4611_v34  ;;  %v4625_v51 = vsel %vm8656_vm5, %v9789_v30, %v9753_v28  ;;  %v4630_v12 = vrot.slane %v4629_v47, 4  ;;  %v9838_v46 = vrot.slane %v4650_v5, 4  ;;  %v6730_v6 = vld [vmem:[%s8014_s24 + $0x64] sm:$0xf] }
 0x1c1   : > { %11798 = vst [vmem:[#allocation97_spill] sm:$0xff] %v9814_v58  ;;  %v9828_v18 = vpop.f32.mrf.mxu1  ;;  %7585 = vmatprep.mubr.msk.bf16.mxu0 %vm476_vm0, %v9141_v11  ;;  %v9844_v22 = vrot.slane %v4643_v41, 4  ;;  %v9846_v33 = vrot.slane %v4656_v10, 5  ;;  %v4664_v11 = vshll.u32 %v6723_v61, 16  ;;  %v4670_v7 = vshll.u32 %v6724_v42, 16  ;;  %v11804_v61 = vld [vmem:[#allocation26_spill] sm:$0xff] }
 0x1c2   : > { %11799 = vst [vmem:[#allocation137_spill] sm:$0xff] %v9828_v18  ;;  %v9842_v17 = vpop.f32.mrf.mxu0  ;;  %v6732_v19 = vld [vmem:[%s8014_s24 + $0x6c] sm:$0xf]  ;;  %v9851_v3 = vrot.slane %v4661_v38, 4  ;;  %v4674_v28 = vshrl.u32 %v6724_v42, 16  ;;  %v4685_v30 = vshrl.u32 %v6726_v50, 16 }
 0x1c3   : > { %11800 = vst [vmem:[#allocation138_spill] sm:$0xff] %v9842_v17  ;;  %v9849_v34 = vpop.f32.mrf.mxu1  ;;  %v4688_v47 = vshll.u32 %v6726_v50, 16  ;;  %v6733_v5 = vld [vmem:[%s8014_s24 + $0x70] sm:$0xf]  ;;  %v4694_v18 = vshll.u32 %v6727_v48, 16  ;;  %v4698_v4 = vshrl.u32 %v6727_v48, 16  ;;  %v4635_v48 = vsel %vm8656_vm5, %v4630_v12, %v9822_v44 }
 0x1c4   : > { %11801 = vst [vmem:[#allocation139_spill] sm:$0xff] %v9849_v34  ;;  %v9854_v56 = vpop.f32.mrf.mxu0  ;;  %v4709_v41 = vshrl.u32 %v6729_v16, 16  ;;  %v4712_v26 = vshll.u32 %v6729_v16, 16  ;;  %v4718_v62 = vshll.u32 %v6730_v6, 16  ;;  %v4722_v34 = vshrl.u32 %v6730_v6, 16  ;;  %v11806_v50 = vld [vmem:[#allocation27_spill] sm:$0xff] }
 0x1c5   : > { %11802 = vst [vmem:[#allocation140_spill] sm:$0xff] %v9854_v56  ;;  %v9856_v10 = vpop.f32.mrf.mxu1  ;;  %7684 = vmatmul.mubr.msk.bf16.gmra.mxu1 %vm476_vm0, %v11804_v61  ;;  %v4733_v38 = vshrl.u32 %v6732_v19, 16  ;;  %v4736_v42 = vshll.u32 %v6732_v19, 16  ;;  %v4666_v16 = vrot.slane %v4664_v11, 5  ;;  %v4742_v56 = vshll.u32 %v6733_v5, 16 }
 0x1c6   : > { %11803 = vst [vmem:[#allocation141_spill] sm:$0xff] %v9856_v10  ;;  %v9860_v17 = vpop.f32.mrf.mxu0  ;;  %7687 = vmatprep.mubr.msk.bf16.mxu1 %vm476_vm0, %v11806_v50  ;;  %v4746_v10 = vshrl.u32 %v6733_v5, 16  ;;  %v6725_v61 = vld [vmem:[%s8014_s24 + $0x50] sm:$0x1]  ;;  %v9870_v60 = vrot.slane %v4670_v7, 5  ;;  %v4676_v6 = vrot.slane %v4674_v28, 4  ;;  %v9888_v2 = vcombine.low %v4625_v51, %v4635_v48 }
 0x1c7   : > { %11805 = vst [vmem:[#allocation26_spill] sm:$0xff] %v9860_v17  ;;  %v9867_v58 = vpop.f32.mrf.mxu1  ;;  %v4687_v19 = vrot.slane %v4685_v30, 4  ;;  %v4690_v9 = vrot.slane %v4688_v47, 5  ;;  %v6728_v50 = vld [vmem:[%s8014_s24 + $0x5c] sm:$0x1]  ;;  %v9877_v44 = vrot.slane %v4694_v18, 5 }
 0x1c8   : > { %11807 = vst [vmem:[#allocation27_spill] sm:$0xff] %v9867_v58  ;;  %v9872_v17 = vpop.f32.mrf.mxu0  ;;  %7586 = vmatmul.mubr.msk.bf16.gmra.mxu0 %vm476_vm0, %v9148_v0  ;;  %v4700_v12 = vrot.slane %v4698_v4, 4  ;;  %v4711_v11 = vrot.slane %v4709_v41, 4  ;;  %v4714_v5 = vrot.slane %v4712_v26, 5  ;;  %v9883_v7 = vrot.slane %v4718_v62, 5 }
 0x1c9   : > { %11808 = vst [vmem:[#allocation142_spill] sm:$0xff] %v9872_v17  ;;  %v9879_v58 = vpop.f32.mrf.mxu1  ;;  %7589 = vmatprep.mubr.msk.bf16.mxu0 %vm476_vm0, %v9154_v31  ;;  %v4724_v28 = vrot.slane %v4722_v34, 4  ;;  %v4735_v30 = vrot.slane %v4733_v38, 4  ;;  %v4738_v47 = vrot.slane %v4736_v42, 5  ;;  %v6735_v17 = vld [vmem:[%s8014_s24 + $0x78] sm:$0xf]  ;;  %v4653_v4 = vor.u32 %v9838_v46, %v9824_v37 }
 0x1ca   : > { %11809 = vst [vmem:[#allocation143_spill] sm:$0xff] %v9879_v58  ;;  %v9886_v0 = vpop.f32.mrf.mxu0  ;;  %v6731_v26 = vld [vmem:[%s8014_s24 + $0x68] sm:$0x1]  ;;  %v9893_v18 = vrot.slane %v4742_v56, 5  ;;  %v4748_v41 = vrot.slane %v4746_v10, 4  ;;  %v4667_v31 = vor.u32 %v4666_v16, %v9851_v3  ;;  %v4677_v62 = vor.u32 %v4676_v6, %v9870_v60  ;;  %v11813_v56 = vld [vmem:[#allocation28_spill] sm:$0xff] }
 0x1cb   : > { %11810 = vst [vmem:[#allocation144_spill] sm:$0xff] %v9886_v0  ;;  %v9895_v58 = vpop.f32.mrf.mxu1  ;;  %v4680_v34 = vshll.u32 %v6725_v61, 16  ;;  %v4704_v38 = vshll.u32 %v6728_v50, 16  ;;  %v6734_v42 = vld [vmem:[%s8014_s24 + $0x74] sm:$0x1]  ;;  %v4691_v51 = vor.u32 %v4690_v9, %v4687_v19  ;;  %v4701_v48 = vor.u32 %v4700_v12, %v9877_v44 }
 0x1cc   : > { %11811 = vst [vmem:[#allocation145_spill] sm:$0xff] %v9895_v58  ;;  %v9900_v53 = vpop.f32.mrf.mxu0  ;;  %v4757_v0 = vshrl.u32 %v6735_v17, 16  ;;  %v4760_v46 = vshll.u32 %v6735_v17, 16  ;;  %v4715_v10 = vor.u32 %v4714_v5, %v4711_v11  ;;  %v4725_v3 = vor.u32 %v4724_v28, %v9883_v7  ;;  %v6739_v58 = vld [vmem:[%s8014_s24 + $0x88] sm:$0xf] }
 0x1cd   : > { %v9903_v43 = vpop.f32.mrf.mxu1  ;;  %7688 = vmatmul.mubr.msk.bf16.gmra.mxu1 %vm476_vm0, %v11813_v56  ;;  %v4728_v16 = vshll.u32 %v6731_v26, 16  ;;  %v4739_v61 = vor.u32 %v4738_v47, %v4735_v30  ;;  %v4649_v9 = vsel %vm8656_vm5, %v9844_v22, %v9824_v37  ;;  %v4654_v17 = vrot.slane %v4653_v4, 4  ;;  %v6736_v47 = vld [vmem:[%s8014_s24 + $0x7c] sm:$0xf]  ;;  %v6737_v56 = vld [vmem:[%s8014_s24 + $0x80] sm:$0x1] }
 0x1ce   : > { %11812 = vst [vmem:[#allocation146_spill] sm:$0xff] %v9903_v43  ;;  %v9908_v6 = vpop.f32.mrf.mxu0  ;;  %7759 = vmatprep.mubr.msk.bf16.mxu1 %vm476_vm0, %v9818_v1  ;;  %v4749_v19 = vor.u32 %v4748_v41, %v9893_v18  ;;  %v4752_v50 = vshll.u32 %v6734_v42, 16  ;;  %v4668_v11 = vrot.slane %v4667_v31, 4  ;;  %v4678_v5 = vrot.slane %v4677_v62, 4  ;;  %v6738_v41 = vld [vmem:[%s8014_s24 + $0x84] sm:$0xf] }
 0x1cf   : > { %v9917_v12 = vpop.f32.mrf.mxu1  ;;  %v4682_v28 = vrot.slane %v4680_v34, 5  ;;  %v4706_v30 = vrot.slane %v4704_v38, 5  ;;  %v4692_v1 = vrot.slane %v4691_v51, 4  ;;  %v4702_v37 = vrot.slane %v4701_v48, 4 }
 0x1d0   : > { %11814 = vst [vmem:[#allocation28_spill] sm:$0xff] %v9917_v12  ;;  %v9920_v26 = vpop.f32.mrf.mxu0  ;;  %7590 = vmatmul.mubr.msk.bf16.gmra.mxu0 %vm476_vm0, %v9156_v45  ;;  %v4759_v22 = vrot.slane %v4757_v0, 4  ;;  %v4762_v4 = vrot.slane %v4760_v46, 5  ;;  %v4716_v31 = vrot.slane %v4715_v10, 4  ;;  %v4726_v62 = vrot.slane %v4725_v3, 4 }
 0x1d1   : > { %v9925_v42 = vpop.f32.mrf.mxu1  ;;  %7593 = vmatprep.mubr.msk.bf16.mxu0 %vm476_vm0, %v9188_v20  ;;  %v4730_v34 = vrot.slane %v4728_v16, 5  ;;  %v4740_v38 = vrot.slane %v4739_v61, 4  ;;  %v4750_v43 = vrot.slane %v4749_v19, 4  ;;  %v4754_v45 = vrot.slane %v4752_v50, 5 }
 0x1d2   : > { %11815 = vst [vmem:[#allocation147_spill] sm:$0xff] %v9925_v42  ;;  %v9930_v12 = vpop.f32.mrf.mxu0  ;;  %v4766_v51 = vshll.u32 %v6736_v47, 16  ;;  %v4770_v48 = vshrl.u32 %v6736_v47, 16  ;;  %v4659_v46 = vsel %vm8656_vm5, %v4654_v17, %v9846_v33  ;;  %v4673_v20 = vsel %vm8656_vm5, %v4668_v11, %v9870_v60 }
 0x1d3   : > { %v9933_v0 = vpop.f32.mrf.mxu1  ;;  %v4781_v10 = vshrl.u32 %v6738_v41, 16  ;;  %v4784_v3 = vshll.u32 %v6738_v41, 16  ;;  %v4683_v61 = vsel %vm8656_vm5, %v4678_v5, %v4682_v28  ;;  %v4697_v19 = vsel %vm8656_vm5, %v4692_v1, %v9877_v44  ;;  %v6741_v1 = vld [vmem:[%s8014_s24 + $0x90] sm:$0xf] }
 0x1d4   : > { %11816 = vst [vmem:[#allocation148_spill] sm:$0xff] %v9933_v0  ;;  %v9941_v16 = vpop.f32.mrf.mxu0  ;;  %v4707_v50 = vsel %vm8656_vm5, %v4702_v37, %v4706_v30  ;;  %v4763_v33 = vor.u32 %v4762_v4, %v4759_v22  ;;  %v4721_v60 = vsel %vm8656_vm5, %v4716_v31, %v9883_v7  ;;  %v4731_v11 = vsel %vm8656_vm5, %v4726_v62, %v4730_v34  ;;  %v6742_v31 = vld [vmem:[%s8014_s24 + $0x94] sm:$0xf]  ;;  %v11827_v0 = vld [vmem:[#allocation44_spill] sm:$0xff] }
 0x1d5   : > { %v9950_v17 = vpop.f32.mrf.mxu1  ;;  %7760 = vmatmul.mubr.msk.bf16.vlgmr.msra.gmra.mxu1 %vm476_vm0, %v9820_v57  ;;  %v4776_v5 = vshll.u32 %v6737_v56, 16  ;;  %v4790_v28 = vshll.u32 %v6739_v58, 16  ;;  %v4745_v30 = vsel %vm8656_vm5, %v4740_v38, %v9893_v18  ;;  %v4755_v57 = vsel %vm8656_vm5, %v4750_v43, %v4754_v45  ;;  %v6740_v38 = vld [vmem:[%s8014_s24 + $0x8c] sm:$0x1]  ;;  %v11820_v56 = vld [vmem:[#allocation119_spill] sm:$0xff] }
 0x1d6   : > { %11817 = vst [vmem:[#allocation149_spill] sm:$0xff] %v9950_v17  ;;  %v9959_v44 = vpop.f32.mrf.mxu0  ;;  %7763 = vmatprep.mubr.msk.bf16.mxu1 %vm476_vm0, %v9832_v35  ;;  %v9968_v7 = vrot.slane %v4766_v51, 5  ;;  %v4772_v47 = vrot.slane %v4770_v48, 4  ;;  %v6808_v22 = vcombine.low %v4649_v9, %v4659_v46  ;;  %v9973_v4 = vrot.slane %v4781_v10, 4  ;;  %v11823_v51 = vld [vmem:[#allocation7_spill] sm:$0xff] }
 0x1d7   : > { %11818 = vst [vmem:[#allocation150_spill] sm:$0xff] %v9959_v44  ;;  %v9971_v37 = vpop.f32.mrf.mxu1  ;;  %v9975_v41 = vrot.slane %v4784_v3, 5  ;;  %v4794_v35 = vshrl.u32 %v6739_v58, 16  ;;  %v9980_v43 = vcombine.low %v4673_v20, %v4683_v61  ;;  %v9982_v62 = vcombine.low %v4697_v19, %v4707_v50  ;;  %v6744_v20 = vld [vmem:[%s8014_s24 + $0x9c] sm:$0xf] }
 0x1d8   : > { %11819 = vst [vmem:[#allocation151_spill] sm:$0xff] %v9971_v37  ;;  %v7431_v18 = vpop.f32.mrf.mxu0  ;;  %7594 = vmatmul.mubr.msk.bf16.gmra.mxu0 %vm476_vm0, %v9207_v39  ;;  %v9984_v34 = vcombine.low %v4721_v60, %v4731_v11  ;;  %v9986_v9 = vrot.slane %v4763_v33, 4  ;;  %v9996_v48 = vcombine.low %v4745_v30, %v4755_v57  ;;  %v9998_v39 = vrot.slane %v4776_v5, 5  ;;  %v6745_v10 = vld [vmem:[%s8014_s24 + $0xa0] sm:$0xf]  ;;  %v11824_v11 = vld [vmem:[#allocation42_spill] sm:$0xff] }
 0x1d9   : > { %v9990_v45 = vadd.f32 %v7431_v18, %v11820_v56  ;;  %v9992_v58 = vpop.f32.mrf.mxu1  ;;  %7597 = vmatprep.mubr.msk.bf16.mxu0 %vm476_vm0, %v11823_v51  ;;  %v10000_v46 = vrot.slane %v4790_v28, 5  ;;  %v4773_v61 = vor.u32 %v4772_v47, %v9968_v7  ;;  %v4805_v19 = vshrl.u32 %v6741_v1, 16  ;;  %v6747_v60 = vld [vmem:[%s8014_s24 + $0xa8] sm:$0xf]  ;;  %v6748_v47 = vld [vmem:[%s8014_s24 + $0xac] sm:$0xf] }
 0x1da   : > { %11822 = vst [vmem:[#allocation152_spill] sm:$0xff] %v9992_v58  ;;  %v1617_v3 = vpop.f32.mrf.mxu0  ;;  %v4808_v50 = vshll.u32 %v6741_v1, 16  ;;  %v4814_v33 = vshll.u32 %v6742_v31, 16  ;;  %v4787_v5 = vor.u32 %v9975_v41, %v9973_v4  ;;  %v4796_v28 = vrot.slane %v4794_v35, 4 }
 0x1db   : > { %11821 = vst [vmem:[#allocation119_spill] sm:$0xff] %v9990_v45  ;;  %v10007_v18 = vadd.f32 %v1617_v3, %v11824_v11  ;;  %v10009_v56 = vpop.f32.mrf.mxu1  ;;  %v4800_v30 = vshll.u32 %v6740_v38, 16  ;;  %v4818_v51 = vshrl.u32 %v6742_v31, 16  ;;  %v4829_v58 = vshrl.u32 %v6744_v20, 16  ;;  %v11840_v45 = vld [vmem:[#allocation50_spill] sm:$0xff] }
 0x1dc   : > { %11826 = vst [vmem:[#allocation42_spill] sm:$0xff] %v10009_v56  ;;  %v7432_v57 = vpop.f32.mrf.mxu0  ;;  %v4832_v37 = vshll.u32 %v6744_v20, 16  ;;  %v4838_v17 = vshll.u32 %v6745_v10, 16  ;;  %v4842_v3 = vshrl.u32 %v6745_v10, 16  ;;  %v4853_v11 = vshrl.u32 %v6747_v60, 16  ;;  %v11830_v20 = vld [vmem:[#allocation46_spill] sm:$0xff] }
 0x1dd   : > { %11825 = vst [vmem:[#allocation7_spill] sm:$0xff] %v10007_v18  ;;  %v10015_v1 = vadd.f32 %v7432_v57, %v11827_v0  ;;  %v10017_v42 = vpop.f32.mrf.mxu1  ;;  %7764 = vmatmul.mubr.msk.bf16.gmra.mxu1 %vm476_vm0, %v9888_v2  ;;  %v4856_v56 = vshll.u32 %v6747_v60, 16  ;;  %v4774_v41 = vrot.slane %v4773_v61, 4  ;;  %v4807_v35 = vrot.slane %v4805_v19, 4  ;;  %v11833_v60 = vld [vmem:[#allocation122_spill] sm:$0xff] }
 0x1de   : > { %11829 = vst [vmem:[#allocation153_spill] sm:$0xff] %v10017_v42  ;;  %v1620_v4 = vpop.f32.mrf.mxu0  ;;  %7767 = vmatprep.mubr.msk.bf16.mxu1 %vm476_vm0, %v6808_v22  ;;  %v4810_v31 = vrot.slane %v4808_v50, 5  ;;  %v10022_v38 = vrot.slane %v4814_v33, 5  ;;  %v4797_v42 = vor.u32 %v4796_v28, %v10000_v46  ;;  %v4862_v2 = vshll.u32 %v6748_v47, 16  ;;  %v11834_v33 = vld [vmem:[#allocation47_spill] sm:$0xff] }
 0x1df   : > { %11828 = vst [vmem:[#allocation44_spill] sm:$0xff] %v10015_v1  ;;  %v10025_v0 = vadd.f32 %v1620_v4, %v11830_v20  ;;  %v10027_v57 = vpop.f32.mrf.mxu1  ;;  %v4866_v10 = vshrl.u32 %v6748_v47, 16  ;;  %v4820_v22 = vrot.slane %v4818_v51, 4  ;;  %v4831_v61 = vrot.slane %v4829_v58, 4  ;;  %v11837_v20 = vld [vmem:[#allocation123_spill] sm:$0xff] }
 0x1e0   : > { %11832 = vst [vmem:[#allocation154_spill] sm:$0xff] %v10027_v57  ;;  %v7435_v1 = vpop.f32.mrf.mxu0  ;;  %7598 = vmatmul.mubr.msk.bf16.gmra.mxu0 %vm476_vm0, %v11833_v60  ;;  %v4834_v19 = vrot.slane %v4832_v37, 5  ;;  %v10032_v50 = vrot.slane %v4838_v17, 5  ;;  %v6743_v28 = vld [vmem:[%s8014_s24 + $0x98] sm:$0x1]  ;;  %v4844_v47 = vrot.slane %v4842_v3, 4  ;;  %v4769_v17 = vsel %vm8656_vm5, %v9986_v9, %v9968_v7 }
 0x1e1   : > { %11831 = vst [vmem:[#allocation46_spill] sm:$0xff] %v10025_v0  ;;  %v10035_v18 = vadd.f32 %v7435_v1, %v11834_v33  ;;  %v10037_v4 = vpop.f32.mrf.mxu1  ;;  %7601 = vmatprep.mubr.msk.bf16.mxu0 %vm476_vm0, %v11837_v20  ;;  %v4855_v57 = vrot.slane %v4853_v11, 4  ;;  %v4858_v0 = vrot.slane %v4856_v56, 5  ;;  %v4779_v37 = vsel %vm8656_vm5, %v4774_v41, %v9998_v39  ;;  %v6746_v1 = vld [vmem:[%s8014_s24 + $0xa4] sm:$0x1]  ;;  %v11838_v33 = vld [vmem:[#allocation48_spill] sm:$0xff] }
 0x1e2   : > { %11836 = vst [vmem:[#allocation47_spill] sm:$0xff] %v10037_v4  ;;  %v1633_v60 = vpop.f32.mrf.mxu0  ;;  %v10049_v58 = vrot.slane %v4787_v5, 4  ;;  %v10051_v51 = vrot.slane %v4800_v30, 5  ;;  %v4811_v11 = vor.u32 %v4810_v31, %v4807_v35  ;;  %v10059_v20 = vrot.slane %v4862_v2, 5  ;;  %v6750_v7 = vld [vmem:[%s8014_s24 + $0xb4] sm:$0xf] }
 0x1e3   : > { %11835 = vst [vmem:[#allocation122_spill] sm:$0xff] %v10035_v18  ;;  %v10055_v3 = vadd.f32 %v1633_v60, %v11838_v33  ;;  %v10057_v56 = vpop.f32.mrf.mxu1  ;;  %v4868_v4 = vrot.slane %v4866_v10, 4  ;;  %v10062_v18 = vrot.slane %v4797_v42, 4  ;;  %v4821_v39 = vor.u32 %v4820_v22, %v10022_v38  ;;  %v6749_v30 = vld [vmem:[%s8014_s24 + $0xb0] sm:$0x1] }
 0x1e4   : > { %11839 = vst [vmem:[#allocation123_spill] sm:$0xff] %v10057_v56  ;;  %v7436_v9 = vpop.f32.mrf.mxu0  ;;  %v4824_v5 = vshll.u32 %v6743_v28, 16  ;;  %v4835_v41 = vor.u32 %v4834_v19, %v4831_v61  ;;  %v4845_v35 = vor.u32 %v4844_v47, %v10032_v50  ;;  %v4848_v31 = vshll.u32 %v6746_v1, 16  ;;  %v11842_v19 = vld [vmem:[#allocation52_spill] sm:$0xff]  ;;  %v11850_v56 = vld [vmem:[#allocation9_spill] sm:$0xff] }
 0x1e5   : > { %v10067_v44 = vadd.f32 %v7436_v9, %v11840_v45  ;;  %v10069_v60 = vpop.f32.mrf.mxu1  ;;  %7768 = vmatmul.mubr.msk.bf16.gmra.mxu1 %vm476_vm0, %v9980_v43  ;;  %v4859_v2 = vor.u32 %v4858_v0, %v4855_v57  ;;  %v10076_v10 = vcombine.low %v4769_v17, %v4779_v37  ;;  %v4877_v22 = vshrl.u32 %v6750_v7, 16  ;;  %v6751_v47 = vld [vmem:[%s8014_s24 + $0xb8] sm:$0xf] }
 0x1e6   : > { %11841 = vst [vmem:[#allocation48_spill] sm:$0xff] %v10069_v60  ;;  %v1636_v42 = vpop.f32.mrf.mxu0  ;;  %7771 = vmatprep.mubr.msk.bf16.mxu1 %vm476_vm0, %v9982_v62  ;;  %v4880_v61 = vshll.u32 %v6750_v7, 16  ;;  %v10087_v0 = vrot.slane %v4811_v11, 4  ;;  %v4869_v57 = vor.u32 %v4868_v4, %v10059_v20  ;;  %v4872_v62 = vshll.u32 %v6749_v30, 16  ;;  %v11845_v37 = vld [vmem:[#allocation124_spill] sm:$0xff]  ;;  %v11849_v30 = vld [vmem:[#allocation125_spill] sm:$0xff] }
 0x1e7   : > { %v10083_v43 = vadd.f32 %v1636_v42, %v11842_v19  ;;  %v10085_v28 = vpop.f32.mrf.mxu1  ;;  %v4803_v1 = vsel %vm8656_vm5, %v10062_v18, %v10051_v51  ;;  %v4822_v33 = vrot.slane %v4821_v39, 4  ;;  %v4826_v7 = vrot.slane %v4824_v5, 5  ;;  %v6753_v11 = vld [vmem:[%s8014_s24 + $0xc0] sm:$0xf]  ;;  %v6754_v60 = vld [vmem:[%s8014_s24 + $0xc4] sm:$0xf] }
 0x1e8   : > { %11844 = vst [vmem:[#allocation52_spill] sm:$0xff] %v10085_v28  ;;  %v7439_v17 = vpop.f32.mrf.mxu0  ;;  %7602 = vmatmul.mubr.msk.bf16.gmra.mxu0 %vm476_vm0, %v11845_v37  ;;  %v10097_v9 = vrot.slane %v4835_v41, 4  ;;  %v11846_v42 = vld [vmem:[#allocation53_spill] sm:$0xff]  ;;  %v4846_v45 = vrot.slane %v4845_v35, 4  ;;  %v4850_v37 = vrot.slane %v4848_v31, 5  ;;  %v10107_v28 = vrot.slane %v4859_v2, 4 }
 0x1e9   : > { %11843 = vst [vmem:[#allocation50_spill] sm:$0xff] %v10083_v43  ;;  %v10101_v19 = vadd.f32 %v7439_v17, %v11846_v42  ;;  %v10103_v4 = vpop.f32.mrf.mxu1  ;;  %7605 = vmatprep.mubr.msk.bf16.mxu0 %vm476_vm0, %v11849_v30  ;;  %v4879_v51 = vrot.slane %v4877_v22, 4  ;;  %v4882_v39 = vrot.slane %v4880_v61, 5  ;;  %v4886_v5 = vshll.u32 %v6751_v47, 16  ;;  %v6752_v2 = vld [vmem:[%s8014_s24 + $0xbc] sm:$0x1] }
 0x1ea   : > { %11848 = vst [vmem:[#allocation53_spill] sm:$0xff] %v10103_v4  ;;  %v1649_v18 = vpop.f32.mrf.mxu0  ;;  %v4890_v41 = vshrl.u32 %v6751_v47, 16  ;;  %v4870_v42 = vrot.slane %v4869_v57, 4  ;;  %v4874_v4 = vrot.slane %v4872_v62, 5  ;;  %v4901_v30 = vshrl.u32 %v6753_v11, 16 }
 0x1eb   : > { %11847 = vst [vmem:[#allocation124_spill] sm:$0xff] %v10101_v19  ;;  %v10111_v43 = vadd.f32 %v1649_v18, %v11850_v56  ;;  %v10113_v17 = vpop.f32.mrf.mxu1  ;;  %v4817_v31 = vsel %vm8656_vm5, %v10087_v0, %v10022_v38  ;;  %v4904_v22 = vshll.u32 %v6753_v11, 16  ;;  %v4910_v61 = vshll.u32 %v6754_v60, 16  ;;  %v11852_v19 = vld [vmem:[#allocation56_spill] sm:$0xff] }
 0x1ec   : > { %11851 = vst [vmem:[#allocation125_spill] sm:$0xff] %v10113_v17  ;;  %v7440_v35 = vpop.f32.mrf.mxu0  ;;  %v4914_v47 = vshrl.u32 %v6754_v60, 16  ;;  %v4827_v57 = vsel %vm8656_vm5, %v4822_v33, %v4826_v7  ;;  %v4841_v38 = vsel %vm8656_vm5, %v10097_v9, %v10032_v50  ;;  %v4851_v0 = vsel %vm8656_vm5, %v4846_v45, %v4850_v37  ;;  %v6756_v60 = vld [vmem:[%s8014_s24 + $0xcc] sm:$0xf] }
 0x1ed   : > { %v10121_v56 = vadd.f32 %v7440_v35, %v11852_v19  ;;  %v10123_v18 = vpop.f32.mrf.mxu1  ;;  %7772 = vmatmul.mubr.msk.bf16.gmra.mxu1 %vm476_vm0, %v9984_v34  ;;  %v4865_v34 = vsel %vm8656_vm5, %v10107_v28, %v10059_v20  ;;  %v4883_v33 = vor.u32 %v4882_v39, %v4879_v51  ;;  %v10142_v7 = vrot.slane %v4886_v5, 5  ;;  %v6757_v19 = vld [vmem:[%s8014_s24 + $0xd0] sm:$0xf]  ;;  %v6755_v20 = vld [vmem:[%s8014_s24 + $0xc8] sm:$0x1] }
 0x1ee   : > { %11853 = vst [vmem:[#allocation9_spill] sm:$0xff] %v10123_v18  ;;  %v1652_v62 = vpop.f32.mrf.mxu0  ;;  %7775 = vmatprep.mubr.msk.bf16.mxu1 %vm476_vm0, %v9996_v48  ;;  %v4892_v11 = vrot.slane %v4890_v41, 4  ;;  %v11854_v50 = vld [vmem:[#allocation58_spill] sm:$0xff]  ;;  %v4875_v37 = vsel %vm8656_vm5, %v4870_v42, %v4874_v4  ;;  %v4896_v35 = vshll.u32 %v6752_v2, 16  ;;  %v4903_v48 = vrot.slane %v4901_v30, 4  ;;  %v11857_v41 = vld [vmem:[#allocation11_spill] sm:$0xff] }
 0x1ef   : > { %v10146_v9 = vadd.f32 %v1652_v62, %v11854_v50  ;;  %v10148_v45 = vpop.f32.mrf.mxu1  ;;  %v11856_v17 = vld [vmem:[#allocation70_spill] sm:$0xff]  ;;  %v4906_v28 = vrot.slane %v4904_v22, 5  ;;  %v10155_v51 = vrot.slane %v4910_v61, 5  ;;  %v4916_v39 = vrot.slane %v4914_v47, 4 }
 0x1f0   : > { %11855 = vst [vmem:[#allocation56_spill] sm:$0xff] %v10148_v45  ;;  %v7443_v18 = vpop.f32.mrf.mxu0  ;;  %7606 = vmatmul.mubr.msk.bf16.gmra.mxu0 %vm476_vm0, %v11856_v17  ;;  %v4925_v5 = vshrl.u32 %v6756_v60, 16  ;;  %v11860_v45 = vld [vmem:[#allocation77_spill] sm:$0xff]  ;;  %v4928_v4 = vshll.u32 %v6756_v60, 16  ;;  %v4934_v42 = vshll.u32 %v6757_v19, 16  ;;  %v4938_v30 = vshrl.u32 %v6757_v19, 16 }
 0x1f1   : > { %v10158_v62 = vadd.f32 %v7443_v18, %v11857_v41  ;;  %v10160_v50 = vpop.f32.mrf.mxu1  ;;  %7609 = vmatprep.mubr.msk.bf16.mxu0 %vm476_vm0, %v11860_v45  ;;  %v11861_v2 = vsel %vm8656_vm5, %v10049_v58, %v10000_v46  ;;  %v10169_v61 = vcombine.low %v4817_v31, %v4827_v57  ;;  %v10171_v47 = vrot.slane %v4883_v33, 4  ;;  %v11862_v41 = vld [vmem:[#allocation59_spill] sm:$0xff] }
 0x1f2   : > { %11859 = vst [vmem:[#allocation70_spill] sm:$0xff] %v10160_v50  ;;  %v1665_v17 = vpop.f32.mrf.mxu0  ;;  %v6814_v22 = vcombine.low %v11861_v2, %v4803_v1  ;;  %v4893_v18 = vor.u32 %v4892_v11, %v10142_v7  ;;  %v10179_v19 = vcombine.low %v4841_v38, %v4851_v0  ;;  %v10181_v50 = vrot.slane %v4896_v35, 5  ;;  %v6759_v46 = vld [vmem:[%s8014_s24 + $0xd8] sm:$0xf]  ;;  %v6758_v33 = vld [vmem:[%s8014_s24 + $0xd4] sm:$0x1] }
 0x1f3   : > { %11858 = vst [vmem:[#allocation58_spill] sm:$0xff] %v10158_v62  ;;  %v10175_v45 = vadd.f32 %v1665_v17, %v11862_v41  ;;  %v10177_v60 = vpop.f32.mrf.mxu1  ;;  %v4920_v62 = vshll.u32 %v6755_v20, 16  ;;  %v10184_v1 = vcombine.low %v4865_v34, %v4875_v37  ;;  %v4907_v31 = vor.u32 %v4906_v28, %v4903_v48  ;;  %v6760_v2 = vld [vmem:[%s8014_s24 + $0xdc] sm:$0xf]  ;;  %v11865_v17 = vld [vmem:[#allocation62_spill] sm:$0xff] }
 0x1f4   : > { %11864 = vst [vmem:[#allocation77_spill] sm:$0xff] %v10177_v60  ;;  %v7444_v58 = vpop.f32.mrf.mxu0  ;;  %v4917_v57 = vor.u32 %v4916_v39, %v10155_v51  ;;  %v4927_v11 = vrot.slane %v4925_v5, 4  ;;  %v4930_v38 = vrot.slane %v4928_v4, 5  ;;  %v10196_v0 = vrot.slane %v4934_v42, 5  ;;  %v6762_v37 = vld [vmem:[%s8014_s24 + $0xe4] sm:$0xf] }
 0x1f5   : > { %11863 = vst [vmem:[#allocation11_spill] sm:$0xff] %v10175_v45  ;;  %v10190_v41 = vadd.f32 %v7444_v58, %v11865_v17  ;;  %v10192_v60 = vpop.f32.mrf.mxu1  ;;  %7776 = vmatmul.mubr.msk.bf16.gmra.mxu1 %vm476_vm0, %v10076_v10  ;;  %v4940_v34 = vrot.slane %v4938_v30, 4  ;;  %v4889_v48 = vsel %vm8656_vm5, %v10171_v47, %v10142_v7  ;;  %v4894_v20 = vrot.slane %v4893_v18, 4  ;;  %v11868_v5 = vld [vmem:[#allocation64_spill] sm:$0xff]  ;;  %v6763_v17 = vld [vmem:[%s8014_s24 + $0xe8] sm:$0xf] }
 0x1f6   : > { %11867 = vst [vmem:[#allocation62_spill] sm:$0xff] %v10192_v60  ;;  %v1668_v35 = vpop.f32.mrf.mxu0  ;;  %7779 = vmatprep.mubr.msk.bf16.mxu1 %vm476_vm0, %v6814_v22  ;;  %v4949_v28 = vshrl.u32 %v6759_v46, 16  ;;  %v4952_v39 = vshll.u32 %v6759_v46, 16  ;;  %v4922_v4 = vrot.slane %v4920_v62, 5  ;;  %v4958_v42 = vshll.u32 %v6760_v2, 16  ;;  %v11871_v47 = vld [vmem:[#allocation65_spill] sm:$0xff] }
 0x1f7   : > { %11866 = vst [vmem:[#allocation59_spill] sm:$0xff] %v10190_v41  ;;  %v10205_v58 = vadd.f32 %v1668_v35, %v11868_v5  ;;  %v10207_v10 = vpop.f32.mrf.mxu1  ;;  %v4962_v30 = vshrl.u32 %v6760_v2, 16  ;;  %v4908_v22 = vrot.slane %v4907_v31, 4  ;;  %v4918_v41 = vrot.slane %v4917_v57, 4 }
 0x1f8   : > { %11870 = vst [vmem:[#allocation155_spill] sm:$0xff] %v10207_v10  ;;  %v7447_v60 = vpop.f32.mrf.mxu0  ;;  %7610 = vmatmul.mubr.msk.bf16.gmra.mxu0 %vm476_vm0, %v9554_v29  ;;  %v4944_v45 = vshll.u32 %v6758_v33, 16  ;;  %v4973_v7 = vshrl.u32 %v6762_v37, 16  ;;  %v4931_v62 = vor.u32 %v4930_v38, %v4927_v11  ;;  %v4941_v2 = vor.u32 %v4940_v34, %v10196_v0  ;;  %v11874_v10 = vld [vmem:[#allocation66_spill] sm:$0xff] }
 0x1f9   : > { %11869 = vst [vmem:[#allocation64_spill] sm:$0xff] %v10205_v58  ;;  %v10213_v18 = vadd.f32 %v7447_v60, %v11871_v47  ;;  %v10215_v46 = vpop.f32.mrf.mxu1  ;;  %7613 = vmatprep.mubr.msk.bf16.mxu0 %vm476_vm0, %v9572_v13  ;;  %v4976_v35 = vshll.u32 %v6762_v37, 16  ;;  %v4951_v29 = vrot.slane %v4949_v28, 4  ;;  %v4954_v31 = vrot.slane %v4952_v39, 5  ;;  %v6761_v13 = vld [vmem:[%s8014_s24 + $0xe0] sm:$0x1] }
 0x1fa   : > { %11873 = vst [vmem:[#allocation156_spill] sm:$0xff] %v10215_v46  ;;  %v1681_v5 = vpop.f32.mrf.mxu0  ;;  %v4982_v57 = vshll.u32 %v6763_v17, 16  ;;  %v4986_v33 = vshrl.u32 %v6763_v17, 16  ;;  %v4899_v47 = vsel %vm8656_vm5, %v4894_v20, %v10181_v50  ;;  %v10229_v11 = vrot.slane %v4958_v42, 5  ;;  %v6764_v37 = vld [vmem:[%s8014_s24 + $0xec] sm:$0x1] }
 0x1fb   : > { %11872 = vst [vmem:[#allocation65_spill] sm:$0xff] %v10213_v18  ;;  %v10221_v58 = vadd.f32 %v1681_v5, %v11874_v10  ;;  %v10223_v60 = vpop.f32.mrf.mxu1  ;;  %v4964_v38 = vrot.slane %v4962_v30, 4  ;;  %v4975_v28 = vrot.slane %v4973_v7, 4  ;;  %v4978_v39 = vrot.slane %v4976_v35, 5  ;;  %v11877_v5 = vld [vmem:[#allocation13_spill] sm:$0xff] }
 0x1fc   : > { %11876 = vst [vmem:[#allocation157_spill] sm:$0xff] %v10223_v60  ;;  %v7448_v34 = vpop.f32.mrf.mxu0  ;;  %v10232_v17 = vrot.slane %v4982_v57, 5  ;;  %v4988_v10 = vrot.slane %v4986_v33, 4  ;;  %v4913_v50 = vsel %vm8656_vm5, %v4908_v22, %v10155_v51  ;;  %v4923_v20 = vsel %vm8656_vm5, %v4918_v41, %v4922_v4  ;;  %v6765_v30 = vld [vmem:[%s8014_s24 + $0xf0] sm:$0xf] }
 0x1fd   : > { %11875 = vst [vmem:[#allocation66_spill] sm:$0xff] %v10221_v58  ;;  %v10235_v46 = vadd.f32 %v7448_v34, %v11877_v5  ;;  %v10237_v60 = vpop.f32.mrf.mxu1  ;;  %7780 = vmatmul.mubr.msk.bf16.gmra.mxu1 %vm476_vm0, %v10169_v61  ;;  %v4932_v42 = vrot.slane %v4931_v62, 4  ;;  %v4942_v35 = vrot.slane %v4941_v2, 4  ;;  %v4946_v57 = vrot.slane %v4944_v45, 5  ;;  %v6766_v5 = vld [vmem:[%s8014_s24 + $0xf4] sm:$0xf] }
 0x1fe   : > { %11879 = vst [vmem:[#allocation158_spill] sm:$0xff] %v10237_v60  ;;  %v1684_v7 = vpop.f32.mrf.mxu0  ;;  %7783 = vmatprep.mubr.msk.bf16.mxu1 %vm476_vm0, %v10179_v19  ;;  %v4955_v33 = vor.u32 %v4954_v31, %v4951_v29  ;;  %v4968_v34 = vshll.u32 %v6761_v13, 16  ;;  %v11880_v61 = vld [vmem:[#allocation68_spill] sm:$0xff]  ;;  %v6818_v51 = vcombine.low %v4889_v48, %v4899_v47  ;;  %v4965_v41 = vor.u32 %v4964_v38, %v10229_v11  ;;  %v11883_v31 = vld [vmem:[#allocation71_spill] sm:$0xff] }
 0x1ff   : > { %11878 = vst [vmem:[#allocation13_spill] sm:$0xff] %v10235_v46  ;;  %v10251_v60 = vadd.f32 %v1684_v7, %v11880_v61  ;;  %v10253_v46 = vpop.f32.mrf.mxu1  ;;  %v4992_v4 = vshll.u32 %v6764_v37, 16  ;;  %v10258_v19 = vcombine.low %v4913_v50, %v4923_v20  ;;  %v4979_v45 = vor.u32 %v4978_v39, %v4975_v28  ;;  %v6768_v29 = vld [vmem:[%s8014_s24 + $0xfc] sm:$0xf]  ;;  %v6769_v50 = vld [vmem:[%s8014_s24 + $0x100] sm:$0xf] }
 0x200   : > { %11882 = vst [vmem:[#allocation159_spill] sm:$0xff] %v10253_v46  ;;  %v7451_v22 = vpop.f32.mrf.mxu0  ;;  %7614 = vmatmul.mubr.msk.bf16.gmra.mxu0 %vm476_vm0, %v9618_v63  ;;  %v4989_v62 = vor.u32 %v4988_v10, %v10232_v17  ;;  %v4997_v2 = vshrl.u32 %v6765_v30, 16  ;;  %v4937_v63 = vsel %vm8656_vm5, %v4932_v42, %v10196_v0  ;;  %v5000_v48 = vshll.u32 %v6765_v30, 16 }
 0x201   : > { %11881 = vst [vmem:[#allocation68_spill] sm:$0xff] %v10251_v60  ;;  %v10263_v13 = vadd.f32 %v7451_v22, %v11883_v31  ;;  %v10265_v7 = vpop.f32.mrf.mxu1  ;;  %7617 = vmatprep.mubr.msk.bf16.mxu0 %vm476_vm0, %v9634_v27  ;;  %v5006_v47 = vshll.u32 %v6766_v5, 16  ;;  %v4947_v37 = vsel %vm8656_vm5, %v4942_v35, %v4946_v57  ;;  %v4956_v28 = vrot.slane %v4955_v33, 4 }
 0x202   : > { %11885 = vst [vmem:[#allocation160_spill] sm:$0xff] %v10265_v7  ;;  %v1697_v38 = vpop.f32.mrf.mxu0  ;;  %v4970_v39 = vrot.slane %v4968_v34, 5  ;;  %v5010_v10 = vshrl.u32 %v6766_v5, 16  ;;  %v4966_v27 = vrot.slane %v4965_v41, 4  ;;  %v4994_v22 = vrot.slane %v4992_v4, 5 }
 0x203   : > { %11884 = vst [vmem:[#allocation71_spill] sm:$0xff] %v10263_v13  ;;  %v10276_v20 = vadd.f32 %v1697_v38, %v9512_v36  ;;  %v10278_v61 = vpop.f32.mrf.mxu1  ;;  %v5021_v0 = vshrl.u32 %v6768_v29, 16  ;;  %v4980_v30 = vrot.slane %v4979_v45, 4  ;;  %v4990_v31 = vrot.slane %v4989_v62, 4  ;;  %v6771_v5 = vld [vmem:[%s8014_s24 + $0x108] sm:$0xf] }
 0x204   : > { %11887 = vst [vmem:[#allocation162_spill] sm:$0xff] %v10278_v61  ;;  %v7452_v42 = vpop.f32.mrf.mxu0  ;;  %v4999_v7 = vrot.slane %v4997_v2, 4  ;;  %v5024_v46 = vshll.u32 %v6768_v29, 16  ;;  %v5002_v36 = vrot.slane %v5000_v48, 5  ;;  %v10287_v33 = vrot.slane %v5006_v47, 5 }
 0x205   : > { %11886 = vst [vmem:[#allocation161_spill] sm:$0xff] %v10276_v20  ;;  %v10281_v35 = vadd.f32 %v7452_v42, %v9516_v8  ;;  %v10283_v57 = vpop.f32.mrf.mxu1  ;;  %7784 = vmatmul.mubr.msk.bf16.gmra.mxu1 %vm476_vm0, %v10184_v1  ;;  %v5030_v34 = vshll.u32 %v6769_v50, 16  ;;  %v6767_v4 = vld [vmem:[%s8014_s24 + $0xf8] sm:$0x1]  ;;  %v5012_v45 = vrot.slane %v5010_v10, 4  ;;  %v5023_v62 = vrot.slane %v5021_v0, 4 }
 0x206   : > { %11889 = vst [vmem:[#allocation164_spill] sm:$0xff] %v10283_v57  ;;  %v1700_v41 = vpop.f32.mrf.mxu0  ;;  %7787 = vmatprep.mubr.msk.bf16.mxu1 %vm476_vm0, %v6818_v51  ;;  %v5026_v8 = vrot.slane %v5024_v46, 5  ;;  %v5034_v2 = vshrl.u32 %v6769_v50, 16  ;;  %v6820_v1 = vcombine.low %v4937_v63, %v4947_v37  ;;  %v4961_v48 = vsel %vm8656_vm5, %v4956_v28, %v10229_v11  ;;  %v6770_v47 = vld [vmem:[%s8014_s24 + $0x104] sm:$0x1] }
 0x207   : > { %11888 = vst [vmem:[#allocation163_spill] sm:$0xff] %v10281_v35  ;;  %v10293_v29 = vadd.f32 %v1700_v41, %v9543_v32  ;;  %v10295_v38 = vpop.f32.mrf.mxu1  ;;  %v10301_v42 = vrot.slane %v5030_v34, 5  ;;  %v4971_v46 = vsel %vm8656_vm5, %v4966_v27, %v4970_v39  ;;  %v4985_v32 = vsel %vm8656_vm5, %v4980_v30, %v10232_v17  ;;  %v6772_v63 = vld [vmem:[%s8014_s24 + $0x10c] sm:$0xf]  ;;  %v11917_v57 = vld [vmem:[#allocation89_spill] sm:$0xff] }
 0x208   : > { %11891 = vst [vmem:[#allocation166_spill] sm:$0xff] %v10295_v38  ;;  %v7455_v51 = vpop.f32.mrf.mxu0  ;;  %7618 = vmatmul.mubr.msk.bf16.gmra.mxu0 %vm476_vm0, %v9646_v52  ;;  %v5036_v10 = vrot.slane %v5034_v2, 4  ;;  %v5045_v37 = vshrl.u32 %v6771_v5, 16  ;;  %v4995_v52 = vsel %vm8656_vm5, %v4990_v31, %v4994_v22  ;;  %v5003_v28 = vor.u32 %v5002_v36, %v4999_v7  ;;  %v6774_v22 = vld [vmem:[%s8014_s24 + $0x114] sm:$0xf] }
 0x209   : > { %11890 = vst [vmem:[#allocation165_spill] sm:$0xff] %v10293_v29  ;;  %v10312_v50 = vadd.f32 %v7455_v51, %v9564_v55  ;;  %v10314_v11 = vpop.f32.mrf.mxu1  ;;  %7621 = vmatprep.mubr.msk.bf16.mxu0 %vm476_vm0, %v9742_v59  ;;  %v5016_v39 = vshll.u32 %v6767_v4, 16  ;;  %v5013_v17 = vor.u32 %v5012_v45, %v10287_v33  ;;  %v5027_v0 = vor.u32 %v5026_v8, %v5023_v62  ;;  %v6773_v4 = vld [vmem:[%s8014_s24 + $0x110] sm:$0x1]  ;;  %v11958_v29 = vld [vmem:[#allocation109_spill] sm:$0xff] }
 0x20a   : > { %11893 = vst [vmem:[#allocation168_spill] sm:$0xff] %v10314_v11  ;;  %v1713_v27 = vpop.f32.mrf.mxu0  ;;  %v5040_v30 = vshll.u32 %v6770_v47, 16  ;;  %v5048_v34 = vshll.u32 %v6771_v5, 16  ;;  %v5037_v2 = vor.u32 %v5036_v10, %v10301_v42  ;;  %v5054_v59 = vshll.u32 %v6772_v63, 16  ;;  %v6775_v10 = vld [vmem:[%s8014_s24 + $0x118] sm:$0xf] }
 0x20b   : > { %11892 = vst [vmem:[#allocation167_spill] sm:$0xff] %v10312_v50  ;;  %v10322_v55 = vadd.f32 %v1713_v27, %v9568_v40  ;;  %v10324_v41 = vpop.f32.mrf.mxu1  ;;  %v5058_v51 = vshrl.u32 %v6772_v63, 16  ;;  %v6821_v31 = vcombine.low %v4961_v48, %v4971_v46  ;;  %v6822_v36 = vcombine.low %v4985_v32, %v4995_v52 }
 0x20c   : > { %11895 = vst [vmem:[#allocation170_spill] sm:$0xff] %v10324_v41  ;;  %v7456_v7 = vpop.f32.mrf.mxu0  ;;  %v5047_v11 = vrot.slane %v5045_v37, 4  ;;  %v5050_v45 = vrot.slane %v5048_v34, 5  ;;  %v10336_v40 = vrot.slane %v5003_v28, 4  ;;  %v10338_v8 = vrot.slane %v5054_v59, 5 }
 0x20d   : > { %11894 = vst [vmem:[#allocation169_spill] sm:$0xff] %v10322_v55  ;;  %v10330_v62 = vadd.f32 %v7456_v7, %v9579_v49  ;;  %v10332_v5 = vpop.f32.mrf.mxu1  ;;  %7788 = vmatmul.mubr.msk.bf16.gmra.mxu1 %vm476_vm0, %v10258_v19  ;;  %v5060_v47 = vrot.slane %v5058_v51, 4  ;;  %v10342_v46 = vrot.slane %v5013_v17, 4  ;;  %v10344_v32 = vrot.slane %v5016_v39, 5  ;;  %v6776_v34 = vld [vmem:[%s8014_s24 + $0x11c] sm:$0x1] }
 0x20e   : > { %11897 = vst [vmem:[#allocation172_spill] sm:$0xff] %v10332_v5  ;;  %v1716_v48 = vpop.f32.mrf.mxu0  ;;  %7791 = vmatprep.mubr.msk.bf16.mxu1 %vm476_vm0, %v6820_v1  ;;  %v10346_v49 = vrot.slane %v5040_v30, 5  ;;  %v5069_v63 = vshrl.u32 %v6774_v22, 16  ;;  %v10353_v52 = vrot.slane %v5027_v0, 4  ;;  %v5038_v28 = vrot.slane %v5037_v2, 4  ;;  %v11902_v7 = vld [vmem:[#allocation29_spill] sm:$0xff] }
 0x20f   : > { %11896 = vst [vmem:[#allocation171_spill] sm:$0xff] %v10330_v62  ;;  %v10349_v37 = vadd.f32 %v1716_v48, %v9608_v54  ;;  %v10351_v19 = vpop.f32.mrf.mxu1  ;;  %v5064_v27 = vshll.u32 %v6773_v4, 16  ;;  %v5051_v1 = vor.u32 %v5050_v45, %v5047_v11  ;;  %v5072_v17 = vshll.u32 %v6774_v22, 16  ;;  %v6777_v2 = vld [vmem:[%s8014_s24 + $0x120] sm:$0xf] }
 0x210   : > { %11899 = vst [vmem:[#allocation174_spill] sm:$0xff] %v10351_v19  ;;  %v7459_v59 = vpop.f32.mrf.mxu0  ;;  %7622 = vmatmul.mubr.msk.bf16.gmra.mxu0 %vm476_vm0, %v9811_v14  ;;  %v5071_v39 = vrot.slane %v5069_v63, 4  ;;  %v5078_v30 = vshll.u32 %v6775_v10, 16  ;;  %v5009_v0 = vsel %vm8656_vm5, %v10336_v40, %v10287_v33  ;;  %v5061_v14 = vor.u32 %v5060_v47, %v10338_v8  ;;  %v6780_v19 = vld [vmem:[%s8014_s24 + $0x12c] sm:$0xf]  ;;  %v11957_v55 = vld [vmem:[#allocation112_spill] sm:$0xff] }
 0x211   : > { %11898 = vst [vmem:[#allocation173_spill] sm:$0xff] %v10349_v37  ;;  %v10359_v51 = vadd.f32 %v7459_v59, %v9612_v15  ;;  %v10361_v54 = vpop.f32.mrf.mxu1  ;;  %7693 = vmatprep.mubr.msk.bf16.mxu0 %vm476_vm0, %v11902_v7  ;;  %v5082_v11 = vshrl.u32 %v6775_v10, 16  ;;  %v5019_v15 = vsel %vm8656_vm5, %v10342_v46, %v10344_v32  ;;  %v5074_v4 = vrot.slane %v5072_v17, 5  ;;  %v6778_v10 = vld [vmem:[%s8014_s24 + $0x124] sm:$0xf] }
 0x212   : > { %11901 = vst [vmem:[#allocation176_spill] sm:$0xff] %v10361_v54  ;;  %v1729_v22 = vpop.f32.mrf.mxu0  ;;  %v10375_v45 = vrot.slane %v5078_v30, 5  ;;  %v5088_v48 = vshll.u32 %v6776_v34, 16  ;;  %v5033_v33 = vsel %vm8656_vm5, %v10353_v52, %v10301_v42  ;;  %v5043_v40 = vsel %vm8656_vm5, %v5038_v28, %v10346_v49  ;;  %v11905_v30 = vld [vmem:[#allocation80_spill] sm:$0xff]  ;;  %v11934_v37 = vld [vmem:[#allocation105_spill] sm:$0xff] }
 0x213   : > { %11900 = vst [vmem:[#allocation175_spill] sm:$0xff] %v10359_v51  ;;  %v10378_v63 = vadd.f32 %v1729_v22, %v9622_v21  ;;  %v10380_v59 = vpop.f32.mrf.mxu1  ;;  %v5084_v47 = vrot.slane %v5082_v11, 4  ;;  %v5052_v32 = vrot.slane %v5051_v1, 4  ;;  %v5066_v34 = vrot.slane %v5064_v27, 5  ;;  %v6779_v27 = vld [vmem:[%s8014_s24 + $0x128] sm:$0x1] }
 0x214   : > { %11904 = vst [vmem:[#allocation177_spill] sm:$0xff] %v10380_v59  ;;  %v7460_v46 = vpop.f32.mrf.mxu0  ;;  %v5075_v17 = vor.u32 %v5074_v4, %v5071_v39  ;;  %v5093_v21 = vshrl.u32 %v6777_v2, 16  ;;  %v5062_v42 = vrot.slane %v5061_v14, 4  ;;  %v5096_v49 = vshll.u32 %v6777_v2, 16  ;;  %v11907_v59 = vld [vmem:[#allocation82_spill] sm:$0xff]  ;;  %v11910_v2 = vld [vmem:[#allocation99_spill] sm:$0xff] }
 0x215   : > { %11903 = vst [vmem:[#allocation29_spill] sm:$0xff] %v10378_v63  ;;  %v10391_v7 = vadd.f32 %v7460_v46, %v11905_v30  ;;  %v10393_v22 = vpop.f32.mrf.mxu1  ;;  %7792 = vmatmul.mubr.msk.bf16.gmra.mxu1 %vm476_vm0, %v6821_v31  ;;  %v5085_v52 = vor.u32 %v5084_v47, %v10375_v45  ;;  %v5090_v1 = vrot.slane %v5088_v48, 5  ;;  %v5102_v39 = vshll.u32 %v6778_v10, 16  ;;  %v11909_v47 = vld [vmem:[#allocation17_spill] sm:$0xff] }
 0x216   : > { %v1732_v28 = vpop.f32.mrf.mxu0  ;;  %7795 = vmatprep.mubr.msk.bf16.mxu1 %vm476_vm0, %v6822_v36  ;;  %v5076_v11 = vrot.slane %v5075_v17, 4  ;;  %v5106_v4 = vshrl.u32 %v6778_v10, 16  ;;  %v5095_v31 = vrot.slane %v5093_v21, 4  ;;  %v5098_v14 = vrot.slane %v5096_v49, 5  ;;  %v11911_v36 = vld [vmem:[#allocation79_spill] sm:$0xff]  ;;  %v11912_v17 = vld [vmem:[#allocation100_spill] sm:$0xff] }
 0x217   : > { %11906 = vst [vmem:[#allocation80_spill] sm:$0xff] %v10391_v7  ;;  %v10400_v46 = vadd.f32 %v1732_v28, %v11907_v59  ;;  %v10402_v30 = vpop.f32.mrf.mxu1  ;;  %v5086_v54 = vrot.slane %v5085_v52, 4  ;;  %v10407_v5 = vadd.f32 %v11910_v2, %v11909_v47  ;;  %v10411_v48 = vadd.f32 %v11912_v17, %v11911_v36  ;;  %v11913_v10 = vld [vmem:[#allocation30_spill] sm:$0xff]  ;;  %v11914_v52 = vld [vmem:[#allocation84_spill] sm:$0xff]  ;;  %v11916_v49 = vld [vmem:[#allocation31_spill] sm:$0xff] }
 0x218   : > { %v7463_v41 = vpop.f32.mrf.mxu0  ;;  %7694 = vmatmul.mubr.msk.bf16.vlgmr.msra.gmra.mxu0 %vm476_vm0, %v11913_v10  ;;  %v10415_v59 = vrot.slane %v5102_v39, 5  ;;  %v5108_v28 = vrot.slane %v5106_v4, 4  ;;  %v6823_v47 = vcombine.low %v5009_v0, %v5019_v15  ;;  %v6824_v2 = vcombine.low %v5033_v33, %v5043_v40  ;;  %v6781_v17 = vld [vmem:[%s8014_s24 + $0x130] sm:$0xf]  ;;  %v6782_v33 = vld [vmem:[%s8014_s24 + $0x134] sm:$0x1] }
 0x219   : > { %11908 = vst [vmem:[#allocation82_spill] sm:$0xff] %v10400_v46  ;;  %v10418_v38 = vadd.f32 %v7463_v41, %v11914_v52  ;;  %v10420_v21 = vpop.f32.mrf.mxu1  ;;  %7697 = vmatprep.mubr.msk.bf16.mxu0 %vm476_vm0, %v11916_v49  ;;  %v5057_v36 = vsel %vm8656_vm5, %v5052_v32, %v10338_v8  ;;  %v5067_v39 = vsel %vm8656_vm5, %v5062_v42, %v5066_v34  ;;  %v5112_v4 = vshll.u32 %v6779_v27, 16  ;;  %v11919_v27 = vld [vmem:[#allocation85_spill] sm:$0xff]  ;;  %v11928_v46 = vld [vmem:[#allocation103_spill] sm:$0xff] }
 0x21a   : > { %v1745_v10 = vpop.f32.mrf.mxu0  ;;  %v5081_v41 = vsel %vm8656_vm5, %v5076_v11, %v10375_v45  ;;  %v5117_v52 = vshrl.u32 %v6780_v19, 16  ;;  %v5091_v8 = vsel %vm8656_vm5, %v5086_v54, %v5090_v1  ;;  %v5099_v15 = vor.u32 %v5098_v14, %v5095_v31  ;;  %v11920_v49 = vld [vmem:[#allocation101_spill] sm:$0xff]  ;;  %v6783_v1 = vld [vmem:[%s8014_s24 + $0x138] sm:$0xf] }
 0x21b   : > { %11915 = vst [vmem:[#allocation17_spill] sm:$0xff] %v10418_v38  ;;  %v10434_v61 = vadd.f32 %v1745_v10, %v11917_v57  ;;  %v10436_v0 = vpop.f32.mrf.mxu1  ;;  %v5120_v40 = vshll.u32 %v6780_v19, 16  ;;  %v5109_v34 = vor.u32 %v5108_v28, %v10415_v59  ;;  %v5126_v45 = vshll.u32 %v6781_v17, 16  ;;  %v11921_v10 = vld [vmem:[#allocation95_spill] sm:$0xff]  ;;  %v11931_v63 = vld [vmem:[#allocation25_spill] sm:$0xff] }
 0x21c   : > { %v7464_v32 = vpop.f32.mrf.mxu0  ;;  %v5119_v42 = vrot.slane %v5117_v52, 4  ;;  %v5130_v11 = vshrl.u32 %v6781_v17, 16  ;;  %v10444_v57 = vadd.f32 %v11920_v49, %v11919_v27  ;;  %v6825_v54 = vcombine.low %v5057_v36, %v5067_v39  ;;  %v6784_v27 = vld [vmem:[%s8014_s24 + $0x13c] sm:$0xf] }
 0x21d   : > { %11918 = vst [vmem:[#allocation99_spill] sm:$0xff] %v10434_v61  ;;  %v10447_v61 = vadd.f32 %v7464_v32, %v11921_v10  ;;  %v10449_v38 = vpop.f32.mrf.mxu1  ;;  %7796 = vmatmul.mubr.msk.bf16.gmra.mxu1 %vm476_vm0, %v6823_v47  ;;  %v5122_v19 = vrot.slane %v5120_v40, 5  ;;  %v6826_v14 = vcombine.low %v5081_v41, %v5091_v8  ;;  %v10454_v28 = vrot.slane %v5126_v45, 5  ;;  %v11924_v40 = vld [vmem:[#allocation32_spill] sm:$0xff] }
 0x21e   : > { %v1748_v31 = vpop.f32.mrf.mxu0  ;;  %7799 = vmatprep.mubr.msk.bf16.mxu1 %vm476_vm0, %v6824_v2  ;;  %v5132_v17 = vrot.slane %v5130_v11, 4  ;;  %v5136_v52 = vshll.u32 %v6782_v33, 16  ;;  %v5100_v10 = vrot.slane %v5099_v15, 4  ;;  %v5114_v47 = vrot.slane %v5112_v4, 5  ;;  %v11926_v11 = vld [vmem:[#allocation33_spill] sm:$0xff] }
 0x21f   : > { %11922 = vst [vmem:[#allocation79_spill] sm:$0xff] %v10447_v61  ;;  %v10458_v49 = vadd.f32 %v1748_v31, %v9760_v23  ;;  %v10460_v32 = vpop.f32.mrf.mxu1  ;;  %v5123_v36 = vor.u32 %v5122_v19, %v5119_v42  ;;  %v5110_v2 = vrot.slane %v5109_v34, 4  ;;  %v5141_v8 = vshrl.u32 %v6783_v1, 16  ;;  %v6785_v42 = vld [vmem:[%s8014_s24 + $0x140] sm:$0x1] }
 0x220   : > { %v7467_v39 = vpop.f32.mrf.mxu0  ;;  %7698 = vmatmul.mubr.msk.bf16.gmra.mxu0 %vm476_vm0, %v11924_v40  ;;  %v5133_v41 = vor.u32 %v5132_v17, %v10454_v28  ;;  %v5144_v33 = vshll.u32 %v6783_v1, 16  ;;  %v5138_v15 = vrot.slane %v5136_v52, 5  ;;  %v5150_v19 = vshll.u32 %v6784_v27, 16  ;;  %v6786_v61 = vld [vmem:[%s8014_s24 + $0x144] sm:$0xf]  ;;  %v11927_v1 = vld [vmem:[#allocation86_spill] sm:$0xff] }
 0x221   : > { %11923 = vst [vmem:[#allocation100_spill] sm:$0xff] %v10458_v49  ;;  %v10466_v45 = vadd.f32 %v7467_v39, %v9803_v24  ;;  %v10468_v23 = vpop.f32.mrf.mxu1  ;;  %7701 = vmatprep.mubr.msk.bf16.mxu0 %vm476_vm0, %v11926_v11  ;;  %v5124_v4 = vrot.slane %v5123_v36, 4  ;;  %v5143_v40 = vrot.slane %v5141_v8, 4  ;;  %v5154_v17 = vshrl.u32 %v6784_v27, 16  ;;  %v11929_v39 = vld [vmem:[#allocation128_spill] sm:$0xff] }
 0x222   : > { %v1761_v31 = vpop.f32.mrf.mxu0  ;;  %v5134_v34 = vrot.slane %v5133_v41, 4  ;;  %v5146_v49 = vrot.slane %v5144_v33, 5  ;;  %v1163_v24 = vadd.f32 %v11928_v46, %v11927_v1  ;;  %v10483_v52 = vrot.slane %v5150_v19, 5  ;;  %v11933_v11 = vld [vmem:[#allocation20_spill] sm:$0xff]  ;;  %v6787_v46 = vld [vmem:[%s8014_s24 + $0x148] sm:$0xf] }
 0x223   : > { %11925 = vst [vmem:[#allocation30_spill] sm:$0xff] %v10466_v45  ;;  %v11930_v45 = vld [vmem:[#allocation104_spill] sm:$0xff]  ;;  %v10479_v51 = vadd.f32 %v1761_v31, %v11931_v63  ;;  %v10481_v36 = vpop.f32.mrf.mxu1  ;;  %v10487_v41 = vadd.f32 %v11934_v37, %v11933_v11  ;;  %v5156_v33 = vrot.slane %v5154_v17, 4  ;;  %v5160_v62 = vshll.u32 %v6785_v42, 16  ;;  %v6788_v31 = vld [vmem:[%s8014_s24 + $0x14c] sm:$0x1] }
 0x224   : > { %v1174_v7 = vadd.f32 %v11930_v45, %v11929_v39  ;;  %v7468_v8 = vpop.f32.mrf.mxu0  ;;  %v5147_v27 = vor.u32 %v5146_v49, %v5143_v40  ;;  %v5105_v63 = vsel %vm8656_vm5, %v5100_v10, %v10415_v59  ;;  %v5115_v37 = vsel %vm8656_vm5, %v5110_v2, %v5114_v47  ;;  %v11937_v11 = vld [vmem:[#allocation34_spill] sm:$0xff] }
 0x225   : > { %11932 = vst [vmem:[#allocation84_spill] sm:$0xff] %v10479_v51  ;;  %v10491_v1 = vadd.f32 %v7468_v8, %v10407_v5  ;;  %v10493_v45 = vpop.f32.mrf.mxu1  ;;  %7800 = vmatmul.mubr.msk.bf16.gmra.mxu1 %vm476_vm0, %v6825_v54  ;;  %v5165_v19 = vshrl.u32 %v6786_v61, 16  ;;  %v5129_v5 = vsel %vm8656_vm5, %v5124_v4, %v10454_v28  ;;  %v5139_v42 = vsel %vm8656_vm5, %v5134_v34, %v5138_v15  ;;  %v11939_v8 = vld [vmem:[#allocation35_spill] sm:$0xff] }
 0x226   : > { %v1764_v49 = vpop.f32.mrf.mxu0  ;;  %7803 = vmatprep.mubr.msk.bf16.mxu1 %vm476_vm0, %v6826_v14  ;;  %v5157_v54 = vor.u32 %v5156_v33, %v10483_v52  ;;  %v5168_v40 = vshll.u32 %v6786_v61, 16  ;;  %v5148_v47 = vrot.slane %v5147_v27, 4  ;;  %v5174_v17 = vshll.u32 %v6787_v46, 16  ;;  %v6789_v14 = vld [vmem:[%s8014_s24 + $0x150] sm:$0xf] }
 0x227   : > { %11935 = vst [vmem:[#allocation31_spill] sm:$0xff] %v10491_v1  ;;  %v10510_v59 = vadd.f32 %v1764_v49, %v10411_v48  ;;  %v10512_v10 = vpop.f32.mrf.mxu1  ;;  %v5167_v2 = vrot.slane %v5165_v19, 4  ;;  %v6827_v28 = vcombine.low %v5105_v63, %v5115_v37  ;;  %v5162_v4 = vrot.slane %v5160_v62, 5  ;;  %v6790_v63 = vld [vmem:[%s8014_s24 + $0x154] sm:$0xf]  ;;  %v11940_v37 = vld [vmem:[#allocation130_spill] sm:$0xff] }
 0x228   : > { %v7471_v39 = vpop.f32.mrf.mxu0  ;;  %7702 = vmatmul.mubr.msk.bf16.gmra.mxu0 %vm476_vm0, %v11937_v11  ;;  %v5170_v15 = vrot.slane %v5168_v40, 5  ;;  %v5178_v34 = vshrl.u32 %v6787_v46, 16  ;;  %v5158_v27 = vrot.slane %v5157_v54, 4  ;;  %v5176_v33 = vrot.slane %v5174_v17, 5  ;;  %v11941_v46 = vld [vmem:[#allocation106_spill] sm:$0xff] }
 0x229   : > { %11936 = vst [vmem:[#allocation89_spill] sm:$0xff] %v10510_v59  ;;  %v10518_v61 = vadd.f32 %v7471_v39, %v10444_v57  ;;  %v10520_v48 = vpop.f32.mrf.mxu1  ;;  %7705 = vmatprep.mubr.msk.bf16.mxu0 %vm476_vm0, %v11939_v8  ;;  %v5184_v19 = vshll.u32 %v6788_v31, 16  ;;  %v6828_v59 = vcombine.low %v5129_v5, %v5139_v42  ;;  %v5189_v62 = vshrl.u32 %v6789_v14, 16  ;;  %v6791_v31 = vld [vmem:[%s8014_s24 + $0x158] sm:$0x1] }
 0x22a   : > { %v1777_v49 = vpop.f32.mrf.mxu0  ;;  %v5171_v1 = vor.u32 %v5170_v15, %v5167_v2  ;;  %v5180_v11 = vrot.slane %v5178_v34, 4  ;;  %v1187_v40 = vadd.f32 %v11941_v46, %v11940_v37  ;;  %v5153_v54 = vsel %vm8656_vm5, %v5148_v47, %v10483_v52  ;;  %v6792_v52 = vld [vmem:[%s8014_s24 + $0x15c] sm:$0xf] }
 0x22b   : > { %11938 = vst [vmem:[#allocation85_spill] sm:$0xff] %v10518_v61  ;;  %v10527_v57 = vadd.f32 %v1777_v49, %v1163_v24  ;;  %v10529_v39 = vpop.f32.mrf.mxu1  ;;  %v5186_v17 = vrot.slane %v5184_v19, 5  ;;  %v5191_v2 = vrot.slane %v5189_v62, 4  ;;  %v5192_v15 = vshll.u32 %v6789_v14, 16  ;;  %v11945_v62 = vld [vmem:[#allocation107_spill] sm:$0xff] }
 0x22c   : > { %v7472_v8 = vpop.f32.mrf.mxu0  ;;  %v5172_v5 = vrot.slane %v5171_v1, 4  ;;  %v5181_v42 = vor.u32 %v5180_v11, %v5176_v33  ;;  %v5163_v24 = vsel %vm8656_vm5, %v5158_v27, %v5162_v4  ;;  %v5198_v49 = vshll.u32 %v6790_v63, 16  ;;  %v11944_v11 = vld [vmem:[#allocation102_spill] sm:$0xff] }
 0x22d   : > { %11942 = vst [vmem:[#allocation101_spill] sm:$0xff] %v10527_v57  ;;  %v10535_v34 = vadd.f32 %v7472_v8, %v1174_v7  ;;  %v10537_v61 = vpop.f32.mrf.mxu1  ;;  %7804 = vmatmul.mubr.msk.bf16.gmra.mxu1 %vm476_vm0, %v6827_v28  ;;  %v5202_v37 = vshrl.u32 %v6790_v63, 16  ;;  %v5194_v7 = vrot.slane %v5192_v15, 5  ;;  %v5208_v19 = vshll.u32 %v6791_v31, 16  ;;  %v6793_v63 = vld [vmem:[%s8014_s24 + $0x160] sm:$0xf] }
 0x22e   : > { %v1780_v47 = vpop.f32.mrf.mxu0  ;;  %7807 = vmatprep.mubr.msk.bf16.mxu1 %vm476_vm0, %v6828_v59  ;;  %v5177_v1 = vsel %vm8656_vm5, %v5172_v5, %v5176_v33  ;;  %v5182_v14 = vrot.slane %v5181_v42, 4  ;;  %v1179_v46 = vadd.f32 %v11945_v62, %v11944_v11  ;;  %v5200_v4 = vrot.slane %v5198_v49, 5  ;;  %v11947_v59 = vld [vmem:[#allocation36_spill] sm:$0xff]  ;;  %v6794_v62 = vld [vmem:[%s8014_s24 + $0x164] sm:$0x1] }
 0x22f   : > { %11943 = vst [vmem:[#allocation95_spill] sm:$0xff] %v10535_v34  ;;  %v10549_v28 = vadd.f32 %v1780_v47, %v10487_v41  ;;  %v10551_v8 = vpop.f32.mrf.mxu1  ;;  %v5204_v27 = vrot.slane %v5202_v37, 4  ;;  %v6829_v33 = vcombine.low %v5153_v54, %v5163_v24  ;;  %v5195_v5 = vor.u32 %v5194_v7, %v5191_v2  ;;  %v11949_v47 = vld [vmem:[#allocation37_spill] sm:$0xff]  ;;  %v11951_v2 = vld [vmem:[#allocation110_spill] sm:$0xff] }
 0x230   : > { %v7475_v34 = vpop.f32.mrf.mxu0  ;;  %7706 = vmatmul.mubr.msk.bf16.gmra.mxu0 %vm476_vm0, %v11947_v59  ;;  %v5187_v31 = vsel %vm8656_vm5, %v5182_v14, %v5186_v17  ;;  %v5213_v42 = vshrl.u32 %v6792_v52, 16  ;;  %v5210_v11 = vrot.slane %v5208_v19, 5  ;;  %v5216_v24 = vshll.u32 %v6792_v52, 16  ;;  %v11950_v17 = vld [vmem:[#allocation132_spill] sm:$0xff]  ;;  %v11956_v52 = vld [vmem:[#allocation134_spill] sm:$0xff] }
 0x231   : > { %11946 = vst [vmem:[#allocation32_spill] sm:$0xff] %v10549_v28  ;;  %v10558_v15 = vadd.f32 %v7475_v34, %v1187_v40  ;;  %v10560_v41 = vpop.f32.mrf.mxu1  ;;  %7709 = vmatprep.mubr.msk.bf16.mxu0 %vm476_vm0, %v11949_v47  ;;  %v6830_v49 = vcombine.low %v5177_v1, %v5187_v31  ;;  %v5205_v37 = vor.u32 %v5204_v27, %v5200_v4  ;;  %v5196_v59 = vrot.slane %v5195_v5, 4  ;;  %v6795_v47 = vld [vmem:[%s8014_s24 + $0x168] sm:$0xf]  ;;  %v11955_v27 = vld [vmem:[#allocation111_spill] sm:$0xff] }
 0x232   : > { %v1793_v28 = vpop.f32.mrf.mxu0  ;;  %v5215_v54 = vrot.slane %v5213_v42, 4  ;;  %v5222_v57 = vshll.u32 %v6793_v63, 16  ;;  %v1190_v14 = vadd.f32 %v11951_v2, %v11950_v17  ;;  %v11954_v1 = vld [vmem:[#allocation22_spill] sm:$0xff]  ;;  %v5218_v51 = vrot.slane %v5216_v24, 5  ;;  %v11959_v17 = vld [vmem:[#allocation113_spill] sm:$0xff] }
 0x233   : > { %11948 = vst [vmem:[#allocation33_spill] sm:$0xff] %v10558_v15  ;;  %v10567_v40 = vadd.f32 %v1793_v28, %v1179_v46  ;;  %v10569_v34 = vpop.f32.mrf.mxu1  ;;  %v5206_v7 = vrot.slane %v5205_v37, 4  ;;  %v5226_v15 = vshrl.u32 %v6793_v63, 16  ;;  %v1182_v19 = vadd.f32 %v11955_v27, %v11954_v1  ;;  %v6796_v37 = vld [vmem:[%s8014_s24 + $0x16c] sm:$0xf] }
 0x234   : > { %11953 = vst [vmem:[#allocation103_spill] sm:$0xff] %v10569_v34  ;;  %v7476_v31 = vpop.f32.mrf.mxu0  ;;  %v5224_v5 = vrot.slane %v5222_v57, 5  ;;  %v5232_v42 = vshll.u32 %v6794_v62, 16  ;;  %v1203_v50 = vadd.f32 %v11957_v55, %v11956_v52  ;;  %v1195_v46 = vadd.f32 %v11959_v17, %v11958_v29  ;;  %v11964_v17 = vld [vmem:[#allocation38_spill] sm:$0xff] }
 0x235   : > { %11952 = vst [vmem:[#allocation86_spill] sm:$0xff] %v10567_v40  ;;  %v10578_v28 = vadd.f32 %v7476_v31, %v1190_v14  ;;  %v10580_v2 = vpop.f32.mrf.mxu1  ;;  %7808 = vmatmul.mubr.msk.bf16.gmra.mxu1 %vm476_vm0, %v6829_v33  ;;  %v5228_v63 = vrot.slane %v5226_v15, 4  ;;  %v5201_v57 = vsel %vm8656_vm5, %v5196_v59, %v5200_v4  ;;  %v5211_v55 = vsel %vm8656_vm5, %v5206_v7, %v5210_v11  ;;  %v6797_v15 = vld [vmem:[%s8014_s24 + $0x170] sm:$0x1] }
 0x236   : > { %11961 = vst [vmem:[#allocation104_spill] sm:$0xff] %v10580_v2  ;;  %v1796_v1 = vpop.f32.mrf.mxu0  ;;  %7811 = vmatprep.mubr.msk.bf16.mxu1 %vm476_vm0, %v6830_v49  ;;  %v5219_v62 = vor.u32 %v5218_v51, %v5215_v54  ;;  %v5237_v29 = vshrl.u32 %v6795_v47, 16  ;;  %v5234_v33 = vrot.slane %v5232_v42, 5  ;;  %v5240_v31 = vshll.u32 %v6795_v47, 16  ;;  %v11967_v54 = vld [vmem:[#allocation39_spill] sm:$0xff] }
 0x237   : > { %11960 = vst [vmem:[#allocation128_spill] sm:$0xff] %v10578_v28  ;;  %v10589_v24 = vadd.f32 %v1796_v1, %v1182_v19  ;;  %v10591_v14 = vpop.f32.mrf.mxu1  ;;  %v5229_v27 = vor.u32 %v5228_v63, %v5224_v5  ;;  %v5246_v59 = vshll.u32 %v6796_v37, 16  ;;  %v5250_v28 = vshrl.u32 %v6796_v37, 16  ;;  %v6798_v47 = vld [vmem:[%s8014_s24 + $0x174] sm:$0xf] }
 0x238   : > { %11963 = vst [vmem:[#allocation20_spill] sm:$0xff] %v10591_v14  ;;  %v7479_v52 = vpop.f32.mrf.mxu0  ;;  %7710 = vmatmul.mubr.msk.bf16.gmra.mxu0 %vm476_vm0, %v11964_v17  ;;  %v5220_v49 = vrot.slane %v5219_v62, 4  ;;  %v5239_v4 = vrot.slane %v5237_v29, 4  ;;  %v6831_v7 = vcombine.low %v5201_v57, %v5211_v55  ;;  %v5242_v42 = vrot.slane %v5240_v31, 5  ;;  %v11968_v37 = vld [vmem:[#allocation135_spill] sm:$0xff] }
 0x239   : > { %11962 = vst [vmem:[#allocation25_spill] sm:$0xff] %v10589_v24  ;;  %v10596_v11 = vadd.f32 %v7479_v52, %v1203_v50  ;;  %v10598_v51 = vpop.f32.mrf.mxu1  ;;  %7713 = vmatprep.mubr.msk.bf16.mxu0 %vm476_vm0, %v11967_v54  ;;  %v5230_v19 = vrot.slane %v5229_v27, 4  ;;  %v5248_v62 = vrot.slane %v5246_v59, 5  ;;  %v5252_v29 = vrot.slane %v5250_v28, 4  ;;  %v11969_v50 = vld [vmem:[#allocation114_spill] sm:$0xff]  ;;  %v11972_v28 = vld [vmem:[#allocation24_spill] sm:$0xff] }
 0x23a   : > { %11966 = vst [vmem:[#allocation34_spill] sm:$0xff] %v10598_v51  ;;  %v1809_v63 = vpop.f32.mrf.mxu0  ;;  %v5225_v1 = vsel %vm8656_vm5, %v5220_v49, %v5224_v5  ;;  %v5256_v17 = vshll.u32 %v6797_v15, 16  ;;  %v1206_v52 = vadd.f32 %v11969_v50, %v11968_v37  ;;  %v5243_v55 = vor.u32 %v5242_v42, %v5239_v4  ;;  %v6799_v27 = vld [vmem:[%s8014_s24 + $0x178] sm:$0xf] }
 0x23b   : > { %11965 = vst [vmem:[#allocation105_spill] sm:$0xff] %v10596_v11  ;;  %v10607_v11 = vadd.f32 %v1809_v63, %v1195_v46  ;;  %v10609_v24 = vpop.f32.mrf.mxu1  ;;  %v5235_v57 = vsel %vm8656_vm5, %v5230_v19, %v5234_v33  ;;  %v5253_v40 = vor.u32 %v5252_v29, %v5248_v62  ;;  %v5261_v49 = vshrl.u32 %v6798_v47, 16  ;;  %v11973_v15 = vld [vmem:[#allocation115_spill] sm:$0xff]  ;;  %v6800_v63 = vld [vmem:[%s8014_s24 + $0x17c] sm:$0x1] }
 0x23c   : > { %11971 = vst [vmem:[#allocation130_spill] sm:$0xff] %v10609_v24  ;;  %v7480_v31 = vpop.f32.mrf.mxu0  ;;  %v6832_v54 = vcombine.low %v5225_v1, %v5235_v57  ;;  %v5258_v5 = vrot.slane %v5256_v17, 5  ;;  %v1198_v59 = vadd.f32 %v11973_v15, %v11972_v28  ;;  %v5244_v46 = vrot.slane %v5243_v55, 4  ;;  %v11976_v17 = vld [vmem:[#allocation97_spill] sm:$0xff]  ;;  %v11977_v50 = vld [vmem:[#allocation116_spill] sm:$0xff] }
 0x23d   : > { %11970 = vst [vmem:[#allocation35_spill] sm:$0xff] %v10607_v11  ;;  %v10616_v35 = vadd.f32 %v7480_v31, %v1206_v52  ;;  %v10618_v37 = vpop.f32.mrf.mxu1  ;;  %7812 = vmatmul.mubr.msk.bf16.gmra.mxu1 %vm476_vm0, %v6831_v7  ;;  %v5264_v33 = vshll.u32 %v6798_v47, 16  ;;  %v5254_v19 = vrot.slane %v5253_v40, 4  ;;  %v5263_v42 = vrot.slane %v5261_v49, 4  ;;  %v6801_v47 = vld [vmem:[%s8014_s24 + $0x180] sm:$0xf] }
 0x23e   : > { %11975 = vst [vmem:[#allocation102_spill] sm:$0xff] %v10618_v37  ;;  %v1812_v4 = vpop.f32.mrf.mxu0  ;;  %7815 = vmatprep.mubr.msk.bf16.mxu1 %vm476_vm0, %v6832_v54  ;;  %v5270_v1 = vshll.u32 %v6799_v27, 16  ;;  %v5274_v29 = vshrl.u32 %v6799_v27, 16  ;;  %v1219_v52 = vadd.f32 %v11977_v50, %v11976_v17  ;;  %v5249_v7 = vsel %vm8656_vm5, %v5244_v46, %v5248_v62  ;;  %v11980_v15 = vld [vmem:[#allocation40_spill] sm:$0xff]  ;;  %v6802_v17 = vld [vmem:[%s8014_s24 + $0x184] sm:$0xf] }
 0x23f   : > { %11974 = vst [vmem:[#allocation106_spill] sm:$0xff] %v10616_v35  ;;  %v10625_v57 = vadd.f32 %v1812_v4, %v1198_v59  ;;  %v10627_v31 = vpop.f32.mrf.mxu1  ;;  %v5266_v55 = vrot.slane %v5264_v33, 5  ;;  %v5259_v40 = vsel %vm8656_vm5, %v5254_v19, %v5258_v5  ;;  %v5280_v49 = vshll.u32 %v6800_v63, 16  ;;  %v11981_v59 = vld [vmem:[#allocation138_spill] sm:$0xff]  ;;  %v11982_v4 = vld [vmem:[#allocation117_spill] sm:$0xff]  ;;  %v11986_v63 = vld [vmem:[#allocation140_spill] sm:$0xff] }
 0x240   : > { %11979 = vst [vmem:[#allocation36_spill] sm:$0xff] %v10627_v31  ;;  %v7483_v28 = vpop.f32.mrf.mxu0  ;;  %7714 = vmatmul.mubr.msk.bf16.gmra.mxu0 %vm476_vm0, %v11980_v15  ;;  %v5272_v27 = vrot.slane %v5270_v1, 5  ;;  %v5276_v54 = vrot.slane %v5274_v29, 4  ;;  %v1211_v50 = vadd.f32 %v11982_v4, %v11981_v59  ;;  %v11985_v46 = vld [vmem:[#allocation41_spill] sm:$0xff]  ;;  %v6833_v33 = vcombine.low %v5249_v7, %v5259_v40  ;;  %v11987_v29 = vld [vmem:[#allocation118_spill] sm:$0xff]  ;;  %v11991_v40 = vld [vmem:[#allocation120_spill] sm:$0xff] }
 0x241   : > { %11978 = vst [vmem:[#allocation107_spill] sm:$0xff] %v10625_v57  ;;  %v10639_v57 = vadd.f32 %v7483_v28, %v1219_v52  ;;  %v10641_v62 = vpop.f32.mrf.mxu1  ;;  %7717 = vmatprep.mubr.msk.bf16.mxu0 %vm476_vm0, %v11985_v46  ;;  %v5267_v15 = vor.u32 %v5266_v55, %v5263_v42  ;;  %v5282_v5 = vrot.slane %v5280_v49, 5  ;;  %v5285_v19 = vshrl.u32 %v6801_v47, 16  ;;  %v6803_v28 = vld [vmem:[%s8014_s24 + $0x188] sm:$0x1]  ;;  %v11990_v55 = vld [vmem:[#allocation26_spill] sm:$0xff] }
 0x242   : > { %11984 = vst [vmem:[#allocation132_spill] sm:$0xff] %v10641_v62  ;;  %v1825_v35 = vpop.f32.mrf.mxu0  ;;  %v5277_v11 = vor.u32 %v5276_v54, %v5272_v27  ;;  %v5288_v1 = vshll.u32 %v6801_v47, 16  ;;  %v1222_v20 = vadd.f32 %v11987_v29, %v11986_v63  ;;  %v5294_v4 = vshll.u32 %v6802_v17, 16  ;;  %v11994_v63 = vld [vmem:[#allocation142_spill] sm:$0xff] }
 0x243   : > { %11983 = vst [vmem:[#allocation37_spill] sm:$0xff] %v10639_v57  ;;  %v10647_v31 = vadd.f32 %v1825_v35, %v1211_v50  ;;  %v10649_v59 = vpop.f32.mrf.mxu1  ;;  %v5268_v52 = vrot.slane %v5267_v15, 4  ;;  %v5287_v46 = vrot.slane %v5285_v19, 4  ;;  %v5298_v42 = vshrl.u32 %v6802_v17, 16  ;;  %v11995_v29 = vld [vmem:[#allocation6_spill] sm:$0xff] }
 0x244   : > { %11989 = vst [vmem:[#allocation22_spill] sm:$0xff] %v10649_v59  ;;  %v7484_v57 = vpop.f32.mrf.mxu0  ;;  %v5278_v62 = vrot.slane %v5277_v11, 4  ;;  %v5290_v7 = vrot.slane %v5288_v1, 5  ;;  %v1214_v54 = vadd.f32 %v11991_v40, %v11990_v55  ;;  %v5296_v50 = vrot.slane %v5294_v4, 5 }
 0x245   : > { %11988 = vst [vmem:[#allocation110_spill] sm:$0xff] %v10647_v31  ;;  %v10654_v49 = vadd.f32 %v7484_v57, %v1222_v20  ;;  %v10656_v47 = vpop.f32.mrf.mxu1  ;;  %7816 = vmatmul.mubr.msk.bf16.gmra.mxu1 %vm476_vm0, %v6833_v33  ;;  %v5273_v35 = vsel %vm8656_vm5, %v5268_v52, %v5272_v27  ;;  %v5300_v1 = vrot.slane %v5298_v42, 4  ;;  %v5304_v17 = vshll.u32 %v6803_v28, 16  ;;  %v11999_v31 = vld [vmem:[#allocation144_spill] sm:$0xff] }
 0x246   : > { %11993 = vst [vmem:[#allocation134_spill] sm:$0xff] %v10656_v47  ;;  %v1828_v15 = vpop.f32.mrf.mxu0  ;;  %v5283_v11 = vsel %vm8656_vm5, %v5278_v62, %v5282_v5  ;;  %v5291_v19 = vor.u32 %v5290_v7, %v5287_v46  ;;  %v1235_v55 = vadd.f32 %v11995_v29, %v11994_v63  ;;  %v12000_v62 = vld [vmem:[#allocation121_spill] sm:$0xff] }
 0x247   : > { %11992 = vst [vmem:[#allocation111_spill] sm:$0xff] %v10654_v49  ;;  %v10665_v20 = vadd.f32 %v1828_v15, %v1214_v54  ;;  %v10667_v57 = vpop.f32.mrf.mxu1  ;;  %v6834_v40 = vcombine.low %v5273_v35, %v5283_v11  ;;  %v11998_v49 = vld [vmem:[#allocation43_spill] sm:$0xff]  ;;  %v5301_v52 = vor.u32 %v5300_v1, %v5296_v50  ;;  %v5306_v4 = vrot.slane %v5304_v17, 5  ;;  %v12003_v7 = vld [vmem:[#allocation45_spill] sm:$0xff]  ;;  %v12004_v35 = vld [vmem:[#allocation8_spill] sm:$0xff] }
 0x248   : > { %11997 = vst [vmem:[#allocation109_spill] sm:$0xff] %v10667_v57  ;;  %v7487_v33 = vpop.f32.mrf.mxu0  ;;  %7718 = vmatmul.mubr.msk.bf16.gmra.mxu0 %vm476_vm0, %v11998_v49  ;;  %v5292_v27 = vrot.slane %v5291_v19, 4  ;;  %v1227_v5 = vadd.f32 %v12000_v62, %v11999_v31  ;;  %v1238_v15 = vadd.f32 %v12004_v35, %v9900_v53  ;;  %v12007_v17 = vld [vmem:[#allocation54_spill] sm:$0xff] }
 0x249   : > { %11996 = vst [vmem:[#allocation112_spill] sm:$0xff] %v10665_v20  ;;  %v10673_v46 = vadd.f32 %v7487_v33, %v1235_v55  ;;  %v10675_v28 = vpop.f32.mrf.mxu1  ;;  %7721 = vmatprep.mubr.msk.bf16.mxu0 %vm476_vm0, %v12003_v7  ;;  %7819 = vmatprep.mubr.msk.bf16.mxu1 %vm476_vm0, %v6834_v40  ;;  %v5302_v49 = vrot.slane %v5301_v52, 4  ;;  %v1230_v63 = vadd.f32 %v12007_v17, %v9908_v6  ;;  %v12010_v33 = vld [vmem:[#allocation10_spill] sm:$0xff]  ;;  %v12014_v6 = vld [vmem:[#allocation60_spill] sm:$0xff] }
 0x24a   : > { %12002 = vst [vmem:[#allocation38_spill] sm:$0xff] %v10675_v28  ;;  %v1841_v42 = vpop.f32.mrf.mxu0  ;;  %v5297_v54 = vsel %vm8656_vm5, %v5292_v27, %v5296_v50  ;;  %v1251_v53 = vadd.f32 %v12010_v33, %v9920_v26  ;;  %v1243_v62 = vadd.f32 %v12014_v6, %v9930_v12  ;;  %v12022_v17 = vld [vmem:[#allocation126_spill] sm:$0xff]  ;;  %v12029_v6 = vld [vmem:[#allocation57_spill] sm:$0xff] }
 0x24b   : > { %12001 = vst [vmem:[#allocation113_spill] sm:$0xff] %v10673_v46  ;;  %v10684_v11 = vadd.f32 %v1841_v42, %v1227_v5  ;;  %v10686_v31 = vpop.f32.mrf.mxu1  ;;  %v5307_v1 = vsel %vm8656_vm5, %v5302_v49, %v5306_v4  ;;  %v12013_v4 = vld [vmem:[#allocation49_spill] sm:$0xff]  ;;  %v12017_v42 = vld [vmem:[#allocation51_spill] sm:$0xff] }
 0x24c   : > { %12006 = vst [vmem:[#allocation135_spill] sm:$0xff] %v10686_v31  ;;  %v7488_v19 = vpop.f32.mrf.mxu0  ;;  %v6835_v50 = vcombine.low %v5297_v54, %v5307_v1  ;;  %v12018_v54 = vld [vmem:[#allocation12_spill] sm:$0xff]  ;;  %v12021_v1 = vld [vmem:[#allocation150_spill] sm:$0xff] }
 0x24d   : > { %12005 = vst [vmem:[#allocation39_spill] sm:$0xff] %v10684_v11  ;;  %v10692_v29 = vadd.f32 %v7488_v19, %v1238_v15  ;;  %v10694_v55 = vpop.f32.mrf.mxu1  ;;  %v1254_v49 = vadd.f32 %v12018_v54, %v9941_v16  ;;  %v12027_v16 = vld [vmem:[#allocation55_spill] sm:$0xff] }
 0x24e   : > { %12009 = vst [vmem:[#allocation24_spill] sm:$0xff] %v10694_v55  ;;  %v1844_v40 = vpop.f32.mrf.mxu0  ;;  %7820 = vmatmul.mubr.msk.bf16.gmra.mxu1 %vm476_vm0, %v6835_v50 }
 0x24f   : > { %12008 = vst [vmem:[#allocation114_spill] sm:$0xff] %v10692_v29  ;;  %v10698_v27 = vadd.f32 %v1844_v40, %v1230_v63  ;;  %v10700_v52 = vpop.f32.mrf.mxu1  ;;  %v1246_v63 = vadd.f32 %v12022_v17, %v12021_v1  ;;  %v12033_v17 = vld [vmem:[#allocation61_spill] sm:$0xff] }
 0x250   : > { %12012 = vst [vmem:[#allocation97_spill] sm:$0xff] %v10700_v52  ;;  %v7491_v25 = vpop.f32.mrf.mxu0  ;;  %7722 = vmatmul.mubr.msk.bf16.gmra.mxu0 %vm476_vm0, %v12013_v4 }
 0x251   : > { %12011 = vst [vmem:[#allocation115_spill] sm:$0xff] %v10698_v27  ;;  %v10707_v5 = vadd.f32 %v7491_v25, %v1251_v53  ;;  %v10709_v7 = vpop.f32.mrf.mxu1  ;;  %7725 = vmatprep.mubr.msk.bf16.mxu0 %vm476_vm0, %v12017_v42 }
 0x252   : > { %12016 = vst [vmem:[#allocation40_spill] sm:$0xff] %v10709_v7  ;;  %v1857_v26 = vpop.f32.mrf.mxu0 }
 0x253   : > { %12015 = vst [vmem:[#allocation116_spill] sm:$0xff] %v10707_v5  ;;  %v10715_v35 = vadd.f32 %v1857_v26, %v1243_v62  ;;  %v10717_v15 = vpop.f32.mrf.mxu1 }
 0x254   : > { %12020 = vst [vmem:[#allocation117_spill] sm:$0xff] %v10717_v15  ;;  %v7492_v19 = vpop.f32.mrf.mxu0 }
 0x255   : > { %12019 = vst [vmem:[#allocation138_spill] sm:$0xff] %v10715_v35  ;;  %v10721_v12 = vadd.f32 %v7492_v19, %v1254_v49  ;;  %v10723_v50 = vpop.f32.mrf.mxu1 }
 0x256   : > { %12024 = vst [vmem:[#allocation140_spill] sm:$0xff] %v10723_v50  ;;  %v1860_v40 = vpop.f32.mrf.mxu0 }
 0x257   : > { %12023 = vst [vmem:[#allocation41_spill] sm:$0xff] %v10721_v12  ;;  %v10725_v33 = vadd.f32 %v1860_v40, %v1246_v63  ;;  %v10727_v53 = vpop.f32.mrf.mxu1  ;;  %v12035_v40 = vld [vmem:[#allocation63_spill] sm:$0xff] }
 0x258   : > { %12026 = vst [vmem:[#allocation26_spill] sm:$0xff] %v10727_v53  ;;  %v10729_v25 = vpop.f32.mrf.mxu0  ;;  %7726 = vmatmul.mubr.msk.bf16.gmra.mxu0 %vm476_vm0, %v12027_v16 }
 0x259   : > { %12025 = vst [vmem:[#allocation118_spill] sm:$0xff] %v10725_v33  ;;  %v10733_v4 = vpop.f32.mrf.mxu1  ;;  %7729 = vmatprep.mubr.msk.bf16.mxu0 %vm476_vm0, %v12029_v6 }
 0x25a   : > { %12028 = vst [vmem:[#allocation120_spill] sm:$0xff] %v10733_v4  ;;  %v10737_v62 = vpop.f32.mrf.mxu0 }
 0x25b   : > { %v10739_v42 = vpop.f32.mrf.mxu1 }
 0x25c   : > { %12030 = vst [vmem:[#allocation142_spill] sm:$0xff] %v10739_v42  ;;  %v10741_v26 = vpop.f32.mrf.mxu0 }
 0x25d   : > { %v10743_v54 = vpop.f32.mrf.mxu1 }
 0x25e   : > { %12031 = vst [vmem:[#allocation6_spill] sm:$0xff] %v10743_v54  ;;  %v10745_v49 = vpop.f32.mrf.mxu0 }
 0x25f   : > { %v10747_v19 = vpop.f32.mrf.mxu1 }
 0x260   : > { %12032 = vst [vmem:[#allocation43_spill] sm:$0xff] %v10747_v19  ;;  %v10749_v1 = vpop.f32.mrf.mxu0  ;;  %7730 = vmatmul.mubr.msk.bf16.gmra.mxu0 %vm476_vm0, %v12033_v17  ;;  %v12039_v17 = vld [vmem:[#allocation67_spill] sm:$0xff] }
 0x261   : > { %v10753_v63 = vpop.f32.mrf.mxu1  ;;  %7733 = vmatprep.mubr.msk.bf16.mxu0 %vm476_vm0, %v12035_v40  ;;  %v12041_v40 = vld [vmem:[#allocation69_spill] sm:$0xff] }
 0x262   : > { %12034 = vst [vmem:[#allocation144_spill] sm:$0xff] %v10753_v63  ;;  %v10757_v16 = vpop.f32.mrf.mxu0 }
 0x263   : > { %v10759_v6 = vpop.f32.mrf.mxu1 }
 0x264   : > { %12036 = vst [vmem:[#allocation121_spill] sm:$0xff] %v10759_v6  ;;  %v10761_v33 = vpop.f32.mrf.mxu0 }
 0x265   : > { %v10763_v12 = vpop.f32.mrf.mxu1 }
 0x266   : > { %12037 = vst [vmem:[#allocation45_spill] sm:$0xff] %v10763_v12  ;;  %v10765_v35 = vpop.f32.mrf.mxu0 }
 0x267   : > { %v10767_v5 = vpop.f32.mrf.mxu1 }
 0x268   : > { %12038 = vst [vmem:[#allocation8_spill] sm:$0xff] %v10767_v5  ;;  %v10769_v27 = vpop.f32.mrf.mxu0  ;;  %7734 = vmatmul.mubr.msk.bf16.gmra.mxu0 %vm476_vm0, %v12039_v17  ;;  %v12045_v17 = vld [vmem:[#allocation73_spill] sm:$0xff] }
 0x269   : > { %v10773_v29 = vpop.f32.mrf.mxu1  ;;  %7737 = vmatprep.mubr.msk.bf16.mxu0 %vm476_vm0, %v12041_v40  ;;  %v12047_v40 = vld [vmem:[#allocation75_spill] sm:$0xff] }
 0x26a   : > { %12040 = vst [vmem:[#allocation54_spill] sm:$0xff] %v10773_v29  ;;  %v10777_v11 = vpop.f32.mrf.mxu0 }
 0x26b   : > { %v10779_v46 = vpop.f32.mrf.mxu1 }
 0x26c   : > { %12042 = vst [vmem:[#allocation10_spill] sm:$0xff] %v10779_v46  ;;  %v10781_v20 = vpop.f32.mrf.mxu0 }
 0x26d   : > { %v10783_v12 = vpop.f32.mrf.mxu1 }
 0x26e   : > { %12043 = vst [vmem:[#allocation49_spill] sm:$0xff] %v10783_v12  ;;  %v10785_v6 = vpop.f32.mrf.mxu0 }
 0x26f   : > { %v10787_v5 = vpop.f32.mrf.mxu1 }
 0x270   : > { %12044 = vst [vmem:[#allocation60_spill] sm:$0xff] %v10787_v5  ;;  %v10789_v63 = vpop.f32.mrf.mxu0  ;;  %7738 = vmatmul.mubr.msk.bf16.gmra.mxu0 %vm476_vm0, %v12045_v17  ;;  %v12052_v17 = vld [vmem:[#allocation81_spill] sm:$0xff] }
 0x271   : > { %v10793_v29 = vpop.f32.mrf.mxu1  ;;  %7741 = vmatprep.mubr.msk.bf16.mxu0 %vm476_vm0, %v12047_v40  ;;  %v12054_v40 = vld [vmem:[#allocation83_spill] sm:$0xff] }
 0x272   : > { %12046 = vst [vmem:[#allocation51_spill] sm:$0xff] %v10793_v29  ;;  %v10797_v19 = vpop.f32.mrf.mxu0 }
 0x273   : > { %v10799_v46 = vpop.f32.mrf.mxu1 }
 0x274   : > { %12048 = vst [vmem:[#allocation12_spill] sm:$0xff] %v10799_v46  ;;  %v10801_v54 = vpop.f32.mrf.mxu0 }
 0x275   : > { %v10803_v12 = vpop.f32.mrf.mxu1 }
 0x276   : > { %12049 = vst [vmem:[#allocation150_spill] sm:$0xff] %v10803_v12  ;;  %v10805_v42 = vpop.f32.mrf.mxu0 }
 0x277   : > { %v10807_v5 = vpop.f32.mrf.mxu1 }
 0x278   : > { %12050 = vst [vmem:[#allocation126_spill] sm:$0xff] %v10807_v5  ;;  %v10809_v4 = vpop.f32.mrf.mxu0  ;;  %7742 = vmatmul.mubr.msk.bf16.gmra.mxu0 %vm476_vm0, %v12052_v17  ;;  %v12062_v17 = vld [vmem:[#allocation87_spill] sm:$0xff] }
 0x279   : > { %12051 = vst [vmem:[#allocation55_spill] sm:$0xff] %v10809_v4  ;;  %v10813_v29 = vpop.f32.mrf.mxu1  ;;  %7745 = vmatprep.mubr.msk.bf16.mxu0 %vm476_vm0, %v12054_v40  ;;  %v12064_v40 = vld [vmem:[#allocation88_spill] sm:$0xff]  ;;  %v12140_v4 = vld [vmem:[#allocation127_spill] sm:$0xff] }
 0x27a   : > { %12053 = vst [vmem:[#allocation57_spill] sm:$0xff] %v10813_v29  ;;  %v10817_v53 = vpop.f32.mrf.mxu0 }
 0x27b   : > { %12055 = vst [vmem:[#allocation61_spill] sm:$0xff] %v10817_v53  ;;  %v10819_v46 = vpop.f32.mrf.mxu1 }
 0x27c   : > { %12056 = vst [vmem:[#allocation63_spill] sm:$0xff] %v10819_v46  ;;  %v10821_v50 = vpop.f32.mrf.mxu0 }
 0x27d   : > { %12057 = vst [vmem:[#allocation67_spill] sm:$0xff] %v10821_v50  ;;  %v10823_v12 = vpop.f32.mrf.mxu1 }
 0x27e   : > { %12058 = vst [vmem:[#allocation69_spill] sm:$0xff] %v10823_v12  ;;  %v10825_v15 = vpop.f32.mrf.mxu0 }
 0x27f   : > { %12059 = vst [vmem:[#allocation73_spill] sm:$0xff] %v10825_v15  ;;  %v10827_v5 = vpop.f32.mrf.mxu1 }
 0x280   : > { %12060 = vst [vmem:[#allocation75_spill] sm:$0xff] %v10827_v5  ;;  %v10829_v7 = vpop.f32.mrf.mxu0  ;;  %7746 = vmatmul.mubr.msk.bf16.gmra.mxu0 %vm476_vm0, %v12062_v17  ;;  %v12072_v17 = vld [vmem:[#allocation90_spill] sm:$0xff] }
 0x281   : > { %12061 = vst [vmem:[#allocation81_spill] sm:$0xff] %v10829_v7  ;;  %v10833_v29 = vpop.f32.mrf.mxu1  ;;  %7749 = vmatprep.mubr.msk.bf16.mxu0 %vm476_vm0, %v12064_v40  ;;  %v12074_v40 = vld [vmem:[#allocation92_spill] sm:$0xff] }
 0x282   : > { %12063 = vst [vmem:[#allocation83_spill] sm:$0xff] %v10833_v29  ;;  %v10837_v52 = vpop.f32.mrf.mxu0 }
 0x283   : > { %12065 = vst [vmem:[#allocation87_spill] sm:$0xff] %v10837_v52  ;;  %v10839_v46 = vpop.f32.mrf.mxu1 }
 0x284   : > { %12066 = vst [vmem:[#allocation88_spill] sm:$0xff] %v10839_v46  ;;  %v10841_v55 = vpop.f32.mrf.mxu0 }
 0x285   : > { %12067 = vst [vmem:[#allocation178_spill] sm:$0xff] %v10841_v55  ;;  %v10843_v12 = vpop.f32.mrf.mxu1 }
 0x286   : > { %12068 = vst [vmem:[#allocation179_spill] sm:$0xff] %v10843_v12  ;;  %v10845_v31 = vpop.f32.mrf.mxu0 }
 0x287   : > { %12069 = vst [vmem:[#allocation180_spill] sm:$0xff] %v10845_v31  ;;  %v10847_v5 = vpop.f32.mrf.mxu1 }
 0x288   : > { %12070 = vst [vmem:[#allocation181_spill] sm:$0xff] %v10847_v5  ;;  %v10849_v28 = vpop.f32.mrf.mxu0  ;;  %7750 = vmatmul.mubr.msk.bf16.gmra.mxu0 %vm476_vm0, %v12072_v17  ;;  %v12082_v17 = vld [vmem:[#allocation98_spill] sm:$0xff] }
 0x289   : > { %12071 = vst [vmem:[#allocation182_spill] sm:$0xff] %v10849_v28  ;;  %v10853_v29 = vpop.f32.mrf.mxu1  ;;  %7753 = vmatprep.mubr.msk.bf16.mxu0 %vm476_vm0, %v12074_v40 }
 0x28a   : > { %12073 = vst [vmem:[#allocation90_spill] sm:$0xff] %v10853_v29  ;;  %v10857_v57 = vpop.f32.mrf.mxu0 }
 0x28b   : > { %12075 = vst [vmem:[#allocation92_spill] sm:$0xff] %v10857_v57  ;;  %v10859_v46 = vpop.f32.mrf.mxu1 }
 0x28c   : > { %12076 = vst [vmem:[#allocation183_spill] sm:$0xff] %v10859_v46  ;;  %v10861_v47 = vpop.f32.mrf.mxu0 }
 0x28d   : > { %12077 = vst [vmem:[#allocation184_spill] sm:$0xff] %v10861_v47  ;;  %v10863_v12 = vpop.f32.mrf.mxu1 }
 0x28e   : > { %12078 = vst [vmem:[#allocation185_spill] sm:$0xff] %v10863_v12  ;;  %v10865_v59 = vpop.f32.mrf.mxu0 }
 0x28f   : > { %12079 = vst [vmem:[#allocation186_spill] sm:$0xff] %v10865_v59  ;;  %v10867_v5 = vpop.f32.mrf.mxu1 }
 0x290   : > { %12080 = vst [vmem:[#allocation187_spill] sm:$0xff] %v10867_v5  ;;  %v10869_v28 = vpop.f32.mrf.mxu0  ;;  %7754 = vmatmul.mubr.msk.bf16.gmra.mxu0 %vm476_vm0, %v12082_v17 }
 0x291   : > { %12081 = vst [vmem:[#allocation188_spill] sm:$0xff] %v10869_v28  ;;  %v10873_v29 = vpop.f32.mrf.mxu1 }
 0x292   : > { %12083 = vst [vmem:[#allocation98_spill] sm:$0xff] %v10873_v29  ;;  %v10875_v40 = vpop.f32.mrf.mxu0 }
 0x293   : > { %12084 = vst [vmem:[#allocation189_spill] sm:$0xff] %v10875_v40  ;;  %v10877_v57 = vpop.f32.mrf.mxu1 }
 0x294   : > { %12085 = vst [vmem:[#allocation190_spill] sm:$0xff] %v10877_v57  ;;  %v10879_v46 = vpop.f32.mrf.mxu0 }
 0x295   : > { %12086 = vst [vmem:[#allocation191_spill] sm:$0xff] %v10879_v46  ;;  %v10881_v47 = vpop.f32.mrf.mxu1 }
 0x296   : > { %v10883_v12 = vpop.f32.mrf.mxu0 }
 0x297   : > { %12087 = vst [vmem:[#allocation192_spill] sm:$0xff] %v10883_v12  ;;  %v10885_v59 = vpop.f32.mrf.mxu1 }
 0x298   : > { %v10887_v5 = vpop.f32.mrf.mxu0 }
 0x299   : > { %12088 = vst [vmem:[#allocation193_spill] sm:$0xff] %v10887_v5  ;;  %v10889_v28 = vpop.f32.mrf.mxu1 }
 0x29a   : > { %v10891_v31 = vpop.f32.mrf.mxu0 }
 0x29b   : > { %12089 = vst [vmem:[#allocation194_spill] sm:$0xff] %v10891_v31  ;;  %v10893_v17 = vpop.f32.mrf.mxu1 }
 0x29c   : > { %v10895_v29 = vpop.f32.mrf.mxu0 }
 0x29d   : > { %12090 = vst [vmem:[#allocation195_spill] sm:$0xff] %v10895_v29  ;;  %v10897_v40 = vpop.f32.mrf.mxu1 }
 0x29e   : > { %v10899_v57 = vpop.f32.mrf.mxu0 }
 0x29f   : > { %12091 = vst [vmem:[#allocation196_spill] sm:$0xff] %v10899_v57  ;;  %v10901_v46 = vpop.f32.mrf.mxu1 }
 0x2a0   : > { %v10903_v55 = vpop.f32.mrf.mxu0 }
 0x2a1   : > { %12092 = vst [vmem:[#allocation197_spill] sm:$0xff] %v10903_v55  ;;  %v10905_v12 = vpop.f32.mrf.mxu1 }
 0x2a2   : > { %v10907_v52 = vpop.f32.mrf.mxu0 }
 0x2a3   : > { %12093 = vst [vmem:[#allocation198_spill] sm:$0xff] %v10907_v52  ;;  %v10909_v5 = vpop.f32.mrf.mxu1 }
 0x2a4   : > { %v10911_v13 = vpop.f32.mrf.mxu0 }
 0x2a5   : > { %12094 = vst [vmem:[#allocation199_spill] sm:$0xff] %v10911_v13  ;;  %v10913_v31 = vpop.f32.mrf.mxu1 }
 0x2a6   : > { %v10915_v60 = vpop.f32.mrf.mxu0 }
 0x2a7   : > { %12095 = vst [vmem:[#allocation200_spill] sm:$0xff] %v10915_v60  ;;  %v10917_v29 = vpop.f32.mrf.mxu1 }
 0x2a8   : > { %v10919_v37 = vpop.f32.mrf.mxu0 }
 0x2a9   : > { %12096 = vst [vmem:[#allocation201_spill] sm:$0xff] %v10919_v37  ;;  %v10921_v57 = vpop.f32.mrf.mxu1 }
 0x2aa   : > { %v10923_v7 = vpop.f32.mrf.mxu0 }
 0x2ab   : > { %12097 = vst [vmem:[#allocation202_spill] sm:$0xff] %v10923_v7  ;;  %v10925_v55 = vpop.f32.mrf.mxu1 }
 0x2ac   : > { %v10927_v24 = vpop.f32.mrf.mxu0 }
 0x2ad   : > { %12098 = vst [vmem:[#allocation203_spill] sm:$0xff] %v10927_v24  ;;  %v10929_v52 = vpop.f32.mrf.mxu1 }
 0x2ae   : > { %v10931_v15 = vpop.f32.mrf.mxu0 }
 0x2af   : > { %12099 = vst [vmem:[#allocation204_spill] sm:$0xff] %v10931_v15  ;;  %v10933_v13 = vpop.f32.mrf.mxu1 }
 0x2b0   : > { %12100 = vst [vmem:[#allocation205_spill] sm:$0xff] %v10933_v13  ;;  %v10935_v58 = vpop.f32.mrf.mxu0  ;;  %v12142_v13 = vld [vmem:[#allocation14_spill] sm:$0xff] }
 0x2b1   : > { %12101 = vst [vmem:[#allocation206_spill] sm:$0xff] %v10935_v58  ;;  %v10937_v60 = vpop.f32.mrf.mxu1 }
 0x2b2   : > { %12102 = vst [vmem:[#allocation207_spill] sm:$0xff] %v10937_v60  ;;  %v10939_v18 = vpop.f32.mrf.mxu0  ;;  %v12141_v60 = vld [vmem:[#allocation7_spill] sm:$0xff] }
 0x2b3   : > { %12103 = vst [vmem:[#allocation208_spill] sm:$0xff] %v10939_v18  ;;  %v10941_v37 = vpop.f32.mrf.mxu1 }
 0x2b4   : > { %12104 = vst [vmem:[#allocation209_spill] sm:$0xff] %v10941_v37  ;;  %v10943_v51 = vpop.f32.mrf.mxu0 }
 0x2b5   : > { %12105 = vst [vmem:[#allocation210_spill] sm:$0xff] %v10943_v51  ;;  %v10945_v7 = vpop.f32.mrf.mxu1 }
 0x2b6   : > { %12106 = vst [vmem:[#allocation211_spill] sm:$0xff] %v10945_v7  ;;  %v10947_v50 = vpop.f32.mrf.mxu0 }
 0x2b7   : > { %12107 = vst [vmem:[#allocation212_spill] sm:$0xff] %v10947_v50  ;;  %v10949_v24 = vpop.f32.mrf.mxu1 }
 0x2b8   : > { %12108 = vst [vmem:[#allocation213_spill] sm:$0xff] %v10949_v24  ;;  %v10951_v14 = vpop.f32.mrf.mxu0 }
 0x2b9   : > { %12109 = vst [vmem:[#allocation214_spill] sm:$0xff] %v10951_v14  ;;  %v10953_v15 = vpop.f32.mrf.mxu1 }
 0x2ba   : > { %12110 = vst [vmem:[#allocation215_spill] sm:$0xff] %v10953_v15  ;;  %v10955_v53 = vpop.f32.mrf.mxu0 }
 0x2bb   : > { %12111 = vst [vmem:[#allocation216_spill] sm:$0xff] %v10955_v53  ;;  %v10957_v58 = vpop.f32.mrf.mxu1 }
 0x2bc   : > { %12112 = vst [vmem:[#allocation217_spill] sm:$0xff] %v10957_v58  ;;  %v10959_v2 = vpop.f32.mrf.mxu0 }
 0x2bd   : > { %12113 = vst [vmem:[#allocation218_spill] sm:$0xff] %v10959_v2  ;;  %v10961_v18 = vpop.f32.mrf.mxu1 }
 0x2be   : > { %12114 = vst [vmem:[#allocation219_spill] sm:$0xff] %v10961_v18  ;;  %v10963_v37 = vpop.f32.mrf.mxu0 }
 0x2bf   : > { %12115 = vst [vmem:[#allocation220_spill] sm:$0xff] %v10963_v37  ;;  %v10965_v51 = vpop.f32.mrf.mxu1 }
 0x2c0   : > { %12116 = vst [vmem:[#allocation221_spill] sm:$0xff] %v10965_v51  ;;  %v10967_v7 = vpop.f32.mrf.mxu0 }
 0x2c1   : > { %12117 = vst [vmem:[#allocation222_spill] sm:$0xff] %v10967_v7  ;;  %v10969_v50 = vpop.f32.mrf.mxu1 }
 0x2c2   : > { %12118 = vst [vmem:[#allocation223_spill] sm:$0xff] %v10969_v50  ;;  %v10971_v24 = vpop.f32.mrf.mxu0 }
 0x2c3   : > { %12119 = vst [vmem:[#allocation224_spill] sm:$0xff] %v10971_v24  ;;  %v10973_v14 = vpop.f32.mrf.mxu1 }
 0x2c4   : > { %12120 = vst [vmem:[#allocation225_spill] sm:$0xff] %v10973_v14  ;;  %v10975_v15 = vpop.f32.mrf.mxu0 }
 0x2c5   : > { %12121 = vst [vmem:[#allocation226_spill] sm:$0xff] %v10975_v15  ;;  %v10977_v53 = vpop.f32.mrf.mxu1 }
 0x2c6   : > { %12122 = vst [vmem:[#allocation227_spill] sm:$0xff] %v10977_v53  ;;  %v10979_v58 = vpop.f32.mrf.mxu0 }
 0x2c7   : > { %12123 = vst [vmem:[#allocation228_spill] sm:$0xff] %v10979_v58  ;;  %v10981_v2 = vpop.f32.mrf.mxu1 }
 0x2c8   : > { %12124 = vst [vmem:[#allocation229_spill] sm:$0xff] %v10981_v2  ;;  %v10983_v18 = vpop.f32.mrf.mxu0 }
 0x2c9   : > { %12125 = vst [vmem:[#allocation230_spill] sm:$0xff] %v10983_v18  ;;  %v10985_v37 = vpop.f32.mrf.mxu1 }
 0x2ca   : > { %12126 = vst [vmem:[#allocation231_spill] sm:$0xff] %v10985_v37  ;;  %v10987_v51 = vpop.f32.mrf.mxu0 }
 0x2cb   : > { %12127 = vst [vmem:[#allocation232_spill] sm:$0xff] %v10987_v51  ;;  %v10989_v7 = vpop.f32.mrf.mxu1  ;;  %v3845_v51 = vadd.f32 %v10393_v22, %v10729_v25  ;;  %v2390_v22 = vadd.f32 %v12142_v13, %v12141_v60  ;;  %v11022_v25 = vld [vmem:[#allocation2] ss:$0 sm:$0xff] }
 0x2cc   : > { %12128 = vst [vmem:[#allocation233_spill] sm:$0xff] %v10989_v7  ;;  %v10991_v50 = vpop.f32.mrf.mxu0 }
 0x2cd   : > { %12129 = vst [vmem:[#allocation234_spill] sm:$0xff] %v10991_v50  ;;  %v10993_v24 = vpop.f32.mrf.mxu1 }
 0x2ce   : > { %12130 = vst [vmem:[#allocation235_spill] sm:$0xff] %v10993_v24  ;;  %v10995_v14 = vpop.f32.mrf.mxu0 }
 0x2cf   : > { %12131 = vst [vmem:[#allocation236_spill] sm:$0xff] %v10995_v14  ;;  %v10999_v53 = vpop.f32.mrf.mxu1  ;;  %v3837_v14 = vadd.f32 %v10402_v30, %v10737_v62  ;;  %v3840_v30 = vadd.f32 %v10436_v0, %v10745_v49  ;;  %v3861_v0 = vadd.f32 %v10449_v38, %v10749_v1  ;;  %v12148_v38 = vld [vmem:[#allocation122_spill] sm:$0xff]  ;;  %v12149_v1 = vld [vmem:[#allocation5_spill] sm:$0xff] }
 0x2d0   : > { %v10997_v15 = vpop.f32.mrf.mxu0  ;;  %12133 = vst [vmem:[#allocation238_spill] sm:$0xff] %v10999_v53  ;;  %v12139_v53 = vld [vmem:[#allocation119_spill] sm:$0xff] }
 0x2d1   : > { %12132 = vst [vmem:[#allocation237_spill] sm:$0xff] %v10997_v15  ;;  %v11005_v18 = vpop.f32.mrf.mxu1 }
 0x2d2   : > { %v11001_v58 = vpop.f32.mrf.mxu0  ;;  %12136 = vst [vmem:[#allocation241_spill] sm:$0xff] %v11005_v18 }
 0x2d3   : > { %12134 = vst [vmem:[#allocation239_spill] sm:$0xff] %v11001_v58  ;;  %v11011_v7 = vpop.f32.mrf.mxu1  ;;  %v2392_v58 = vadd.f32 %v12140_v4, %v12139_v53  ;;  %v12144_v4 = vld [vmem:[#allocation44_spill] sm:$0xff] }
 0x2d4   : > { %v11003_v2 = vpop.f32.mrf.mxu0  ;;  %12138 = vst [vmem:[#allocation243_spill] sm:$0xff] %v11011_v7 }
 0x2d5   : > { %12135 = vst [vmem:[#allocation240_spill] sm:$0xff] %v11003_v2  ;;  %v3848_v2 = vadd.f32 %v10420_v21, %v10741_v26  ;;  %v11024_v34 = vpop.f32.mrf.mxu1  ;;  %v12145_v21 = vld [vmem:[#allocation15_spill] sm:$0xff]  ;;  %v12147_v26 = vld [vmem:[#allocation78_spill] sm:$0xff] }
 0x2d6   : > { %v11007_v37 = vpop.f32.mrf.mxu0  ;;  %12143 = vst [vmem:[#allocation119_spill] sm:$0xff] %v11024_v34  ;;  %v2393_v62 = vadd.f32 %v12145_v21, %v12144_v4  ;;  %v2396_v4 = vadd.f32 %v12149_v1, %v12148_v38  ;;  %v12150_v21 = vld [vmem:[#allocation72_spill] sm:$0xff] }
 0x2d7   : > { %12137 = vst [vmem:[#allocation242_spill] sm:$0xff] %v11007_v37 }
 0x2d8   : > { %v7695_v50 = vpop.f32.mrf.mxu0 }
 0x2d9   : > { %v4382_v15 = vadd.f32 %v7695_v50, %v3845_v51 }
 0x2da   : > { %v4125_v24 = vpop.f32.mrf.mxu0 }
 0x2db   : > { %v5791_v18 = vadd.f32 %v10881_v47, %v4382_v15  ;;  %v4380_v37 = vadd.f32 %v4125_v24, %v3837_v14  ;;  %v12146_v15 = vld [vmem:[#allocation46_spill] sm:$0xff] }
 0x2dc   : > { %v7696_v7 = vpop.f32.mrf.mxu0  ;;  %v2391_v34 = vadd.f32 %v12147_v26, %v12146_v15 }
 0x2dd   : > { %v5855_v51 = vmax.f32 %v2392_v58, %v5791_v18  ;;  %v5789_v50 = vadd.f32 %v10885_v59, %v4380_v37  ;;  %v4383_v53 = vadd.f32 %v7696_v7, %v3848_v2  ;;  %v11037_v18 = vpop.f32.mrf.mxu1  ;;  %v3853_v2 = vadd.f32 %v10460_v32, %v10757_v16 }
 0x2de   : > { %v4128_v47 = vpop.f32.mrf.mxu0  ;;  %v2394_v32 = vadd.f32 %v12150_v21, %v10055_v3  ;;  %v3864_v16 = vadd.f32 %v10468_v23, %v10761_v33  ;;  %v3877_v3 = vadd.f32 %v10493_v45, %v10769_v27 }
 0x2df   : > { %v5926_v24 = vadd.f32 %v11022_v25, %v5855_v51  ;;  %v5853_v14 = vmax.f32 %v2390_v22, %v5789_v50  ;;  %v5792_v60 = vadd.f32 %v10889_v28, %v4383_v53  ;;  %v4381_v13 = vadd.f32 %v4128_v47, %v3840_v30  ;;  %v11051_v47 = vpop.f32.mrf.mxu1 }
 0x2e0   : > { %v7699_v58 = vpop.f32.mrf.mxu0 }
 0x2e1   : > { %v5924_v37 = vadd.f32 %v11022_v25, %v5853_v14  ;;  %v5856_v59 = vmax.f32 %v2393_v62, %v5792_v60  ;;  %v5790_v7 = vadd.f32 %v10893_v17, %v4381_v13  ;;  %v5990_v49 = vmax.f32 %v5926_v24, 0.0  ;;  %v12151_v13 = vld [vmem:[#allocation74_spill] sm:$0xff]  ;;  %v11068_v45 = vpop.f32.mrf.mxu1 }
 0x2e2   : > { %v4386_v28 = vadd.f32 %v7699_v58, %v3861_v0  ;;  %v4141_v22 = vpop.f32.mrf.mxu0  ;;  %v3856_v24 = vadd.f32 %v10481_v36, %v10765_v35  ;;  %v2397_v15 = vadd.f32 %v12151_v13, %v10067_v44  ;;  %v12152_v36 = vld [vmem:[#allocation50_spill] sm:$0xff]  ;;  %v12153_v35 = vld [vmem:[#allocation16_spill] sm:$0xff] }
 0x2e3   : > { %v5988_v30 = vmax.f32 %v5924_v37, 0.0  ;;  %v5927_v51 = vadd.f32 %v11022_v25, %v5856_v59  ;;  %v5854_v50 = vmax.f32 %v2391_v34, %v5790_v7  ;;  %v4384_v53 = vadd.f32 %v4141_v22, %v3853_v2  ;;  %v12154_v59 = vld [vmem:[#allocation124_spill] sm:$0xff] }
 0x2e4   : > { %v5795_v17 = vadd.f32 %v10897_v40, %v4386_v28  ;;  %v7700_v62 = vpop.f32.mrf.mxu0  ;;  %v2395_v37 = vadd.f32 %v12153_v35, %v12152_v36  ;;  %v12155_v7 = vld [vmem:[#allocation76_spill] sm:$0xff] }
 0x2e5   : > { %v6052_v34 = vmax.f32 %v5988_v30, %v5990_v49  ;;  %v5925_v14 = vadd.f32 %v11022_v25, %v5854_v50  ;;  %v5793_v60 = vadd.f32 %v10901_v46, %v4384_v53  ;;  %v4387_v33 = vadd.f32 %v7700_v62, %v3864_v16  ;;  %v11085_v16 = vpop.f32.mrf.mxu1 }
 0x2e6   : > { %v5859_v23 = vmax.f32 %v2396_v4, %v5795_v17  ;;  %v4144_v40 = vpop.f32.mrf.mxu0  ;;  %v5991_v26 = vmax.f32 %v5927_v51, 0.0  ;;  %v2400_v46 = vadd.f32 %v12155_v7, %v12154_v59  ;;  %v3869_v50 = vadd.f32 %v10512_v10, %v10777_v11  ;;  %v12160_v59 = vld [vmem:[#allocation129_spill] sm:$0xff] }
 0x2e7   : > { %v5989_v0 = vmax.f32 %v5925_v14, 0.0  ;;  %v5857_v58 = vmax.f32 %v2394_v32, %v5793_v60  ;;  %v4385_v2 = vadd.f32 %v4144_v40, %v3856_v24  ;;  %v5796_v44 = vadd.f32 %v10905_v12, %v4387_v33  ;;  %v12158_v40 = vld [vmem:[#allocation94_spill] sm:$0xff]  ;;  %v11100_v36 = vpop.f32.mrf.mxu1 }
 0x2e8   : > { %v5930_v49 = vadd.f32 %v11022_v25, %v5859_v23  ;;  %v7703_v28 = vpop.f32.mrf.mxu0  ;;  %v3880_v53 = vadd.f32 %v10520_v48, %v10781_v20  ;;  %v3872_v10 = vadd.f32 %v10529_v39, %v10785_v6 }
 0x2e9   : > { %v6053_v27 = vmax.f32 %v5989_v0, %v5991_v26  ;;  %v5928_v22 = vadd.f32 %v11022_v25, %v5857_v58  ;;  %v5794_v30 = vadd.f32 %v10909_v5, %v4385_v2  ;;  %v4390_v51 = vadd.f32 %v7703_v28, %v3877_v3 }
 0x2ea   : > { %v5994_v12 = vmax.f32 %v5930_v49, 0.0  ;;  %v5860_v38 = vmax.f32 %v2397_v15, %v5796_v44  ;;  %v4157_v1 = vpop.f32.mrf.mxu0  ;;  %v2399_v26 = vadd.f32 %v12158_v40, %v10146_v9  ;;  %v3893_v0 = vadd.f32 %v10537_v61, %v10789_v63 }
 0x2eb   : > { %v6939_v4 = vpack.c.bf16 %v6053_v27, %v6052_v34  ;;  %v5992_v21 = vmax.f32 %v5928_v22, 0.0  ;;  %v5858_v32 = vmax.f32 %v2395_v37, %v5794_v30  ;;  %v5799_v5 = vadd.f32 %v10913_v31, %v4390_v51  ;;  %v12156_v34 = vld [vmem:[#allocation18_spill] sm:$0xff]  ;;  %v12157_v31 = vld [vmem:[#allocation19_spill] sm:$0xff]  ;;  %v12162_v27 = vld [vmem:[#allocation21_spill] sm:$0xff] }
 0x2ec   : > { %v5931_v11 = vadd.f32 %v11022_v25, %v5860_v38  ;;  %v4388_v48 = vadd.f32 %v4157_v1, %v3869_v50  ;;  %v7704_v20 = vpop.f32.mrf.mxu0  ;;  %v2398_v60 = vadd.f32 %v12156_v34, %v10111_v43  ;;  %v2401_v13 = vadd.f32 %v12157_v31, %v10121_v56  ;;  %v12159_v37 = vld [vmem:[#allocation58_spill] sm:$0xff]  ;;  %v12164_v38 = vld [vmem:[#allocation205_spill] sm:$0xff]  ;;  %v12168_v34 = vld [vmem:[#allocation64_spill] sm:$0xff] }
 0x2ed   : > { %6940 = vst [vmem:[%s11079_s10] sm:$0xff] %v6939_v4   ;;  %v6054_v17 = vmax.f32 %v5992_v21, %v5994_v12  ;;  %v5929_v62 = vadd.f32 %v11022_v25, %v5858_v32  ;;  %v5863_v24 = vmax.f32 %v2400_v46, %v5799_v5  ;;  %v4391_v14 = vadd.f32 %v7704_v20, %v3880_v53  ;;  %v11114_v53 = vpop.f32.mrf.mxu1  ;;  %v12165_v21 = vld [vmem:[#allocation59_spill] sm:$0xff] }
 0x2ee   : > { %v5797_v39 = vadd.f32 %v10917_v29, %v4388_v48  ;;  %v4160_v6 = vpop.f32.mrf.mxu0  ;;  %v5995_v15 = vmax.f32 %v5931_v11, 0.0  ;;  %v3885_v56 = vadd.f32 %v10551_v8, %v10797_v19  ;;  %v2404_v7 = vadd.f32 %v12160_v59, %v12159_v37  ;;  %v12161_v19 = vld [vmem:[#allocation11_spill] sm:$0xff] }
 0x2ef   : > { %v5993_v3 = vmax.f32 %v5929_v62, 0.0  ;;  %v5800_v23 = vadd.f32 %v10921_v57, %v4391_v14  ;;  %v4389_v33 = vadd.f32 %v4160_v6, %v3872_v10  ;;  %v5934_v58 = vadd.f32 %v11022_v25, %v5863_v24  ;;  %v12166_v32 = vld [vmem:[#allocation91_spill] sm:$0xff] }
 0x2f0   : > { %v5861_v43 = vmax.f32 %v2398_v60, %v5797_v39  ;;  %v7707_v2 = vpop.f32.mrf.mxu0  ;;  %v3896_v9 = vadd.f32 %v10560_v41, %v10801_v54  ;;  %v2402_v22 = vadd.f32 %v12162_v27, %v12161_v19  ;;  %v12163_v41 = vld [vmem:[#allocation103_spill] sm:$0xff]  ;;  %v2405_v5 = vadd.f32 %v12166_v32, %v12165_v21  ;;  %v12185_v21 = vld [vmem:[#allocation108_spill] sm:$0xff] }
 0x2f1   : > { %v6055_v29 = vmax.f32 %v5993_v3, %v5995_v15  ;;  %v5864_v35 = vmax.f32 %v2401_v13, %v5800_v23  ;;  %v5798_v57 = vadd.f32 %v10925_v55, %v4389_v33  ;;  %v4394_v63 = vadd.f32 %v7707_v2, %v3893_v0  ;;  %v12167_v62 = vld [vmem:[#allocation207_spill] sm:$0xff]  ;;  %v12171_v13 = vld [vmem:[#allocation104_spill] sm:$0xff]  ;;  %v11129_v3 = vpop.f32.mrf.mxu1 }
 0x2f2   : > { %v5932_v61 = vadd.f32 %v11022_v25, %v5861_v43  ;;  %v4173_v46 = vpop.f32.mrf.mxu0  ;;  %v5998_v55 = vmax.f32 %v5934_v58, 0.0  ;;  %v3888_v54 = vadd.f32 %v12163_v41, %v10805_v42  ;;  %v12169_v42 = vld [vmem:[#allocation131_spill] sm:$0xff]  ;;  %v12173_v58 = vld [vmem:[#allocation61_spill] sm:$0xff]  ;;  %v12174_v43 = vld [vmem:[#allocation20_spill] sm:$0xff] }
 0x2f3   : > { %v6944_v49 = vpack.c.bf16 %v6055_v29, %v6054_v17  ;;  %v5935_v44 = vadd.f32 %v11022_v25, %v5864_v35  ;;  %v5862_v28 = vmax.f32 %v2399_v26, %v5798_v57  ;;  %v4392_v8 = vadd.f32 %v4173_v46, %v3885_v56  ;;  %v12170_v31 = vld [vmem:[#allocation55_spill] sm:$0xff]  ;;  %v12172_v26 = vld [vmem:[#allocation209_spill] sm:$0xff]  ;;  %v12176_v29 = vld [vmem:[#allocation34_spill] sm:$0xff] }
 0x2f4   : > { %v5996_v30 = vmax.f32 %v5932_v61, 0.0  ;;  %v5803_v51 = vadd.f32 %v10929_v52, %v4394_v63  ;;  %v7708_v50 = vpop.f32.mrf.mxu0  ;;  %v2403_v60 = vadd.f32 %v12169_v42, %v12168_v34  ;;  %v3909_v39 = vadd.f32 %v12171_v13, %v12170_v31  ;;  %v12175_v56 = vld [vmem:[#allocation67_spill] sm:$0xff]  ;;  %v12177_v46 = vld [vmem:[#allocation65_spill] sm:$0xff]  ;;  %v12183_v41 = vld [vmem:[#allocation130_spill] sm:$0xff] }
 0x2f5   : > { %7016 = vst [vmem:[%s11079_s10 + $0x8] sm:$0xff] %v6944_v49   ;;  %v5933_v12 = vadd.f32 %v11022_v25, %v5862_v28  ;;  %v5801_v1 = vadd.f32 %v12164_v38, %v4392_v8  ;;  %v4395_v4 = vadd.f32 %v7708_v50, %v3896_v9  ;;  %v5999_v11 = vmax.f32 %v5935_v44, 0.0  ;;  %v12178_v49 = vld [vmem:[#allocation133_spill] sm:$0xff]  ;;  %v12179_v28 = vld [vmem:[#allocation66_spill] sm:$0xff]  ;;  %v12180_v8 = vld [vmem:[#allocation23_spill] sm:$0xff] }
 0x2f6   : > { %v6056_v10 = vmax.f32 %v5996_v30, %v5998_v55  ;;  %v5867_v48 = vmax.f32 %v2404_v7, %v5803_v51  ;;  %v4176_v20 = vpop.f32.mrf.mxu0  ;;  %v3901_v2 = vadd.f32 %v12174_v43, %v12173_v58  ;;  %v3912_v35 = vadd.f32 %v12176_v29, %v12175_v56  ;;  %v12181_v27 = vld [vmem:[#allocation211_spill] sm:$0xff]  ;;  %v11143_v51 = vpop.f32.mrf.mxu1  ;;  %v12182_v50 = vld [vmem:[#allocation73_spill] sm:$0xff] }
 0x2f7   : > { %v5997_v52 = vmax.f32 %v5933_v12, 0.0  ;;  %v5865_v17 = vmax.f32 %v2402_v22, %v5801_v1  ;;  %v5804_v24 = vadd.f32 %v12167_v62, %v4395_v4  ;;  %v4393_v14 = vadd.f32 %v4176_v20, %v3888_v54  ;;  %v12184_v4 = vld [vmem:[#allocation13_spill] sm:$0xff]  ;;  %v12193_v43 = vld [vmem:[#allocation71_spill] sm:$0xff] }
 0x2f8   : > { %v5938_v6 = vadd.f32 %v11022_v25, %v5867_v48  ;;  %v7711_v15 = vpop.f32.mrf.mxu0  ;;  %v2408_v44 = vadd.f32 %v12178_v49, %v12177_v46  ;;  %v2406_v19 = vadd.f32 %v12180_v8, %v12179_v28  ;;  %v3904_v54 = vadd.f32 %v12183_v41, %v12182_v50  ;;  %v12188_v20 = vld [vmem:[#allocation213_spill] sm:$0xff]  ;;  %v12195_v29 = vld [vmem:[#allocation87_spill] sm:$0xff]  ;;  %v12201_v50 = vld [vmem:[#allocation22_spill] sm:$0xff] }
 0x2f9   : > { %v6057_v23 = vmax.f32 %v5997_v52, %v5999_v11  ;;  %v5936_v33 = vadd.f32 %v11022_v25, %v5865_v17  ;;  %v5868_v40 = vmax.f32 %v2405_v5, %v5804_v24  ;;  %v5802_v0 = vadd.f32 %v12172_v26, %v4393_v14  ;;  %v12186_v5 = vld [vmem:[#allocation81_spill] sm:$0xff]  ;;  %v12189_v14 = vld [vmem:[#allocation215_spill] sm:$0xff] }
 0x2fa   : > { %v6002_v57 = vmax.f32 %v5938_v6, 0.0  ;;  %v4398_v37 = vadd.f32 %v7711_v15, %v3909_v39  ;;  %v4189_v59 = vpop.f32.mrf.mxu0  ;;  %v2409_v32 = vadd.f32 %v12185_v21, %v12184_v4  ;;  %v12191_v31 = vld [vmem:[#allocation93_spill] sm:$0xff]  ;;  %v12203_v4 = vld [vmem:[#allocation96_spill] sm:$0xff] }
 0x2fb   : > { %v6949_v7 = vpack.c.bf16 %v6057_v23, %v6056_v10  ;;  %v6000_v9 = vmax.f32 %v5936_v33, 0.0  ;;  %v5939_v61 = vadd.f32 %v11022_v25, %v5868_v40  ;;  %v5866_v63 = vmax.f32 %v2403_v60, %v5802_v0  ;;  %v12187_v10 = vld [vmem:[#allocation102_spill] sm:$0xff]  ;;  %v12190_v60 = vld [vmem:[#allocation68_spill] sm:$0xff]  ;;  %v11158_v23 = vpop.f32.mrf.mxu1  ;;  %v12192_v26 = vld [vmem:[#allocation217_spill] sm:$0xff] }
 0x2fc   : > { %v5807_v22 = vadd.f32 %v12181_v27, %v4398_v37  ;;  %v4396_v55 = vadd.f32 %v4189_v59, %v3901_v2  ;;  %v7712_v30 = vpop.f32.mrf.mxu0  ;;  %v3925_v11 = vadd.f32 %v12187_v10, %v12186_v5  ;;  %v2407_v13 = vadd.f32 %v12191_v31, %v12190_v60  ;;  %v12194_v2 = vld [vmem:[#allocation136_spill] sm:$0xff]  ;;  %v12197_v37 = vld [vmem:[#allocation178_spill] sm:$0xff]  ;;  %v12205_v5 = vld [vmem:[#allocation137_spill] sm:$0xff] }
 0x2fd   : > { %7017 = vst [vmem:[%s11079_s10 + $0x10] sm:$0xff] %v6949_v7   ;;  %v6058_v12 = vmax.f32 %v6000_v9, %v6002_v57  ;;  %v5937_v38 = vadd.f32 %v11022_v25, %v5866_v63  ;;  %v4399_v1 = vadd.f32 %v7712_v30, %v3912_v35  ;;  %v6003_v62 = vmax.f32 %v5939_v61, 0.0  ;;  %v12196_v35 = vld [vmem:[#allocation36_spill] sm:$0xff]  ;;  %v12209_v60 = vld [vmem:[#allocation139_spill] sm:$0xff] }
 0x2fe   : > { %v5871_v48 = vmax.f32 %v2408_v44, %v5807_v22  ;;  %v5805_v52 = vadd.f32 %v12188_v20, %v4396_v55  ;;  %v4192_v17 = vpop.f32.mrf.mxu0  ;;  %v2412_v56 = vadd.f32 %v12194_v2, %v12193_v43  ;;  %v3917_v57 = vadd.f32 %v12196_v35, %v12195_v29  ;;  %v12198_v59 = vld [vmem:[#allocation132_spill] sm:$0xff]  ;;  %v12199_v44 = vld [vmem:[#allocation219_spill] sm:$0xff]  ;;  %v11170_v55 = vpop.f32.mrf.mxu1  ;;  %v12214_v29 = vld [vmem:[#allocation225_spill] sm:$0xff] }
 0x2ff   : > { %v6001_v24 = vmax.f32 %v5937_v38, 0.0  ;;  %v5808_v34 = vadd.f32 %v12189_v14, %v4399_v1  ;;  %v4397_v42 = vadd.f32 %v4192_v17, %v3904_v54  ;;  %v3928_v7 = vadd.f32 %v12198_v59, %v12197_v37  ;;  %v12200_v30 = vld [vmem:[#allocation180_spill] sm:$0xff]  ;;  %v12216_v37 = vld [vmem:[#allocation141_spill] sm:$0xff] }
 0x300   : > { %v5942_v39 = vadd.f32 %v11022_v25, %v5871_v48  ;;  %v5869_v6 = vmax.f32 %v2406_v19, %v5805_v52  ;;  %v7715_v15 = vpop.f32.mrf.mxu0  ;;  %v3920_v41 = vadd.f32 %v12201_v50, %v12200_v30  ;;  %v12206_v48 = vld [vmem:[#allocation221_spill] sm:$0xff] }
 0x301   : > { %v6059_v33 = vmax.f32 %v6001_v24, %v6003_v62  ;;  %v5872_v40 = vmax.f32 %v2409_v32, %v5808_v34  ;;  %v5806_v0 = vadd.f32 %v12192_v26, %v4397_v42  ;;  %v4402_v58 = vadd.f32 %v7715_v15, %v3925_v11  ;;  %v12204_v32 = vld [vmem:[#allocation163_spill] sm:$0xff]  ;;  %v12208_v42 = vld [vmem:[#allocation165_spill] sm:$0xff]  ;;  %v11187_v26 = vpop.f32.mrf.mxu1 }
 0x302   : > { %v5940_v9 = vadd.f32 %v11022_v25, %v5869_v6  ;;  %v4205_v61 = vpop.f32.mrf.mxu0  ;;  %v6006_v8 = vmax.f32 %v5942_v39, 0.0  ;;  %v2413_v10 = vadd.f32 %v12205_v5, %v12204_v32  ;;  %v12207_v24 = vld [vmem:[#allocation223_spill] sm:$0xff]  ;;  %v2411_v31 = vadd.f32 %v12209_v60, %v12208_v42  ;;  %v12211_v39 = vld [vmem:[#allocation134_spill] sm:$0xff] }
 0x303   : > { %v6954_v63 = vpack.c.bf16 %v6059_v33, %v6058_v12  ;;  %v5943_v46 = vadd.f32 %v11022_v25, %v5872_v40  ;;  %v5870_v49 = vmax.f32 %v2407_v13, %v5806_v0  ;;  %v5811_v28 = vadd.f32 %v12199_v44, %v4402_v58  ;;  %v12202_v12 = vld [vmem:[#allocation161_spill] sm:$0xff]  ;;  %v12210_v13 = vld [vmem:[#allocation182_spill] sm:$0xff]  ;;  %v12212_v0 = vld [vmem:[#allocation92_spill] sm:$0xff] }
 0x304   : > { %v6004_v19 = vmax.f32 %v5940_v9, 0.0  ;;  %v4400_v27 = vadd.f32 %v4205_v61, %v3917_v57  ;;  %v7716_v22 = vpop.f32.mrf.mxu0  ;;  %v2410_v21 = vadd.f32 %v12203_v4, %v12202_v12  ;;  %v3941_v6 = vadd.f32 %v12211_v39, %v12210_v13  ;;  %v12213_v58 = vld [vmem:[#allocation109_spill] sm:$0xff]  ;;  %v12215_v57 = vld [vmem:[#allocation167_spill] sm:$0xff]  ;;  %v12218_v9 = vld [vmem:[#allocation38_spill] sm:$0xff]  ;;  %v11201_v12 = vpop.f32.mrf.mxu1 }
 0x305   : > { %7018 = vst [vmem:[%s11079_s10 + $0x18] sm:$0xff] %v6954_v63   ;;  %v5941_v54 = vadd.f32 %v11022_v25, %v5870_v49  ;;  %v5875_v38 = vmax.f32 %v2412_v56, %v5811_v28  ;;  %v4403_v1 = vadd.f32 %v7716_v22, %v3928_v7  ;;  %v6007_v17 = vmax.f32 %v5943_v46, 0.0  ;;  %v12217_v7 = vld [vmem:[#allocation184_spill] sm:$0xff]  ;;  %v12220_v22 = vld [vmem:[#allocation27_spill] sm:$0xff]  ;;  %v12222_v4 = vld [vmem:[#allocation186_spill] sm:$0xff] }
 0x306   : > { %v6060_v11 = vmax.f32 %v6004_v19, %v6006_v8  ;;  %v5809_v20 = vadd.f32 %v12206_v48, %v4400_v27  ;;  %v4208_v52 = vpop.f32.mrf.mxu0  ;;  %v3933_v43 = vadd.f32 %v12213_v58, %v12212_v0  ;;  %v2416_v59 = vadd.f32 %v12216_v37, %v12215_v57  ;;  %v12219_v27 = vld [vmem:[#allocation169_spill] sm:$0xff]  ;;  %v12231_v0 = vld [vmem:[#allocation24_spill] sm:$0xff] }
 0x307   : > { %v6005_v62 = vmax.f32 %v5941_v54, 0.0  ;;  %v5812_v14 = vadd.f32 %v12207_v24, %v4403_v1  ;;  %v4401_v34 = vadd.f32 %v4208_v52, %v3920_v41  ;;  %v5946_v15 = vadd.f32 %v11022_v25, %v5875_v38  ;;  %v12221_v54 = vld [vmem:[#allocation227_spill] sm:$0xff]  ;;  %v12232_v37 = vld [vmem:[#allocation233_spill] sm:$0xff] }
 0x308   : > { %v5873_v33 = vmax.f32 %v2410_v21, %v5809_v20  ;;  %v7719_v40 = vpop.f32.mrf.mxu0  ;;  %v3944_v61 = vadd.f32 %v12218_v9, %v12217_v7  ;;  %v2414_v30 = vadd.f32 %v12220_v22, %v12219_v27  ;;  %v12223_v21 = vld [vmem:[#allocation135_spill] sm:$0xff]  ;;  %v12233_v7 = vld [vmem:[#allocation189_spill] sm:$0xff] }
 0x309   : > { %v6061_v2 = vmax.f32 %v6005_v62, %v6007_v17  ;;  %v5876_v56 = vmax.f32 %v2413_v10, %v5812_v14  ;;  %v5810_v35 = vadd.f32 %v12214_v29, %v4401_v34  ;;  %v4406_v46 = vadd.f32 %v7719_v40, %v3941_v6  ;;  %v12224_v10 = vld [vmem:[#allocation229_spill] sm:$0xff]  ;;  %v12225_v20 = vld [vmem:[#allocation171_spill] sm:$0xff]  ;;  %v12230_v40 = vld [vmem:[#allocation188_spill] sm:$0xff] }
 0x30a   : > { %v5944_v63 = vadd.f32 %v11022_v25, %v5873_v33  ;;  %v4221_v49 = vpop.f32.mrf.mxu0  ;;  %v6010_v50 = vmax.f32 %v5946_v15, 0.0  ;;  %v3936_v32 = vadd.f32 %v12223_v21, %v12222_v4  ;;  %v12226_v52 = vld [vmem:[#allocation143_spill] sm:$0xff]  ;;  %v12228_v6 = vld [vmem:[#allocation173_spill] sm:$0xff]  ;;  %v3957_v58 = vadd.f32 %v12231_v0, %v12230_v40 }
 0x30b   : > { %v6959_v44 = vpack.c.bf16 %v6061_v2, %v6060_v11  ;;  %v5947_v28 = vadd.f32 %v11022_v25, %v5876_v56  ;;  %v5874_v8 = vmax.f32 %v2411_v31, %v5810_v35  ;;  %v4404_v19 = vadd.f32 %v4221_v49, %v3933_v43  ;;  %v12227_v31 = vld [vmem:[#allocation231_spill] sm:$0xff]  ;;  %v12229_v15 = vld [vmem:[#allocation145_spill] sm:$0xff]  ;;  %v11216_v56 = vpop.f32.mrf.mxu1 }
 0x30c   : > { %v6008_v41 = vmax.f32 %v5944_v63, 0.0  ;;  %v5815_v38 = vadd.f32 %v12221_v54, %v4406_v46  ;;  %v7720_v1 = vpop.f32.mrf.mxu0  ;;  %v2417_v17 = vadd.f32 %v12226_v52, %v12225_v20  ;;  %v2415_v33 = vadd.f32 %v12229_v15, %v12228_v6  ;;  %v12234_v9 = vld [vmem:[#allocation97_spill] sm:$0xff]  ;;  %v12235_v63 = vld [vmem:[#allocation191_spill] sm:$0xff]  ;;  %v12236_v46 = vld [vmem:[#allocation40_spill] sm:$0xff] }
 0x30d   : > { %7019 = vst [vmem:[%s11079_s10 + $0x20] sm:$0xff] %v6959_v44   ;;  %v5945_v5 = vadd.f32 %v11022_v25, %v5874_v8  ;;  %v5813_v11 = vadd.f32 %v12224_v10, %v4404_v19  ;;  %v4407_v48 = vadd.f32 %v7720_v1, %v3944_v61  ;;  %v6011_v24 = vmax.f32 %v5947_v28, 0.0  ;;  %v12240_v1 = vld [vmem:[#allocation28_spill] sm:$0xff]  ;;  %v12241_v21 = vld [vmem:[#allocation235_spill] sm:$0xff]  ;;  %v12243_v20 = vld [vmem:[#allocation117_spill] sm:$0xff] }
 0x30e   : > { %v6062_v62 = vmax.f32 %v6008_v41, %v6010_v50  ;;  %v5879_v14 = vmax.f32 %v2416_v59, %v5815_v38  ;;  %v4224_v34 = vpop.f32.mrf.mxu0  ;;  %v3949_v61 = vadd.f32 %v12234_v9, %v12233_v7  ;;  %v3960_v49 = vadd.f32 %v12236_v46, %v12235_v63  ;;  %v12237_v50 = vld [vmem:[#allocation175_spill] sm:$0xff]  ;;  %v12238_v41 = vld [vmem:[#allocation146_spill] sm:$0xff]  ;;  %v12239_v38 = vld [vmem:[#allocation29_spill] sm:$0xff] }
 0x30f   : > { %v6009_v42 = vmax.f32 %v5945_v5, 0.0  ;;  %v5877_v60 = vmax.f32 %v2414_v30, %v5813_v11  ;;  %v5816_v13 = vadd.f32 %v12227_v31, %v4407_v48  ;;  %v4405_v39 = vadd.f32 %v4224_v34, %v3936_v32  ;;  %v11230_v11 = vpop.f32.mrf.mxu1  ;;  %v12242_v48 = vld [vmem:[#allocation192_spill] sm:$0xff]  ;;  %v12245_v34 = vld [vmem:[#allocation147_spill] sm:$0xff]  ;;  %v12248_v6 = vld [vmem:[#allocation238_spill] sm:$0xff] }
 0x310   : > { %v5950_v43 = vadd.f32 %v11022_v25, %v5879_v14  ;;  %v7723_v2 = vpop.f32.mrf.mxu0  ;;  %v2420_v54 = vadd.f32 %v12238_v41, %v12237_v50  ;;  %v2418_v4 = vadd.f32 %v12240_v1, %v12239_v38  ;;  %v3952_v52 = vadd.f32 %v12243_v20, %v12242_v48  ;;  %v12244_v14 = vld [vmem:[#allocation80_spill] sm:$0xff]  ;;  %v12252_v46 = vld [vmem:[#allocation243_spill] sm:$0xff] }
 0x311   : > { %v6063_v29 = vmax.f32 %v6009_v42, %v6011_v24  ;;  %v5948_v35 = vadd.f32 %v11022_v25, %v5877_v60  ;;  %v5880_v57 = vmax.f32 %v2417_v17, %v5816_v13  ;;  %v5814_v59 = vadd.f32 %v12232_v37, %v4405_v39  ;;  %v12246_v60 = vld [vmem:[#allocation193_spill] sm:$0xff]  ;;  %v12247_v31 = vld [vmem:[#allocation140_spill] sm:$0xff]  ;;  %v11245_v9 = vpop.f32.mrf.mxu1  ;;  %v12257_v50 = vld [vmem:[#allocation195_spill] sm:$0xff] }
 0x312   : > { %v6014_v44 = vmax.f32 %v5950_v43, 0.0  ;;  %v4410_v28 = vadd.f32 %v7723_v2, %v3957_v58  ;;  %v4237_v8 = vpop.f32.mrf.mxu0  ;;  %v2421_v42 = vadd.f32 %v12245_v34, %v12244_v14  ;;  %v3973_v13 = vadd.f32 %v12247_v31, %v12246_v60  ;;  %v12249_v58 = vld [vmem:[#allocation241_spill] sm:$0xff]  ;;  %v12258_v41 = vld [vmem:[#allocation120_spill] sm:$0xff]  ;;  %v12261_v34 = vld [vmem:[#allocation142_spill] sm:$0xff] }
 0x313   : > { %v6964_v19 = vpack.c.bf16 %v6063_v29, %v6062_v62  ;;  %v6012_v27 = vmax.f32 %v5948_v35, 0.0  ;;  %v5951_v22 = vadd.f32 %v11022_v25, %v5880_v57  ;;  %v5878_v30 = vmax.f32 %v2415_v33, %v5814_v59  ;;  %v12250_v29 = vld [vmem:[#allocation82_spill] sm:$0xff]  ;;  %v12251_v35 = vld [vmem:[#allocation148_spill] sm:$0xff] }
 0x314   : > { %v5819_v32 = vadd.f32 %v12241_v21, %v4410_v28  ;;  %v4408_v5 = vadd.f32 %v4237_v8, %v3949_v61  ;;  %v7724_v10 = vpop.f32.mrf.mxu0  ;;  %v2419_v57 = vadd.f32 %v12251_v35, %v12250_v29  ;;  %v12253_v28 = vld [vmem:[#allocation17_spill] sm:$0xff]  ;;  %v12260_v14 = vld [vmem:[#allocation196_spill] sm:$0xff] }
 0x315   : > { %7020 = vst [vmem:[%s11079_s10 + $0x28] sm:$0xff] %v6964_v19   ;;  %v6064_v17 = vmax.f32 %v6012_v27, %v6014_v44  ;;  %v5949_v62 = vadd.f32 %v11022_v25, %v5878_v30  ;;  %v4411_v24 = vadd.f32 %v7724_v10, %v3960_v49  ;;  %v6015_v40 = vmax.f32 %v5951_v22, 0.0  ;;  %v12254_v8 = vld [vmem:[#allocation149_spill] sm:$0xff]  ;;  %v12255_v27 = vld [vmem:[#allocation194_spill] sm:$0xff] }
 0x316   : > { %v5883_v39 = vmax.f32 %v2420_v54, %v5819_v32  ;;  %v5817_v15 = vadd.f32 %v12248_v6, %v4408_v5  ;;  %v4240_v33 = vpop.f32.mrf.mxu0  ;;  %v2424_v19 = vadd.f32 %v12254_v8, %v12253_v28  ;;  %v12256_v22 = vld [vmem:[#allocation26_spill] sm:$0xff]  ;;  %v3976_v54 = vadd.f32 %v12258_v41, %v12257_v50  ;;  %v12259_v5 = vld [vmem:[#allocation119_spill] sm:$0xff]  ;;  %v12273_v41 = vld [vmem:[#allocation153_spill] sm:$0xff] }
 0x317   : > { %v6013_v0 = vmax.f32 %v5949_v62, 0.0  ;;  %v5820_v43 = vadd.f32 %v12249_v58, %v4411_v24  ;;  %v4409_v2 = vadd.f32 %v4240_v33, %v3952_v52  ;;  %v3965_v30 = vadd.f32 %v12256_v22, %v12255_v27  ;;  %v11257_v24 = vpop.f32.mrf.mxu1  ;;  %v12265_v33 = vld [vmem:[#allocation152_spill] sm:$0xff]  ;;  %v12272_v50 = vld [vmem:[#allocation30_spill] sm:$0xff] }
 0x318   : > { %v5954_v37 = vadd.f32 %v11022_v25, %v5883_v39  ;;  %v5881_v59 = vmax.f32 %v2418_v4, %v5817_v15  ;;  %v7727_v7 = vpop.f32.mrf.mxu0  ;;  %v12263_v39 = vld [vmem:[#allocation151_spill] sm:$0xff] }
 0x319   : > { %v6065_v61 = vmax.f32 %v6013_v0, %v6015_v40  ;;  %v5884_v63 = vmax.f32 %v2421_v42, %v5820_v43  ;;  %v5818_v49 = vadd.f32 %v12252_v46, %v4409_v2  ;;  %v4414_v44 = vadd.f32 %v7727_v7, %v3973_v13  ;;  %v12264_v15 = vld [vmem:[#allocation79_spill] sm:$0xff]  ;;  %v11274_v8 = vpop.f32.mrf.mxu1 }
 0x31a   : > { %v5952_v38 = vadd.f32 %v11022_v25, %v5881_v59  ;;  %v4253_v1 = vpop.f32.mrf.mxu0  ;;  %v6018_v48 = vmax.f32 %v5954_v37, 0.0  ;;  %v3968_v42 = vadd.f32 %v12261_v34, %v12260_v14  ;;  %v2425_v40 = vadd.f32 %v12265_v33, %v12264_v15  ;;  %v12266_v37 = vld [vmem:[#allocation100_spill] sm:$0xff]  ;;  %v12267_v59 = vld [vmem:[#allocation42_spill] sm:$0xff] }
 0x31b   : > { %v6969_v4 = vpack.c.bf16 %v6065_v61, %v6064_v17  ;;  %v5955_v21 = vadd.f32 %v11022_v25, %v5884_v63  ;;  %v5882_v32 = vmax.f32 %v2419_v57, %v5818_v49  ;;  %v5823_v10 = vadd.f32 %v12259_v5, %v4414_v44  ;;  %v12262_v17 = vld [vmem:[#allocation99_spill] sm:$0xff]  ;;  %v12268_v61 = vld [vmem:[#allocation197_spill] sm:$0xff]  ;;  %v12269_v63 = vld [vmem:[#allocation6_spill] sm:$0xff] }
 0x31c   : > { %v6016_v20 = vmax.f32 %v5952_v38, 0.0  ;;  %v4412_v52 = vadd.f32 %v4253_v1, %v3965_v30  ;;  %v7728_v62 = vpop.f32.mrf.mxu0  ;;  %v2422_v6 = vadd.f32 %v12263_v39, %v12262_v17  ;;  %v2423_v7 = vadd.f32 %v12267_v59, %v12266_v37  ;;  %v12274_v38 = vld [vmem:[#allocation199_spill] sm:$0xff]  ;;  %v12275_v1 = vld [vmem:[#allocation144_spill] sm:$0xff]  ;;  %v12277_v14 = vld [vmem:[#allocation154_spill] sm:$0xff] }
 0x31d   : > { %7021 = vst [vmem:[%s11079_s10 + $0x30] sm:$0xff] %v6969_v4   ;;  %v5953_v60 = vadd.f32 %v11022_v25, %v5882_v32  ;;  %v5887_v31 = vmax.f32 %v2424_v19, %v5823_v10  ;;  %v4415_v13 = vadd.f32 %v7728_v62, %v3976_v54  ;;  %v6019_v2 = vmax.f32 %v5955_v21, 0.0  ;;  %v12270_v19 = vld [vmem:[#allocation198_spill] sm:$0xff]  ;;  %v12276_v62 = vld [vmem:[#allocation84_spill] sm:$0xff]  ;;  %v12279_v39 = vld [vmem:[#allocation121_spill] sm:$0xff] }
 0x31e   : > { %v6066_v0 = vmax.f32 %v6016_v20, %v6018_v48  ;;  %v5821_v58 = vadd.f32 %v11037_v18, %v4412_v52  ;;  %v4256_v43 = vpop.f32.mrf.mxu0  ;;  %v3989_v46 = vadd.f32 %v12269_v63, %v12268_v61  ;;  %v12271_v18 = vld [vmem:[#allocation43_spill] sm:$0xff]  ;;  %v2428_v54 = vadd.f32 %v12273_v41, %v12272_v50  ;;  %v12278_v17 = vld [vmem:[#allocation200_spill] sm:$0xff]  ;;  %v12282_v61 = vld [vmem:[#allocation89_spill] sm:$0xff] }
 0x31f   : > { %v6017_v29 = vmax.f32 %v5953_v60, 0.0  ;;  %v5824_v35 = vadd.f32 %v11051_v47, %v4415_v13  ;;  %v4413_v57 = vadd.f32 %v4256_v43, %v3968_v42  ;;  %v5958_v49 = vadd.f32 %v11022_v25, %v5887_v31  ;;  %v11288_v13 = vpop.f32.mrf.mxu1  ;;  %v12283_v63 = vld [vmem:[#allocation123_spill] sm:$0xff]  ;;  %v12286_v50 = vld [vmem:[#allocation202_spill] sm:$0xff] }
 0x320   : > { %v5885_v44 = vmax.f32 %v2422_v6, %v5821_v58  ;;  %v7731_v28 = vpop.f32.mrf.mxu0  ;;  %v3981_v27 = vadd.f32 %v12271_v18, %v12270_v19  ;;  %v3992_v4 = vadd.f32 %v12275_v1, %v12274_v38  ;;  %v2426_v34 = vadd.f32 %v12277_v14, %v12276_v62  ;;  %v12281_v58 = vld [vmem:[#allocation47_spill] sm:$0xff]  ;;  %v12289_v38 = vld [vmem:[#allocation54_spill] sm:$0xff]  ;;  %v12291_v62 = vld [vmem:[#allocation48_spill] sm:$0xff] }
 0x321   : > { %v6067_v22 = vmax.f32 %v6017_v29, %v6019_v2  ;;  %v5888_v30 = vmax.f32 %v2425_v40, %v5824_v35  ;;  %v5822_v47 = vadd.f32 %v11068_v45, %v4413_v57  ;;  %v4418_v32 = vadd.f32 %v7731_v28, %v3989_v46  ;;  %v11303_v18 = vpop.f32.mrf.mxu1 }
 0x322   : > { %v5956_v21 = vadd.f32 %v11022_v25, %v5885_v44  ;;  %v4269_v5 = vpop.f32.mrf.mxu0  ;;  %v6022_v45 = vmax.f32 %v5958_v49, 0.0  ;;  %v3984_v6 = vadd.f32 %v12279_v39, %v12278_v17  ;;  %v2427_v46 = vadd.f32 %v12283_v63, %v12282_v61  ;;  %v12284_v49 = vld [vmem:[#allocation201_spill] sm:$0xff]  ;;  %v12294_v39 = vld [vmem:[#allocation204_spill] sm:$0xff] }
 0x323   : > { %v6974_v10 = vpack.c.bf16 %v6067_v22, %v6066_v0  ;;  %v5959_v48 = vadd.f32 %v11022_v25, %v5888_v30  ;;  %v5886_v20 = vmax.f32 %v2423_v7, %v5822_v47  ;;  %v4416_v52 = vadd.f32 %v4269_v5, %v3981_v27  ;;  %v12280_v0 = vld [vmem:[#allocation31_spill] sm:$0xff]  ;;  %v12285_v44 = vld [vmem:[#allocation45_spill] sm:$0xff]  ;;  %v11317_v17 = vpop.f32.mrf.mxu1 }
 0x324   : > { %v6020_v42 = vmax.f32 %v5956_v21, 0.0  ;;  %v5827_v60 = vadd.f32 %v11085_v16, %v4418_v32  ;;  %v7732_v31 = vpop.f32.mrf.mxu0  ;;  %v2429_v43 = vadd.f32 %v12281_v58, %v12280_v0  ;;  %v4005_v28 = vadd.f32 %v12285_v44, %v12284_v49  ;;  %v12296_v58 = vld [vmem:[#allocation95_spill] sm:$0xff]  ;;  %v12301_v49 = vld [vmem:[#allocation125_spill] sm:$0xff] }
 0x325   : > { %7022 = vst [vmem:[%s11079_s10 + $0x38] sm:$0xff] %v6974_v10   ;;  %v5957_v15 = vadd.f32 %v11022_v25, %v5886_v20  ;;  %v5825_v33 = vadd.f32 %v11100_v36, %v4416_v52  ;;  %v4419_v40 = vadd.f32 %v7732_v31, %v3992_v4  ;;  %v6023_v29 = vmax.f32 %v5959_v48, 0.0  ;;  %v12290_v52 = vld [vmem:[#allocation85_spill] sm:$0xff] }
 0x326   : > { %v6068_v2 = vmax.f32 %v6020_v42, %v6022_v45  ;;  %v5891_v35 = vmax.f32 %v2428_v54, %v5827_v60  ;;  %v4272_v57 = vpop.f32.mrf.mxu0  ;;  %v12288_v54 = vld [vmem:[#allocation203_spill] sm:$0xff]  ;;  %v2432_v14 = vadd.f32 %v12291_v62, %v12290_v52 }
 0x327   : > { %v6021_v16 = vmax.f32 %v5957_v15, 0.0  ;;  %v5889_v37 = vmax.f32 %v2426_v34, %v5825_v33  ;;  %v5828_v59 = vadd.f32 %v11114_v53, %v4419_v40  ;;  %v4417_v7 = vadd.f32 %v4272_v57, %v3984_v6  ;;  %v12287_v53 = vld [vmem:[#allocation8_spill] sm:$0xff]  ;;  %v12292_v34 = vld [vmem:[#allocation101_spill] sm:$0xff]  ;;  %v12295_v6 = vld [vmem:[#allocation10_spill] sm:$0xff] }
 0x328   : > { %v5962_v36 = vadd.f32 %v11022_v25, %v5891_v35  ;;  %v7735_v19 = vpop.f32.mrf.mxu0  ;;  %v3997_v41 = vadd.f32 %v12287_v53, %v12286_v50  ;;  %v4008_v1 = vadd.f32 %v12289_v38, %v12288_v54  ;;  %v4000_v15 = vadd.f32 %v12295_v6, %v12294_v39  ;;  %v12299_v35 = vld [vmem:[#allocation49_spill] sm:$0xff]  ;;  %v12305_v54 = vld [vmem:[#allocation60_spill] sm:$0xff] }
 0x329   : > { %v6069_v27 = vmax.f32 %v6021_v16, %v6023_v29  ;;  %v5960_v22 = vadd.f32 %v11022_v25, %v5889_v37  ;;  %v5892_v30 = vmax.f32 %v2429_v43, %v5828_v59  ;;  %v5826_v47 = vadd.f32 %v11129_v3, %v4417_v7  ;;  %v12293_v3 = vld [vmem:[#allocation52_spill] sm:$0xff]  ;;  %v12297_v43 = vld [vmem:[#allocation53_spill] sm:$0xff]  ;;  %v12298_v29 = vld [vmem:[#allocation206_spill] sm:$0xff] }
 0x32a   : > { %v6026_v4 = vmax.f32 %v5962_v36, 0.0  ;;  %v4422_v21 = vadd.f32 %v7735_v19, %v4005_v28  ;;  %v4285_v32 = vpop.f32.mrf.mxu0  ;;  %v2430_v45 = vadd.f32 %v12293_v3, %v12292_v34  ;;  %v4021_v57 = vadd.f32 %v12299_v35, %v12298_v29  ;;  %v12302_v50 = vld [vmem:[#allocation33_spill] sm:$0xff] }
 0x32b   : > { %v6979_v5 = vpack.c.bf16 %v6069_v27, %v6068_v2  ;;  %v6024_v10 = vmax.f32 %v5960_v22, 0.0  ;;  %v5963_v48 = vadd.f32 %v11022_v25, %v5892_v30  ;;  %v5890_v20 = vmax.f32 %v2427_v46, %v5826_v47  ;;  %v12300_v46 = vld [vmem:[#allocation32_spill] sm:$0xff]  ;;  %v11332_v27 = vpop.f32.mrf.mxu1  ;;  %v12303_v53 = vld [vmem:[#allocation9_spill] sm:$0xff] }
 0x32c   : > { %v5831_v42 = vadd.f32 %v11143_v51, %v4422_v21  ;;  %v4420_v60 = vadd.f32 %v4285_v32, %v3997_v41  ;;  %v7736_v31 = vpop.f32.mrf.mxu0  ;;  %v2433_v2 = vadd.f32 %v12297_v43, %v12296_v58  ;;  %v2431_v44 = vadd.f32 %v12301_v49, %v12300_v46  ;;  %v12313_v58 = vld [vmem:[#allocation70_spill] sm:$0xff] }
 0x32d   : > { %7023 = vst [vmem:[%s11079_s10 + $0x40] sm:$0xff] %v6979_v5   ;;  %v6070_v33 = vmax.f32 %v6024_v10, %v6026_v4  ;;  %v5961_v40 = vadd.f32 %v11022_v25, %v5890_v20  ;;  %v4423_v0 = vadd.f32 %v7736_v31, %v4008_v1  ;;  %v6027_v59 = vmax.f32 %v5963_v48, 0.0  ;;  %v12306_v1 = vld [vmem:[#allocation210_spill] sm:$0xff]  ;;  %v12307_v4 = vld [vmem:[#allocation51_spill] sm:$0xff]  ;;  %v11344_v3 = vpop.f32.mrf.mxu1 }
 0x32e   : > { %v5895_v16 = vmax.f32 %v2432_v14, %v5831_v42  ;;  %v5829_v51 = vadd.f32 %v11158_v23, %v4420_v60  ;;  %v4288_v37 = vpop.f32.mrf.mxu0  ;;  %v2436_v41 = vadd.f32 %v12303_v53, %v12302_v50  ;;  %v4024_v21 = vadd.f32 %v12307_v4, %v12306_v1  ;;  %v12309_v42 = vld [vmem:[#allocation12_spill] sm:$0xff]  ;;  %v12321_v50 = vld [vmem:[#allocation62_spill] sm:$0xff] }
 0x32f   : > { %v6025_v7 = vmax.f32 %v5961_v40, 0.0  ;;  %v5832_v61 = vadd.f32 %v11170_v55, %v4423_v0  ;;  %v4421_v63 = vadd.f32 %v4288_v37, %v4000_v15  ;;  %v12304_v55 = vld [vmem:[#allocation208_spill] sm:$0xff]  ;;  %v12310_v15 = vld [vmem:[#allocation86_spill] sm:$0xff]  ;;  %v12314_v37 = vld [vmem:[#allocation25_spill] sm:$0xff] }
 0x330   : > { %v5966_v28 = vadd.f32 %v11022_v25, %v5895_v16  ;;  %v5893_v36 = vmax.f32 %v2430_v45, %v5829_v51  ;;  %v7739_v19 = vpop.f32.mrf.mxu0  ;;  %v4013_v38 = vadd.f32 %v12305_v54, %v12304_v55  ;;  %v12308_v45 = vld [vmem:[#allocation212_spill] sm:$0xff]  ;;  %v12323_v55 = vld [vmem:[#allocation57_spill] sm:$0xff] }
 0x331   : > { %v6071_v22 = vmax.f32 %v6025_v7, %v6027_v59  ;;  %v5896_v30 = vmax.f32 %v2433_v2, %v5832_v61  ;;  %v5830_v47 = vadd.f32 %v11187_v26, %v4421_v63  ;;  %v4426_v23 = vadd.f32 %v7739_v19, %v4021_v57  ;;  %v12312_v0 = vld [vmem:[#allocation128_spill] sm:$0xff]  ;;  %v12315_v59 = vld [vmem:[#allocation77_spill] sm:$0xff]  ;;  %v12316_v61 = vld [vmem:[#allocation214_spill] sm:$0xff] }
 0x332   : > { %v5964_v32 = vadd.f32 %v11022_v25, %v5893_v36  ;;  %v4301_v5 = vpop.f32.mrf.mxu0  ;;  %v6030_v52 = vmax.f32 %v5966_v28, 0.0  ;;  %v4016_v60 = vadd.f32 %v12309_v42, %v12308_v45  ;;  %v2435_v7 = vadd.f32 %v12315_v59, %v12314_v37  ;;  %v12317_v63 = vld [vmem:[#allocation150_spill] sm:$0xff]  ;;  %v11361_v36 = vpop.f32.mrf.mxu1  ;;  %v12318_v19 = vld [vmem:[#allocation216_spill] sm:$0xff]  ;;  %v12327_v42 = vld [vmem:[#allocation63_spill] sm:$0xff] }
 0x333   : > { %v6984_v10 = vpack.c.bf16 %v6071_v22, %v6070_v33  ;;  %v5967_v48 = vadd.f32 %v11022_v25, %v5896_v30  ;;  %v5894_v20 = vmax.f32 %v2431_v44, %v5830_v47  ;;  %v5835_v26 = vadd.f32 %v11201_v12, %v4426_v23  ;;  %v12311_v33 = vld [vmem:[#allocation56_spill] sm:$0xff]  ;;  %v12320_v23 = vld [vmem:[#allocation105_spill] sm:$0xff]  ;;  %v12332_v37 = vld [vmem:[#allocation222_spill] sm:$0xff] }
 0x334   : > { %v6028_v62 = vmax.f32 %v5964_v32, 0.0  ;;  %v4424_v14 = vadd.f32 %v4301_v5, %v4013_v38  ;;  %v7740_v34 = vpop.f32.mrf.mxu0  ;;  %v2434_v40 = vadd.f32 %v12311_v33, %v12310_v15  ;;  %v2437_v12 = vadd.f32 %v12313_v58, %v12312_v0  ;;  %v12326_v45 = vld [vmem:[#allocation220_spill] sm:$0xff]  ;;  %v12328_v15 = vld [vmem:[#allocation106_spill] sm:$0xff]  ;;  %v12333_v59 = vld [vmem:[#allocation69_spill] sm:$0xff] }
 0x335   : > { %7024 = vst [vmem:[%s11079_s10 + $0x48] sm:$0xff] %v6984_v10   ;;  %v5965_v31 = vadd.f32 %v11022_v25, %v5894_v20  ;;  %v5899_v39 = vmax.f32 %v2436_v41, %v5835_v26  ;;  %v4427_v6 = vadd.f32 %v7740_v34, %v4024_v21  ;;  %v6031_v35 = vmax.f32 %v5967_v48, 0.0  ;;  %v12322_v41 = vld [vmem:[#allocation218_spill] sm:$0xff]  ;;  %v12324_v48 = vld [vmem:[#allocation35_spill] sm:$0xff]  ;;  %v11375_v34 = vpop.f32.mrf.mxu1  ;;  %v12329_v33 = vld [vmem:[#allocation156_spill] sm:$0xff] }
 0x336   : > { %v6072_v43 = vmax.f32 %v6028_v62, %v6030_v52  ;;  %v5833_v2 = vadd.f32 %v11216_v56, %v4424_v14  ;;  %v4304_v29 = vpop.f32.mrf.mxu0  ;;  %v4037_v46 = vadd.f32 %v12317_v63, %v12316_v61  ;;  %v12319_v56 = vld [vmem:[#allocation126_spill] sm:$0xff]  ;;  %v2440_v53 = vadd.f32 %v12321_v50, %v12320_v23  ;;  %v12325_v20 = vld [vmem:[#allocation155_spill] sm:$0xff] }
 0x337   : > { %v6029_v57 = vmax.f32 %v5965_v31, 0.0  ;;  %v5836_v16 = vadd.f32 %v11230_v11, %v4427_v6  ;;  %v4425_v51 = vadd.f32 %v4304_v29, %v4016_v60  ;;  %v5970_v49 = vadd.f32 %v11022_v25, %v5899_v39  ;;  %v11390_v63 = vpop.f32.mrf.mxu1 }
 0x338   : > { %v5897_v44 = vmax.f32 %v2434_v40, %v5833_v2  ;;  %v7743_v28 = vpop.f32.mrf.mxu0  ;;  %v4029_v22 = vadd.f32 %v12319_v56, %v12318_v19  ;;  %v4040_v54 = vadd.f32 %v12323_v55, %v12322_v41  ;;  %v2438_v26 = vadd.f32 %v12325_v20, %v12324_v48  ;;  %v12334_v19 = vld [vmem:[#allocation224_spill] sm:$0xff] }
 0x339   : > { %v6073_v30 = vmax.f32 %v6029_v57, %v6031_v35  ;;  %v5900_v47 = vmax.f32 %v2437_v12, %v5836_v16  ;;  %v5834_v11 = vadd.f32 %v11245_v9, %v4425_v51  ;;  %v4430_v1 = vadd.f32 %v7743_v28, %v4037_v46  ;;  %v12330_v57 = vld [vmem:[#allocation107_spill] sm:$0xff]  ;;  %v12331_v16 = vld [vmem:[#allocation157_spill] sm:$0xff]  ;;  %v7818_v20 = vpop.f32.mrf.mxu1 }
 0x33a   : > { %v5968_v38 = vadd.f32 %v11022_v25, %v5897_v44  ;;  %v4317_v4 = vpop.f32.mrf.mxu0  ;;  %v6034_v9 = vmax.f32 %v5970_v49, 0.0  ;;  %v4032_v60 = vadd.f32 %v12327_v42, %v12326_v45  ;;  %v2441_v40 = vadd.f32 %v12329_v33, %v12328_v15  ;;  %v12344_v42 = vld [vmem:[#allocation111_spill] sm:$0xff] }
 0x33b   : > { %v6989_v21 = vpack.c.bf16 %v6073_v30, %v6072_v43  ;;  %v5971_v32 = vadd.f32 %v11022_v25, %v5900_v47  ;;  %v5898_v5 = vmax.f32 %v2435_v7, %v5834_v11  ;;  %v4428_v10 = vadd.f32 %v4317_v4, %v4029_v22  ;;  %v12336_v22 = vld [vmem:[#allocation226_spill] sm:$0xff]  ;;  %v12337_v30 = vld [vmem:[#allocation83_spill] sm:$0xff] }
 0x33c   : > { %v6032_v52 = vmax.f32 %v5968_v38, 0.0  ;;  %v5839_v62 = vadd.f32 %v11257_v24, %v4430_v1  ;;  %v7744_v14 = vpop.f32.mrf.mxu0  ;;  %v2439_v51 = vadd.f32 %v12331_v16, %v12330_v57  ;;  %v4053_v7 = vadd.f32 %v12333_v59, %v12332_v37  ;;  %v12338_v38 = vld [vmem:[#allocation37_spill] sm:$0xff]  ;;  %v12339_v1 = vld [vmem:[#allocation158_spill] sm:$0xff] }
 0x33d   : > { %7025 = vst [vmem:[%s11079_s10 + $0x50] sm:$0xff] %v6989_v21   ;;  %v5969_v31 = vadd.f32 %v11022_v25, %v5898_v5  ;;  %v5837_v39 = vadd.f32 %v11274_v8, %v4428_v10  ;;  %v4431_v6 = vadd.f32 %v7744_v14, %v4040_v54  ;;  %v6035_v58 = vmax.f32 %v5971_v32, 0.0  ;;  %v12340_v21 = vld [vmem:[#allocation110_spill] sm:$0xff] }
 0x33e   : > { %v6074_v0 = vmax.f32 %v6032_v52, %v6034_v9  ;;  %v5903_v12 = vmax.f32 %v2440_v53, %v5839_v62  ;;  %v4320_v43 = vpop.f32.mrf.mxu0  ;;  %v4056_v47 = vadd.f32 %v12337_v30, %v12336_v22  ;;  %v2444_v4 = vadd.f32 %v12339_v1, %v12338_v38  ;;  %v12343_v9 = vld [vmem:[#allocation88_spill] sm:$0xff]  ;;  %v12357_v38 = vld [vmem:[#allocation183_spill] sm:$0xff] }
 0x33f   : > { %v6033_v24 = vmax.f32 %v5969_v31, 0.0  ;;  %v5901_v2 = vmax.f32 %v2438_v26, %v5837_v39  ;;  %v5840_v29 = vadd.f32 %v11288_v13, %v4431_v6  ;;  %v4429_v35 = vadd.f32 %v4320_v43, %v4032_v60  ;;  %v12335_v13 = vld [vmem:[#allocation75_spill] sm:$0xff]  ;;  %v12342_v26 = vld [vmem:[#allocation228_spill] sm:$0xff]  ;;  %v12346_v39 = vld [vmem:[#allocation230_spill] sm:$0xff] }
 0x340   : > { %v5974_v8 = vadd.f32 %v11022_v25, %v5903_v12  ;;  %v7747_v61 = vpop.f32.mrf.mxu0  ;;  %v4045_v56 = vadd.f32 %v12335_v13, %v12334_v19  ;;  %v4048_v52 = vadd.f32 %v12343_v9, %v12342_v26  ;;  %v12345_v60 = vld [vmem:[#allocation160_spill] sm:$0xff]  ;;  %v12347_v6 = vld [vmem:[#allocation179_spill] sm:$0xff]  ;;  %v12355_v19 = vld [vmem:[#allocation90_spill] sm:$0xff] }
 0x341   : > { %v6075_v46 = vmax.f32 %v6033_v24, %v6035_v58  ;;  %v5972_v49 = vadd.f32 %v11022_v25, %v5901_v2  ;;  %v5904_v44 = vmax.f32 %v2441_v40, %v5840_v29  ;;  %v5838_v28 = vadd.f32 %v11303_v18, %v4429_v35  ;;  %v12341_v18 = vld [vmem:[#allocation159_spill] sm:$0xff]  ;;  %v12348_v24 = vld [vmem:[#allocation112_spill] sm:$0xff]  ;;  %v12349_v2 = vld [vmem:[#allocation162_spill] sm:$0xff] }
 0x342   : > { %v6038_v11 = vmax.f32 %v5974_v8, 0.0  ;;  %v4434_v23 = vadd.f32 %v7747_v61, %v4053_v7  ;;  %v4333_v50 = vpop.f32.mrf.mxu0  ;;  %v2442_v32 = vadd.f32 %v12341_v18, %v12340_v21  ;;  %v2445_v31 = vadd.f32 %v12345_v60, %v12344_v42  ;;  %v12351_v61 = vld [vmem:[#allocation164_spill] sm:$0xff] }
 0x343   : > { %v6994_v53 = vpack.c.bf16 %v6075_v46, %v6074_v0  ;;  %v6036_v41 = vmax.f32 %v5972_v49, 0.0  ;;  %v5975_v55 = vadd.f32 %v11022_v25, %v5904_v44  ;;  %v5902_v54 = vmax.f32 %v2439_v51, %v5838_v28  ;;  %v5761_v51 = vpop.f32.mrf.mxu1  ;;  %v12352_v49 = vld [vmem:[#allocation232_spill] sm:$0xff]  ;;  %v12353_v44 = vld [vmem:[#allocation181_spill] sm:$0xff]  ;;  %v12354_v28 = vld [vmem:[#allocation234_spill] sm:$0xff] }
 0x344   : > { %v5843_v5 = vadd.f32 %v11317_v17, %v4434_v23  ;;  %v4432_v10 = vadd.f32 %v4333_v50, %v4045_v56  ;;  %v7748_v48 = vpop.f32.mrf.mxu0  ;;  %v4069_v15 = vadd.f32 %v12347_v6, %v12346_v39  ;;  %v2443_v29 = vadd.f32 %v12349_v2, %v12348_v24  ;;  %v11424_v56 = vld [vmem:[#allocation2] ss:$0 sm:$0xff]  ;;  %v12363_v39 = vld [vmem:[#allocation170_spill] sm:$0xff]  ;;  %v12367_v24 = vld [vmem:[#allocation187_spill] sm:$0xff] }
 0x345   : > { %7026 = vst [vmem:[%s11079_s10 + $0x58] sm:$0xff] %v6994_v53   ;;  %v6076_v62 = vmax.f32 %v6036_v41, %v6038_v11  ;;  %v5973_v14 = vadd.f32 %v11022_v25, %v5902_v54  ;;  %v4435_v45 = vadd.f32 %v7748_v48, %v4056_v47  ;;  %v6039_v0 = vmax.f32 %v5975_v55, 0.0  ;;  %v7821_v55 = vpop.f32.mrf.mxu1  ;;  %v12356_v54 = vld [vmem:[#allocation236_spill] sm:$0xff]  ;;  %v12360_v48 = vld [vmem:[#allocation114_spill] sm:$0xff] }
 0x346   : > { %v5907_v33 = vmax.f32 %v2444_v4, %v5843_v5  ;;  %v5841_v17 = vadd.f32 %v11332_v27, %v4432_v10  ;;  %v4336_v40 = vpop.f32.mrf.mxu0  ;;  %v12350_v27 = vld [vmem:[#allocation113_spill] sm:$0xff]  ;;  %v4072_v13 = vadd.f32 %v12355_v19, %v12354_v28  ;;  %v4064_v1 = vadd.f32 %v12357_v38, %v12356_v54  ;;  %v12359_v5 = vld [vmem:[#allocation166_spill] sm:$0xff]  ;;  %v12361_v26 = vld [vmem:[#allocation168_spill] sm:$0xff] }
 0x347   : > { %v6037_v58 = vmax.f32 %v5973_v14, 0.0  ;;  %v5844_v12 = vadd.f32 %v11344_v3, %v4435_v45  ;;  %v4433_v43 = vadd.f32 %v4336_v40, %v4048_v52  ;;  %v2448_v46 = vadd.f32 %v12351_v61, %v12350_v27  ;;  %v12372_v28 = vld [vmem:[#allocation138_spill] sm:$0xff]  ;;  %v12376_v54 = vld [vmem:[#allocation41_spill] sm:$0xff]  ;;  %v12377_v38 = vld [vmem:[#allocation176_spill] sm:$0xff] }
 0x348   : > { %v5978_v35 = vadd.f32 %v11022_v25, %v5907_v33  ;;  %v5905_v57 = vmax.f32 %v2442_v32, %v5841_v17  ;;  %v7751_v16 = vpop.f32.mrf.mxu0  ;;  %v4061_v3 = vadd.f32 %v12353_v44, %v12352_v49  ;;  %v12358_v32 = vld [vmem:[#allocation39_spill] sm:$0xff]  ;;  %v2449_v9 = vadd.f32 %v12361_v26, %v12360_v48  ;;  %v12365_v33 = vld [vmem:[#allocation185_spill] sm:$0xff]  ;;  %v12373_v19 = vld [vmem:[#allocation174_spill] sm:$0xff] }
 0x349   : > { %v6077_v37 = vmax.f32 %v6037_v58, %v6039_v0  ;;  %v5908_v59 = vmax.f32 %v2445_v31, %v5844_v12  ;;  %v5842_v7 = vadd.f32 %v11361_v36, %v4433_v43  ;;  %v4438_v8 = vadd.f32 %v7751_v16, %v4069_v15  ;;  %v12362_v31 = vld [vmem:[#allocation115_spill] sm:$0xff]  ;;  %v12364_v15 = vld [vmem:[#allocation237_spill] sm:$0xff]  ;;  %v5774_v58 = vpop.f32.mrf.mxu1  ;;  %v12378_v26 = vld [vmem:[#allocation118_spill] sm:$0xff] }
 0x34a   : > { %v5976_v25 = vadd.f32 %v11424_v56, %v5905_v57  ;;  %v4349_v22 = vpop.f32.mrf.mxu0  ;;  %v6042_v23 = vmax.f32 %v5978_v35, 0.0  ;;  %v2446_v10 = vadd.f32 %v12359_v5, %v12358_v32  ;;  %v2447_v6 = vadd.f32 %v12363_v39, %v12362_v31  ;;  %v12366_v43 = vld [vmem:[#allocation239_spill] sm:$0xff]  ;;  %v12368_v57 = vld [vmem:[#allocation116_spill] sm:$0xff] }
 0x34b   : > { %v6999_v30 = vpack.c.bf16 %v6077_v37, %v6076_v62  ;;  %v5979_v47 = vadd.f32 %v11424_v56, %v5908_v59  ;;  %v5906_v36 = vmax.f32 %v2443_v29, %v5842_v7  ;;  %v5847_v11 = vadd.f32 %v11375_v34, %v4438_v8  ;;  %v12370_v37 = vld [vmem:[#allocation240_spill] sm:$0xff]  ;;  %v12371_v59 = vld [vmem:[#allocation98_spill] sm:$0xff] }
 0x34c   : > { %v6040_v50 = vmax.f32 %v5976_v25, 0.0  ;;  %v4436_v53 = vadd.f32 %v4349_v22, %v4061_v3  ;;  %v7752_v41 = vpop.f32.mrf.mxu0  ;;  %v4085_v17 = vadd.f32 %v12365_v33, %v12364_v15  ;;  %v4077_v2 = vadd.f32 %v12367_v24, %v12366_v43 }
 0x34d   : > { %7027 = vst [vmem:[%s11079_s10 + $0x60] sm:$0xff] %v6999_v30   ;;  %v5977_v4 = vadd.f32 %v11424_v56, %v5906_v36  ;;  %v5911_v21 = vmax.f32 %v2448_v46, %v5847_v11  ;;  %v4439_v18 = vadd.f32 %v7752_v41, %v4072_v13  ;;  %v6043_v14 = vmax.f32 %v5979_v47, 0.0  ;;  %v7822_v30 = vpop.f32.mrf.mxu1  ;;  %v12374_v36 = vld [vmem:[#allocation242_spill] sm:$0xff] }
 0x34e   : > { %v6078_v34 = vmax.f32 %v6040_v50, %v6042_v23  ;;  %v5845_v52 = vadd.f32 %v11390_v63, %v4436_v53  ;;  %v4352_v62 = vpop.f32.mrf.mxu0  ;;  %v4088_v7 = vadd.f32 %v12371_v59, %v12370_v37  ;;  %v2450_v13 = vadd.f32 %v12373_v19, %v12372_v28  ;;  %v12375_v11 = vld [vmem:[#allocation190_spill] sm:$0xff] }
 0x34f   : > { %v6041_v45 = vmax.f32 %v5977_v4, 0.0  ;;  %v5848_v42 = vadd.f32 %v7818_v20, %v4439_v18  ;;  %v4437_v60 = vadd.f32 %v4352_v62, %v4064_v1  ;;  %v5982_v40 = vadd.f32 %v11424_v56, %v5911_v21  ;;  %v12369_v20 = vld [vmem:[#allocation172_spill] sm:$0xff]  ;;  %v5777_v62 = vpop.f32.mrf.mxu1 }
 0x350   : > { %v5909_v0 = vmax.f32 %v2446_v10, %v5845_v52  ;;  %v7755_v12 = vpop.f32.mrf.mxu0  ;;  %v2452_v16 = vadd.f32 %v12369_v20, %v12368_v57  ;;  %v4080_v23 = vadd.f32 %v12375_v11, %v12374_v36  ;;  %v2453_v1 = vadd.f32 %v12377_v38, %v12376_v54 }
 0x351   : > { %v6079_v63 = vmax.f32 %v6041_v45, %v6043_v14  ;;  %v5912_v29 = vmax.f32 %v2449_v9, %v5848_v42  ;;  %v5846_v35 = vadd.f32 %v5761_v51, %v4437_v60  ;;  %v4442_v27 = vadd.f32 %v7755_v12, %v4085_v17  ;;  %v12379_v9 = vld [vmem:[#allocation177_spill] sm:$0xff] }
 0x352   : > { %v5980_v8 = vadd.f32 %v11424_v56, %v5909_v0  ;;  %v4365_v61 = vpop.f32.mrf.mxu0  ;;  %v6046_v51 = vmax.f32 %v5982_v40, 0.0 }
 0x353   : > { %v7004_v46 = vpack.c.bf16 %v6079_v63, %v6078_v34  ;;  %v5983_v49 = vadd.f32 %v11424_v56, %v5912_v29  ;;  %v5910_v44 = vmax.f32 %v2447_v6, %v5846_v35  ;;  %v4440_v3 = vadd.f32 %v4365_v61, %v4077_v2 }
 0x354   : > { %v6044_v25 = vmax.f32 %v5980_v8, 0.0  ;;  %v5851_v22 = vadd.f32 %v7821_v55, %v4442_v27  ;;  %v7756_v47 = vpop.f32.mrf.mxu0  ;;  %v2451_v34 = vadd.f32 %v12379_v9, %v12378_v26 }
 0x355   : > { %7028 = vst [vmem:[%s11079_s10 + $0x68] sm:$0xff] %v7004_v46   ;;  %v5981_v50 = vadd.f32 %v11424_v56, %v5910_v44  ;;  %v5849_v53 = vadd.f32 %v5774_v58, %v4440_v3  ;;  %v4443_v41 = vadd.f32 %v7756_v47, %v4088_v7  ;;  %v6047_v21 = vmax.f32 %v5983_v49, 0.0 }
 0x356   : > { %v6080_v4 = vmax.f32 %v6044_v25, %v6046_v51  ;;  %v5915_v18 = vmax.f32 %v2452_v16, %v5851_v22  ;;  %v4368_v32 = vpop.f32.mrf.mxu0 }
 0x357   : > { %v6045_v5 = vmax.f32 %v5981_v50, 0.0  ;;  %v5913_v55 = vmax.f32 %v2450_v13, %v5849_v53  ;;  %v5852_v10 = vadd.f32 %v7822_v30, %v4443_v41  ;;  %v4441_v48 = vadd.f32 %v4368_v32, %v4080_v23 }
 0x358   : > { %v5986_v52 = vadd.f32 %v11424_v56, %v5915_v18 }
 0x359   : > { %v6081_v14 = vmax.f32 %v6045_v5, %v6047_v21  ;;  %v5984_v45 = vadd.f32 %v11424_v56, %v5913_v55  ;;  %v5916_v42 = vmax.f32 %v2453_v1, %v5852_v10  ;;  %v5850_v60 = vadd.f32 %v5777_v62, %v4441_v48 }
 0x35a   : > { %v6050_v31 = vmax.f32 %v5986_v52, 0.0 }
 0x35b   : > { %v7009_v39 = vpack.c.bf16 %v6081_v14, %v6080_v4  ;;  %v6048_v6 = vmax.f32 %v5984_v45, 0.0  ;;  %v5987_v15 = vadd.f32 %v11424_v56, %v5916_v42  ;;  %v5914_v33 = vmax.f32 %v2451_v34, %v5850_v60 }
 0x35d   : > { %7029 = vst [vmem:[%s11079_s10 + $0x70] sm:$0xff] %v7009_v39   ;;  %v6082_v17 = vmax.f32 %v6048_v6, %v6050_v31  ;;  %v5985_v40 = vadd.f32 %v11424_v56, %v5914_v33  ;;  %v6051_v0 = vmax.f32 %v5987_v15, 0.0 }
 0x35f   : > { %v6049_v58 = vmax.f32 %v5985_v40, 0.0 }
 0x361   : > { %v6083_v12 = vmax.f32 %v6049_v58, %v6051_v0 }
 0x363   : > { %v7014_v43 = vpack.c.bf16 %v6083_v12, %v6082_v17 }
 0x365   : > { %7030 = vst [vmem:[%s11079_s10 + $0x78] sm:$0xff] %v7014_v43  }
 0x366 PF: > { %s14_s12 = sadd.s32 1, %s7961_s12  }
 0x367   : > { %p11_p1 = scmp.ge.s32.totalorder %s14_s12, 4  }
 0x369   :  { %13 = sbr.rel (!%p11_p1) target bundleno = 1 (0x1), region = 71 }
 0x36e   :  { %6265 = vsyncpa [#allocation3], 1 }
 0x36f   :  { %6267 = vsyncpa [#allocation3 + $0x1], 1 }

</bundles_post_ra>
